<compile_context>
chip_gen: v7x
topology: tpu7x:2x2x1
jax: 0.10.0
libtpu: 0.0.40
codegen_flags: <defaults>
</compile_context>

<pallas_src>
import functools

import jax
import jax.numpy as jnp
from jax.experimental import pallas as pl
from jax.experimental.pallas import tpu as pltpu

BN_EPS = 1e-5
LAYER_STRIDES = {"layer1": (1, 1), "layer2": (2, 1), "layer3": (2, 1), "layer4": (2, 1)}


# ------------------------------ small helpers -------------------------------

def _round_up(x, m):
    return (x + m - 1) // m * m


def _pad_axis(x, axis, target):
    pad = target - x.shape[axis]
    if pad <= 0:
        return x
    widths = [(0, 0)] * x.ndim
    widths[axis] = (0, pad)
    return jnp.pad(x, widths)


def _choose_tk(kp):
    for tk in (512, 384, 256, 128):
        if kp % tk == 0:
            return tk
    return 128


# -------- tiled matmul + fused BN affine (+ optional residual, ReLU) ---------

def _mm_bn_kernel(a_ref, b_ref, s_ref, t_ref, *rest, relu, has_residual):
    if has_residual:
        r_ref, o_ref, acc_ref = rest
    else:
        o_ref, acc_ref = rest
    k = pl.program_id(2)

    @pl.when(k == 0)
    def _():
        acc_ref[...] = jnp.zeros_like(acc_ref)

    acc_ref[...] += jnp.dot(a_ref[...], b_ref[...],
                            preferred_element_type=jnp.float32)

    @pl.when(k == pl.num_programs(2) - 1)
    def _():
        y = acc_ref[...] * s_ref[...] + t_ref[...]          # f32 epilogue
        if has_residual:
            y = y + r_ref[...].astype(jnp.float32)
        if relu:
            y = jnp.maximum(y, 0.0)
        o_ref[...] = y.astype(o_ref.dtype)


def matmul_bn(a, b, scale, shift, *, relu, residual=None,
              out_dtype=jnp.bfloat16):
    """out = relu?((a @ b) * scale + shift [+ residual]) , bf16 MXU, f32 acc."""
    M, K = a.shape
    K2, Nc = b.shape
    assert K == K2
    kp = _round_up(K, 128)
    tk = _choose_tk(kp)
    tn = Nc if Nc <= 256 else 256
    assert Nc % tn == 0
    if M >= 512:
        tm = 512
        mp = _round_up(M, tm)
    else:
        tm = _round_up(M, 8)
        mp = tm

    a = _pad_axis(_pad_axis(a.astype(jnp.bfloat16), 1, kp), 0, mp)
    b = _pad_axis(b.astype(jnp.bfloat16), 0, kp)
    s = scale.reshape(1, Nc).astype(jnp.float32)
    t = shift.reshape(1, Nc).astype(jnp.float32)

    in_specs = [
        pl.BlockSpec((tm, tk), lambda i, j, k: (i, k)),
        pl.BlockSpec((tk, tn), lambda i, j, k: (k, j)),
        pl.BlockSpec((1, tn), lambda i, j, k: (0, j)),
        pl.BlockSpec((1, tn), lambda i, j, k: (0, j)),
    ]
    args = [a, b, s, t]
    has_residual = residual is not None
    if has_residual:
        r = _pad_axis(residual.astype(jnp.bfloat16), 0, mp)
        in_specs.append(pl.BlockSpec((tm, tn), lambda i, j, k: (i, j)))
        args.append(r)

    kernel = functools.partial(_mm_bn_kernel, relu=relu,
                               has_residual=has_residual)
    out = pl.pallas_call(
        kernel,
        out_shape=jax.ShapeDtypeStruct((mp, Nc), out_dtype),
        grid=(mp // tm, Nc // tn, kp // tk),
        in_specs=in_specs,
        out_specs=pl.BlockSpec((tm, tn), lambda i, j, k: (i, j)),
        scratch_shapes=[pltpu.VMEM((tm, tn), jnp.float32)],
        compiler_params=pltpu.CompilerParams(
            dimension_semantics=("parallel", "parallel", "arbitrary")),
    )(*args)
    return out[:M] if mp != M else out


# --------------------------- maxpool (9-tap max) -----------------------------

def _max_reduce_kernel(*refs):
    *in_refs, o_ref = refs
    m = in_refs[0][...]
    for r in in_refs[1:]:
        m = jnp.maximum(m, r[...])
    o_ref[...] = m


def elementwise_max(taps):
    M, C = taps[0].shape
    if M >= 512:
        tm = 512
        mp = _round_up(M, tm)
    else:
        tm = _round_up(M, 8)
        mp = tm
    taps = [_pad_axis(t, 0, mp) for t in taps]
    spec = pl.BlockSpec((tm, C), lambda i: (i, 0))
    out = pl.pallas_call(
        _max_reduce_kernel,
        out_shape=jax.ShapeDtypeStruct((mp, C), taps[0].dtype),
        grid=(mp // tm,),
        in_specs=[spec] * len(taps),
        out_specs=spec,
        compiler_params=pltpu.CompilerParams(
            dimension_semantics=("parallel",)),
    )(*taps)
    return out[:M] if mp != M else out


def maxpool_3x3_s2_p1(x):
    N, H, W, C = x.shape
    k, s, p = 3, 2, 1
    xp = jnp.pad(x, ((0, 0), (p, p), (p, p), (0, 0)),
                 constant_values=-jnp.inf)
    Ho = (H + 2 * p - k) // s + 1
    Wo = (W + 2 * p - k) // s + 1
    taps = [xp[:, i:i + s * Ho:s, j:j + s * Wo:s, :].reshape(N * Ho * Wo, C)
            for i in range(k) for j in range(k)]
    return elementwise_max(taps).reshape(N, Ho, Wo, C)


# ------------------- fused global average pool + Linear ----------------------

def _pool_fc_kernel(x_ref, w_ref, b_ref, o_ref):
    pooled = jnp.mean(x_ref[...].astype(jnp.float32), axis=1)    # (N, C)
    o_ref[...] = jnp.dot(pooled, w_ref[...],
                         preferred_element_type=jnp.float32) + b_ref[...]


def pool_fc(x, fc_w, fc_b):
    N, H, W, C = x.shape
    ncls = fc_w.shape[0]
    xr = x.reshape(N, H * W, C)
    wt = fc_w.T.astype(jnp.float32)                 # (C, ncls)
    b = fc_b.reshape(1, ncls).astype(jnp.float32)
    return pl.pallas_call(
        _pool_fc_kernel,
        out_shape=jax.ShapeDtypeStruct((N, ncls), jnp.float32),
        grid=(1,),
        in_specs=[pl.BlockSpec((N, H * W, C), lambda i: (0, 0, 0)),
                  pl.BlockSpec((C, ncls), lambda i: (0, 0)),
                  pl.BlockSpec((1, ncls), lambda i: (0, 0))],
        out_specs=pl.BlockSpec((N, ncls), lambda i: (0, 0)),
    )(xr, wt, b)


# ------------------------------- JAX glue ------------------------------------

def im2col_nhwc(x, kh, kw, stride, padding):
    """(N,H,W,C) -> (N*Ho*Wo, kh*kw*C) with column order (kh, kw, cin)."""
    N, H, W, C = x.shape
    xp = jnp.pad(x, ((0, 0), (padding, padding), (padding, padding), (0, 0)))
    Ho = (H + 2 * padding - kh) // stride + 1
    Wo = (W + 2 * padding - kw) // stride + 1
    taps = [xp[:, i:i + stride * Ho:stride, j:j + stride * Wo:stride, :]
            for i in range(kh) for j in range(kw)]
    cols = jnp.stack(taps, axis=3)                  # (N, Ho, Wo, kh*kw, C)
    return cols.reshape(N * Ho * Wo, kh * kw * C), Ho, Wo


def fold_bn(bn):
    s = bn["gamma"] / jnp.sqrt(bn["var"] + BN_EPS)
    t = bn["beta"] - bn["mean"] * s
    return s, t


def conv_bn(x, w, bn, *, stride, padding, relu, residual=None):
    """Conv (PyTorch layout weight) + eval-mode BN, fused into one matmul."""
    cout, cin, kh, kw = w.shape
    cols, Ho, Wo = im2col_nhwc(x, kh, kw, stride, padding)
    wmat = jnp.transpose(w, (2, 3, 1, 0)).reshape(kh * kw * cin, cout)
    s, t = fold_bn(bn)
    y = matmul_bn(cols, wmat, s, t, relu=relu, residual=residual)
    return y.reshape(x.shape[0], Ho, Wo, cout)


def basic_block(x, p, *, stride):
    y1 = conv_bn(x, p["conv1_w"], p["bn1"], stride=stride, padding=1, relu=True)
    if "down_w" in p:
        idn = conv_bn(x, p["down_w"], p["down_bn"], stride=stride, padding=0,
                      relu=False)
    else:
        idn = x
    cout = p["conv2_w"].shape[0]
    idn_flat = idn.reshape(-1, cout)
    # conv2 + BN2 + residual add + ReLU fused into one matmul epilogue.
    return conv_bn(y1, p["conv2_w"], p["bn2"], stride=1, padding=1, relu=True,
                   residual=idn_flat)


def resnet18_forward(params, x_nchw):
    """CustomDogCatClassifier.forward: resnet18 backbone + Linear(512, 2)."""
    x = jnp.transpose(x_nchw, (0, 2, 3, 1)).astype(jnp.bfloat16)   # NHWC bf16
    x = conv_bn(x, params["conv1_w"], params["bn1"],
                stride=2, padding=3, relu=True)
    x = maxpool_3x3_s2_p1(x)
    for layer in ("layer1", "layer2", "layer3", "layer4"):
        for bp, stride in zip(params[layer], LAYER_STRIDES[layer]):
            x = basic_block(x, bp, stride=stride)
    return pool_fc(x, params["fc_w"], params["fc_b"])               # (N, 2) f32


# --------------------------- deterministic init -------------------------------

def _init_bn(key, c):
    k1, k2, k3, k4 = jax.random.split(key, 4)
    return {
        "gamma": 1.0 + 0.1 * jax.random.normal(k1, (c,), jnp.float32),
        "beta": 0.1 * jax.random.normal(k2, (c,), jnp.float32),
        "mean": 0.1 * jax.random.normal(k3, (c,), jnp.float32),
        "var": 1.0 + 0.1 * jnp.abs(jax.random.normal(k4, (c,), jnp.float32)),
    }


def _init_conv(key, cout, cin, k):
    std = (2.0 / (cin * k * k)) ** 0.5
    return std * jax.random.normal(key, (cout, cin, k, k), jnp.float32)


def _init_block(key, cin, cout, stride):
    keys = jax.random.split(key, 6)
    p = {
        "conv1_w": _init_conv(keys[0], cout, cin, 3),
        "bn1": _init_bn(keys[1], cout),
        "conv2_w": _init_conv(keys[2], cout, cout, 3),
        "bn2": _init_bn(keys[3], cout),
    }
    if stride != 1 or cin != cout:
        p["down_w"] = _init_conv(keys[4], cout, cin, 1)
        p["down_bn"] = _init_bn(keys[5], cout)
    return p


def init_params(key):
    keys = jax.random.split(key, 16)
    params = {
        "conv1_w": _init_conv(keys[0], 64, 3, 7),
        "bn1": _init_bn(keys[1], 64),
    }
    cfg = [("layer1", 64, 64), ("layer2", 64, 128),
           ("layer3", 128, 256), ("layer4", 256, 512)]
    ki = 2
    for name, cin, cout in cfg:
        s0, s1 = LAYER_STRIDES[name]
        b0 = _init_block(keys[ki], cin, cout, s0); ki += 1
        b1 = _init_block(keys[ki], cout, cout, s1); ki += 1
        params[name] = [b0, b1]
    params["fc_w"] = 0.02 * jax.random.normal(keys[ki], (2, 512), jnp.float32)
    params["fc_b"] = jnp.zeros((2,), jnp.float32)
    return params


if __name__ == "__main__":
    key = jax.random.PRNGKey(0)
    pkey, xkey = jax.random.split(key)
    params = init_params(pkey)
    # Small input consistent with the module (3-channel image); 32x32 is the
    # smallest spatial size that survives resnet18's /32 downsampling.
    x = jax.random.normal(xkey, (2, 3, 32, 32), jnp.float32)
    logits = jax.jit(resnet18_forward)(params, x)
    jax.block_until_ready(logits)
    assert logits.shape == (2, 2) and logits.dtype == jnp.float32
    print("KERNEL_OK")
</pallas_src>

<mosaic_0001>
module attributes {stable_mosaic.version = 11 : i64} {
  func.func @_mm_bn_kernel(%arg0: i32, %arg1: i32, %arg2: i32, %arg3: memref<512x256xbf16, #tpu.memory_space<vmem>>, %arg4: memref<256x64xbf16, #tpu.memory_space<vmem>>, %arg5: memref<1x64xf32, #tpu.memory_space<vmem>>, %arg6: memref<1x64xf32, #tpu.memory_space<vmem>>, %arg7: memref<512x64xbf16, #tpu.memory_space<vmem>>, %arg8: memref<512x64xf32, #tpu.memory_space<vmem>>) attributes {dimension_semantics = [#tpu.dimension_semantics<parallel>, #tpu.dimension_semantics<parallel>, #tpu.dimension_semantics<arbitrary>], iteration_bounds = array<i64: 1, 1, 1>, scalar_prefetch = 0 : i64, scratch_operands = 1 : i64, tpu.core_type = #tpu.core_type<tc>, window_params = [{transform_indices = @transform_0, window_bounds = array<i64: 512, 256>}, {transform_indices = @transform_1, window_bounds = array<i64: 256, 64>}, {transform_indices = @transform_2, window_bounds = array<i64: 1, 64>}, {transform_indices = @transform_3, window_bounds = array<i64: 1, 64>}, {transform_indices = @transform_4, window_bounds = array<i64: 512, 64>}]} {
    %c0_i32 = arith.constant 0 : i32
    %0 = arith.cmpi eq, %arg2, %c0_i32 : i32
    %1 = arith.extui %0 : i1 to i32
    %c0_i32_0 = arith.constant 0 : i32
    %2 = arith.cmpi ne, %1, %c0_i32_0 : i32
    scf.if %2 {
      %cst_10 = arith.constant 0.000000e+00 : f32
      %12 = vector.broadcast %cst_10 : f32 to vector<512x64xf32>
      %c0_11 = arith.constant 0 : index
      %c0_12 = arith.constant 0 : index
      %13 = vector.load %arg8[%c0_11, %c0_12] : memref<512x64xf32, #tpu.memory_space<vmem>>, vector<512x64xf32>
      tpu.vector_store %arg8[%c0_11, %c0_12], %12 {strides = array<i32>} : memref<512x64xf32, #tpu.memory_space<vmem>>, vector<512x64xf32>,
    } else {
    }
    %c0 = arith.constant 0 : index
    %c0_1 = arith.constant 0 : index
    %3 = vector.load %arg8[%c0, %c0_1] : memref<512x64xf32, #tpu.memory_space<vmem>>, vector<512x64xf32>
    %c0_2 = arith.constant 0 : index
    %c0_3 = arith.constant 0 : index
    %4 = vector.load %arg3[%c0_2, %c0_3] : memref<512x256xbf16, #tpu.memory_space<vmem>>, vector<512x256xbf16>
    %c0_4 = arith.constant 0 : index
    %c0_5 = arith.constant 0 : index
    %5 = vector.load %arg4[%c0_4, %c0_5] : memref<256x64xbf16, #tpu.memory_space<vmem>>, vector<256x64xbf16>
    %cst = arith.constant dense<0.000000e+00> : vector<512x64xf32>
    %6 = tpu.matmul %4, %5, %cst {dimension_numbers = #tpu.dot_dimension_numbers<[1], [0], [0], [1], [0, 0, 1, 1], [], []>} : vector<512x256xbf16>, vector<256x64xbf16>, vector<512x64xf32> -> vector<512x64xf32>
    %7 = arith.addf %3, %6 : vector<512x64xf32>
    %c0_6 = arith.constant 0 : index
    %c0_7 = arith.constant 0 : index
    %8 = vector.load %arg8[%c0_6, %c0_7] : memref<512x64xf32, #tpu.memory_space<vmem>>, vector<512x64xf32>
    tpu.vector_store %arg8[%c0_6, %c0_7], %7 {strides = array<i32>} : memref<512x64xf32, #tpu.memory_space<vmem>>, vector<512x64xf32>,
    %c0_i32_8 = arith.constant 0 : i32
    %9 = arith.cmpi eq, %arg2, %c0_i32_8 : i32
    %10 = arith.extui %9 : i1 to i32
    %c0_i32_9 = arith.constant 0 : i32
    %11 = arith.cmpi ne, %10, %c0_i32_9 : i32
    scf.if %11 {
      %c0_10 = arith.constant 0 : index
      %c0_11 = arith.constant 0 : index
      %12 = vector.load %arg8[%c0_10, %c0_11] : memref<512x64xf32, #tpu.memory_space<vmem>>, vector<512x64xf32>
      %c0_12 = arith.constant 0 : index
      %c0_13 = arith.constant 0 : index
      %13 = vector.load %arg5[%c0_12, %c0_13] : memref<1x64xf32, #tpu.memory_space<vmem>>, vector<1x64xf32>
      %14 = vector.broadcast %13 : vector<1x64xf32> to vector<512x64xf32>
      %15 = arith.mulf %12, %14 : vector<512x64xf32>
      %c0_14 = arith.constant 0 : index
      %c0_15 = arith.constant 0 : index
      %16 = vector.load %arg6[%c0_14, %c0_15] : memref<1x64xf32, #tpu.memory_space<vmem>>, vector<1x64xf32>
      %17 = vector.broadcast %16 : vector<1x64xf32> to vector<512x64xf32>
      %18 = arith.addf %15, %17 : vector<512x64xf32>
      %cst_16 = arith.constant 0.000000e+00 : f32
      %19 = vector.broadcast %cst_16 : f32 to vector<512x64xf32>
      %20 = arith.maximumf %18, %19 : vector<512x64xf32>
      %21 = arith.truncf %20 : vector<512x64xf32> to vector<512x64xbf16>
      %c0_17 = arith.constant 0 : index
      %c0_18 = arith.constant 0 : index
      %22 = vector.load %arg7[%c0_17, %c0_18] : memref<512x64xbf16, #tpu.memory_space<vmem>>, vector<512x64xbf16>
      tpu.vector_store %arg7[%c0_17, %c0_18], %21 {strides = array<i32>} : memref<512x64xbf16, #tpu.memory_space<vmem>>, vector<512x64xbf16>,
    } else {
    }
    return
  }
  func.func @transform_0(%arg0: i32, %arg1: i32, %arg2: i32) -> (i32, i32) {
    %c0_i32 = arith.constant 0 : i32
    return %arg0, %arg2 : i32, i32
  }
  func.func @transform_1(%arg0: i32, %arg1: i32, %arg2: i32) -> (i32, i32) {
    %c0_i32 = arith.constant 0 : i32
    return %arg2, %arg1 : i32, i32
  }
  func.func @transform_2(%arg0: i32, %arg1: i32, %arg2: i32) -> (i32, i32) {
    %c0_i32 = arith.constant 0 : i32
    %c0_i32_0 = arith.constant 0 : i32
    return %c0_i32, %arg1 : i32, i32
  }
  func.func @transform_3(%arg0: i32, %arg1: i32, %arg2: i32) -> (i32, i32) {
    %c0_i32 = arith.constant 0 : i32
    %c0_i32_0 = arith.constant 0 : i32
    return %c0_i32, %arg1 : i32, i32
  }
  func.func @transform_4(%arg0: i32, %arg1: i32, %arg2: i32) -> (i32, i32) {
    %c0_i32 = arith.constant 0 : i32
    return %arg0, %arg1 : i32, i32
  }
}

module attributes {stable_mosaic.version = 11 : i64} {
  func.func @_max_reduce_kernel(%arg0: i32, %arg1: memref<128x64xbf16, #tpu.memory_space<vmem>>, %arg2: memref<128x64xbf16, #tpu.memory_space<vmem>>, %arg3: memref<128x64xbf16, #tpu.memory_space<vmem>>, %arg4: memref<128x64xbf16, #tpu.memory_space<vmem>>, %arg5: memref<128x64xbf16, #tpu.memory_space<vmem>>, %arg6: memref<128x64xbf16, #tpu.memory_space<vmem>>, %arg7: memref<128x64xbf16, #tpu.memory_space<vmem>>, %arg8: memref<128x64xbf16, #tpu.memory_space<vmem>>, %arg9: memref<128x64xbf16, #tpu.memory_space<vmem>>, %arg10: memref<128x64xbf16, #tpu.memory_space<vmem>>) attributes {dimension_semantics = [#tpu.dimension_semantics<parallel>], iteration_bounds = array<i64: 1>, scalar_prefetch = 0 : i64, scratch_operands = 0 : i64, tpu.core_type = #tpu.core_type<tc>, window_params = [{transform_indices = @transform_0, window_bounds = array<i64: 128, 64>}, {transform_indices = @transform_1, window_bounds = array<i64: 128, 64>}, {transform_indices = @transform_2, window_bounds = array<i64: 128, 64>}, {transform_indices = @transform_3, window_bounds = array<i64: 128, 64>}, {transform_indices = @transform_4, window_bounds = array<i64: 128, 64>}, {transform_indices = @transform_5, window_bounds = array<i64: 128, 64>}, {transform_indices = @transform_6, window_bounds = array<i64: 128, 64>}, {transform_indices = @transform_7, window_bounds = array<i64: 128, 64>}, {transform_indices = @transform_8, window_bounds = array<i64: 128, 64>}, {transform_indices = @transform_9, window_bounds = array<i64: 128, 64>}]} {
    %c0 = arith.constant 0 : index
    %c0_0 = arith.constant 0 : index
    %0 = vector.load %arg1[%c0, %c0_0] : memref<128x64xbf16, #tpu.memory_space<vmem>>, vector<128x64xbf16>
    %c0_1 = arith.constant 0 : index
    %c0_2 = arith.constant 0 : index
    %1 = vector.load %arg2[%c0_1, %c0_2] : memref<128x64xbf16, #tpu.memory_space<vmem>>, vector<128x64xbf16>
    %2 = arith.maximumf %0, %1 : vector<128x64xbf16>
    %c0_3 = arith.constant 0 : index
    %c0_4 = arith.constant 0 : index
    %3 = vector.load %arg3[%c0_3, %c0_4] : memref<128x64xbf16, #tpu.memory_space<vmem>>, vector<128x64xbf16>
    %4 = arith.maximumf %2, %3 : vector<128x64xbf16>
    %c0_5 = arith.constant 0 : index
    %c0_6 = arith.constant 0 : index
    %5 = vector.load %arg4[%c0_5, %c0_6] : memref<128x64xbf16, #tpu.memory_space<vmem>>, vector<128x64xbf16>
    %6 = arith.maximumf %4, %5 : vector<128x64xbf16>
    %c0_7 = arith.constant 0 : index
    %c0_8 = arith.constant 0 : index
    %7 = vector.load %arg5[%c0_7, %c0_8] : memref<128x64xbf16, #tpu.memory_space<vmem>>, vector<128x64xbf16>
    %8 = arith.maximumf %6, %7 : vector<128x64xbf16>
    %c0_9 = arith.constant 0 : index
    %c0_10 = arith.constant 0 : index
    %9 = vector.load %arg6[%c0_9, %c0_10] : memref<128x64xbf16, #tpu.memory_space<vmem>>, vector<128x64xbf16>
    %10 = arith.maximumf %8, %9 : vector<128x64xbf16>
    %c0_11 = arith.constant 0 : index
    %c0_12 = arith.constant 0 : index
    %11 = vector.load %arg7[%c0_11, %c0_12] : memref<128x64xbf16, #tpu.memory_space<vmem>>, vector<128x64xbf16>
    %12 = arith.maximumf %10, %11 : vector<128x64xbf16>
    %c0_13 = arith.constant 0 : index
    %c0_14 = arith.constant 0 : index
    %13 = vector.load %arg8[%c0_13, %c0_14] : memref<128x64xbf16, #tpu.memory_space<vmem>>, vector<128x64xbf16>
    %14 = arith.maximumf %12, %13 : vector<128x64xbf16>
    %c0_15 = arith.constant 0 : index
    %c0_16 = arith.constant 0 : index
    %15 = vector.load %arg9[%c0_15, %c0_16] : memref<128x64xbf16, #tpu.memory_space<vmem>>, vector<128x64xbf16>
    %16 = arith.maximumf %14, %15 : vector<128x64xbf16>
    %c0_17 = arith.constant 0 : index
    %c0_18 = arith.constant 0 : index
    %17 = vector.load %arg10[%c0_17, %c0_18] : memref<128x64xbf16, #tpu.memory_space<vmem>>, vector<128x64xbf16>
    tpu.vector_store %arg10[%c0_17, %c0_18], %16 {strides = array<i32>} : memref<128x64xbf16, #tpu.memory_space<vmem>>, vector<128x64xbf16>,
    return
  }
  func.func @transform_0(%arg0: i32) -> (i32, i32) {
    %c0_i32 = arith.constant 0 : i32
    %c0_i32_0 = arith.constant 0 : i32
    return %arg0, %c0_i32 : i32, i32
  }
  func.func @transform_1(%arg0: i32) -> (i32, i32) {
    %c0_i32 = arith.constant 0 : i32
    %c0_i32_0 = arith.constant 0 : i32
    return %arg0, %c0_i32 : i32, i32
  }
  func.func @transform_2(%arg0: i32) -> (i32, i32) {
    %c0_i32 = arith.constant 0 : i32
    %c0_i32_0 = arith.constant 0 : i32
    return %arg0, %c0_i32 : i32, i32
  }
  func.func @transform_3(%arg0: i32) -> (i32, i32) {
    %c0_i32 = arith.constant 0 : i32
    %c0_i32_0 = arith.constant 0 : i32
    return %arg0, %c0_i32 : i32, i32
  }
  func.func @transform_4(%arg0: i32) -> (i32, i32) {
    %c0_i32 = arith.constant 0 : i32
    %c0_i32_0 = arith.constant 0 : i32
    return %arg0, %c0_i32 : i32, i32
  }
  func.func @transform_5(%arg0: i32) -> (i32, i32) {
    %c0_i32 = arith.constant 0 : i32
    %c0_i32_0 = arith.constant 0 : i32
    return %arg0, %c0_i32 : i32, i32
  }
  func.func @transform_6(%arg0: i32) -> (i32, i32) {
    %c0_i32 = arith.constant 0 : i32
    %c0_i32_0 = arith.constant 0 : i32
    return %arg0, %c0_i32 : i32, i32
  }
  func.func @transform_7(%arg0: i32) -> (i32, i32) {
    %c0_i32 = arith.constant 0 : i32
    %c0_i32_0 = arith.constant 0 : i32
    return %arg0, %c0_i32 : i32, i32
  }
  func.func @transform_8(%arg0: i32) -> (i32, i32) {
    %c0_i32 = arith.constant 0 : i32
    %c0_i32_0 = arith.constant 0 : i32
    return %arg0, %c0_i32 : i32, i32
  }
  func.func @transform_9(%arg0: i32) -> (i32, i32) {
    %c0_i32 = arith.constant 0 : i32
    %c0_i32_0 = arith.constant 0 : i32
    return %arg0, %c0_i32 : i32, i32
  }
}

module attributes {stable_mosaic.version = 11 : i64} {
  func.func @_mm_bn_kernel(%arg0: i32, %arg1: i32, %arg2: i32, %arg3: memref<128x128xbf16, #tpu.memory_space<vmem>>, %arg4: memref<128x64xbf16, #tpu.memory_space<vmem>>, %arg5: memref<1x64xf32, #tpu.memory_space<vmem>>, %arg6: memref<1x64xf32, #tpu.memory_space<vmem>>, %arg7: memref<128x64xbf16, #tpu.memory_space<vmem>>, %arg8: memref<128x64xf32, #tpu.memory_space<vmem>>) attributes {dimension_semantics = [#tpu.dimension_semantics<parallel>, #tpu.dimension_semantics<parallel>, #tpu.dimension_semantics<arbitrary>], iteration_bounds = array<i64: 1, 1, 5>, scalar_prefetch = 0 : i64, scratch_operands = 1 : i64, tpu.core_type = #tpu.core_type<tc>, window_params = [{transform_indices = @transform_0, window_bounds = array<i64: 128, 128>}, {transform_indices = @transform_1, window_bounds = array<i64: 128, 64>}, {transform_indices = @transform_2, window_bounds = array<i64: 1, 64>}, {transform_indices = @transform_3, window_bounds = array<i64: 1, 64>}, {transform_indices = @transform_4, window_bounds = array<i64: 128, 64>}]} {
    %c0_i32 = arith.constant 0 : i32
    %0 = arith.cmpi eq, %arg2, %c0_i32 : i32
    %1 = arith.extui %0 : i1 to i32
    %c0_i32_0 = arith.constant 0 : i32
    %2 = arith.cmpi ne, %1, %c0_i32_0 : i32
    scf.if %2 {
      %cst_9 = arith.constant 0.000000e+00 : f32
      %12 = vector.broadcast %cst_9 : f32 to vector<128x64xf32>
      %c0_10 = arith.constant 0 : index
      %c0_11 = arith.constant 0 : index
      %13 = vector.load %arg8[%c0_10, %c0_11] : memref<128x64xf32, #tpu.memory_space<vmem>>, vector<128x64xf32>
      tpu.vector_store %arg8[%c0_10, %c0_11], %12 {strides = array<i32>} : memref<128x64xf32, #tpu.memory_space<vmem>>, vector<128x64xf32>,
    } else {
    }
    %c0 = arith.constant 0 : index
    %c0_1 = arith.constant 0 : index
    %3 = vector.load %arg8[%c0, %c0_1] : memref<128x64xf32, #tpu.memory_space<vmem>>, vector<128x64xf32>
    %c0_2 = arith.constant 0 : index
    %c0_3 = arith.constant 0 : index
    %4 = vector.load %arg3[%c0_2, %c0_3] : memref<128x128xbf16, #tpu.memory_space<vmem>>, vector<128x128xbf16>
    %c0_4 = arith.constant 0 : index
    %c0_5 = arith.constant 0 : index
    %5 = vector.load %arg4[%c0_4, %c0_5] : memref<128x64xbf16, #tpu.memory_space<vmem>>, vector<128x64xbf16>
    %cst = arith.constant dense<0.000000e+00> : vector<128x64xf32>
    %6 = tpu.matmul %4, %5, %cst {dimension_numbers = #tpu.dot_dimension_numbers<[1], [0], [0], [1], [0, 0, 1, 1], [], []>} : vector<128x128xbf16>, vector<128x64xbf16>, vector<128x64xf32> -> vector<128x64xf32>
    %7 = arith.addf %3, %6 : vector<128x64xf32>
    %c0_6 = arith.constant 0 : index
    %c0_7 = arith.constant 0 : index
    %8 = vector.load %arg8[%c0_6, %c0_7] : memref<128x64xf32, #tpu.memory_space<vmem>>, vector<128x64xf32>
    tpu.vector_store %arg8[%c0_6, %c0_7], %7 {strides = array<i32>} : memref<128x64xf32, #tpu.memory_space<vmem>>, vector<128x64xf32>,
    %c4_i32 = arith.constant 4 : i32
    %9 = arith.cmpi eq, %arg2, %c4_i32 : i32
    %10 = arith.extui %9 : i1 to i32
    %c0_i32_8 = arith.constant 0 : i32
    %11 = arith.cmpi ne, %10, %c0_i32_8 : i32
    scf.if %11 {
      %c0_9 = arith.constant 0 : index
      %c0_10 = arith.constant 0 : index
      %12 = vector.load %arg8[%c0_9, %c0_10] : memref<128x64xf32, #tpu.memory_space<vmem>>, vector<128x64xf32>
      %c0_11 = arith.constant 0 : index
      %c0_12 = arith.constant 0 : index
      %13 = vector.load %arg5[%c0_11, %c0_12] : memref<1x64xf32, #tpu.memory_space<vmem>>, vector<1x64xf32>
      %14 = vector.broadcast %13 : vector<1x64xf32> to vector<128x64xf32>
      %15 = arith.mulf %12, %14 : vector<128x64xf32>
      %c0_13 = arith.constant 0 : index
      %c0_14 = arith.constant 0 : index
      %16 = vector.load %arg6[%c0_13, %c0_14] : memref<1x64xf32, #tpu.memory_space<vmem>>, vector<1x64xf32>
      %17 = vector.broadcast %16 : vector<1x64xf32> to vector<128x64xf32>
      %18 = arith.addf %15, %17 : vector<128x64xf32>
      %cst_15 = arith.constant 0.000000e+00 : f32
      %19 = vector.broadcast %cst_15 : f32 to vector<128x64xf32>
      %20 = arith.maximumf %18, %19 : vector<128x64xf32>
      %21 = arith.truncf %20 : vector<128x64xf32> to vector<128x64xbf16>
      %c0_16 = arith.constant 0 : index
      %c0_17 = arith.constant 0 : index
      %22 = vector.load %arg7[%c0_16, %c0_17] : memref<128x64xbf16, #tpu.memory_space<vmem>>, vector<128x64xbf16>
      tpu.vector_store %arg7[%c0_16, %c0_17], %21 {strides = array<i32>} : memref<128x64xbf16, #tpu.memory_space<vmem>>, vector<128x64xbf16>,
    } else {
    }
    return
  }
  func.func @transform_0(%arg0: i32, %arg1: i32, %arg2: i32) -> (i32, i32) {
    %c0_i32 = arith.constant 0 : i32
    return %arg0, %arg2 : i32, i32
  }
  func.func @transform_1(%arg0: i32, %arg1: i32, %arg2: i32) -> (i32, i32) {
    %c0_i32 = arith.constant 0 : i32
    return %arg2, %arg1 : i32, i32
  }
  func.func @transform_2(%arg0: i32, %arg1: i32, %arg2: i32) -> (i32, i32) {
    %c0_i32 = arith.constant 0 : i32
    %c0_i32_0 = arith.constant 0 : i32
    return %c0_i32, %arg1 : i32, i32
  }
  func.func @transform_3(%arg0: i32, %arg1: i32, %arg2: i32) -> (i32, i32) {
    %c0_i32 = arith.constant 0 : i32
    %c0_i32_0 = arith.constant 0 : i32
    return %c0_i32, %arg1 : i32, i32
  }
  func.func @transform_4(%arg0: i32, %arg1: i32, %arg2: i32) -> (i32, i32) {
    %c0_i32 = arith.constant 0 : i32
    return %arg0, %arg1 : i32, i32
  }
}

module attributes {stable_mosaic.version = 11 : i64} {
  func.func @_mm_bn_kernel(%arg0: i32, %arg1: i32, %arg2: i32, %arg3: memref<128x128xbf16, #tpu.memory_space<vmem>>, %arg4: memref<128x64xbf16, #tpu.memory_space<vmem>>, %arg5: memref<1x64xf32, #tpu.memory_space<vmem>>, %arg6: memref<1x64xf32, #tpu.memory_space<vmem>>, %arg7: memref<128x64xbf16, #tpu.memory_space<vmem>>, %arg8: memref<128x64xbf16, #tpu.memory_space<vmem>>, %arg9: memref<128x64xf32, #tpu.memory_space<vmem>>) attributes {dimension_semantics = [#tpu.dimension_semantics<parallel>, #tpu.dimension_semantics<parallel>, #tpu.dimension_semantics<arbitrary>], iteration_bounds = array<i64: 1, 1, 5>, scalar_prefetch = 0 : i64, scratch_operands = 1 : i64, tpu.core_type = #tpu.core_type<tc>, window_params = [{transform_indices = @transform_0, window_bounds = array<i64: 128, 128>}, {transform_indices = @transform_1, window_bounds = array<i64: 128, 64>}, {transform_indices = @transform_2, window_bounds = array<i64: 1, 64>}, {transform_indices = @transform_3, window_bounds = array<i64: 1, 64>}, {transform_indices = @transform_4, window_bounds = array<i64: 128, 64>}, {transform_indices = @transform_5, window_bounds = array<i64: 128, 64>}]} {
    %c0_i32 = arith.constant 0 : i32
    %0 = arith.cmpi eq, %arg2, %c0_i32 : i32
    %1 = arith.extui %0 : i1 to i32
    %c0_i32_0 = arith.constant 0 : i32
    %2 = arith.cmpi ne, %1, %c0_i32_0 : i32
    scf.if %2 {
      %cst_9 = arith.constant 0.000000e+00 : f32
      %12 = vector.broadcast %cst_9 : f32 to vector<128x64xf32>
      %c0_10 = arith.constant 0 : index
      %c0_11 = arith.constant 0 : index
      %13 = vector.load %arg9[%c0_10, %c0_11] : memref<128x64xf32, #tpu.memory_space<vmem>>, vector<128x64xf32>
      tpu.vector_store %arg9[%c0_10, %c0_11], %12 {strides = array<i32>} : memref<128x64xf32, #tpu.memory_space<vmem>>, vector<128x64xf32>,
    } else {
    }
    %c0 = arith.constant 0 : index
    %c0_1 = arith.constant 0 : index
    %3 = vector.load %arg9[%c0, %c0_1] : memref<128x64xf32, #tpu.memory_space<vmem>>, vector<128x64xf32>
    %c0_2 = arith.constant 0 : index
    %c0_3 = arith.constant 0 : index
    %4 = vector.load %arg3[%c0_2, %c0_3] : memref<128x128xbf16, #tpu.memory_space<vmem>>, vector<128x128xbf16>
    %c0_4 = arith.constant 0 : index
    %c0_5 = arith.constant 0 : index
    %5 = vector.load %arg4[%c0_4, %c0_5] : memref<128x64xbf16, #tpu.memory_space<vmem>>, vector<128x64xbf16>
    %cst = arith.constant dense<0.000000e+00> : vector<128x64xf32>
    %6 = tpu.matmul %4, %5, %cst {dimension_numbers = #tpu.dot_dimension_numbers<[1], [0], [0], [1], [0, 0, 1, 1], [], []>} : vector<128x128xbf16>, vector<128x64xbf16>, vector<128x64xf32> -> vector<128x64xf32>
    %7 = arith.addf %3, %6 : vector<128x64xf32>
    %c0_6 = arith.constant 0 : index
    %c0_7 = arith.constant 0 : index
    %8 = vector.load %arg9[%c0_6, %c0_7] : memref<128x64xf32, #tpu.memory_space<vmem>>, vector<128x64xf32>
    tpu.vector_store %arg9[%c0_6, %c0_7], %7 {strides = array<i32>} : memref<128x64xf32, #tpu.memory_space<vmem>>, vector<128x64xf32>,
    %c4_i32 = arith.constant 4 : i32
    %9 = arith.cmpi eq, %arg2, %c4_i32 : i32
    %10 = arith.extui %9 : i1 to i32
    %c0_i32_8 = arith.constant 0 : i32
    %11 = arith.cmpi ne, %10, %c0_i32_8 : i32
    scf.if %11 {
      %c0_9 = arith.constant 0 : index
      %c0_10 = arith.constant 0 : index
      %12 = vector.load %arg9[%c0_9, %c0_10] : memref<128x64xf32, #tpu.memory_space<vmem>>, vector<128x64xf32>
      %c0_11 = arith.constant 0 : index
      %c0_12 = arith.constant 0 : index
      %13 = vector.load %arg5[%c0_11, %c0_12] : memref<1x64xf32, #tpu.memory_space<vmem>>, vector<1x64xf32>
      %14 = vector.broadcast %13 : vector<1x64xf32> to vector<128x64xf32>
      %15 = arith.mulf %12, %14 : vector<128x64xf32>
      %c0_13 = arith.constant 0 : index
      %c0_14 = arith.constant 0 : index
      %16 = vector.load %arg6[%c0_13, %c0_14] : memref<1x64xf32, #tpu.memory_space<vmem>>, vector<1x64xf32>
      %17 = vector.broadcast %16 : vector<1x64xf32> to vector<128x64xf32>
      %18 = arith.addf %15, %17 : vector<128x64xf32>
      %c0_15 = arith.constant 0 : index
      %c0_16 = arith.constant 0 : index
      %19 = vector.load %arg7[%c0_15, %c0_16] : memref<128x64xbf16, #tpu.memory_space<vmem>>, vector<128x64xbf16>
      %20 = arith.extf %19 : vector<128x64xbf16> to vector<128x64xf32>
      %21 = arith.addf %18, %20 : vector<128x64xf32>
      %cst_17 = arith.constant 0.000000e+00 : f32
      %22 = vector.broadcast %cst_17 : f32 to vector<128x64xf32>
      %23 = arith.maximumf %21, %22 : vector<128x64xf32>
      %24 = arith.truncf %23 : vector<128x64xf32> to vector<128x64xbf16>
      %c0_18 = arith.constant 0 : index
      %c0_19 = arith.constant 0 : index
      %25 = vector.load %arg8[%c0_18, %c0_19] : memref<128x64xbf16, #tpu.memory_space<vmem>>, vector<128x64xbf16>
      tpu.vector_store %arg8[%c0_18, %c0_19], %24 {strides = array<i32>} : memref<128x64xbf16, #tpu.memory_space<vmem>>, vector<128x64xbf16>,
    } else {
    }
    return
  }
  func.func @transform_0(%arg0: i32, %arg1: i32, %arg2: i32) -> (i32, i32) {
    %c0_i32 = arith.constant 0 : i32
    return %arg0, %arg2 : i32, i32
  }
  func.func @transform_1(%arg0: i32, %arg1: i32, %arg2: i32) -> (i32, i32) {
    %c0_i32 = arith.constant 0 : i32
    return %arg2, %arg1 : i32, i32
  }
  func.func @transform_2(%arg0: i32, %arg1: i32, %arg2: i32) -> (i32, i32) {
    %c0_i32 = arith.constant 0 : i32
    %c0_i32_0 = arith.constant 0 : i32
    return %c0_i32, %arg1 : i32, i32
  }
  func.func @transform_3(%arg0: i32, %arg1: i32, %arg2: i32) -> (i32, i32) {
    %c0_i32 = arith.constant 0 : i32
    %c0_i32_0 = arith.constant 0 : i32
    return %c0_i32, %arg1 : i32, i32
  }
  func.func @transform_4(%arg0: i32, %arg1: i32, %arg2: i32) -> (i32, i32) {
    %c0_i32 = arith.constant 0 : i32
    return %arg0, %arg1 : i32, i32
  }
  func.func @transform_5(%arg0: i32, %arg1: i32, %arg2: i32) -> (i32, i32) {
    %c0_i32 = arith.constant 0 : i32
    return %arg0, %arg1 : i32, i32
  }
}

module attributes {stable_mosaic.version = 11 : i64} {
  func.func @_mm_bn_kernel(%arg0: i32, %arg1: i32, %arg2: i32, %arg3: memref<32x128xbf16, #tpu.memory_space<vmem>>, %arg4: memref<128x128xbf16, #tpu.memory_space<vmem>>, %arg5: memref<1x128xf32, #tpu.memory_space<vmem>>, %arg6: memref<1x128xf32, #tpu.memory_space<vmem>>, %arg7: memref<32x128xbf16, #tpu.memory_space<vmem>>, %arg8: memref<32x128xf32, #tpu.memory_space<vmem>>) attributes {dimension_semantics = [#tpu.dimension_semantics<parallel>, #tpu.dimension_semantics<parallel>, #tpu.dimension_semantics<arbitrary>], iteration_bounds = array<i64: 1, 1, 5>, scalar_prefetch = 0 : i64, scratch_operands = 1 : i64, tpu.core_type = #tpu.core_type<tc>, window_params = [{transform_indices = @transform_0, window_bounds = array<i64: 32, 128>}, {transform_indices = @transform_1, window_bounds = array<i64: 128, 128>}, {transform_indices = @transform_2, window_bounds = array<i64: 1, 128>}, {transform_indices = @transform_3, window_bounds = array<i64: 1, 128>}, {transform_indices = @transform_4, window_bounds = array<i64: 32, 128>}]} {
    %c0_i32 = arith.constant 0 : i32
    %0 = arith.cmpi eq, %arg2, %c0_i32 : i32
    %1 = arith.extui %0 : i1 to i32
    %c0_i32_0 = arith.constant 0 : i32
    %2 = arith.cmpi ne, %1, %c0_i32_0 : i32
    scf.if %2 {
      %cst_9 = arith.constant 0.000000e+00 : f32
      %12 = vector.broadcast %cst_9 : f32 to vector<32x128xf32>
      %c0_10 = arith.constant 0 : index
      %c0_11 = arith.constant 0 : index
      %13 = vector.load %arg8[%c0_10, %c0_11] : memref<32x128xf32, #tpu.memory_space<vmem>>, vector<32x128xf32>
      tpu.vector_store %arg8[%c0_10, %c0_11], %12 {strides = array<i32>} : memref<32x128xf32, #tpu.memory_space<vmem>>, vector<32x128xf32>,
    } else {
    }
    %c0 = arith.constant 0 : index
    %c0_1 = arith.constant 0 : index
    %3 = vector.load %arg8[%c0, %c0_1] : memref<32x128xf32, #tpu.memory_space<vmem>>, vector<32x128xf32>
    %c0_2 = arith.constant 0 : index
    %c0_3 = arith.constant 0 : index
    %4 = vector.load %arg3[%c0_2, %c0_3] : memref<32x128xbf16, #tpu.memory_space<vmem>>, vector<32x128xbf16>
    %c0_4 = arith.constant 0 : index
    %c0_5 = arith.constant 0 : index
    %5 = vector.load %arg4[%c0_4, %c0_5] : memref<128x128xbf16, #tpu.memory_space<vmem>>, vector<128x128xbf16>
    %cst = arith.constant dense<0.000000e+00> : vector<32x128xf32>
    %6 = tpu.matmul %4, %5, %cst {dimension_numbers = #tpu.dot_dimension_numbers<[1], [0], [0], [1], [0, 0, 1, 1], [], []>} : vector<32x128xbf16>, vector<128x128xbf16>, vector<32x128xf32> -> vector<32x128xf32>
    %7 = arith.addf %3, %6 : vector<32x128xf32>
    %c0_6 = arith.constant 0 : index
    %c0_7 = arith.constant 0 : index
    %8 = vector.load %arg8[%c0_6, %c0_7] : memref<32x128xf32, #tpu.memory_space<vmem>>, vector<32x128xf32>
    tpu.vector_store %arg8[%c0_6, %c0_7], %7 {strides = array<i32>} : memref<32x128xf32, #tpu.memory_space<vmem>>, vector<32x128xf32>,
    %c4_i32 = arith.constant 4 : i32
    %9 = arith.cmpi eq, %arg2, %c4_i32 : i32
    %10 = arith.extui %9 : i1 to i32
    %c0_i32_8 = arith.constant 0 : i32
    %11 = arith.cmpi ne, %10, %c0_i32_8 : i32
    scf.if %11 {
      %c0_9 = arith.constant 0 : index
      %c0_10 = arith.constant 0 : index
      %12 = vector.load %arg8[%c0_9, %c0_10] : memref<32x128xf32, #tpu.memory_space<vmem>>, vector<32x128xf32>
      %c0_11 = arith.constant 0 : index
      %c0_12 = arith.constant 0 : index
      %13 = vector.load %arg5[%c0_11, %c0_12] : memref<1x128xf32, #tpu.memory_space<vmem>>, vector<1x128xf32>
      %14 = vector.broadcast %13 : vector<1x128xf32> to vector<32x128xf32>
      %15 = arith.mulf %12, %14 : vector<32x128xf32>
      %c0_13 = arith.constant 0 : index
      %c0_14 = arith.constant 0 : index
      %16 = vector.load %arg6[%c0_13, %c0_14] : memref<1x128xf32, #tpu.memory_space<vmem>>, vector<1x128xf32>
      %17 = vector.broadcast %16 : vector<1x128xf32> to vector<32x128xf32>
      %18 = arith.addf %15, %17 : vector<32x128xf32>
      %cst_15 = arith.constant 0.000000e+00 : f32
      %19 = vector.broadcast %cst_15 : f32 to vector<32x128xf32>
      %20 = arith.maximumf %18, %19 : vector<32x128xf32>
      %21 = arith.truncf %20 : vector<32x128xf32> to vector<32x128xbf16>
      %c0_16 = arith.constant 0 : index
      %c0_17 = arith.constant 0 : index
      %22 = vector.load %arg7[%c0_16, %c0_17] : memref<32x128xbf16, #tpu.memory_space<vmem>>, vector<32x128xbf16>
      tpu.vector_store %arg7[%c0_16, %c0_17], %21 {strides = array<i32>} : memref<32x128xbf16, #tpu.memory_space<vmem>>, vector<32x128xbf16>,
    } else {
    }
    return
  }
  func.func @transform_0(%arg0: i32, %arg1: i32, %arg2: i32) -> (i32, i32) {
    %c0_i32 = arith.constant 0 : i32
    return %arg0, %arg2 : i32, i32
  }
  func.func @transform_1(%arg0: i32, %arg1: i32, %arg2: i32) -> (i32, i32) {
    %c0_i32 = arith.constant 0 : i32
    return %arg2, %arg1 : i32, i32
  }
  func.func @transform_2(%arg0: i32, %arg1: i32, %arg2: i32) -> (i32, i32) {
    %c0_i32 = arith.constant 0 : i32
    %c0_i32_0 = arith.constant 0 : i32
    return %c0_i32, %arg1 : i32, i32
  }
  func.func @transform_3(%arg0: i32, %arg1: i32, %arg2: i32) -> (i32, i32) {
    %c0_i32 = arith.constant 0 : i32
    %c0_i32_0 = arith.constant 0 : i32
    return %c0_i32, %arg1 : i32, i32
  }
  func.func @transform_4(%arg0: i32, %arg1: i32, %arg2: i32) -> (i32, i32) {
    %c0_i32 = arith.constant 0 : i32
    return %arg0, %arg1 : i32, i32
  }
}

module attributes {stable_mosaic.version = 11 : i64} {
  func.func @_mm_bn_kernel(%arg0: i32, %arg1: i32, %arg2: i32, %arg3: memref<32x128xbf16, #tpu.memory_space<vmem>>, %arg4: memref<128x128xbf16, #tpu.memory_space<vmem>>, %arg5: memref<1x128xf32, #tpu.memory_space<vmem>>, %arg6: memref<1x128xf32, #tpu.memory_space<vmem>>, %arg7: memref<32x128xbf16, #tpu.memory_space<vmem>>, %arg8: memref<32x128xf32, #tpu.memory_space<vmem>>) attributes {dimension_semantics = [#tpu.dimension_semantics<parallel>, #tpu.dimension_semantics<parallel>, #tpu.dimension_semantics<arbitrary>], iteration_bounds = array<i64: 1, 1, 1>, scalar_prefetch = 0 : i64, scratch_operands = 1 : i64, tpu.core_type = #tpu.core_type<tc>, window_params = [{transform_indices = @transform_0, window_bounds = array<i64: 32, 128>}, {transform_indices = @transform_1, window_bounds = array<i64: 128, 128>}, {transform_indices = @transform_2, window_bounds = array<i64: 1, 128>}, {transform_indices = @transform_3, window_bounds = array<i64: 1, 128>}, {transform_indices = @transform_4, window_bounds = array<i64: 32, 128>}]} {
    %c0_i32 = arith.constant 0 : i32
    %0 = arith.cmpi eq, %arg2, %c0_i32 : i32
    %1 = arith.extui %0 : i1 to i32
    %c0_i32_0 = arith.constant 0 : i32
    %2 = arith.cmpi ne, %1, %c0_i32_0 : i32
    scf.if %2 {
      %cst_10 = arith.constant 0.000000e+00 : f32
      %12 = vector.broadcast %cst_10 : f32 to vector<32x128xf32>
      %c0_11 = arith.constant 0 : index
      %c0_12 = arith.constant 0 : index
      %13 = vector.load %arg8[%c0_11, %c0_12] : memref<32x128xf32, #tpu.memory_space<vmem>>, vector<32x128xf32>
      tpu.vector_store %arg8[%c0_11, %c0_12], %12 {strides = array<i32>} : memref<32x128xf32, #tpu.memory_space<vmem>>, vector<32x128xf32>,
    } else {
    }
    %c0 = arith.constant 0 : index
    %c0_1 = arith.constant 0 : index
    %3 = vector.load %arg8[%c0, %c0_1] : memref<32x128xf32, #tpu.memory_space<vmem>>, vector<32x128xf32>
    %c0_2 = arith.constant 0 : index
    %c0_3 = arith.constant 0 : index
    %4 = vector.load %arg3[%c0_2, %c0_3] : memref<32x128xbf16, #tpu.memory_space<vmem>>, vector<32x128xbf16>
    %c0_4 = arith.constant 0 : index
    %c0_5 = arith.constant 0 : index
    %5 = vector.load %arg4[%c0_4, %c0_5] : memref<128x128xbf16, #tpu.memory_space<vmem>>, vector<128x128xbf16>
    %cst = arith.constant dense<0.000000e+00> : vector<32x128xf32>
    %6 = tpu.matmul %4, %5, %cst {dimension_numbers = #tpu.dot_dimension_numbers<[1], [0], [0], [1], [0, 0, 1, 1], [], []>} : vector<32x128xbf16>, vector<128x128xbf16>, vector<32x128xf32> -> vector<32x128xf32>
    %7 = arith.addf %3, %6 : vector<32x128xf32>
    %c0_6 = arith.constant 0 : index
    %c0_7 = arith.constant 0 : index
    %8 = vector.load %arg8[%c0_6, %c0_7] : memref<32x128xf32, #tpu.memory_space<vmem>>, vector<32x128xf32>
    tpu.vector_store %arg8[%c0_6, %c0_7], %7 {strides = array<i32>} : memref<32x128xf32, #tpu.memory_space<vmem>>, vector<32x128xf32>,
    %c0_i32_8 = arith.constant 0 : i32
    %9 = arith.cmpi eq, %arg2, %c0_i32_8 : i32
    %10 = arith.extui %9 : i1 to i32
    %c0_i32_9 = arith.constant 0 : i32
    %11 = arith.cmpi ne, %10, %c0_i32_9 : i32
    scf.if %11 {
      %c0_10 = arith.constant 0 : index
      %c0_11 = arith.constant 0 : index
      %12 = vector.load %arg8[%c0_10, %c0_11] : memref<32x128xf32, #tpu.memory_space<vmem>>, vector<32x128xf32>
      %c0_12 = arith.constant 0 : index
      %c0_13 = arith.constant 0 : index
      %13 = vector.load %arg5[%c0_12, %c0_13] : memref<1x128xf32, #tpu.memory_space<vmem>>, vector<1x128xf32>
      %14 = vector.broadcast %13 : vector<1x128xf32> to vector<32x128xf32>
      %15 = arith.mulf %12, %14 : vector<32x128xf32>
      %c0_14 = arith.constant 0 : index
      %c0_15 = arith.constant 0 : index
      %16 = vector.load %arg6[%c0_14, %c0_15] : memref<1x128xf32, #tpu.memory_space<vmem>>, vector<1x128xf32>
      %17 = vector.broadcast %16 : vector<1x128xf32> to vector<32x128xf32>
      %18 = arith.addf %15, %17 : vector<32x128xf32>
      %19 = arith.truncf %18 : vector<32x128xf32> to vector<32x128xbf16>
      %c0_16 = arith.constant 0 : index
      %c0_17 = arith.constant 0 : index
      %20 = vector.load %arg7[%c0_16, %c0_17] : memref<32x128xbf16, #tpu.memory_space<vmem>>, vector<32x128xbf16>
      tpu.vector_store %arg7[%c0_16, %c0_17], %19 {strides = array<i32>} : memref<32x128xbf16, #tpu.memory_space<vmem>>, vector<32x128xbf16>,
    } else {
    }
    return
  }
  func.func @transform_0(%arg0: i32, %arg1: i32, %arg2: i32) -> (i32, i32) {
    %c0_i32 = arith.constant 0 : i32
    return %arg0, %arg2 : i32, i32
  }
  func.func @transform_1(%arg0: i32, %arg1: i32, %arg2: i32) -> (i32, i32) {
    %c0_i32 = arith.constant 0 : i32
    return %arg2, %arg1 : i32, i32
  }
  func.func @transform_2(%arg0: i32, %arg1: i32, %arg2: i32) -> (i32, i32) {
    %c0_i32 = arith.constant 0 : i32
    %c0_i32_0 = arith.constant 0 : i32
    return %c0_i32, %arg1 : i32, i32
  }
  func.func @transform_3(%arg0: i32, %arg1: i32, %arg2: i32) -> (i32, i32) {
    %c0_i32 = arith.constant 0 : i32
    %c0_i32_0 = arith.constant 0 : i32
    return %c0_i32, %arg1 : i32, i32
  }
  func.func @transform_4(%arg0: i32, %arg1: i32, %arg2: i32) -> (i32, i32) {
    %c0_i32 = arith.constant 0 : i32
    return %arg0, %arg1 : i32, i32
  }
}

module attributes {stable_mosaic.version = 11 : i64} {
  func.func @_mm_bn_kernel(%arg0: i32, %arg1: i32, %arg2: i32, %arg3: memref<32x384xbf16, #tpu.memory_space<vmem>>, %arg4: memref<384x128xbf16, #tpu.memory_space<vmem>>, %arg5: memref<1x128xf32, #tpu.memory_space<vmem>>, %arg6: memref<1x128xf32, #tpu.memory_space<vmem>>, %arg7: memref<32x128xbf16, #tpu.memory_space<vmem>>, %arg8: memref<32x128xbf16, #tpu.memory_space<vmem>>, %arg9: memref<32x128xf32, #tpu.memory_space<vmem>>) attributes {dimension_semantics = [#tpu.dimension_semantics<parallel>, #tpu.dimension_semantics<parallel>, #tpu.dimension_semantics<arbitrary>], iteration_bounds = array<i64: 1, 1, 3>, scalar_prefetch = 0 : i64, scratch_operands = 1 : i64, tpu.core_type = #tpu.core_type<tc>, window_params = [{transform_indices = @transform_0, window_bounds = array<i64: 32, 384>}, {transform_indices = @transform_1, window_bounds = array<i64: 384, 128>}, {transform_indices = @transform_2, window_bounds = array<i64: 1, 128>}, {transform_indices = @transform_3, window_bounds = array<i64: 1, 128>}, {transform_indices = @transform_4, window_bounds = array<i64: 32, 128>}, {transform_indices = @transform_5, window_bounds = array<i64: 32, 128>}]} {
    %c0_i32 = arith.constant 0 : i32
    %0 = arith.cmpi eq, %arg2, %c0_i32 : i32
    %1 = arith.extui %0 : i1 to i32
    %c0_i32_0 = arith.constant 0 : i32
    %2 = arith.cmpi ne, %1, %c0_i32_0 : i32
    scf.if %2 {
      %cst_9 = arith.constant 0.000000e+00 : f32
      %12 = vector.broadcast %cst_9 : f32 to vector<32x128xf32>
      %c0_10 = arith.constant 0 : index
      %c0_11 = arith.constant 0 : index
      %13 = vector.load %arg9[%c0_10, %c0_11] : memref<32x128xf32, #tpu.memory_space<vmem>>, vector<32x128xf32>
      tpu.vector_store %arg9[%c0_10, %c0_11], %12 {strides = array<i32>} : memref<32x128xf32, #tpu.memory_space<vmem>>, vector<32x128xf32>,
    } else {
    }
    %c0 = arith.constant 0 : index
    %c0_1 = arith.constant 0 : index
    %3 = vector.load %arg9[%c0, %c0_1] : memref<32x128xf32, #tpu.memory_space<vmem>>, vector<32x128xf32>
    %c0_2 = arith.constant 0 : index
    %c0_3 = arith.constant 0 : index
    %4 = vector.load %arg3[%c0_2, %c0_3] : memref<32x384xbf16, #tpu.memory_space<vmem>>, vector<32x384xbf16>
    %c0_4 = arith.constant 0 : index
    %c0_5 = arith.constant 0 : index
    %5 = vector.load %arg4[%c0_4, %c0_5] : memref<384x128xbf16, #tpu.memory_space<vmem>>, vector<384x128xbf16>
    %cst = arith.constant dense<0.000000e+00> : vector<32x128xf32>
    %6 = tpu.matmul %4, %5, %cst {dimension_numbers = #tpu.dot_dimension_numbers<[1], [0], [0], [1], [0, 0, 1, 1], [], []>} : vector<32x384xbf16>, vector<384x128xbf16>, vector<32x128xf32> -> vector<32x128xf32>
    %7 = arith.addf %3, %6 : vector<32x128xf32>
    %c0_6 = arith.constant 0 : index
    %c0_7 = arith.constant 0 : index
    %8 = vector.load %arg9[%c0_6, %c0_7] : memref<32x128xf32, #tpu.memory_space<vmem>>, vector<32x128xf32>
    tpu.vector_store %arg9[%c0_6, %c0_7], %7 {strides = array<i32>} : memref<32x128xf32, #tpu.memory_space<vmem>>, vector<32x128xf32>,
    %c2_i32 = arith.constant 2 : i32
    %9 = arith.cmpi eq, %arg2, %c2_i32 : i32
    %10 = arith.extui %9 : i1 to i32
    %c0_i32_8 = arith.constant 0 : i32
    %11 = arith.cmpi ne, %10, %c0_i32_8 : i32
    scf.if %11 {
      %c0_9 = arith.constant 0 : index
      %c0_10 = arith.constant 0 : index
      %12 = vector.load %arg9[%c0_9, %c0_10] : memref<32x128xf32, #tpu.memory_space<vmem>>, vector<32x128xf32>
      %c0_11 = arith.constant 0 : index
      %c0_12 = arith.constant 0 : index
      %13 = vector.load %arg5[%c0_11, %c0_12] : memref<1x128xf32, #tpu.memory_space<vmem>>, vector<1x128xf32>
      %14 = vector.broadcast %13 : vector<1x128xf32> to vector<32x128xf32>
      %15 = arith.mulf %12, %14 : vector<32x128xf32>
      %c0_13 = arith.constant 0 : index
      %c0_14 = arith.constant 0 : index
      %16 = vector.load %arg6[%c0_13, %c0_14] : memref<1x128xf32, #tpu.memory_space<vmem>>, vector<1x128xf32>
      %17 = vector.broadcast %16 : vector<1x128xf32> to vector<32x128xf32>
      %18 = arith.addf %15, %17 : vector<32x128xf32>
      %c0_15 = arith.constant 0 : index
      %c0_16 = arith.constant 0 : index
      %19 = vector.load %arg7[%c0_15, %c0_16] : memref<32x128xbf16, #tpu.memory_space<vmem>>, vector<32x128xbf16>
      %20 = arith.extf %19 : vector<32x128xbf16> to vector<32x128xf32>
      %21 = arith.addf %18, %20 : vector<32x128xf32>
      %cst_17 = arith.constant 0.000000e+00 : f32
      %22 = vector.broadcast %cst_17 : f32 to vector<32x128xf32>
      %23 = arith.maximumf %21, %22 : vector<32x128xf32>
      %24 = arith.truncf %23 : vector<32x128xf32> to vector<32x128xbf16>
      %c0_18 = arith.constant 0 : index
      %c0_19 = arith.constant 0 : index
      %25 = vector.load %arg8[%c0_18, %c0_19] : memref<32x128xbf16, #tpu.memory_space<vmem>>, vector<32x128xbf16>
      tpu.vector_store %arg8[%c0_18, %c0_19], %24 {strides = array<i32>} : memref<32x128xbf16, #tpu.memory_space<vmem>>, vector<32x128xbf16>,
    } else {
    }
    return
  }
  func.func @transform_0(%arg0: i32, %arg1: i32, %arg2: i32) -> (i32, i32) {
    %c0_i32 = arith.constant 0 : i32
    return %arg0, %arg2 : i32, i32
  }
  func.func @transform_1(%arg0: i32, %arg1: i32, %arg2: i32) -> (i32, i32) {
    %c0_i32 = arith.constant 0 : i32
    return %arg2, %arg1 : i32, i32
  }
  func.func @transform_2(%arg0: i32, %arg1: i32, %arg2: i32) -> (i32, i32) {
    %c0_i32 = arith.constant 0 : i32
    %c0_i32_0 = arith.constant 0 : i32
    return %c0_i32, %arg1 : i32, i32
  }
  func.func @transform_3(%arg0: i32, %arg1: i32, %arg2: i32) -> (i32, i32) {
    %c0_i32 = arith.constant 0 : i32
    %c0_i32_0 = arith.constant 0 : i32
    return %c0_i32, %arg1 : i32, i32
  }
  func.func @transform_4(%arg0: i32, %arg1: i32, %arg2: i32) -> (i32, i32) {
    %c0_i32 = arith.constant 0 : i32
    return %arg0, %arg1 : i32, i32
  }
  func.func @transform_5(%arg0: i32, %arg1: i32, %arg2: i32) -> (i32, i32) {
    %c0_i32 = arith.constant 0 : i32
    return %arg0, %arg1 : i32, i32
  }
}

module attributes {stable_mosaic.version = 11 : i64} {
  func.func @_mm_bn_kernel(%arg0: i32, %arg1: i32, %arg2: i32, %arg3: memref<32x384xbf16, #tpu.memory_space<vmem>>, %arg4: memref<384x128xbf16, #tpu.memory_space<vmem>>, %arg5: memref<1x128xf32, #tpu.memory_space<vmem>>, %arg6: memref<1x128xf32, #tpu.memory_space<vmem>>, %arg7: memref<32x128xbf16, #tpu.memory_space<vmem>>, %arg8: memref<32x128xf32, #tpu.memory_space<vmem>>) attributes {dimension_semantics = [#tpu.dimension_semantics<parallel>, #tpu.dimension_semantics<parallel>, #tpu.dimension_semantics<arbitrary>], iteration_bounds = array<i64: 1, 1, 3>, scalar_prefetch = 0 : i64, scratch_operands = 1 : i64, tpu.core_type = #tpu.core_type<tc>, window_params = [{transform_indices = @transform_0, window_bounds = array<i64: 32, 384>}, {transform_indices = @transform_1, window_bounds = array<i64: 384, 128>}, {transform_indices = @transform_2, window_bounds = array<i64: 1, 128>}, {transform_indices = @transform_3, window_bounds = array<i64: 1, 128>}, {transform_indices = @transform_4, window_bounds = array<i64: 32, 128>}]} {
    %c0_i32 = arith.constant 0 : i32
    %0 = arith.cmpi eq, %arg2, %c0_i32 : i32
    %1 = arith.extui %0 : i1 to i32
    %c0_i32_0 = arith.constant 0 : i32
    %2 = arith.cmpi ne, %1, %c0_i32_0 : i32
    scf.if %2 {
      %cst_9 = arith.constant 0.000000e+00 : f32
      %12 = vector.broadcast %cst_9 : f32 to vector<32x128xf32>
      %c0_10 = arith.constant 0 : index
      %c0_11 = arith.constant 0 : index
      %13 = vector.load %arg8[%c0_10, %c0_11] : memref<32x128xf32, #tpu.memory_space<vmem>>, vector<32x128xf32>
      tpu.vector_store %arg8[%c0_10, %c0_11], %12 {strides = array<i32>} : memref<32x128xf32, #tpu.memory_space<vmem>>, vector<32x128xf32>,
    } else {
    }
    %c0 = arith.constant 0 : index
    %c0_1 = arith.constant 0 : index
    %3 = vector.load %arg8[%c0, %c0_1] : memref<32x128xf32, #tpu.memory_space<vmem>>, vector<32x128xf32>
    %c0_2 = arith.constant 0 : index
    %c0_3 = arith.constant 0 : index
    %4 = vector.load %arg3[%c0_2, %c0_3] : memref<32x384xbf16, #tpu.memory_space<vmem>>, vector<32x384xbf16>
    %c0_4 = arith.constant 0 : index
    %c0_5 = arith.constant 0 : index
    %5 = vector.load %arg4[%c0_4, %c0_5] : memref<384x128xbf16, #tpu.memory_space<vmem>>, vector<384x128xbf16>
    %cst = arith.constant dense<0.000000e+00> : vector<32x128xf32>
    %6 = tpu.matmul %4, %5, %cst {dimension_numbers = #tpu.dot_dimension_numbers<[1], [0], [0], [1], [0, 0, 1, 1], [], []>} : vector<32x384xbf16>, vector<384x128xbf16>, vector<32x128xf32> -> vector<32x128xf32>
    %7 = arith.addf %3, %6 : vector<32x128xf32>
    %c0_6 = arith.constant 0 : index
    %c0_7 = arith.constant 0 : index
    %8 = vector.load %arg8[%c0_6, %c0_7] : memref<32x128xf32, #tpu.memory_space<vmem>>, vector<32x128xf32>
    tpu.vector_store %arg8[%c0_6, %c0_7], %7 {strides = array<i32>} : memref<32x128xf32, #tpu.memory_space<vmem>>, vector<32x128xf32>,
    %c2_i32 = arith.constant 2 : i32
    %9 = arith.cmpi eq, %arg2, %c2_i32 : i32
    %10 = arith.extui %9 : i1 to i32
    %c0_i32_8 = arith.constant 0 : i32
    %11 = arith.cmpi ne, %10, %c0_i32_8 : i32
    scf.if %11 {
      %c0_9 = arith.constant 0 : index
      %c0_10 = arith.constant 0 : index
      %12 = vector.load %arg8[%c0_9, %c0_10] : memref<32x128xf32, #tpu.memory_space<vmem>>, vector<32x128xf32>
      %c0_11 = arith.constant 0 : index
      %c0_12 = arith.constant 0 : index
      %13 = vector.load %arg5[%c0_11, %c0_12] : memref<1x128xf32, #tpu.memory_space<vmem>>, vector<1x128xf32>
      %14 = vector.broadcast %13 : vector<1x128xf32> to vector<32x128xf32>
      %15 = arith.mulf %12, %14 : vector<32x128xf32>
      %c0_13 = arith.constant 0 : index
      %c0_14 = arith.constant 0 : index
      %16 = vector.load %arg6[%c0_13, %c0_14] : memref<1x128xf32, #tpu.memory_space<vmem>>, vector<1x128xf32>
      %17 = vector.broadcast %16 : vector<1x128xf32> to vector<32x128xf32>
      %18 = arith.addf %15, %17 : vector<32x128xf32>
      %cst_15 = arith.constant 0.000000e+00 : f32
      %19 = vector.broadcast %cst_15 : f32 to vector<32x128xf32>
      %20 = arith.maximumf %18, %19 : vector<32x128xf32>
      %21 = arith.truncf %20 : vector<32x128xf32> to vector<32x128xbf16>
      %c0_16 = arith.constant 0 : index
      %c0_17 = arith.constant 0 : index
      %22 = vector.load %arg7[%c0_16, %c0_17] : memref<32x128xbf16, #tpu.memory_space<vmem>>, vector<32x128xbf16>
      tpu.vector_store %arg7[%c0_16, %c0_17], %21 {strides = array<i32>} : memref<32x128xbf16, #tpu.memory_space<vmem>>, vector<32x128xbf16>,
    } else {
    }
    return
  }
  func.func @transform_0(%arg0: i32, %arg1: i32, %arg2: i32) -> (i32, i32) {
    %c0_i32 = arith.constant 0 : i32
    return %arg0, %arg2 : i32, i32
  }
  func.func @transform_1(%arg0: i32, %arg1: i32, %arg2: i32) -> (i32, i32) {
    %c0_i32 = arith.constant 0 : i32
    return %arg2, %arg1 : i32, i32
  }
  func.func @transform_2(%arg0: i32, %arg1: i32, %arg2: i32) -> (i32, i32) {
    %c0_i32 = arith.constant 0 : i32
    %c0_i32_0 = arith.constant 0 : i32
    return %c0_i32, %arg1 : i32, i32
  }
  func.func @transform_3(%arg0: i32, %arg1: i32, %arg2: i32) -> (i32, i32) {
    %c0_i32 = arith.constant 0 : i32
    %c0_i32_0 = arith.constant 0 : i32
    return %c0_i32, %arg1 : i32, i32
  }
  func.func @transform_4(%arg0: i32, %arg1: i32, %arg2: i32) -> (i32, i32) {
    %c0_i32 = arith.constant 0 : i32
    return %arg0, %arg1 : i32, i32
  }
}

module attributes {stable_mosaic.version = 11 : i64} {
  func.func @_mm_bn_kernel(%arg0: i32, %arg1: i32, %arg2: i32, %arg3: memref<8x384xbf16, #tpu.memory_space<vmem>>, %arg4: memref<384x256xbf16, #tpu.memory_space<vmem>>, %arg5: memref<1x256xf32, #tpu.memory_space<vmem>>, %arg6: memref<1x256xf32, #tpu.memory_space<vmem>>, %arg7: memref<8x256xbf16, #tpu.memory_space<vmem>>, %arg8: memref<8x256xf32, #tpu.memory_space<vmem>>) attributes {dimension_semantics = [#tpu.dimension_semantics<parallel>, #tpu.dimension_semantics<parallel>, #tpu.dimension_semantics<arbitrary>], iteration_bounds = array<i64: 1, 1, 3>, scalar_prefetch = 0 : i64, scratch_operands = 1 : i64, tpu.core_type = #tpu.core_type<tc>, window_params = [{transform_indices = @transform_0, window_bounds = array<i64: 8, 384>}, {transform_indices = @transform_1, window_bounds = array<i64: 384, 256>}, {transform_indices = @transform_2, window_bounds = array<i64: 1, 256>}, {transform_indices = @transform_3, window_bounds = array<i64: 1, 256>}, {transform_indices = @transform_4, window_bounds = array<i64: 8, 256>}]} {
    %c0_i32 = arith.constant 0 : i32
    %0 = arith.cmpi eq, %arg2, %c0_i32 : i32
    %1 = arith.extui %0 : i1 to i32
    %c0_i32_0 = arith.constant 0 : i32
    %2 = arith.cmpi ne, %1, %c0_i32_0 : i32
    scf.if %2 {
      %cst_9 = arith.constant 0.000000e+00 : f32
      %12 = vector.broadcast %cst_9 : f32 to vector<8x256xf32>
      %c0_10 = arith.constant 0 : index
      %c0_11 = arith.constant 0 : index
      %13 = vector.load %arg8[%c0_10, %c0_11] : memref<8x256xf32, #tpu.memory_space<vmem>>, vector<8x256xf32>
      tpu.vector_store %arg8[%c0_10, %c0_11], %12 {strides = array<i32>} : memref<8x256xf32, #tpu.memory_space<vmem>>, vector<8x256xf32>,
    } else {
    }
    %c0 = arith.constant 0 : index
    %c0_1 = arith.constant 0 : index
    %3 = vector.load %arg8[%c0, %c0_1] : memref<8x256xf32, #tpu.memory_space<vmem>>, vector<8x256xf32>
    %c0_2 = arith.constant 0 : index
    %c0_3 = arith.constant 0 : index
    %4 = vector.load %arg3[%c0_2, %c0_3] : memref<8x384xbf16, #tpu.memory_space<vmem>>, vector<8x384xbf16>
    %c0_4 = arith.constant 0 : index
    %c0_5 = arith.constant 0 : index
    %5 = vector.load %arg4[%c0_4, %c0_5] : memref<384x256xbf16, #tpu.memory_space<vmem>>, vector<384x256xbf16>
    %cst = arith.constant dense<0.000000e+00> : vector<8x256xf32>
    %6 = tpu.matmul %4, %5, %cst {dimension_numbers = #tpu.dot_dimension_numbers<[1], [0], [0], [1], [0, 0, 1, 1], [], []>} : vector<8x384xbf16>, vector<384x256xbf16>, vector<8x256xf32> -> vector<8x256xf32>
    %7 = arith.addf %3, %6 : vector<8x256xf32>
    %c0_6 = arith.constant 0 : index
    %c0_7 = arith.constant 0 : index
    %8 = vector.load %arg8[%c0_6, %c0_7] : memref<8x256xf32, #tpu.memory_space<vmem>>, vector<8x256xf32>
    tpu.vector_store %arg8[%c0_6, %c0_7], %7 {strides = array<i32>} : memref<8x256xf32, #tpu.memory_space<vmem>>, vector<8x256xf32>,
    %c2_i32 = arith.constant 2 : i32
    %9 = arith.cmpi eq, %arg2, %c2_i32 : i32
    %10 = arith.extui %9 : i1 to i32
    %c0_i32_8 = arith.constant 0 : i32
    %11 = arith.cmpi ne, %10, %c0_i32_8 : i32
    scf.if %11 {
      %c0_9 = arith.constant 0 : index
      %c0_10 = arith.constant 0 : index
      %12 = vector.load %arg8[%c0_9, %c0_10] : memref<8x256xf32, #tpu.memory_space<vmem>>, vector<8x256xf32>
      %c0_11 = arith.constant 0 : index
      %c0_12 = arith.constant 0 : index
      %13 = vector.load %arg5[%c0_11, %c0_12] : memref<1x256xf32, #tpu.memory_space<vmem>>, vector<1x256xf32>
      %14 = vector.broadcast %13 : vector<1x256xf32> to vector<8x256xf32>
      %15 = arith.mulf %12, %14 : vector<8x256xf32>
      %c0_13 = arith.constant 0 : index
      %c0_14 = arith.constant 0 : index
      %16 = vector.load %arg6[%c0_13, %c0_14] : memref<1x256xf32, #tpu.memory_space<vmem>>, vector<1x256xf32>
      %17 = vector.broadcast %16 : vector<1x256xf32> to vector<8x256xf32>
      %18 = arith.addf %15, %17 : vector<8x256xf32>
      %cst_15 = arith.constant 0.000000e+00 : f32
      %19 = vector.broadcast %cst_15 : f32 to vector<8x256xf32>
      %20 = arith.maximumf %18, %19 : vector<8x256xf32>
      %21 = arith.truncf %20 : vector<8x256xf32> to vector<8x256xbf16>
      %c0_16 = arith.constant 0 : index
      %c0_17 = arith.constant 0 : index
      %22 = vector.load %arg7[%c0_16, %c0_17] : memref<8x256xbf16, #tpu.memory_space<vmem>>, vector<8x256xbf16>
      tpu.vector_store %arg7[%c0_16, %c0_17], %21 {strides = array<i32>} : memref<8x256xbf16, #tpu.memory_space<vmem>>, vector<8x256xbf16>,
    } else {
    }
    return
  }
  func.func @transform_0(%arg0: i32, %arg1: i32, %arg2: i32) -> (i32, i32) {
    %c0_i32 = arith.constant 0 : i32
    return %arg0, %arg2 : i32, i32
  }
  func.func @transform_1(%arg0: i32, %arg1: i32, %arg2: i32) -> (i32, i32) {
    %c0_i32 = arith.constant 0 : i32
    return %arg2, %arg1 : i32, i32
  }
  func.func @transform_2(%arg0: i32, %arg1: i32, %arg2: i32) -> (i32, i32) {
    %c0_i32 = arith.constant 0 : i32
    %c0_i32_0 = arith.constant 0 : i32
    return %c0_i32, %arg1 : i32, i32
  }
  func.func @transform_3(%arg0: i32, %arg1: i32, %arg2: i32) -> (i32, i32) {
    %c0_i32 = arith.constant 0 : i32
    %c0_i32_0 = arith.constant 0 : i32
    return %c0_i32, %arg1 : i32, i32
  }
  func.func @transform_4(%arg0: i32, %arg1: i32, %arg2: i32) -> (i32, i32) {
    %c0_i32 = arith.constant 0 : i32
    return %arg0, %arg1 : i32, i32
  }
}

module attributes {stable_mosaic.version = 11 : i64} {
  func.func @_mm_bn_kernel(%arg0: i32, %arg1: i32, %arg2: i32, %arg3: memref<8x128xbf16, #tpu.memory_space<vmem>>, %arg4: memref<128x256xbf16, #tpu.memory_space<vmem>>, %arg5: memref<1x256xf32, #tpu.memory_space<vmem>>, %arg6: memref<1x256xf32, #tpu.memory_space<vmem>>, %arg7: memref<8x256xbf16, #tpu.memory_space<vmem>>, %arg8: memref<8x256xf32, #tpu.memory_space<vmem>>) attributes {dimension_semantics = [#tpu.dimension_semantics<parallel>, #tpu.dimension_semantics<parallel>, #tpu.dimension_semantics<arbitrary>], iteration_bounds = array<i64: 1, 1, 1>, scalar_prefetch = 0 : i64, scratch_operands = 1 : i64, tpu.core_type = #tpu.core_type<tc>, window_params = [{transform_indices = @transform_0, window_bounds = array<i64: 8, 128>}, {transform_indices = @transform_1, window_bounds = array<i64: 128, 256>}, {transform_indices = @transform_2, window_bounds = array<i64: 1, 256>}, {transform_indices = @transform_3, window_bounds = array<i64: 1, 256>}, {transform_indices = @transform_4, window_bounds = array<i64: 8, 256>}]} {
    %c0_i32 = arith.constant 0 : i32
    %0 = arith.cmpi eq, %arg2, %c0_i32 : i32
    %1 = arith.extui %0 : i1 to i32
    %c0_i32_0 = arith.constant 0 : i32
    %2 = arith.cmpi ne, %1, %c0_i32_0 : i32
    scf.if %2 {
      %cst_10 = arith.constant 0.000000e+00 : f32
      %12 = vector.broadcast %cst_10 : f32 to vector<8x256xf32>
      %c0_11 = arith.constant 0 : index
      %c0_12 = arith.constant 0 : index
      %13 = vector.load %arg8[%c0_11, %c0_12] : memref<8x256xf32, #tpu.memory_space<vmem>>, vector<8x256xf32>
      tpu.vector_store %arg8[%c0_11, %c0_12], %12 {strides = array<i32>} : memref<8x256xf32, #tpu.memory_space<vmem>>, vector<8x256xf32>,
    } else {
    }
    %c0 = arith.constant 0 : index
    %c0_1 = arith.constant 0 : index
    %3 = vector.load %arg8[%c0, %c0_1] : memref<8x256xf32, #tpu.memory_space<vmem>>, vector<8x256xf32>
    %c0_2 = arith.constant 0 : index
    %c0_3 = arith.constant 0 : index
    %4 = vector.load %arg3[%c0_2, %c0_3] : memref<8x128xbf16, #tpu.memory_space<vmem>>, vector<8x128xbf16>
    %c0_4 = arith.constant 0 : index
    %c0_5 = arith.constant 0 : index
    %5 = vector.load %arg4[%c0_4, %c0_5] : memref<128x256xbf16, #tpu.memory_space<vmem>>, vector<128x256xbf16>
    %cst = arith.constant dense<0.000000e+00> : vector<8x256xf32>
    %6 = tpu.matmul %4, %5, %cst {dimension_numbers = #tpu.dot_dimension_numbers<[1], [0], [0], [1], [0, 0, 1, 1], [], []>} : vector<8x128xbf16>, vector<128x256xbf16>, vector<8x256xf32> -> vector<8x256xf32>
    %7 = arith.addf %3, %6 : vector<8x256xf32>
    %c0_6 = arith.constant 0 : index
    %c0_7 = arith.constant 0 : index
    %8 = vector.load %arg8[%c0_6, %c0_7] : memref<8x256xf32, #tpu.memory_space<vmem>>, vector<8x256xf32>
    tpu.vector_store %arg8[%c0_6, %c0_7], %7 {strides = array<i32>} : memref<8x256xf32, #tpu.memory_space<vmem>>, vector<8x256xf32>,
    %c0_i32_8 = arith.constant 0 : i32
    %9 = arith.cmpi eq, %arg2, %c0_i32_8 : i32
    %10 = arith.extui %9 : i1 to i32
    %c0_i32_9 = arith.constant 0 : i32
    %11 = arith.cmpi ne, %10, %c0_i32_9 : i32
    scf.if %11 {
      %c0_10 = arith.constant 0 : index
      %c0_11 = arith.constant 0 : index
      %12 = vector.load %arg8[%c0_10, %c0_11] : memref<8x256xf32, #tpu.memory_space<vmem>>, vector<8x256xf32>
      %c0_12 = arith.constant 0 : index
      %c0_13 = arith.constant 0 : index
      %13 = vector.load %arg5[%c0_12, %c0_13] : memref<1x256xf32, #tpu.memory_space<vmem>>, vector<1x256xf32>
      %14 = vector.broadcast %13 : vector<1x256xf32> to vector<8x256xf32>
      %15 = arith.mulf %12, %14 : vector<8x256xf32>
      %c0_14 = arith.constant 0 : index
      %c0_15 = arith.constant 0 : index
      %16 = vector.load %arg6[%c0_14, %c0_15] : memref<1x256xf32, #tpu.memory_space<vmem>>, vector<1x256xf32>
      %17 = vector.broadcast %16 : vector<1x256xf32> to vector<8x256xf32>
      %18 = arith.addf %15, %17 : vector<8x256xf32>
      %19 = arith.truncf %18 : vector<8x256xf32> to vector<8x256xbf16>
      %c0_16 = arith.constant 0 : index
      %c0_17 = arith.constant 0 : index
      %20 = vector.load %arg7[%c0_16, %c0_17] : memref<8x256xbf16, #tpu.memory_space<vmem>>, vector<8x256xbf16>
      tpu.vector_store %arg7[%c0_16, %c0_17], %19 {strides = array<i32>} : memref<8x256xbf16, #tpu.memory_space<vmem>>, vector<8x256xbf16>,
    } else {
    }
    return
  }
  func.func @transform_0(%arg0: i32, %arg1: i32, %arg2: i32) -> (i32, i32) {
    %c0_i32 = arith.constant 0 : i32
    return %arg0, %arg2 : i32, i32
  }
  func.func @transform_1(%arg0: i32, %arg1: i32, %arg2: i32) -> (i32, i32) {
    %c0_i32 = arith.constant 0 : i32
    return %arg2, %arg1 : i32, i32
  }
  func.func @transform_2(%arg0: i32, %arg1: i32, %arg2: i32) -> (i32, i32) {
    %c0_i32 = arith.constant 0 : i32
    %c0_i32_0 = arith.constant 0 : i32
    return %c0_i32, %arg1 : i32, i32
  }
  func.func @transform_3(%arg0: i32, %arg1: i32, %arg2: i32) -> (i32, i32) {
    %c0_i32 = arith.constant 0 : i32
    %c0_i32_0 = arith.constant 0 : i32
    return %c0_i32, %arg1 : i32, i32
  }
  func.func @transform_4(%arg0: i32, %arg1: i32, %arg2: i32) -> (i32, i32) {
    %c0_i32 = arith.constant 0 : i32
    return %arg0, %arg1 : i32, i32
  }
}

module attributes {stable_mosaic.version = 11 : i64} {
  func.func @_mm_bn_kernel(%arg0: i32, %arg1: i32, %arg2: i32, %arg3: memref<8x384xbf16, #tpu.memory_space<vmem>>, %arg4: memref<384x256xbf16, #tpu.memory_space<vmem>>, %arg5: memref<1x256xf32, #tpu.memory_space<vmem>>, %arg6: memref<1x256xf32, #tpu.memory_space<vmem>>, %arg7: memref<8x256xbf16, #tpu.memory_space<vmem>>, %arg8: memref<8x256xbf16, #tpu.memory_space<vmem>>, %arg9: memref<8x256xf32, #tpu.memory_space<vmem>>) attributes {dimension_semantics = [#tpu.dimension_semantics<parallel>, #tpu.dimension_semantics<parallel>, #tpu.dimension_semantics<arbitrary>], iteration_bounds = array<i64: 1, 1, 6>, scalar_prefetch = 0 : i64, scratch_operands = 1 : i64, tpu.core_type = #tpu.core_type<tc>, window_params = [{transform_indices = @transform_0, window_bounds = array<i64: 8, 384>}, {transform_indices = @transform_1, window_bounds = array<i64: 384, 256>}, {transform_indices = @transform_2, window_bounds = array<i64: 1, 256>}, {transform_indices = @transform_3, window_bounds = array<i64: 1, 256>}, {transform_indices = @transform_4, window_bounds = array<i64: 8, 256>}, {transform_indices = @transform_5, window_bounds = array<i64: 8, 256>}]} {
    %c0_i32 = arith.constant 0 : i32
    %0 = arith.cmpi eq, %arg2, %c0_i32 : i32
    %1 = arith.extui %0 : i1 to i32
    %c0_i32_0 = arith.constant 0 : i32
    %2 = arith.cmpi ne, %1, %c0_i32_0 : i32
    scf.if %2 {
      %cst_9 = arith.constant 0.000000e+00 : f32
      %12 = vector.broadcast %cst_9 : f32 to vector<8x256xf32>
      %c0_10 = arith.constant 0 : index
      %c0_11 = arith.constant 0 : index
      %13 = vector.load %arg9[%c0_10, %c0_11] : memref<8x256xf32, #tpu.memory_space<vmem>>, vector<8x256xf32>
      tpu.vector_store %arg9[%c0_10, %c0_11], %12 {strides = array<i32>} : memref<8x256xf32, #tpu.memory_space<vmem>>, vector<8x256xf32>,
    } else {
    }
    %c0 = arith.constant 0 : index
    %c0_1 = arith.constant 0 : index
    %3 = vector.load %arg9[%c0, %c0_1] : memref<8x256xf32, #tpu.memory_space<vmem>>, vector<8x256xf32>
    %c0_2 = arith.constant 0 : index
    %c0_3 = arith.constant 0 : index
    %4 = vector.load %arg3[%c0_2, %c0_3] : memref<8x384xbf16, #tpu.memory_space<vmem>>, vector<8x384xbf16>
    %c0_4 = arith.constant 0 : index
    %c0_5 = arith.constant 0 : index
    %5 = vector.load %arg4[%c0_4, %c0_5] : memref<384x256xbf16, #tpu.memory_space<vmem>>, vector<384x256xbf16>
    %cst = arith.constant dense<0.000000e+00> : vector<8x256xf32>
    %6 = tpu.matmul %4, %5, %cst {dimension_numbers = #tpu.dot_dimension_numbers<[1], [0], [0], [1], [0, 0, 1, 1], [], []>} : vector<8x384xbf16>, vector<384x256xbf16>, vector<8x256xf32> -> vector<8x256xf32>
    %7 = arith.addf %3, %6 : vector<8x256xf32>
    %c0_6 = arith.constant 0 : index
    %c0_7 = arith.constant 0 : index
    %8 = vector.load %arg9[%c0_6, %c0_7] : memref<8x256xf32, #tpu.memory_space<vmem>>, vector<8x256xf32>
    tpu.vector_store %arg9[%c0_6, %c0_7], %7 {strides = array<i32>} : memref<8x256xf32, #tpu.memory_space<vmem>>, vector<8x256xf32>,
    %c5_i32 = arith.constant 5 : i32
    %9 = arith.cmpi eq, %arg2, %c5_i32 : i32
    %10 = arith.extui %9 : i1 to i32
    %c0_i32_8 = arith.constant 0 : i32
    %11 = arith.cmpi ne, %10, %c0_i32_8 : i32
    scf.if %11 {
      %c0_9 = arith.constant 0 : index
      %c0_10 = arith.constant 0 : index
      %12 = vector.load %arg9[%c0_9, %c0_10] : memref<8x256xf32, #tpu.memory_space<vmem>>, vector<8x256xf32>
      %c0_11 = arith.constant 0 : index
      %c0_12 = arith.constant 0 : index
      %13 = vector.load %arg5[%c0_11, %c0_12] : memref<1x256xf32, #tpu.memory_space<vmem>>, vector<1x256xf32>
      %14 = vector.broadcast %13 : vector<1x256xf32> to vector<8x256xf32>
      %15 = arith.mulf %12, %14 : vector<8x256xf32>
      %c0_13 = arith.constant 0 : index
      %c0_14 = arith.constant 0 : index
      %16 = vector.load %arg6[%c0_13, %c0_14] : memref<1x256xf32, #tpu.memory_space<vmem>>, vector<1x256xf32>
      %17 = vector.broadcast %16 : vector<1x256xf32> to vector<8x256xf32>
      %18 = arith.addf %15, %17 : vector<8x256xf32>
      %c0_15 = arith.constant 0 : index
      %c0_16 = arith.constant 0 : index
      %19 = vector.load %arg7[%c0_15, %c0_16] : memref<8x256xbf16, #tpu.memory_space<vmem>>, vector<8x256xbf16>
      %20 = arith.extf %19 : vector<8x256xbf16> to vector<8x256xf32>
      %21 = arith.addf %18, %20 : vector<8x256xf32>
      %cst_17 = arith.constant 0.000000e+00 : f32
      %22 = vector.broadcast %cst_17 : f32 to vector<8x256xf32>
      %23 = arith.maximumf %21, %22 : vector<8x256xf32>
      %24 = arith.truncf %23 : vector<8x256xf32> to vector<8x256xbf16>
      %c0_18 = arith.constant 0 : index
      %c0_19 = arith.constant 0 : index
      %25 = vector.load %arg8[%c0_18, %c0_19] : memref<8x256xbf16, #tpu.memory_space<vmem>>, vector<8x256xbf16>
      tpu.vector_store %arg8[%c0_18, %c0_19], %24 {strides = array<i32>} : memref<8x256xbf16, #tpu.memory_space<vmem>>, vector<8x256xbf16>,
    } else {
    }
    return
  }
  func.func @transform_0(%arg0: i32, %arg1: i32, %arg2: i32) -> (i32, i32) {
    %c0_i32 = arith.constant 0 : i32
    return %arg0, %arg2 : i32, i32
  }
  func.func @transform_1(%arg0: i32, %arg1: i32, %arg2: i32) -> (i32, i32) {
    %c0_i32 = arith.constant 0 : i32
    return %arg2, %arg1 : i32, i32
  }
  func.func @transform_2(%arg0: i32, %arg1: i32, %arg2: i32) -> (i32, i32) {
    %c0_i32 = arith.constant 0 : i32
    %c0_i32_0 = arith.constant 0 : i32
    return %c0_i32, %arg1 : i32, i32
  }
  func.func @transform_3(%arg0: i32, %arg1: i32, %arg2: i32) -> (i32, i32) {
    %c0_i32 = arith.constant 0 : i32
    %c0_i32_0 = arith.constant 0 : i32
    return %c0_i32, %arg1 : i32, i32
  }
  func.func @transform_4(%arg0: i32, %arg1: i32, %arg2: i32) -> (i32, i32) {
    %c0_i32 = arith.constant 0 : i32
    return %arg0, %arg1 : i32, i32
  }
  func.func @transform_5(%arg0: i32, %arg1: i32, %arg2: i32) -> (i32, i32) {
    %c0_i32 = arith.constant 0 : i32
    return %arg0, %arg1 : i32, i32
  }
}

module attributes {stable_mosaic.version = 11 : i64} {
  func.func @_mm_bn_kernel(%arg0: i32, %arg1: i32, %arg2: i32, %arg3: memref<8x384xbf16, #tpu.memory_space<vmem>>, %arg4: memref<384x256xbf16, #tpu.memory_space<vmem>>, %arg5: memref<1x256xf32, #tpu.memory_space<vmem>>, %arg6: memref<1x256xf32, #tpu.memory_space<vmem>>, %arg7: memref<8x256xbf16, #tpu.memory_space<vmem>>, %arg8: memref<8x256xf32, #tpu.memory_space<vmem>>) attributes {dimension_semantics = [#tpu.dimension_semantics<parallel>, #tpu.dimension_semantics<parallel>, #tpu.dimension_semantics<arbitrary>], iteration_bounds = array<i64: 1, 1, 6>, scalar_prefetch = 0 : i64, scratch_operands = 1 : i64, tpu.core_type = #tpu.core_type<tc>, window_params = [{transform_indices = @transform_0, window_bounds = array<i64: 8, 384>}, {transform_indices = @transform_1, window_bounds = array<i64: 384, 256>}, {transform_indices = @transform_2, window_bounds = array<i64: 1, 256>}, {transform_indices = @transform_3, window_bounds = array<i64: 1, 256>}, {transform_indices = @transform_4, window_bounds = array<i64: 8, 256>}]} {
    %c0_i32 = arith.constant 0 : i32
    %0 = arith.cmpi eq, %arg2, %c0_i32 : i32
    %1 = arith.extui %0 : i1 to i32
    %c0_i32_0 = arith.constant 0 : i32
    %2 = arith.cmpi ne, %1, %c0_i32_0 : i32
    scf.if %2 {
      %cst_9 = arith.constant 0.000000e+00 : f32
      %12 = vector.broadcast %cst_9 : f32 to vector<8x256xf32>
      %c0_10 = arith.constant 0 : index
      %c0_11 = arith.constant 0 : index
      %13 = vector.load %arg8[%c0_10, %c0_11] : memref<8x256xf32, #tpu.memory_space<vmem>>, vector<8x256xf32>
      tpu.vector_store %arg8[%c0_10, %c0_11], %12 {strides = array<i32>} : memref<8x256xf32, #tpu.memory_space<vmem>>, vector<8x256xf32>,
    } else {
    }
    %c0 = arith.constant 0 : index
    %c0_1 = arith.constant 0 : index
    %3 = vector.load %arg8[%c0, %c0_1] : memref<8x256xf32, #tpu.memory_space<vmem>>, vector<8x256xf32>
    %c0_2 = arith.constant 0 : index
    %c0_3 = arith.constant 0 : index
    %4 = vector.load %arg3[%c0_2, %c0_3] : memref<8x384xbf16, #tpu.memory_space<vmem>>, vector<8x384xbf16>
    %c0_4 = arith.constant 0 : index
    %c0_5 = arith.constant 0 : index
    %5 = vector.load %arg4[%c0_4, %c0_5] : memref<384x256xbf16, #tpu.memory_space<vmem>>, vector<384x256xbf16>
    %cst = arith.constant dense<0.000000e+00> : vector<8x256xf32>
    %6 = tpu.matmul %4, %5, %cst {dimension_numbers = #tpu.dot_dimension_numbers<[1], [0], [0], [1], [0, 0, 1, 1], [], []>} : vector<8x384xbf16>, vector<384x256xbf16>, vector<8x256xf32> -> vector<8x256xf32>
    %7 = arith.addf %3, %6 : vector<8x256xf32>
    %c0_6 = arith.constant 0 : index
    %c0_7 = arith.constant 0 : index
    %8 = vector.load %arg8[%c0_6, %c0_7] : memref<8x256xf32, #tpu.memory_space<vmem>>, vector<8x256xf32>
    tpu.vector_store %arg8[%c0_6, %c0_7], %7 {strides = array<i32>} : memref<8x256xf32, #tpu.memory_space<vmem>>, vector<8x256xf32>,
    %c5_i32 = arith.constant 5 : i32
    %9 = arith.cmpi eq, %arg2, %c5_i32 : i32
    %10 = arith.extui %9 : i1 to i32
    %c0_i32_8 = arith.constant 0 : i32
    %11 = arith.cmpi ne, %10, %c0_i32_8 : i32
    scf.if %11 {
      %c0_9 = arith.constant 0 : index
      %c0_10 = arith.constant 0 : index
      %12 = vector.load %arg8[%c0_9, %c0_10] : memref<8x256xf32, #tpu.memory_space<vmem>>, vector<8x256xf32>
      %c0_11 = arith.constant 0 : index
      %c0_12 = arith.constant 0 : index
      %13 = vector.load %arg5[%c0_11, %c0_12] : memref<1x256xf32, #tpu.memory_space<vmem>>, vector<1x256xf32>
      %14 = vector.broadcast %13 : vector<1x256xf32> to vector<8x256xf32>
      %15 = arith.mulf %12, %14 : vector<8x256xf32>
      %c0_13 = arith.constant 0 : index
      %c0_14 = arith.constant 0 : index
      %16 = vector.load %arg6[%c0_13, %c0_14] : memref<1x256xf32, #tpu.memory_space<vmem>>, vector<1x256xf32>
      %17 = vector.broadcast %16 : vector<1x256xf32> to vector<8x256xf32>
      %18 = arith.addf %15, %17 : vector<8x256xf32>
      %cst_15 = arith.constant 0.000000e+00 : f32
      %19 = vector.broadcast %cst_15 : f32 to vector<8x256xf32>
      %20 = arith.maximumf %18, %19 : vector<8x256xf32>
      %21 = arith.truncf %20 : vector<8x256xf32> to vector<8x256xbf16>
      %c0_16 = arith.constant 0 : index
      %c0_17 = arith.constant 0 : index
      %22 = vector.load %arg7[%c0_16, %c0_17] : memref<8x256xbf16, #tpu.memory_space<vmem>>, vector<8x256xbf16>
      tpu.vector_store %arg7[%c0_16, %c0_17], %21 {strides = array<i32>} : memref<8x256xbf16, #tpu.memory_space<vmem>>, vector<8x256xbf16>,
    } else {
    }
    return
  }
  func.func @transform_0(%arg0: i32, %arg1: i32, %arg2: i32) -> (i32, i32) {
    %c0_i32 = arith.constant 0 : i32
    return %arg0, %arg2 : i32, i32
  }
  func.func @transform_1(%arg0: i32, %arg1: i32, %arg2: i32) -> (i32, i32) {
    %c0_i32 = arith.constant 0 : i32
    return %arg2, %arg1 : i32, i32
  }
  func.func @transform_2(%arg0: i32, %arg1: i32, %arg2: i32) -> (i32, i32) {
    %c0_i32 = arith.constant 0 : i32
    %c0_i32_0 = arith.constant 0 : i32
    return %c0_i32, %arg1 : i32, i32
  }
  func.func @transform_3(%arg0: i32, %arg1: i32, %arg2: i32) -> (i32, i32) {
    %c0_i32 = arith.constant 0 : i32
    %c0_i32_0 = arith.constant 0 : i32
    return %c0_i32, %arg1 : i32, i32
  }
  func.func @transform_4(%arg0: i32, %arg1: i32, %arg2: i32) -> (i32, i32) {
    %c0_i32 = arith.constant 0 : i32
    return %arg0, %arg1 : i32, i32
  }
}

module attributes {stable_mosaic.version = 11 : i64} {
  func.func @_mm_bn_kernel(%arg0: i32, %arg1: i32, %arg2: i32, %arg3: memref<8x384xbf16, #tpu.memory_space<vmem>>, %arg4: memref<384x256xbf16, #tpu.memory_space<vmem>>, %arg5: memref<1x256xf32, #tpu.memory_space<vmem>>, %arg6: memref<1x256xf32, #tpu.memory_space<vmem>>, %arg7: memref<8x256xbf16, #tpu.memory_space<vmem>>, %arg8: memref<8x256xf32, #tpu.memory_space<vmem>>) attributes {dimension_semantics = [#tpu.dimension_semantics<parallel>, #tpu.dimension_semantics<parallel>, #tpu.dimension_semantics<arbitrary>], iteration_bounds = array<i64: 1, 2, 6>, scalar_prefetch = 0 : i64, scratch_operands = 1 : i64, tpu.core_type = #tpu.core_type<tc>, window_params = [{transform_indices = @transform_0, window_bounds = array<i64: 8, 384>}, {transform_indices = @transform_1, window_bounds = array<i64: 384, 256>}, {transform_indices = @transform_2, window_bounds = array<i64: 1, 256>}, {transform_indices = @transform_3, window_bounds = array<i64: 1, 256>}, {transform_indices = @transform_4, window_bounds = array<i64: 8, 256>}]} {
    %c0_i32 = arith.constant 0 : i32
    %0 = arith.cmpi eq, %arg2, %c0_i32 : i32
    %1 = arith.extui %0 : i1 to i32
    %c0_i32_0 = arith.constant 0 : i32
    %2 = arith.cmpi ne, %1, %c0_i32_0 : i32
    scf.if %2 {
      %cst_9 = arith.constant 0.000000e+00 : f32
      %12 = vector.broadcast %cst_9 : f32 to vector<8x256xf32>
      %c0_10 = arith.constant 0 : index
      %c0_11 = arith.constant 0 : index
      %13 = vector.load %arg8[%c0_10, %c0_11] : memref<8x256xf32, #tpu.memory_space<vmem>>, vector<8x256xf32>
      tpu.vector_store %arg8[%c0_10, %c0_11], %12 {strides = array<i32>} : memref<8x256xf32, #tpu.memory_space<vmem>>, vector<8x256xf32>,
    } else {
    }
    %c0 = arith.constant 0 : index
    %c0_1 = arith.constant 0 : index
    %3 = vector.load %arg8[%c0, %c0_1] : memref<8x256xf32, #tpu.memory_space<vmem>>, vector<8x256xf32>
    %c0_2 = arith.constant 0 : index
    %c0_3 = arith.constant 0 : index
    %4 = vector.load %arg3[%c0_2, %c0_3] : memref<8x384xbf16, #tpu.memory_space<vmem>>, vector<8x384xbf16>
    %c0_4 = arith.constant 0 : index
    %c0_5 = arith.constant 0 : index
    %5 = vector.load %arg4[%c0_4, %c0_5] : memref<384x256xbf16, #tpu.memory_space<vmem>>, vector<384x256xbf16>
    %cst = arith.constant dense<0.000000e+00> : vector<8x256xf32>
    %6 = tpu.matmul %4, %5, %cst {dimension_numbers = #tpu.dot_dimension_numbers<[1], [0], [0], [1], [0, 0, 1, 1], [], []>} : vector<8x384xbf16>, vector<384x256xbf16>, vector<8x256xf32> -> vector<8x256xf32>
    %7 = arith.addf %3, %6 : vector<8x256xf32>
    %c0_6 = arith.constant 0 : index
    %c0_7 = arith.constant 0 : index
    %8 = vector.load %arg8[%c0_6, %c0_7] : memref<8x256xf32, #tpu.memory_space<vmem>>, vector<8x256xf32>
    tpu.vector_store %arg8[%c0_6, %c0_7], %7 {strides = array<i32>} : memref<8x256xf32, #tpu.memory_space<vmem>>, vector<8x256xf32>,
    %c5_i32 = arith.constant 5 : i32
    %9 = arith.cmpi eq, %arg2, %c5_i32 : i32
    %10 = arith.extui %9 : i1 to i32
    %c0_i32_8 = arith.constant 0 : i32
    %11 = arith.cmpi ne, %10, %c0_i32_8 : i32
    scf.if %11 {
      %c0_9 = arith.constant 0 : index
      %c0_10 = arith.constant 0 : index
      %12 = vector.load %arg8[%c0_9, %c0_10] : memref<8x256xf32, #tpu.memory_space<vmem>>, vector<8x256xf32>
      %c0_11 = arith.constant 0 : index
      %c0_12 = arith.constant 0 : index
      %13 = vector.load %arg5[%c0_11, %c0_12] : memref<1x256xf32, #tpu.memory_space<vmem>>, vector<1x256xf32>
      %14 = vector.broadcast %13 : vector<1x256xf32> to vector<8x256xf32>
      %15 = arith.mulf %12, %14 : vector<8x256xf32>
      %c0_13 = arith.constant 0 : index
      %c0_14 = arith.constant 0 : index
      %16 = vector.load %arg6[%c0_13, %c0_14] : memref<1x256xf32, #tpu.memory_space<vmem>>, vector<1x256xf32>
      %17 = vector.broadcast %16 : vector<1x256xf32> to vector<8x256xf32>
      %18 = arith.addf %15, %17 : vector<8x256xf32>
      %cst_15 = arith.constant 0.000000e+00 : f32
      %19 = vector.broadcast %cst_15 : f32 to vector<8x256xf32>
      %20 = arith.maximumf %18, %19 : vector<8x256xf32>
      %21 = arith.truncf %20 : vector<8x256xf32> to vector<8x256xbf16>
      %c0_16 = arith.constant 0 : index
      %c0_17 = arith.constant 0 : index
      %22 = vector.load %arg7[%c0_16, %c0_17] : memref<8x256xbf16, #tpu.memory_space<vmem>>, vector<8x256xbf16>
      tpu.vector_store %arg7[%c0_16, %c0_17], %21 {strides = array<i32>} : memref<8x256xbf16, #tpu.memory_space<vmem>>, vector<8x256xbf16>,
    } else {
    }
    return
  }
  func.func @transform_0(%arg0: i32, %arg1: i32, %arg2: i32) -> (i32, i32) {
    %c0_i32 = arith.constant 0 : i32
    return %arg0, %arg2 : i32, i32
  }
  func.func @transform_1(%arg0: i32, %arg1: i32, %arg2: i32) -> (i32, i32) {
    %c0_i32 = arith.constant 0 : i32
    return %arg2, %arg1 : i32, i32
  }
  func.func @transform_2(%arg0: i32, %arg1: i32, %arg2: i32) -> (i32, i32) {
    %c0_i32 = arith.constant 0 : i32
    %c0_i32_0 = arith.constant 0 : i32
    return %c0_i32, %arg1 : i32, i32
  }
  func.func @transform_3(%arg0: i32, %arg1: i32, %arg2: i32) -> (i32, i32) {
    %c0_i32 = arith.constant 0 : i32
    %c0_i32_0 = arith.constant 0 : i32
    return %c0_i32, %arg1 : i32, i32
  }
  func.func @transform_4(%arg0: i32, %arg1: i32, %arg2: i32) -> (i32, i32) {
    %c0_i32 = arith.constant 0 : i32
    return %arg0, %arg1 : i32, i32
  }
}

module attributes {stable_mosaic.version = 11 : i64} {
  func.func @_mm_bn_kernel(%arg0: i32, %arg1: i32, %arg2: i32, %arg3: memref<8x256xbf16, #tpu.memory_space<vmem>>, %arg4: memref<256x256xbf16, #tpu.memory_space<vmem>>, %arg5: memref<1x256xf32, #tpu.memory_space<vmem>>, %arg6: memref<1x256xf32, #tpu.memory_space<vmem>>, %arg7: memref<8x256xbf16, #tpu.memory_space<vmem>>, %arg8: memref<8x256xf32, #tpu.memory_space<vmem>>) attributes {dimension_semantics = [#tpu.dimension_semantics<parallel>, #tpu.dimension_semantics<parallel>, #tpu.dimension_semantics<arbitrary>], iteration_bounds = array<i64: 1, 2, 1>, scalar_prefetch = 0 : i64, scratch_operands = 1 : i64, tpu.core_type = #tpu.core_type<tc>, window_params = [{transform_indices = @transform_0, window_bounds = array<i64: 8, 256>}, {transform_indices = @transform_1, window_bounds = array<i64: 256, 256>}, {transform_indices = @transform_2, window_bounds = array<i64: 1, 256>}, {transform_indices = @transform_3, window_bounds = array<i64: 1, 256>}, {transform_indices = @transform_4, window_bounds = array<i64: 8, 256>}]} {
    %c0_i32 = arith.constant 0 : i32
    %0 = arith.cmpi eq, %arg2, %c0_i32 : i32
    %1 = arith.extui %0 : i1 to i32
    %c0_i32_0 = arith.constant 0 : i32
    %2 = arith.cmpi ne, %1, %c0_i32_0 : i32
    scf.if %2 {
      %cst_10 = arith.constant 0.000000e+00 : f32
      %12 = vector.broadcast %cst_10 : f32 to vector<8x256xf32>
      %c0_11 = arith.constant 0 : index
      %c0_12 = arith.constant 0 : index
      %13 = vector.load %arg8[%c0_11, %c0_12] : memref<8x256xf32, #tpu.memory_space<vmem>>, vector<8x256xf32>
      tpu.vector_store %arg8[%c0_11, %c0_12], %12 {strides = array<i32>} : memref<8x256xf32, #tpu.memory_space<vmem>>, vector<8x256xf32>,
    } else {
    }
    %c0 = arith.constant 0 : index
    %c0_1 = arith.constant 0 : index
    %3 = vector.load %arg8[%c0, %c0_1] : memref<8x256xf32, #tpu.memory_space<vmem>>, vector<8x256xf32>
    %c0_2 = arith.constant 0 : index
    %c0_3 = arith.constant 0 : index
    %4 = vector.load %arg3[%c0_2, %c0_3] : memref<8x256xbf16, #tpu.memory_space<vmem>>, vector<8x256xbf16>
    %c0_4 = arith.constant 0 : index
    %c0_5 = arith.constant 0 : index
    %5 = vector.load %arg4[%c0_4, %c0_5] : memref<256x256xbf16, #tpu.memory_space<vmem>>, vector<256x256xbf16>
    %cst = arith.constant dense<0.000000e+00> : vector<8x256xf32>
    %6 = tpu.matmul %4, %5, %cst {dimension_numbers = #tpu.dot_dimension_numbers<[1], [0], [0], [1], [0, 0, 1, 1], [], []>} : vector<8x256xbf16>, vector<256x256xbf16>, vector<8x256xf32> -> vector<8x256xf32>
    %7 = arith.addf %3, %6 : vector<8x256xf32>
    %c0_6 = arith.constant 0 : index
    %c0_7 = arith.constant 0 : index
    %8 = vector.load %arg8[%c0_6, %c0_7] : memref<8x256xf32, #tpu.memory_space<vmem>>, vector<8x256xf32>
    tpu.vector_store %arg8[%c0_6, %c0_7], %7 {strides = array<i32>} : memref<8x256xf32, #tpu.memory_space<vmem>>, vector<8x256xf32>,
    %c0_i32_8 = arith.constant 0 : i32
    %9 = arith.cmpi eq, %arg2, %c0_i32_8 : i32
    %10 = arith.extui %9 : i1 to i32
    %c0_i32_9 = arith.constant 0 : i32
    %11 = arith.cmpi ne, %10, %c0_i32_9 : i32
    scf.if %11 {
      %c0_10 = arith.constant 0 : index
      %c0_11 = arith.constant 0 : index
      %12 = vector.load %arg8[%c0_10, %c0_11] : memref<8x256xf32, #tpu.memory_space<vmem>>, vector<8x256xf32>
      %c0_12 = arith.constant 0 : index
      %c0_13 = arith.constant 0 : index
      %13 = vector.load %arg5[%c0_12, %c0_13] : memref<1x256xf32, #tpu.memory_space<vmem>>, vector<1x256xf32>
      %14 = vector.broadcast %13 : vector<1x256xf32> to vector<8x256xf32>
      %15 = arith.mulf %12, %14 : vector<8x256xf32>
      %c0_14 = arith.constant 0 : index
      %c0_15 = arith.constant 0 : index
      %16 = vector.load %arg6[%c0_14, %c0_15] : memref<1x256xf32, #tpu.memory_space<vmem>>, vector<1x256xf32>
      %17 = vector.broadcast %16 : vector<1x256xf32> to vector<8x256xf32>
      %18 = arith.addf %15, %17 : vector<8x256xf32>
      %19 = arith.truncf %18 : vector<8x256xf32> to vector<8x256xbf16>
      %c0_16 = arith.constant 0 : index
      %c0_17 = arith.constant 0 : index
      %20 = vector.load %arg7[%c0_16, %c0_17] : memref<8x256xbf16, #tpu.memory_space<vmem>>, vector<8x256xbf16>
      tpu.vector_store %arg7[%c0_16, %c0_17], %19 {strides = array<i32>} : memref<8x256xbf16, #tpu.memory_space<vmem>>, vector<8x256xbf16>,
    } else {
    }
    return
  }
  func.func @transform_0(%arg0: i32, %arg1: i32, %arg2: i32) -> (i32, i32) {
    %c0_i32 = arith.constant 0 : i32
    return %arg0, %arg2 : i32, i32
  }
  func.func @transform_1(%arg0: i32, %arg1: i32, %arg2: i32) -> (i32, i32) {
    %c0_i32 = arith.constant 0 : i32
    return %arg2, %arg1 : i32, i32
  }
  func.func @transform_2(%arg0: i32, %arg1: i32, %arg2: i32) -> (i32, i32) {
    %c0_i32 = arith.constant 0 : i32
    %c0_i32_0 = arith.constant 0 : i32
    return %c0_i32, %arg1 : i32, i32
  }
  func.func @transform_3(%arg0: i32, %arg1: i32, %arg2: i32) -> (i32, i32) {
    %c0_i32 = arith.constant 0 : i32
    %c0_i32_0 = arith.constant 0 : i32
    return %c0_i32, %arg1 : i32, i32
  }
  func.func @transform_4(%arg0: i32, %arg1: i32, %arg2: i32) -> (i32, i32) {
    %c0_i32 = arith.constant 0 : i32
    return %arg0, %arg1 : i32, i32
  }
}

module attributes {stable_mosaic.version = 11 : i64} {
  func.func @_mm_bn_kernel(%arg0: i32, %arg1: i32, %arg2: i32, %arg3: memref<8x512xbf16, #tpu.memory_space<vmem>>, %arg4: memref<512x256xbf16, #tpu.memory_space<vmem>>, %arg5: memref<1x256xf32, #tpu.memory_space<vmem>>, %arg6: memref<1x256xf32, #tpu.memory_space<vmem>>, %arg7: memref<8x256xbf16, #tpu.memory_space<vmem>>, %arg8: memref<8x256xbf16, #tpu.memory_space<vmem>>, %arg9: memref<8x256xf32, #tpu.memory_space<vmem>>) attributes {dimension_semantics = [#tpu.dimension_semantics<parallel>, #tpu.dimension_semantics<parallel>, #tpu.dimension_semantics<arbitrary>], iteration_bounds = array<i64: 1, 2, 9>, scalar_prefetch = 0 : i64, scratch_operands = 1 : i64, tpu.core_type = #tpu.core_type<tc>, window_params = [{transform_indices = @transform_0, window_bounds = array<i64: 8, 512>}, {transform_indices = @transform_1, window_bounds = array<i64: 512, 256>}, {transform_indices = @transform_2, window_bounds = array<i64: 1, 256>}, {transform_indices = @transform_3, window_bounds = array<i64: 1, 256>}, {transform_indices = @transform_4, window_bounds = array<i64: 8, 256>}, {transform_indices = @transform_5, window_bounds = array<i64: 8, 256>}]} {
    %c0_i32 = arith.constant 0 : i32
    %0 = arith.cmpi eq, %arg2, %c0_i32 : i32
    %1 = arith.extui %0 : i1 to i32
    %c0_i32_0 = arith.constant 0 : i32
    %2 = arith.cmpi ne, %1, %c0_i32_0 : i32
    scf.if %2 {
      %cst_9 = arith.constant 0.000000e+00 : f32
      %12 = vector.broadcast %cst_9 : f32 to vector<8x256xf32>
      %c0_10 = arith.constant 0 : index
      %c0_11 = arith.constant 0 : index
      %13 = vector.load %arg9[%c0_10, %c0_11] : memref<8x256xf32, #tpu.memory_space<vmem>>, vector<8x256xf32>
      tpu.vector_store %arg9[%c0_10, %c0_11], %12 {strides = array<i32>} : memref<8x256xf32, #tpu.memory_space<vmem>>, vector<8x256xf32>,
    } else {
    }
    %c0 = arith.constant 0 : index
    %c0_1 = arith.constant 0 : index
    %3 = vector.load %arg9[%c0, %c0_1] : memref<8x256xf32, #tpu.memory_space<vmem>>, vector<8x256xf32>
    %c0_2 = arith.constant 0 : index
    %c0_3 = arith.constant 0 : index
    %4 = vector.load %arg3[%c0_2, %c0_3] : memref<8x512xbf16, #tpu.memory_space<vmem>>, vector<8x512xbf16>
    %c0_4 = arith.constant 0 : index
    %c0_5 = arith.constant 0 : index
    %5 = vector.load %arg4[%c0_4, %c0_5] : memref<512x256xbf16, #tpu.memory_space<vmem>>, vector<512x256xbf16>
    %cst = arith.constant dense<0.000000e+00> : vector<8x256xf32>
    %6 = tpu.matmul %4, %5, %cst {dimension_numbers = #tpu.dot_dimension_numbers<[1], [0], [0], [1], [0, 0, 1, 1], [], []>} : vector<8x512xbf16>, vector<512x256xbf16>, vector<8x256xf32> -> vector<8x256xf32>
    %7 = arith.addf %3, %6 : vector<8x256xf32>
    %c0_6 = arith.constant 0 : index
    %c0_7 = arith.constant 0 : index
    %8 = vector.load %arg9[%c0_6, %c0_7] : memref<8x256xf32, #tpu.memory_space<vmem>>, vector<8x256xf32>
    tpu.vector_store %arg9[%c0_6, %c0_7], %7 {strides = array<i32>} : memref<8x256xf32, #tpu.memory_space<vmem>>, vector<8x256xf32>,
    %c8_i32 = arith.constant 8 : i32
    %9 = arith.cmpi eq, %arg2, %c8_i32 : i32
    %10 = arith.extui %9 : i1 to i32
    %c0_i32_8 = arith.constant 0 : i32
    %11 = arith.cmpi ne, %10, %c0_i32_8 : i32
    scf.if %11 {
      %c0_9 = arith.constant 0 : index
      %c0_10 = arith.constant 0 : index
      %12 = vector.load %arg9[%c0_9, %c0_10] : memref<8x256xf32, #tpu.memory_space<vmem>>, vector<8x256xf32>
      %c0_11 = arith.constant 0 : index
      %c0_12 = arith.constant 0 : index
      %13 = vector.load %arg5[%c0_11, %c0_12] : memref<1x256xf32, #tpu.memory_space<vmem>>, vector<1x256xf32>
      %14 = vector.broadcast %13 : vector<1x256xf32> to vector<8x256xf32>
      %15 = arith.mulf %12, %14 : vector<8x256xf32>
      %c0_13 = arith.constant 0 : index
      %c0_14 = arith.constant 0 : index
      %16 = vector.load %arg6[%c0_13, %c0_14] : memref<1x256xf32, #tpu.memory_space<vmem>>, vector<1x256xf32>
      %17 = vector.broadcast %16 : vector<1x256xf32> to vector<8x256xf32>
      %18 = arith.addf %15, %17 : vector<8x256xf32>
      %c0_15 = arith.constant 0 : index
      %c0_16 = arith.constant 0 : index
      %19 = vector.load %arg7[%c0_15, %c0_16] : memref<8x256xbf16, #tpu.memory_space<vmem>>, vector<8x256xbf16>
      %20 = arith.extf %19 : vector<8x256xbf16> to vector<8x256xf32>
      %21 = arith.addf %18, %20 : vector<8x256xf32>
      %cst_17 = arith.constant 0.000000e+00 : f32
      %22 = vector.broadcast %cst_17 : f32 to vector<8x256xf32>
      %23 = arith.maximumf %21, %22 : vector<8x256xf32>
      %24 = arith.truncf %23 : vector<8x256xf32> to vector<8x256xbf16>
      %c0_18 = arith.constant 0 : index
      %c0_19 = arith.constant 0 : index
      %25 = vector.load %arg8[%c0_18, %c0_19] : memref<8x256xbf16, #tpu.memory_space<vmem>>, vector<8x256xbf16>
      tpu.vector_store %arg8[%c0_18, %c0_19], %24 {strides = array<i32>} : memref<8x256xbf16, #tpu.memory_space<vmem>>, vector<8x256xbf16>,
    } else {
    }
    return
  }
  func.func @transform_0(%arg0: i32, %arg1: i32, %arg2: i32) -> (i32, i32) {
    %c0_i32 = arith.constant 0 : i32
    return %arg0, %arg2 : i32, i32
  }
  func.func @transform_1(%arg0: i32, %arg1: i32, %arg2: i32) -> (i32, i32) {
    %c0_i32 = arith.constant 0 : i32
    return %arg2, %arg1 : i32, i32
  }
  func.func @transform_2(%arg0: i32, %arg1: i32, %arg2: i32) -> (i32, i32) {
    %c0_i32 = arith.constant 0 : i32
    %c0_i32_0 = arith.constant 0 : i32
    return %c0_i32, %arg1 : i32, i32
  }
  func.func @transform_3(%arg0: i32, %arg1: i32, %arg2: i32) -> (i32, i32) {
    %c0_i32 = arith.constant 0 : i32
    %c0_i32_0 = arith.constant 0 : i32
    return %c0_i32, %arg1 : i32, i32
  }
  func.func @transform_4(%arg0: i32, %arg1: i32, %arg2: i32) -> (i32, i32) {
    %c0_i32 = arith.constant 0 : i32
    return %arg0, %arg1 : i32, i32
  }
  func.func @transform_5(%arg0: i32, %arg1: i32, %arg2: i32) -> (i32, i32) {
    %c0_i32 = arith.constant 0 : i32
    return %arg0, %arg1 : i32, i32
  }
}

module attributes {stable_mosaic.version = 11 : i64} {
  func.func @_mm_bn_kernel(%arg0: i32, %arg1: i32, %arg2: i32, %arg3: memref<8x512xbf16, #tpu.memory_space<vmem>>, %arg4: memref<512x256xbf16, #tpu.memory_space<vmem>>, %arg5: memref<1x256xf32, #tpu.memory_space<vmem>>, %arg6: memref<1x256xf32, #tpu.memory_space<vmem>>, %arg7: memref<8x256xbf16, #tpu.memory_space<vmem>>, %arg8: memref<8x256xf32, #tpu.memory_space<vmem>>) attributes {dimension_semantics = [#tpu.dimension_semantics<parallel>, #tpu.dimension_semantics<parallel>, #tpu.dimension_semantics<arbitrary>], iteration_bounds = array<i64: 1, 2, 9>, scalar_prefetch = 0 : i64, scratch_operands = 1 : i64, tpu.core_type = #tpu.core_type<tc>, window_params = [{transform_indices = @transform_0, window_bounds = array<i64: 8, 512>}, {transform_indices = @transform_1, window_bounds = array<i64: 512, 256>}, {transform_indices = @transform_2, window_bounds = array<i64: 1, 256>}, {transform_indices = @transform_3, window_bounds = array<i64: 1, 256>}, {transform_indices = @transform_4, window_bounds = array<i64: 8, 256>}]} {
    %c0_i32 = arith.constant 0 : i32
    %0 = arith.cmpi eq, %arg2, %c0_i32 : i32
    %1 = arith.extui %0 : i1 to i32
    %c0_i32_0 = arith.constant 0 : i32
    %2 = arith.cmpi ne, %1, %c0_i32_0 : i32
    scf.if %2 {
      %cst_9 = arith.constant 0.000000e+00 : f32
      %12 = vector.broadcast %cst_9 : f32 to vector<8x256xf32>
      %c0_10 = arith.constant 0 : index
      %c0_11 = arith.constant 0 : index
      %13 = vector.load %arg8[%c0_10, %c0_11] : memref<8x256xf32, #tpu.memory_space<vmem>>, vector<8x256xf32>
      tpu.vector_store %arg8[%c0_10, %c0_11], %12 {strides = array<i32>} : memref<8x256xf32, #tpu.memory_space<vmem>>, vector<8x256xf32>,
    } else {
    }
    %c0 = arith.constant 0 : index
    %c0_1 = arith.constant 0 : index
    %3 = vector.load %arg8[%c0, %c0_1] : memref<8x256xf32, #tpu.memory_space<vmem>>, vector<8x256xf32>
    %c0_2 = arith.constant 0 : index
    %c0_3 = arith.constant 0 : index
    %4 = vector.load %arg3[%c0_2, %c0_3] : memref<8x512xbf16, #tpu.memory_space<vmem>>, vector<8x512xbf16>
    %c0_4 = arith.constant 0 : index
    %c0_5 = arith.constant 0 : index
    %5 = vector.load %arg4[%c0_4, %c0_5] : memref<512x256xbf16, #tpu.memory_space<vmem>>, vector<512x256xbf16>
    %cst = arith.constant dense<0.000000e+00> : vector<8x256xf32>
    %6 = tpu.matmul %4, %5, %cst {dimension_numbers = #tpu.dot_dimension_numbers<[1], [0], [0], [1], [0, 0, 1, 1], [], []>} : vector<8x512xbf16>, vector<512x256xbf16>, vector<8x256xf32> -> vector<8x256xf32>
    %7 = arith.addf %3, %6 : vector<8x256xf32>
    %c0_6 = arith.constant 0 : index
    %c0_7 = arith.constant 0 : index
    %8 = vector.load %arg8[%c0_6, %c0_7] : memref<8x256xf32, #tpu.memory_space<vmem>>, vector<8x256xf32>
    tpu.vector_store %arg8[%c0_6, %c0_7], %7 {strides = array<i32>} : memref<8x256xf32, #tpu.memory_space<vmem>>, vector<8x256xf32>,
    %c8_i32 = arith.constant 8 : i32
    %9 = arith.cmpi eq, %arg2, %c8_i32 : i32
    %10 = arith.extui %9 : i1 to i32
    %c0_i32_8 = arith.constant 0 : i32
    %11 = arith.cmpi ne, %10, %c0_i32_8 : i32
    scf.if %11 {
      %c0_9 = arith.constant 0 : index
      %c0_10 = arith.constant 0 : index
      %12 = vector.load %arg8[%c0_9, %c0_10] : memref<8x256xf32, #tpu.memory_space<vmem>>, vector<8x256xf32>
      %c0_11 = arith.constant 0 : index
      %c0_12 = arith.constant 0 : index
      %13 = vector.load %arg5[%c0_11, %c0_12] : memref<1x256xf32, #tpu.memory_space<vmem>>, vector<1x256xf32>
      %14 = vector.broadcast %13 : vector<1x256xf32> to vector<8x256xf32>
      %15 = arith.mulf %12, %14 : vector<8x256xf32>
      %c0_13 = arith.constant 0 : index
      %c0_14 = arith.constant 0 : index
      %16 = vector.load %arg6[%c0_13, %c0_14] : memref<1x256xf32, #tpu.memory_space<vmem>>, vector<1x256xf32>
      %17 = vector.broadcast %16 : vector<1x256xf32> to vector<8x256xf32>
      %18 = arith.addf %15, %17 : vector<8x256xf32>
      %cst_15 = arith.constant 0.000000e+00 : f32
      %19 = vector.broadcast %cst_15 : f32 to vector<8x256xf32>
      %20 = arith.maximumf %18, %19 : vector<8x256xf32>
      %21 = arith.truncf %20 : vector<8x256xf32> to vector<8x256xbf16>
      %c0_16 = arith.constant 0 : index
      %c0_17 = arith.constant 0 : index
      %22 = vector.load %arg7[%c0_16, %c0_17] : memref<8x256xbf16, #tpu.memory_space<vmem>>, vector<8x256xbf16>
      tpu.vector_store %arg7[%c0_16, %c0_17], %21 {strides = array<i32>} : memref<8x256xbf16, #tpu.memory_space<vmem>>, vector<8x256xbf16>,
    } else {
    }
    return
  }
  func.func @transform_0(%arg0: i32, %arg1: i32, %arg2: i32) -> (i32, i32) {
    %c0_i32 = arith.constant 0 : i32
    return %arg0, %arg2 : i32, i32
  }
  func.func @transform_1(%arg0: i32, %arg1: i32, %arg2: i32) -> (i32, i32) {
    %c0_i32 = arith.constant 0 : i32
    return %arg2, %arg1 : i32, i32
  }
  func.func @transform_2(%arg0: i32, %arg1: i32, %arg2: i32) -> (i32, i32) {
    %c0_i32 = arith.constant 0 : i32
    %c0_i32_0 = arith.constant 0 : i32
    return %c0_i32, %arg1 : i32, i32
  }
  func.func @transform_3(%arg0: i32, %arg1: i32, %arg2: i32) -> (i32, i32) {
    %c0_i32 = arith.constant 0 : i32
    %c0_i32_0 = arith.constant 0 : i32
    return %c0_i32, %arg1 : i32, i32
  }
  func.func @transform_4(%arg0: i32, %arg1: i32, %arg2: i32) -> (i32, i32) {
    %c0_i32 = arith.constant 0 : i32
    return %arg0, %arg1 : i32, i32
  }
}

module attributes {stable_mosaic.version = 11 : i64} {
  func.func @_pool_fc_kernel(%arg0: i32, %arg1: memref<2x1x512xbf16, #tpu.memory_space<vmem>>, %arg2: memref<512x2xf32, #tpu.memory_space<vmem>>, %arg3: memref<1x2xf32, #tpu.memory_space<vmem>>, %arg4: memref<2x2xf32, #tpu.memory_space<vmem>>) attributes {dimension_semantics = [#tpu.dimension_semantics<arbitrary>], iteration_bounds = array<i64: 1>, scalar_prefetch = 0 : i64, scratch_operands = 0 : i64, tpu.core_type = #tpu.core_type<tc>, window_params = [{pipeline_mode = #tpu.pipeline_mode<synchronous>, transform_indices = @transform_0, window_bounds = array<i64: 2, 1, 512>}, {pipeline_mode = #tpu.pipeline_mode<synchronous>, transform_indices = @transform_1, window_bounds = array<i64: 512, 2>}, {pipeline_mode = #tpu.pipeline_mode<synchronous>, transform_indices = @transform_2, window_bounds = array<i64: 1, 2>}, {pipeline_mode = #tpu.pipeline_mode<synchronous>, transform_indices = @transform_3, window_bounds = array<i64: 2, 2>}]} {
    %c0 = arith.constant 0 : index
    %c0_0 = arith.constant 0 : index
    %c0_1 = arith.constant 0 : index
    %0 = vector.load %arg1[%c0, %c0_0, %c0_1] : memref<2x1x512xbf16, #tpu.memory_space<vmem>>, vector<2x1x512xbf16>
    %1 = arith.extf %0 : vector<2x1x512xbf16> to vector<2x1x512xf32>
    %cst = arith.constant dense<0.000000e+00> : vector<2x512xf32>
    %2 = vector.multi_reduction <add>, %1, %cst [1] : vector<2x1x512xf32> to vector<2x512xf32>
    %cst_2 = arith.constant 1.000000e+00 : f32
    %3 = vector.broadcast %cst_2 : f32 to vector<2x512xf32>
    %4 = arith.divf %2, %3 : vector<2x512xf32>
    %c0_3 = arith.constant 0 : index
    %c0_4 = arith.constant 0 : index
    %5 = vector.load %arg2[%c0_3, %c0_4] : memref<512x2xf32, #tpu.memory_space<vmem>>, vector<512x2xf32>
    %cst_5 = arith.constant dense<0.000000e+00> : vector<2x2xf32>
    %6 = tpu.matmul %4, %5, %cst_5 {dimension_numbers = #tpu.dot_dimension_numbers<[1], [0], [0], [1], [0, 0, 1, 1], [], []>} : vector<2x512xf32>, vector<512x2xf32>, vector<2x2xf32> -> vector<2x2xf32>
    %c0_6 = arith.constant 0 : index
    %c0_7 = arith.constant 0 : index
    %7 = vector.load %arg3[%c0_6, %c0_7] : memref<1x2xf32, #tpu.memory_space<vmem>>, vector<1x2xf32>
    %8 = vector.broadcast %7 : vector<1x2xf32> to vector<2x2xf32>
    %9 = arith.addf %6, %8 : vector<2x2xf32>
    %c0_8 = arith.constant 0 : index
    %c0_9 = arith.constant 0 : index
    %10 = vector.load %arg4[%c0_8, %c0_9] : memref<2x2xf32, #tpu.memory_space<vmem>>, vector<2x2xf32>
    tpu.vector_store %arg4[%c0_8, %c0_9], %9 {strides = array<i32>} : memref<2x2xf32, #tpu.memory_space<vmem>>, vector<2x2xf32>,
    return
  }
  func.func @transform_0(%arg0: i32) -> (i32, i32, i32) {
    %c0_i32 = arith.constant 0 : i32
    %c0_i32_0 = arith.constant 0 : i32
    %c0_i32_1 = arith.constant 0 : i32
    %c0_i32_2 = arith.constant 0 : i32
    return %c0_i32, %c0_i32_0, %c0_i32_1 : i32, i32, i32
  }
  func.func @transform_1(%arg0: i32) -> (i32, i32) {
    %c0_i32 = arith.constant 0 : i32
    %c0_i32_0 = arith.constant 0 : i32
    %c0_i32_1 = arith.constant 0 : i32
    return %c0_i32, %c0_i32_0 : i32, i32
  }
  func.func @transform_2(%arg0: i32) -> (i32, i32) {
    %c0_i32 = arith.constant 0 : i32
    %c0_i32_0 = arith.constant 0 : i32
    %c0_i32_1 = arith.constant 0 : i32
    return %c0_i32, %c0_i32_0 : i32, i32
  }
  func.func @transform_3(%arg0: i32) -> (i32, i32) {
    %c0_i32 = arith.constant 0 : i32
    %c0_i32_0 = arith.constant 0 : i32
    %c0_i32_1 = arith.constant 0 : i32
    return %c0_i32, %c0_i32_0 : i32, i32
  }
}

</mosaic_0001>

<bundles_post_ra>
// kernel: resnet18_forward.23
= control target key start
LH: loop header
LB: loop body
LE: loop exit
PB: predicated region body
PF: predicated region fallthrough
CT: control target
= control target key end

     0   :  { %vm304_vm0 = vcmask 519168   ;;  %s871_s0 = inlined_call_operand.vmem [shape: bf16[128,64], index: 0, kind: input, shape index: {}]   ;;  %s872_s1 = inlined_call_operand.vmem [shape: bf16[128,64], index: 1, kind: input, shape index: {}]   ;;  %s873_s2 = inlined_call_operand.vmem [shape: bf16[128,64], index: 2, kind: input, shape index: {}]   ;;  %s874_s3 = inlined_call_operand.vmem [shape: bf16[128,64], index: 3, kind: input, shape index: {}]   ;;  %s875_s4 = inlined_call_operand.vmem [shape: bf16[128,64], index: 4, kind: input, shape index: {}]   ;;  %s876_s5 = inlined_call_operand.vmem [shape: bf16[128,64], index: 5, kind: input, shape index: {}]   ;;  %s877_s6 = inlined_call_operand.vmem [shape: bf16[128,64], index: 6, kind: input, shape index: {}]   ;;  %s878_s7 = inlined_call_operand.vmem [shape: bf16[128,64], index: 7, kind: input, shape index: {}]   ;;  %s879_s8 = inlined_call_operand.vmem [shape: bf16[128,64], index: 8, kind: input, shape index: {}]   ;;  %s880_s9 = inlined_call_operand.vmem [shape: bf16[128,64], index: 9, kind: output, shape index: {}]  }
   0x1   :  { %v32_v0 = vld [vmem:[%s871_s0] sm:$0xf]  ;;  %v33_v6 = vld [vmem:[%s871_s0 + $0x4] sm:$0xf]  ;;  %v34_v15 = vld [vmem:[%s871_s0 + $0x8] sm:$0xf] }
   0x2   :  { %v48_v1 = vld [vmem:[%s872_s1] sm:$0xf]  ;;  %v49_v7 = vld [vmem:[%s872_s1 + $0x4] sm:$0xf]  ;;  %v50_v16 = vld [vmem:[%s872_s1 + $0x8] sm:$0xf] }
   0x3   :  { %v80_v2 = vld [vmem:[%s873_s2] sm:$0xf]  ;;  %v64_v3 = vmax.bf16 %v48_v1, %v32_v0  ;;  %v81_v8 = vld [vmem:[%s873_s2 + $0x4] sm:$0xf]  ;;  %v65_v10 = vmax.bf16 %v49_v7, %v33_v6  ;;  %v82_v17 = vld [vmem:[%s873_s2 + $0x8] sm:$0xf]  ;;  %v66_v20 = vmax.bf16 %v50_v16, %v34_v15 }
   0x4   :  { %v112_v4 = vld [vmem:[%s874_s3] sm:$0xf]  ;;  %v113_v13 = vld [vmem:[%s874_s3 + $0x4] sm:$0xf]  ;;  %v114_v24 = vld [vmem:[%s874_s3 + $0x8] sm:$0xf] }
   0x5   :  { %v96_v5 = vmax.bf16 %v80_v2, %v64_v3  ;;  %v144_v9 = vld [vmem:[%s875_s4] sm:$0xf]  ;;  %v97_v14 = vmax.bf16 %v81_v8, %v65_v10  ;;  %v145_v19 = vld [vmem:[%s875_s4 + $0x4] sm:$0xf]  ;;  %v98_v26 = vmax.bf16 %v82_v17, %v66_v20  ;;  %v35_v27 = vld [vmem:[%s871_s0 + $0xc] sm:$0xf] }
   0x6   :  { %v176_v12 = vld [vmem:[%s876_s5] sm:$0xf]  ;;  %v177_v23 = vld [vmem:[%s876_s5 + $0x4] sm:$0xf]  ;;  %v51_v28 = vld [vmem:[%s872_s1 + $0xc] sm:$0xf] }
   0x7   :  { %v128_v11 = vmax.bf16 %v112_v4, %v96_v5  ;;  %v208_v21 = vld [vmem:[%s877_s6] sm:$0xf]  ;;  %v129_v22 = vmax.bf16 %v113_v13, %v97_v14  ;;  %v83_v29 = vld [vmem:[%s873_s2 + $0xc] sm:$0xf]  ;;  %v146_v33 = vld [vmem:[%s875_s4 + $0x8] sm:$0xf]  ;;  %v67_v34 = vmax.bf16 %v51_v28, %v35_v27  ;;  %v130_v37 = vmax.bf16 %v114_v24, %v98_v26 }
   0x8   :  { %v240_v30 = vld [vmem:[%s878_s7] sm:$0xf]  ;;  %v209_v36 = vld [vmem:[%s877_s6 + $0x4] sm:$0xf]  ;;  %v178_v38 = vld [vmem:[%s876_s5 + $0x8] sm:$0xf] }
   0x9   :  { %v160_v18 = vmax.bf16 %v144_v9, %v128_v11  ;;  %v272_v31 = vld [vmem:[%s879_s8] sm:$0xf]  ;;  %v161_v32 = vmax.bf16 %v145_v19, %v129_v22  ;;  %v115_v39 = vld [vmem:[%s874_s3 + $0xc] sm:$0xf]  ;;  %v99_v41 = vmax.bf16 %v83_v29, %v67_v34  ;;  %v36_v42 = vld [vmem:[%s871_s0 + $0x10] sm:$0xf]  ;;  %v162_v48 = vmax.bf16 %v146_v33, %v130_v37 }
   0xa   :  { %v52_v43 = vld [vmem:[%s872_s1 + $0x10] sm:$0xf]  ;;  %v241_v46 = vld [vmem:[%s878_s7 + $0x4] sm:$0xf]  ;;  %v147_v49 = vld [vmem:[%s875_s4 + $0xc] sm:$0xf] }
   0xb   :  { %v192_v25 = vmax.bf16 %v176_v12, %v160_v18  ;;  %v193_v40 = vmax.bf16 %v177_v23, %v161_v32  ;;  %v84_v44 = vld [vmem:[%s873_s2 + $0x10] sm:$0xf]  ;;  %v273_v47 = vld [vmem:[%s879_s8 + $0x4] sm:$0xf]  ;;  %v68_v50 = vmax.bf16 %v52_v43, %v36_v42  ;;  %v210_v52 = vld [vmem:[%s877_s6 + $0x8] sm:$0xf]  ;;  %v131_v53 = vmax.bf16 %v115_v39, %v99_v41 }
   0xc   :  { %v179_v54 = vld [vmem:[%s876_s5 + $0xc] sm:$0xf]  ;;  %v116_v55 = vld [vmem:[%s874_s3 + $0x10] sm:$0xf]  ;;  %v194_v57 = vmax.bf16 %v178_v38, %v162_v48  ;;  %v37_v59 = vld [vmem:[%s871_s0 + $0x14] sm:$0xf] }
   0xd   :  { %v224_v35 = vmax.bf16 %v208_v21, %v192_v25  ;;  %v225_v51 = vmax.bf16 %v209_v36, %v193_v40  ;;  %v100_v58 = vmax.bf16 %v84_v44, %v68_v50  ;;  %v53_v60 = vld [vmem:[%s872_s1 + $0x14] sm:$0xf]  ;;  %v242_v63 = vld [vmem:[%s878_s7 + $0x8] sm:$0xf]  ;;  %v163_v1 = vmax.bf16 %v147_v49, %v131_v53  ;;  %v148_v2 = vld [vmem:[%s875_s4 + $0x10] sm:$0xf] }
   0xe   :  { %v85_v61 = vld [vmem:[%s873_s2 + $0x14] sm:$0xf]  ;;  %v274_v0 = vld [vmem:[%s879_s8 + $0x8] sm:$0xf]  ;;  %v69_v3 = vmax.bf16 %v53_v60, %v37_v59  ;;  %v226_v4 = vmax.bf16 %v210_v52, %v194_v57  ;;  %v211_v5 = vld [vmem:[%s877_s6 + $0xc] sm:$0xf] }
   0xf   :  { %v256_v45 = vmax.bf16 %v240_v30, %v224_v35  ;;  %v257_v62 = vmax.bf16 %v241_v46, %v225_v51  ;;  %v132_v6 = vmax.bf16 %v116_v55, %v100_v58  ;;  %v180_v7 = vld [vmem:[%s876_s5 + $0x10] sm:$0xf]  ;;  %v117_v8 = vld [vmem:[%s874_s3 + $0x14] sm:$0xf]  ;;  %v195_v10 = vmax.bf16 %v179_v54, %v163_v1  ;;  %v38_v12 = vld [vmem:[%s871_s0 + $0x18] sm:$0xf] }
  0x10   :  { %v101_v11 = vmax.bf16 %v85_v61, %v69_v3  ;;  %v54_v13 = vld [vmem:[%s872_s1 + $0x18] sm:$0xf]  ;;  %v258_v15 = vmax.bf16 %v242_v63, %v226_v4  ;;  %v243_v16 = vld [vmem:[%s878_s7 + $0xc] sm:$0xf]  ;;  %v149_v19 = vld [vmem:[%s875_s4 + $0x14] sm:$0xf] }
  0x11   :  { %v288_v56 = vmax.bf16 %v272_v31, %v256_v45  ;;  %v289_v9 = vmax.bf16 %v273_v47, %v257_v62  ;;  %v86_v14 = vld [vmem:[%s873_s2 + $0x18] sm:$0xf]  ;;  %v275_v17 = vld [vmem:[%s879_s8 + $0xc] sm:$0xf]  ;;  %v164_v18 = vmax.bf16 %v148_v2, %v132_v6  ;;  %v70_v20 = vmax.bf16 %v54_v13, %v38_v12  ;;  %v212_v22 = vld [vmem:[%s877_s6 + $0x10] sm:$0xf] }
  0x12   :  { %v227_v21 = vmax.bf16 %v211_v5, %v195_v10  ;;  %v133_v23 = vmax.bf16 %v117_v8, %v101_v11  ;;  %v181_v24 = vld [vmem:[%s876_s5 + $0x14] sm:$0xf]  ;;  %v118_v25 = vld [vmem:[%s874_s3 + $0x18] sm:$0xf]  ;;  %v290_v26 = vmax.bf16 %v274_v0, %v258_v15  ;;  %v39_v29 = vld [vmem:[%s871_s0 + $0x1c] sm:$0xf] }
  0x13   :  { %305 = vst.msk [vmem:[%s880_s9] sm:$0xf] %vm304_vm0, %v288_v56  ;;  %306 = vst.msk [vmem:[%s880_s9 + $0x4] sm:$0xf] %vm304_vm0, %v289_v9  ;;  %v196_v27 = vmax.bf16 %v180_v7, %v164_v18  ;;  %v102_v28 = vmax.bf16 %v86_v14, %v70_v20  ;;  %v55_v30 = vld [vmem:[%s872_s1 + $0x1c] sm:$0xf] }
  0x14   :  { %v87_v31 = vld [vmem:[%s873_s2 + $0x1c] sm:$0xf]  ;;  %v259_v32 = vmax.bf16 %v243_v16, %v227_v21  ;;  %v244_v33 = vld [vmem:[%s878_s7 + $0x10] sm:$0xf]  ;;  %v165_v35 = vmax.bf16 %v149_v19, %v133_v23  ;;  %v150_v36 = vld [vmem:[%s875_s4 + $0x18] sm:$0xf]  ;;  %v71_v37 = vmax.bf16 %v55_v30, %v39_v29 }
  0x15   :  { %v276_v34 = vld [vmem:[%s879_s8 + $0x10] sm:$0xf]  ;;  %307 = vst.msk [vmem:[%s880_s9 + $0x8] sm:$0xf] %vm304_vm0, %v290_v26  ;;  %v228_v38 = vmax.bf16 %v212_v22, %v196_v27  ;;  %v213_v39 = vld [vmem:[%s877_s6 + $0x14] sm:$0xf]  ;;  %v134_v40 = vmax.bf16 %v118_v25, %v102_v28 }
  0x16   :  { %v182_v41 = vld [vmem:[%s876_s5 + $0x18] sm:$0xf]  ;;  %v119_v42 = vld [vmem:[%s874_s3 + $0x1c] sm:$0xf]  ;;  %v291_v43 = vmax.bf16 %v275_v17, %v259_v32  ;;  %v197_v44 = vmax.bf16 %v181_v24, %v165_v35  ;;  %v103_v45 = vmax.bf16 %v87_v31, %v71_v37  ;;  %v40_v46 = vld [vmem:[%s871_s0 + $0x20] sm:$0xf] }
  0x17   :  { %v56_v47 = vld [vmem:[%s872_s1 + $0x20] sm:$0xf]  ;;  %v260_v49 = vmax.bf16 %v244_v33, %v228_v38  ;;  %v245_v50 = vld [vmem:[%s878_s7 + $0x14] sm:$0xf]  ;;  %v166_v52 = vmax.bf16 %v150_v36, %v134_v40  ;;  %v151_v53 = vld [vmem:[%s875_s4 + $0x1c] sm:$0xf] }
  0x18   :  { %v88_v48 = vld [vmem:[%s873_s2 + $0x20] sm:$0xf]  ;;  %v277_v51 = vld [vmem:[%s879_s8 + $0x14] sm:$0xf]  ;;  %v72_v54 = vmax.bf16 %v56_v47, %v40_v46  ;;  %308 = vst.msk [vmem:[%s880_s9 + $0xc] sm:$0xf] %vm304_vm0, %v291_v43  ;;  %v229_v55 = vmax.bf16 %v213_v39, %v197_v44  ;;  %v135_v57 = vmax.bf16 %v119_v42, %v103_v45 }
  0x19   :  { %v214_v56 = vld [vmem:[%s877_s6 + $0x18] sm:$0xf]  ;;  %v183_v58 = vld [vmem:[%s876_s5 + $0x1c] sm:$0xf]  ;;  %v120_v59 = vld [vmem:[%s874_s3 + $0x20] sm:$0xf]  ;;  %v292_v60 = vmax.bf16 %v276_v34, %v260_v49  ;;  %v198_v61 = vmax.bf16 %v182_v41, %v166_v52 }
  0x1a   :  { %v104_v62 = vmax.bf16 %v88_v48, %v72_v54  ;;  %v41_v63 = vld [vmem:[%s871_s0 + $0x24] sm:$0xf]  ;;  %v261_v2 = vmax.bf16 %v245_v50, %v229_v55  ;;  %v246_v3 = vld [vmem:[%s878_s7 + $0x18] sm:$0xf]  ;;  %v167_v5 = vmax.bf16 %v151_v53, %v135_v57  ;;  %v152_v6 = vld [vmem:[%s875_s4 + $0x20] sm:$0xf] }
  0x1b   :  { %v57_v0 = vld [vmem:[%s872_s1 + $0x24] sm:$0xf]  ;;  %v278_v4 = vld [vmem:[%s879_s8 + $0x18] sm:$0xf]  ;;  %309 = vst.msk [vmem:[%s880_s9 + $0x10] sm:$0xf] %vm304_vm0, %v292_v60  ;;  %v230_v8 = vmax.bf16 %v214_v56, %v198_v61 }
  0x1c   :  { %v89_v1 = vld [vmem:[%s873_s2 + $0x24] sm:$0xf]  ;;  %v73_v7 = vmax.bf16 %v57_v0, %v41_v63  ;;  %v215_v9 = vld [vmem:[%s877_s6 + $0x1c] sm:$0xf]  ;;  %v136_v10 = vmax.bf16 %v120_v59, %v104_v62  ;;  %v184_v11 = vld [vmem:[%s876_s5 + $0x20] sm:$0xf]  ;;  %v293_v13 = vmax.bf16 %v277_v51, %v261_v2  ;;  %v199_v14 = vmax.bf16 %v183_v58, %v167_v5 }
  0x1d   :  { %v121_v12 = vld [vmem:[%s874_s3 + $0x24] sm:$0xf]  ;;  %v42_v16 = vld [vmem:[%s871_s0 + $0x28] sm:$0xf]  ;;  %v262_v19 = vmax.bf16 %v246_v3, %v230_v8  ;;  %v247_v20 = vld [vmem:[%s878_s7 + $0x1c] sm:$0xf] }
  0x1e   :  { %v105_v15 = vmax.bf16 %v89_v1, %v73_v7  ;;  %v58_v17 = vld [vmem:[%s872_s1 + $0x28] sm:$0xf]  ;;  %v279_v21 = vld [vmem:[%s879_s8 + $0x1c] sm:$0xf]  ;;  %v168_v22 = vmax.bf16 %v152_v6, %v136_v10  ;;  %v153_v23 = vld [vmem:[%s875_s4 + $0x24] sm:$0xf]  ;;  %v231_v25 = vmax.bf16 %v215_v9, %v199_v14 }
  0x1f   :  { %v90_v18 = vld [vmem:[%s873_s2 + $0x28] sm:$0xf]  ;;  %v74_v24 = vmax.bf16 %v58_v17, %v42_v16  ;;  %310 = vst.msk [vmem:[%s880_s9 + $0x14] sm:$0xf] %vm304_vm0, %v293_v13  ;;  %v216_v26 = vld [vmem:[%s877_s6 + $0x20] sm:$0xf]  ;;  %v294_v30 = vmax.bf16 %v278_v4, %v262_v19 }
  0x20   :  { %v137_v27 = vmax.bf16 %v121_v12, %v105_v15  ;;  %v185_v28 = vld [vmem:[%s876_s5 + $0x24] sm:$0xf]  ;;  %v122_v29 = vld [vmem:[%s874_s3 + $0x28] sm:$0xf]  ;;  %v200_v31 = vmax.bf16 %v184_v11, %v168_v22  ;;  %v43_v33 = vld [vmem:[%s871_s0 + $0x2c] sm:$0xf]  ;;  %v263_v36 = vmax.bf16 %v247_v20, %v231_v25 }
  0x21   :  { %v106_v32 = vmax.bf16 %v90_v18, %v74_v24  ;;  %v59_v34 = vld [vmem:[%s872_s1 + $0x2c] sm:$0xf]  ;;  %v248_v37 = vld [vmem:[%s878_s7 + $0x20] sm:$0xf]  ;;  %v154_v40 = vld [vmem:[%s875_s4 + $0x28] sm:$0xf] }
  0x22   :  { %v91_v35 = vld [vmem:[%s873_s2 + $0x2c] sm:$0xf]  ;;  %v280_v38 = vld [vmem:[%s879_s8 + $0x20] sm:$0xf]  ;;  %v169_v39 = vmax.bf16 %v153_v23, %v137_v27  ;;  %v75_v41 = vmax.bf16 %v59_v34, %v43_v33  ;;  %311 = vst.msk [vmem:[%s880_s9 + $0x18] sm:$0xf] %vm304_vm0, %v294_v30  ;;  %v232_v42 = vmax.bf16 %v216_v26, %v200_v31  ;;  %v295_v47 = vmax.bf16 %v279_v21, %v263_v36 }
  0x23   :  { %v217_v43 = vld [vmem:[%s877_s6 + $0x24] sm:$0xf]  ;;  %v138_v44 = vmax.bf16 %v122_v29, %v106_v32  ;;  %v186_v45 = vld [vmem:[%s876_s5 + $0x28] sm:$0xf]  ;;  %v123_v46 = vld [vmem:[%s874_s3 + $0x2c] sm:$0xf] }
  0x24   :  { %v201_v48 = vmax.bf16 %v185_v28, %v169_v39  ;;  %v107_v49 = vmax.bf16 %v91_v35, %v75_v41  ;;  %v44_v50 = vld [vmem:[%s871_s0 + $0x30] sm:$0xf]  ;;  %v264_v53 = vmax.bf16 %v248_v37, %v232_v42  ;;  %v249_v54 = vld [vmem:[%s878_s7 + $0x24] sm:$0xf]  ;;  %v155_v57 = vld [vmem:[%s875_s4 + $0x2c] sm:$0xf] }
  0x25   :  { %v60_v51 = vld [vmem:[%s872_s1 + $0x30] sm:$0xf]  ;;  %v281_v55 = vld [vmem:[%s879_s8 + $0x24] sm:$0xf]  ;;  %v170_v56 = vmax.bf16 %v154_v40, %v138_v44  ;;  %312 = vst.msk [vmem:[%s880_s9 + $0x1c] sm:$0xf] %vm304_vm0, %v295_v47 }
  0x26   :  { %v92_v52 = vld [vmem:[%s873_s2 + $0x30] sm:$0xf]  ;;  %v76_v58 = vmax.bf16 %v60_v51, %v44_v50  ;;  %v233_v59 = vmax.bf16 %v217_v43, %v201_v48  ;;  %v218_v60 = vld [vmem:[%s877_s6 + $0x28] sm:$0xf]  ;;  %v139_v61 = vmax.bf16 %v123_v46, %v107_v49  ;;  %v187_v62 = vld [vmem:[%s876_s5 + $0x2c] sm:$0xf]  ;;  %v296_v0 = vmax.bf16 %v280_v38, %v264_v53 }
  0x27   :  { %v124_v63 = vld [vmem:[%s874_s3 + $0x30] sm:$0xf]  ;;  %v202_v1 = vmax.bf16 %v186_v45, %v170_v56  ;;  %v45_v3 = vld [vmem:[%s871_s0 + $0x34] sm:$0xf]  ;;  %v250_v7 = vld [vmem:[%s878_s7 + $0x28] sm:$0xf] }
  0x28   :  { %v108_v2 = vmax.bf16 %v92_v52, %v76_v58  ;;  %v61_v4 = vld [vmem:[%s872_s1 + $0x34] sm:$0xf]  ;;  %v265_v6 = vmax.bf16 %v249_v54, %v233_v59  ;;  %v282_v8 = vld [vmem:[%s879_s8 + $0x28] sm:$0xf]  ;;  %v171_v9 = vmax.bf16 %v155_v57, %v139_v61  ;;  %v156_v10 = vld [vmem:[%s875_s4 + $0x30] sm:$0xf] }
  0x29   :  { %v93_v5 = vld [vmem:[%s873_s2 + $0x34] sm:$0xf]  ;;  %v77_v11 = vmax.bf16 %v61_v4, %v45_v3  ;;  %313 = vst.msk [vmem:[%s880_s9 + $0x20] sm:$0xf] %vm304_vm0, %v296_v0  ;;  %v234_v12 = vmax.bf16 %v218_v60, %v202_v1  ;;  %v219_v13 = vld [vmem:[%s877_s6 + $0x2c] sm:$0xf] }
  0x2a   :  { %v140_v14 = vmax.bf16 %v124_v63, %v108_v2  ;;  %v188_v15 = vld [vmem:[%s876_s5 + $0x30] sm:$0xf]  ;;  %v125_v16 = vld [vmem:[%s874_s3 + $0x34] sm:$0xf]  ;;  %v297_v17 = vmax.bf16 %v281_v55, %v265_v6  ;;  %v203_v18 = vmax.bf16 %v187_v62, %v171_v9  ;;  %v46_v20 = vld [vmem:[%s871_s0 + $0x38] sm:$0xf] }
  0x2b   :  { %v109_v19 = vmax.bf16 %v93_v5, %v77_v11  ;;  %v62_v21 = vld [vmem:[%s872_s1 + $0x38] sm:$0xf]  ;;  %v266_v23 = vmax.bf16 %v250_v7, %v234_v12  ;;  %v251_v24 = vld [vmem:[%s878_s7 + $0x2c] sm:$0xf]  ;;  %v157_v27 = vld [vmem:[%s875_s4 + $0x34] sm:$0xf] }
  0x2c   :  { %v94_v22 = vld [vmem:[%s873_s2 + $0x38] sm:$0xf]  ;;  %v283_v25 = vld [vmem:[%s879_s8 + $0x2c] sm:$0xf]  ;;  %v172_v26 = vmax.bf16 %v156_v10, %v140_v14  ;;  %v78_v28 = vmax.bf16 %v62_v21, %v46_v20  ;;  %314 = vst.msk [vmem:[%s880_s9 + $0x24] sm:$0xf] %vm304_vm0, %v297_v17  ;;  %v235_v29 = vmax.bf16 %v219_v13, %v203_v18 }
  0x2d   :  { %v220_v30 = vld [vmem:[%s877_s6 + $0x30] sm:$0xf]  ;;  %v141_v31 = vmax.bf16 %v125_v16, %v109_v19  ;;  %v189_v32 = vld [vmem:[%s876_s5 + $0x34] sm:$0xf]  ;;  %v126_v33 = vld [vmem:[%s874_s3 + $0x38] sm:$0xf]  ;;  %v298_v34 = vmax.bf16 %v282_v8, %v266_v23 }
  0x2e   :  { %v204_v35 = vmax.bf16 %v188_v15, %v172_v26  ;;  %v110_v36 = vmax.bf16 %v94_v22, %v78_v28  ;;  %v47_v37 = vld [vmem:[%s871_s0 + $0x3c] sm:$0xf]  ;;  %v267_v40 = vmax.bf16 %v251_v24, %v235_v29  ;;  %v252_v41 = vld [vmem:[%s878_s7 + $0x30] sm:$0xf]  ;;  %v158_v43 = vld [vmem:[%s875_s4 + $0x38] sm:$0xf] }
  0x2f   :  { %v63_v38 = vld [vmem:[%s872_s1 + $0x3c] sm:$0xf]  ;;  %v173_v42 = vmax.bf16 %v157_v27, %v141_v31  ;;  %315 = vst.msk [vmem:[%s880_s9 + $0x28] sm:$0xf] %vm304_vm0, %v298_v34  ;;  %v221_v46 = vld [vmem:[%s877_s6 + $0x34] sm:$0xf] }
  0x30   :  { %v95_v39 = vld [vmem:[%s873_s2 + $0x3c] sm:$0xf]  ;;  %v79_v44 = vmax.bf16 %v63_v38, %v47_v37  ;;  %v236_v45 = vmax.bf16 %v220_v30, %v204_v35  ;;  %v142_v47 = vmax.bf16 %v126_v33, %v110_v36  ;;  %v299_v49 = vmax.bf16 %v283_v25, %v267_v40  ;;  %v284_v50 = vld [vmem:[%s879_s8 + $0x30] sm:$0xf]  ;;  %v190_v52 = vld [vmem:[%s876_s5 + $0x38] sm:$0xf] }
  0x31   :  { %v127_v48 = vld [vmem:[%s874_s3 + $0x3c] sm:$0xf]  ;;  %v205_v51 = vmax.bf16 %v189_v32, %v173_v42  ;;  %v253_v55 = vld [vmem:[%s878_s7 + $0x34] sm:$0xf]  ;;  %v222_v59 = vld [vmem:[%s877_s6 + $0x38] sm:$0xf] }
  0x32   :  { %v111_v53 = vmax.bf16 %v95_v39, %v79_v44  ;;  %v268_v54 = vmax.bf16 %v252_v41, %v236_v45  ;;  %v174_v56 = vmax.bf16 %v158_v43, %v142_v47  ;;  %v159_v57 = vld [vmem:[%s875_s4 + $0x3c] sm:$0xf]  ;;  %316 = vst.msk [vmem:[%s880_s9 + $0x2c] sm:$0xf] %vm304_vm0, %v299_v49  ;;  %v285_v62 = vld [vmem:[%s879_s8 + $0x34] sm:$0xf] }
  0x33   :  { %v237_v58 = vmax.bf16 %v221_v46, %v205_v51  ;;  %v191_v0 = vld [vmem:[%s876_s5 + $0x3c] sm:$0xf]  ;;  %v254_v2 = vld [vmem:[%s878_s7 + $0x38] sm:$0xf] }
  0x34   :  { %v143_v60 = vmax.bf16 %v127_v48, %v111_v53  ;;  %v300_v61 = vmax.bf16 %v284_v50, %v268_v54  ;;  %v206_v63 = vmax.bf16 %v190_v52, %v174_v56  ;;  %v223_v5 = vld [vmem:[%s877_s6 + $0x3c] sm:$0xf]  ;;  %v286_v7 = vld [vmem:[%s879_s8 + $0x38] sm:$0xf] }
  0x35   :  { %v269_v1 = vmax.bf16 %v253_v55, %v237_v58  ;;  %v255_v10 = vld [vmem:[%s878_s7 + $0x3c] sm:$0xf] }
  0x36   :  { %v175_v3 = vmax.bf16 %v159_v57, %v143_v60  ;;  %317 = vst.msk [vmem:[%s880_s9 + $0x30] sm:$0xf] %vm304_vm0, %v300_v61  ;;  %v238_v4 = vmax.bf16 %v222_v59, %v206_v63  ;;  %v287_v13 = vld [vmem:[%s879_s8 + $0x3c] sm:$0xf] }
  0x37   :  { %v301_v6 = vmax.bf16 %v285_v62, %v269_v1 }
  0x38   :  { %v207_v8 = vmax.bf16 %v191_v0, %v175_v3  ;;  %v270_v9 = vmax.bf16 %v254_v2, %v238_v4 }
  0x39   :  { %318 = vst.msk [vmem:[%s880_s9 + $0x34] sm:$0xf] %vm304_vm0, %v301_v6 }
  0x3a   :  { %v239_v11 = vmax.bf16 %v223_v5, %v207_v8  ;;  %v302_v12 = vmax.bf16 %v286_v7, %v270_v9 }
  0x3c   :  { %v271_v14 = vmax.bf16 %v255_v10, %v239_v11  ;;  %319 = vst.msk [vmem:[%s880_s9 + $0x38] sm:$0xf] %vm304_vm0, %v302_v12 }
  0x3e   :  { %v303_v15 = vmax.bf16 %v287_v13, %v271_v14 }
  0x40   :  { %320 = vst.msk [vmem:[%s880_s9 + $0x3c] sm:$0xf] %vm304_vm0, %v303_v15 }

// kernel: resnet18_forward.22
= control target key start
LH: loop header
LB: loop body
LE: loop exit
PB: predicated region body
PF: predicated region fallthrough
CT: control target
= control target key end

     0   :  { %v2037_v0 = vmov 0   ;;  %vm22_vm0 = vcmask 523264   ;;  %v2038_v19 = vmov 0.0   ;;  %vm1610_vm1 = vcmask 519168   ;;  %s2936_s1 = inlined_call_operand.vmem [shape: bf16[256,64], index: 1, kind: input, shape index: {}]   ;;  %s2937_s0 = inlined_call_operand.vmem [shape: bf16[512,256], index: 0, kind: input, shape index: {}]   ;;  %s2938_s2 = inlined_call_operand.vmem [shape: f32[1,64], index: 2, kind: input, shape index: {}]   ;;  %s2939_s3 = inlined_call_operand.vmem [shape: f32[1,64], index: 3, kind: input, shape index: {}]   ;;  %s2940_s4 = inlined_call_operand.vmem [shape: bf16[512,64], index: 4, kind: output, shape index: {}]  }
   0x1   :  { %663 = vmatprep.subr.bf16.mxu0 %v2037_v0  ;;  %1889 = vmatprep.subr.bf16.mxu1 %v2037_v0  ;;  %v1923_v1 = vld [vmem:[%s2936_s1] sm:$0xff]   ;;  %v1924_v2 = vld [vmem:[%s2936_s1 + $0x8] sm:$0xff]   ;;  %v1925_v3 = vld [vmem:[%s2936_s1 + $0x10] sm:$0xff]   ;;  %23 = vst.msk [vmem:[#allocation2] sm:$0xff] %vm22_vm0, %v2038_v19 }
   0x2   :  { %664 = vmatpush1.bf16.msra.mxu0 %v1923_v1  ;;  %1905 = vmatpush1.bf16.msra.mxu1 %v1923_v1  ;;  %v1926_v4 = vld [vmem:[%s2936_s1 + $0x18] sm:$0xff]   ;;  %v1927_v5 = vld [vmem:[%s2936_s1 + $0x20] sm:$0xff]   ;;  %v1928_v7 = vld [vmem:[%s2936_s1 + $0x28] sm:$0xff]   ;;  %24 = vst.msk [vmem:[#allocation2 + $0x8] sm:$0xff] %vm22_vm0, %v2038_v19 }
   0x3   :  { %665 = vmatprep.subr.bf16.mxu0 %v2037_v0  ;;  %1890 = vmatprep.subr.bf16.mxu1 %v2037_v0  ;;  %v1941_v6 = vld [vmem:[%s2937_s0 + $0x4] ss:$8 sps:$4 sm:$0xff]   ;;  %v1929_v9 = vld [vmem:[%s2936_s1 + $0x30] sm:$0xff]   ;;  %v1930_v10 = vld [vmem:[%s2936_s1 + $0x38] sm:$0xff]   ;;  %25 = vst.msk [vmem:[#allocation2 + $0x10] sm:$0xff] %vm22_vm0, %v2038_v19 }
   0x4   :  { %v1944_v8 = vld [vmem:[%s2937_s0 + $0x104] ss:$8 sps:$4 sm:$0xff]   ;;  %695 = vmatprep.mubr.bf16.mxu0 %v1941_v6  ;;  %v1933_v13 = vld [vmem:[%s2936_s1 + $0x50] sm:$0xff]   ;;  %v1934_v14 = vld [vmem:[%s2936_s1 + $0x58] sm:$0xff]   ;;  %26 = vst.msk [vmem:[#allocation2 + $0x18] sm:$0xff] %vm22_vm0, %v2038_v19 }
   0x5   :  { %823 = vmatprep.mubr.bf16.mxu1 %v1944_v8  ;;  %v1931_v11 = vld [vmem:[%s2936_s1 + $0x40] sm:$0xff]   ;;  %v1932_v12 = vld [vmem:[%s2936_s1 + $0x48] sm:$0xff]   ;;  %v1937_v17 = vld [vmem:[%s2936_s1 + $0x70] sm:$0xff]   ;;  %27 = vst.msk [vmem:[#allocation2 + $0x20] sm:$0xff] %vm22_vm0, %v2038_v19 }
   0x6   :  { %666 = vmatpush1.bf16.msra.mxu0 %v1924_v2  ;;  %1906 = vmatpush1.bf16.msra.mxu1 %v1924_v2  ;;  %v1935_v15 = vld [vmem:[%s2936_s1 + $0x60] sm:$0xff]   ;;  %v1936_v16 = vld [vmem:[%s2936_s1 + $0x68] sm:$0xff]   ;;  %v2148_v18 = vld [vmem:[%s2936_s1 + $0x78] sm:$0xff]   ;;  %28 = vst.msk [vmem:[#allocation2 + $0x28] sm:$0xff] %vm22_vm0, %v2038_v19 }
   0x7   :  { %667 = vmatprep.subr.bf16.mxu0 %v2037_v0  ;;  %1891 = vmatprep.subr.bf16.mxu1 %v2037_v0  ;;  %29 = vst.msk [vmem:[#allocation2 + $0x30] sm:$0xff] %vm22_vm0, %v2038_v19  ;;  %30 = vst.msk [vmem:[#allocation2 + $0x38] sm:$0xff] %vm22_vm0, %v2038_v19  ;;  %v1939_v20 = vld [vmem:[%s2937_s0] ss:$8 sps:$4 sm:$0xff]   ;;  %v1945_v22 = vld [vmem:[%s2937_s0 + $0x14] ss:$8 sps:$4 sm:$0xff]  }
   0x8   :  { %31 = vst.msk [vmem:[#allocation2 + $0x40] sm:$0xff] %vm22_vm0, %v2038_v19  ;;  %32 = vst.msk [vmem:[#allocation2 + $0x48] sm:$0xff] %vm22_vm0, %v2038_v19  ;;  %v1942_v21 = vld [vmem:[%s2937_s0 + $0x100] ss:$8 sps:$4 sm:$0xff]   ;;  %v1947_v23 = vld [vmem:[%s2937_s0 + $0x114] ss:$8 sps:$4 sm:$0xff]  }
   0x9   :  { %33 = vst.msk [vmem:[#allocation2 + $0x50] sm:$0xff] %vm22_vm0, %v2038_v19  ;;  %34 = vst.msk [vmem:[#allocation2 + $0x58] sm:$0xff] %vm22_vm0, %v2038_v19  ;;  %v1949_v24 = vld [vmem:[%s2937_s0 + $0x10] ss:$8 sps:$4 sm:$0xff]   ;;  %v1951_v26 = vld [vmem:[%s2937_s0 + $0x24] ss:$8 sps:$4 sm:$0xff]  }
   0xa   :  { %668 = vmatpush1.bf16.msra.mxu0 %v1925_v3  ;;  %1907 = vmatpush1.bf16.msra.mxu1 %v1925_v3  ;;  %35 = vst.msk [vmem:[#allocation2 + $0x60] sm:$0xff] %vm22_vm0, %v2038_v19  ;;  %36 = vst.msk [vmem:[#allocation2 + $0x68] sm:$0xff] %vm22_vm0, %v2038_v19  ;;  %v1950_v25 = vld [vmem:[%s2937_s0 + $0x110] ss:$8 sps:$4 sm:$0xff]   ;;  %v1953_v27 = vld [vmem:[%s2937_s0 + $0x124] ss:$8 sps:$4 sm:$0xff]  }
   0xb   :  { %669 = vmatprep.subr.bf16.mxu0 %v2037_v0  ;;  %1892 = vmatprep.subr.bf16.mxu1 %v2037_v0  ;;  %37 = vst.msk [vmem:[#allocation2 + $0x70] sm:$0xff] %vm22_vm0, %v2038_v19  ;;  %38 = vst.msk [vmem:[#allocation2 + $0x78] sm:$0xff] %vm22_vm0, %v2038_v19  ;;  %v1955_v28 = vld [vmem:[%s2937_s0 + $0x20] ss:$8 sps:$4 sm:$0xff]   ;;  %v1957_v30 = vld [vmem:[%s2937_s0 + $0x34] ss:$8 sps:$4 sm:$0xff]  }
   0xc   :  { %39 = vst.msk [vmem:[#allocation2 + $0x80] sm:$0xff] %vm22_vm0, %v2038_v19  ;;  %40 = vst.msk [vmem:[#allocation2 + $0x88] sm:$0xff] %vm22_vm0, %v2038_v19  ;;  %v1956_v29 = vld [vmem:[%s2937_s0 + $0x120] ss:$8 sps:$4 sm:$0xff]   ;;  %v1959_v31 = vld [vmem:[%s2937_s0 + $0x134] ss:$8 sps:$4 sm:$0xff]  }
   0xd   :  { %41 = vst.msk [vmem:[#allocation2 + $0x90] sm:$0xff] %vm22_vm0, %v2038_v19  ;;  %42 = vst.msk [vmem:[#allocation2 + $0x98] sm:$0xff] %vm22_vm0, %v2038_v19  ;;  %v1961_v32 = vld [vmem:[%s2937_s0 + $0x30] ss:$8 sps:$4 sm:$0xff]   ;;  %v1963_v34 = vld [vmem:[%s2937_s0 + $0x44] ss:$8 sps:$4 sm:$0xff]  }
   0xe   :  { %670 = vmatpush1.bf16.msra.mxu0 %v1926_v4  ;;  %1908 = vmatpush1.bf16.msra.mxu1 %v1926_v4  ;;  %43 = vst.msk [vmem:[#allocation2 + $0xa0] sm:$0xff] %vm22_vm0, %v2038_v19  ;;  %44 = vst.msk [vmem:[#allocation2 + $0xa8] sm:$0xff] %vm22_vm0, %v2038_v19  ;;  %v1962_v33 = vld [vmem:[%s2937_s0 + $0x130] ss:$8 sps:$4 sm:$0xff]   ;;  %v1965_v35 = vld [vmem:[%s2937_s0 + $0x144] ss:$8 sps:$4 sm:$0xff]  }
   0xf   :  { %671 = vmatprep.subr.bf16.mxu0 %v2037_v0  ;;  %1893 = vmatprep.subr.bf16.mxu1 %v2037_v0  ;;  %45 = vst.msk [vmem:[#allocation2 + $0xb0] sm:$0xff] %vm22_vm0, %v2038_v19  ;;  %46 = vst.msk [vmem:[#allocation2 + $0xb8] sm:$0xff] %vm22_vm0, %v2038_v19  ;;  %v1967_v36 = vld [vmem:[%s2937_s0 + $0x40] ss:$8 sps:$4 sm:$0xff]   ;;  %v1969_v38 = vld [vmem:[%s2937_s0 + $0x54] ss:$8 sps:$4 sm:$0xff]  }
  0x10   :  { %47 = vst.msk [vmem:[#allocation2 + $0xc0] sm:$0xff] %vm22_vm0, %v2038_v19  ;;  %48 = vst.msk [vmem:[#allocation2 + $0xc8] sm:$0xff] %vm22_vm0, %v2038_v19  ;;  %v1968_v37 = vld [vmem:[%s2937_s0 + $0x140] ss:$8 sps:$4 sm:$0xff]   ;;  %v1971_v39 = vld [vmem:[%s2937_s0 + $0x154] ss:$8 sps:$4 sm:$0xff]  }
  0x11   :  { %49 = vst.msk [vmem:[#allocation2 + $0xd0] sm:$0xff] %vm22_vm0, %v2038_v19  ;;  %50 = vst.msk [vmem:[#allocation2 + $0xd8] sm:$0xff] %vm22_vm0, %v2038_v19  ;;  %v1973_v40 = vld [vmem:[%s2937_s0 + $0x50] ss:$8 sps:$4 sm:$0xff]   ;;  %v1975_v42 = vld [vmem:[%s2937_s0 + $0x64] ss:$8 sps:$4 sm:$0xff]  }
  0x12   :  { %672 = vmatpush1.bf16.msra.mxu0 %v1927_v5  ;;  %1909 = vmatpush1.bf16.msra.mxu1 %v1927_v5  ;;  %51 = vst.msk [vmem:[#allocation2 + $0xe0] sm:$0xff] %vm22_vm0, %v2038_v19  ;;  %52 = vst.msk [vmem:[#allocation2 + $0xe8] sm:$0xff] %vm22_vm0, %v2038_v19  ;;  %v1974_v41 = vld [vmem:[%s2937_s0 + $0x150] ss:$8 sps:$4 sm:$0xff]   ;;  %v1977_v43 = vld [vmem:[%s2937_s0 + $0x164] ss:$8 sps:$4 sm:$0xff]  }
  0x13   :  { %673 = vmatprep.subr.bf16.mxu0 %v2037_v0  ;;  %1894 = vmatprep.subr.bf16.mxu1 %v2037_v0  ;;  %53 = vst.msk [vmem:[#allocation2 + $0xf0] sm:$0xff] %vm22_vm0, %v2038_v19  ;;  %54 = vst.msk [vmem:[#allocation2 + $0xf8] sm:$0xff] %vm22_vm0, %v2038_v19  ;;  %v1979_v44 = vld [vmem:[%s2937_s0 + $0x60] ss:$8 sps:$4 sm:$0xff]   ;;  %v1981_v46 = vld [vmem:[%s2937_s0 + $0x74] ss:$8 sps:$4 sm:$0xff]  }
  0x14   :  { %55 = vst.msk [vmem:[#allocation2 + $0x100] sm:$0xff] %vm22_vm0, %v2038_v19  ;;  %56 = vst.msk [vmem:[#allocation2 + $0x108] sm:$0xff] %vm22_vm0, %v2038_v19  ;;  %v1980_v45 = vld [vmem:[%s2937_s0 + $0x160] ss:$8 sps:$4 sm:$0xff]   ;;  %v1983_v47 = vld [vmem:[%s2937_s0 + $0x174] ss:$8 sps:$4 sm:$0xff]  }
  0x15   :  { %57 = vst.msk [vmem:[#allocation2 + $0x110] sm:$0xff] %vm22_vm0, %v2038_v19  ;;  %58 = vst.msk [vmem:[#allocation2 + $0x118] sm:$0xff] %vm22_vm0, %v2038_v19  ;;  %v1985_v48 = vld [vmem:[%s2937_s0 + $0x70] ss:$8 sps:$4 sm:$0xff]   ;;  %v1987_v50 = vld [vmem:[%s2937_s0 + $0x84] ss:$8 sps:$4 sm:$0xff]  }
  0x16   :  { %674 = vmatpush1.bf16.msra.mxu0 %v1928_v7  ;;  %1910 = vmatpush1.bf16.msra.mxu1 %v1928_v7  ;;  %59 = vst.msk [vmem:[#allocation2 + $0x120] sm:$0xff] %vm22_vm0, %v2038_v19  ;;  %60 = vst.msk [vmem:[#allocation2 + $0x128] sm:$0xff] %vm22_vm0, %v2038_v19  ;;  %v1986_v49 = vld [vmem:[%s2937_s0 + $0x170] ss:$8 sps:$4 sm:$0xff]   ;;  %v1989_v51 = vld [vmem:[%s2937_s0 + $0x184] ss:$8 sps:$4 sm:$0xff]  }
  0x17   :  { %675 = vmatprep.subr.bf16.mxu0 %v2037_v0  ;;  %1895 = vmatprep.subr.bf16.mxu1 %v2037_v0  ;;  %61 = vst.msk [vmem:[#allocation2 + $0x130] sm:$0xff] %vm22_vm0, %v2038_v19  ;;  %62 = vst.msk [vmem:[#allocation2 + $0x138] sm:$0xff] %vm22_vm0, %v2038_v19  ;;  %v1991_v52 = vld [vmem:[%s2937_s0 + $0x80] ss:$8 sps:$4 sm:$0xff]   ;;  %v1993_v54 = vld [vmem:[%s2937_s0 + $0x94] ss:$8 sps:$4 sm:$0xff]  }
  0x18   :  { %63 = vst.msk [vmem:[#allocation2 + $0x140] sm:$0xff] %vm22_vm0, %v2038_v19  ;;  %64 = vst.msk [vmem:[#allocation2 + $0x148] sm:$0xff] %vm22_vm0, %v2038_v19  ;;  %v1992_v53 = vld [vmem:[%s2937_s0 + $0x180] ss:$8 sps:$4 sm:$0xff]   ;;  %v1995_v55 = vld [vmem:[%s2937_s0 + $0x194] ss:$8 sps:$4 sm:$0xff]  }
  0x19   :  { %65 = vst.msk [vmem:[#allocation2 + $0x150] sm:$0xff] %vm22_vm0, %v2038_v19  ;;  %66 = vst.msk [vmem:[#allocation2 + $0x158] sm:$0xff] %vm22_vm0, %v2038_v19  ;;  %v1997_v56 = vld [vmem:[%s2937_s0 + $0x90] ss:$8 sps:$4 sm:$0xff]   ;;  %v1999_v58 = vld [vmem:[%s2937_s0 + $0xa4] ss:$8 sps:$4 sm:$0xff]  }
  0x1a   :  { %676 = vmatpush1.bf16.msra.mxu0 %v1929_v9  ;;  %1911 = vmatpush1.bf16.msra.mxu1 %v1929_v9  ;;  %67 = vst.msk [vmem:[#allocation2 + $0x160] sm:$0xff] %vm22_vm0, %v2038_v19  ;;  %68 = vst.msk [vmem:[#allocation2 + $0x168] sm:$0xff] %vm22_vm0, %v2038_v19  ;;  %v1998_v57 = vld [vmem:[%s2937_s0 + $0x190] ss:$8 sps:$4 sm:$0xff]   ;;  %v2001_v59 = vld [vmem:[%s2937_s0 + $0x1a4] ss:$8 sps:$4 sm:$0xff]  }
  0x1b   :  { %677 = vmatprep.subr.bf16.mxu0 %v2037_v0  ;;  %1896 = vmatprep.subr.bf16.mxu1 %v2037_v0  ;;  %69 = vst.msk [vmem:[#allocation2 + $0x170] sm:$0xff] %vm22_vm0, %v2038_v19  ;;  %70 = vst.msk [vmem:[#allocation2 + $0x178] sm:$0xff] %vm22_vm0, %v2038_v19  ;;  %v2003_v60 = vld [vmem:[%s2937_s0 + $0xa0] ss:$8 sps:$4 sm:$0xff]   ;;  %v2005_v62 = vld [vmem:[%s2937_s0 + $0xb4] ss:$8 sps:$4 sm:$0xff]  }
  0x1c   :  { %71 = vst.msk [vmem:[#allocation2 + $0x180] sm:$0xff] %vm22_vm0, %v2038_v19  ;;  %72 = vst.msk [vmem:[#allocation2 + $0x188] sm:$0xff] %vm22_vm0, %v2038_v19  ;;  %v2004_v61 = vld [vmem:[%s2937_s0 + $0x1a0] ss:$8 sps:$4 sm:$0xff]   ;;  %v2007_v63 = vld [vmem:[%s2937_s0 + $0x1b4] ss:$8 sps:$4 sm:$0xff]  }
  0x1d   :  { %73 = vst.msk [vmem:[#allocation2 + $0x190] sm:$0xff] %vm22_vm0, %v2038_v19  ;;  %74 = vst.msk [vmem:[#allocation2 + $0x198] sm:$0xff] %vm22_vm0, %v2038_v19  ;;  %v2010_v1 = vld [vmem:[%s2937_s0 + $0x1b0] ss:$8 sps:$4 sm:$0xff]   ;;  %v2011_v2 = vld [vmem:[%s2937_s0 + $0xc4] ss:$8 sps:$4 sm:$0xff]  }
  0x1e   :  { %678 = vmatpush1.bf16.msra.mxu0 %v1930_v10  ;;  %1912 = vmatpush1.bf16.msra.mxu1 %v1930_v10  ;;  %75 = vst.msk [vmem:[#allocation2 + $0x1a0] sm:$0xff] %vm22_vm0, %v2038_v19  ;;  %76 = vst.msk [vmem:[#allocation2 + $0x1a8] sm:$0xff] %vm22_vm0, %v2038_v19  ;;  %v2013_v3 = vld [vmem:[%s2937_s0 + $0x1c4] ss:$8 sps:$4 sm:$0xff]   ;;  %v2015_v4 = vld [vmem:[%s2937_s0 + $0xc0] ss:$8 sps:$4 sm:$0xff]  }
  0x1f   :  { %679 = vmatprep.subr.bf16.mxu0 %v2037_v0  ;;  %1897 = vmatprep.subr.bf16.mxu1 %v2037_v0  ;;  %77 = vst.msk [vmem:[#allocation2 + $0x1b0] sm:$0xff] %vm22_vm0, %v2038_v19  ;;  %78 = vst.msk [vmem:[#allocation2 + $0x1b8] sm:$0xff] %vm22_vm0, %v2038_v19  ;;  %v2016_v5 = vld [vmem:[%s2937_s0 + $0x1c0] ss:$8 sps:$4 sm:$0xff]   ;;  %v2017_v6 = vld [vmem:[%s2937_s0 + $0xd4] ss:$8 sps:$4 sm:$0xff]  }
  0x20   :  { %79 = vst.msk [vmem:[#allocation2 + $0x1c0] sm:$0xff] %vm22_vm0, %v2038_v19  ;;  %80 = vst.msk [vmem:[#allocation2 + $0x1c8] sm:$0xff] %vm22_vm0, %v2038_v19  ;;  %v2019_v7 = vld [vmem:[%s2937_s0 + $0x1d4] ss:$8 sps:$4 sm:$0xff]   ;;  %v2021_v8 = vld [vmem:[%s2937_s0 + $0xd0] ss:$8 sps:$4 sm:$0xff]  }
  0x21   :  { %81 = vst.msk [vmem:[#allocation2 + $0x1d0] sm:$0xff] %vm22_vm0, %v2038_v19  ;;  %82 = vst.msk [vmem:[#allocation2 + $0x1d8] sm:$0xff] %vm22_vm0, %v2038_v19  ;;  %v2022_v9 = vld [vmem:[%s2937_s0 + $0x1d0] ss:$8 sps:$4 sm:$0xff]   ;;  %v2023_v10 = vld [vmem:[%s2937_s0 + $0xe4] ss:$8 sps:$4 sm:$0xff]  }
  0x22   :  { %680 = vmatpush1.bf16.msra.mxu0 %v1931_v11  ;;  %1913 = vmatpush1.bf16.msra.mxu1 %v1931_v11  ;;  %83 = vst.msk [vmem:[#allocation2 + $0x1e0] sm:$0xff] %vm22_vm0, %v2038_v19  ;;  %84 = vst.msk [vmem:[#allocation2 + $0x1e8] sm:$0xff] %vm22_vm0, %v2038_v19  ;;  %v2025_v11 = vld [vmem:[%s2937_s0 + $0x1e4] ss:$8 sps:$4 sm:$0xff]  }
  0x23   :  { %681 = vmatprep.subr.bf16.mxu0 %v2037_v0  ;;  %1898 = vmatprep.subr.bf16.mxu1 %v2037_v0  ;;  %85 = vst.msk [vmem:[#allocation2 + $0x1f0] sm:$0xff] %vm22_vm0, %v2038_v19  ;;  %86 = vst.msk [vmem:[#allocation2 + $0x1f8] sm:$0xff] %vm22_vm0, %v2038_v19  ;;  %v119_v19 = vld [vmem:[#allocation2 + $0x100] sm:$0xff] }
  0x26   :  { %682 = vmatpush1.bf16.msra.mxu0 %v1932_v12  ;;  %1914 = vmatpush1.bf16.msra.mxu1 %v1932_v12  ;;  %v2027_v12 = vld [vmem:[%s2937_s0 + $0xe0] ss:$8 sps:$4 sm:$0xff]  }
  0x27   :  { %683 = vmatprep.subr.bf16.mxu0 %v2037_v0  ;;  %1899 = vmatprep.subr.bf16.mxu1 %v2037_v0 }
  0x2a   :  { %684 = vmatpush1.bf16.msra.mxu0 %v1933_v13  ;;  %1915 = vmatpush1.bf16.msra.mxu1 %v1933_v13  ;;  %v2028_v13 = vld [vmem:[%s2937_s0 + $0x1e0] ss:$8 sps:$4 sm:$0xff]  }
  0x2b   :  { %685 = vmatprep.subr.bf16.mxu0 %v2037_v0  ;;  %1900 = vmatprep.subr.bf16.mxu1 %v2037_v0 }
  0x2e   :  { %686 = vmatpush1.bf16.msra.mxu0 %v1934_v14  ;;  %1916 = vmatpush1.bf16.msra.mxu1 %v1934_v14  ;;  %v2029_v14 = vld [vmem:[%s2937_s0 + $0xf4] ss:$8 sps:$4 sm:$0xff]  }
  0x2f   :  { %687 = vmatprep.subr.bf16.mxu0 %v2037_v0  ;;  %1901 = vmatprep.subr.bf16.mxu1 %v2037_v0 }
  0x32   :  { %688 = vmatpush1.bf16.msra.mxu0 %v1935_v15  ;;  %1917 = vmatpush1.bf16.msra.mxu1 %v1935_v15  ;;  %v2031_v15 = vld [vmem:[%s2937_s0 + $0x1f4] ss:$8 sps:$4 sm:$0xff]  }
  0x33   :  { %689 = vmatprep.subr.bf16.mxu0 %v2037_v0  ;;  %1902 = vmatprep.subr.bf16.mxu1 %v2037_v0 }
  0x36   :  { %690 = vmatpush1.bf16.msra.mxu0 %v1936_v16  ;;  %1918 = vmatpush1.bf16.msra.mxu1 %v1936_v16  ;;  %v2033_v16 = vld [vmem:[%s2937_s0 + $0xf0] ss:$8 sps:$4 sm:$0xff]  }
  0x37   :  { %691 = vmatprep.subr.bf16.mxu0 %v2037_v0  ;;  %1903 = vmatprep.subr.bf16.mxu1 %v2037_v0 }
  0x3a   :  { %692 = vmatpush1.bf16.msra.mxu0 %v1937_v17  ;;  %1919 = vmatpush1.bf16.msra.mxu1 %v1937_v17  ;;  %v2034_v17 = vld [vmem:[%s2937_s0 + $0x1f0] ss:$8 sps:$4 sm:$0xff]  }
  0x3b   :  { %693 = vmatprep.subr.bf16.mxu0 %v2037_v0  ;;  %1904 = vmatprep.subr.bf16.mxu1 %v2037_v0  ;;  %v2009_v0 = vld [vmem:[%s2937_s0 + $0xb0] ss:$8 sps:$4 sm:$0xff]  }
  0x3e   :  { %694 = vmatpush1.bf16.msra.mxu0 %v2148_v18  ;;  %1920 = vmatpush1.bf16.msra.mxu1 %v2148_v18  ;;  %v87_v18 = vld [vmem:[#allocation2] sm:$0xff] }
  0x41   :  { %696 = vmatmul.mubr.bf16.vlgmr.msra.gmra.mrb[0].mxu0 %v1939_v20  ;;  %824 = vmatmul.mubr.bf16.vlgmr.msra.gmra.mrb[0].mxu1 %v1942_v21 }
  0x42   :  { %703 = vmatprep.mubr.bf16.mxu0 %v1945_v22  ;;  %831 = vmatprep.mubr.bf16.mxu1 %v1947_v23  ;;  %v88_v22 = vld [vmem:[#allocation2 + $0x8] sm:$0xff] }
  0x43   :  { %v120_v23 = vld [vmem:[#allocation2 + $0x108] sm:$0xff] }
  0x49   :  { %704 = vmatmul.mubr.bf16.gmra.mrb[4].mxu0 %v1949_v24  ;;  %832 = vmatmul.mubr.bf16.gmra.mrb[4].mxu1 %v1950_v25 }
  0x4a   :  { %711 = vmatprep.mubr.bf16.mxu0 %v1951_v26  ;;  %839 = vmatprep.mubr.bf16.mxu1 %v1953_v27 }
  0x51   :  { %712 = vmatmul.mubr.bf16.gmra.mrb[8].mxu0 %v1955_v28  ;;  %840 = vmatmul.mubr.bf16.gmra.mrb[8].mxu1 %v1956_v29 }
  0x52   :  { %719 = vmatprep.mubr.bf16.mxu0 %v1957_v30  ;;  %847 = vmatprep.mubr.bf16.mxu1 %v1959_v31 }
  0x59   :  { %720 = vmatmul.mubr.bf16.gmra.mrb[12].mxu0 %v1961_v32  ;;  %848 = vmatmul.mubr.bf16.gmra.mrb[12].mxu1 %v1962_v33 }
  0x5a   :  { %727 = vmatprep.mubr.bf16.mxu0 %v1963_v34  ;;  %855 = vmatprep.mubr.bf16.mxu1 %v1965_v35  ;;  %v89_v34 = vld [vmem:[#allocation2 + $0x10] sm:$0xff] }
  0x5b   :  { %v121_v35 = vld [vmem:[#allocation2 + $0x110] sm:$0xff] }
  0x61   :  { %728 = vmatmul.mubr.bf16.gmra.mrb[16].mxu0 %v1967_v36  ;;  %856 = vmatmul.mubr.bf16.gmra.mrb[16].mxu1 %v1968_v37  ;;  %v2475_v36 = vld [vmem:[%s2938_s2] ss:$0 sm:$0xff] }
  0x62   :  { %735 = vmatprep.mubr.bf16.mxu0 %v1969_v38  ;;  %863 = vmatprep.mubr.bf16.mxu1 %v1971_v39  ;;  %v90_v39 = vld [vmem:[#allocation2 + $0x18] sm:$0xff] }
  0x69   :  { %736 = vmatmul.mubr.bf16.gmra.mrb[20].mxu0 %v1973_v40  ;;  %864 = vmatmul.mubr.bf16.gmra.mrb[20].mxu1 %v1974_v41  ;;  %v122_v40 = vld [vmem:[#allocation2 + $0x118] sm:$0xff] }
  0x6a   :  { %743 = vmatprep.mubr.bf16.mxu0 %v1975_v42  ;;  %871 = vmatprep.mubr.bf16.mxu1 %v1977_v43 }
  0x71   :  { %744 = vmatmul.mubr.bf16.gmra.mrb[24].mxu0 %v1979_v44  ;;  %872 = vmatmul.mubr.bf16.gmra.mrb[24].mxu1 %v1980_v45 }
  0x72   :  { %751 = vmatprep.mubr.bf16.mxu0 %v1981_v46  ;;  %879 = vmatprep.mubr.bf16.mxu1 %v1983_v47  ;;  %v2480_v46 = vld [vmem:[%s2939_s3] ss:$0 sm:$0xff] }
  0x79   :  { %752 = vmatmul.mubr.bf16.gmra.mrb[28].mxu0 %v1985_v48  ;;  %880 = vmatmul.mubr.bf16.gmra.mrb[28].mxu1 %v1986_v49 }
  0x7a   :  { %759 = vmatprep.mubr.bf16.mxu0 %v1987_v50  ;;  %887 = vmatprep.mubr.bf16.mxu1 %v1989_v51 }
  0x81   :  { %760 = vmatmul.mubr.bf16.gmra.mrb[32].mxu0 %v1991_v52  ;;  %888 = vmatmul.mubr.bf16.gmra.mrb[32].mxu1 %v1992_v53 }
  0x82   :  { %767 = vmatprep.mubr.bf16.mxu0 %v1993_v54  ;;  %895 = vmatprep.mubr.bf16.mxu1 %v1995_v55 }
  0x89   :  { %768 = vmatmul.mubr.bf16.gmra.mrb[36].mxu0 %v1997_v56  ;;  %896 = vmatmul.mubr.bf16.gmra.mrb[36].mxu1 %v1998_v57 }
  0x8a   :  { %775 = vmatprep.mubr.bf16.mxu0 %v1999_v58  ;;  %903 = vmatprep.mubr.bf16.mxu1 %v2001_v59 }
  0x91   :  { %776 = vmatmul.mubr.bf16.gmra.mrb[40].mxu0 %v2003_v60  ;;  %904 = vmatmul.mubr.bf16.gmra.mrb[40].mxu1 %v2004_v61 }
  0x92   :  { %783 = vmatprep.mubr.bf16.mxu0 %v2005_v62  ;;  %911 = vmatprep.mubr.bf16.mxu1 %v2007_v63 }
  0x99   :  { %784 = vmatmul.mubr.bf16.gmra.mrb[44].mxu0 %v2009_v0  ;;  %912 = vmatmul.mubr.bf16.gmra.mrb[44].mxu1 %v2010_v1 }
  0x9a   :  { %791 = vmatprep.mubr.bf16.mxu0 %v2011_v2  ;;  %919 = vmatprep.mubr.bf16.mxu1 %v2013_v3  ;;  %v91_v2 = vld [vmem:[#allocation2 + $0x20] sm:$0xff] }
  0x9b   :  { %v123_v3 = vld [vmem:[#allocation2 + $0x120] sm:$0xff] }
  0xa1   :  { %792 = vmatmul.mubr.bf16.gmra.mrb[48].mxu0 %v2015_v4  ;;  %920 = vmatmul.mubr.bf16.gmra.mrb[48].mxu1 %v2016_v5 }
  0xa2   :  { %799 = vmatprep.mubr.bf16.mxu0 %v2017_v6  ;;  %927 = vmatprep.mubr.bf16.mxu1 %v2019_v7 }
  0xa9   :  { %800 = vmatmul.mubr.bf16.gmra.mrb[52].mxu0 %v2021_v8  ;;  %928 = vmatmul.mubr.bf16.gmra.mrb[52].mxu1 %v2022_v9 }
  0xaa   :  { %807 = vmatprep.mubr.bf16.mxu0 %v2023_v10  ;;  %935 = vmatprep.mubr.bf16.mxu1 %v2025_v11 }
  0xb1   :  { %808 = vmatmul.mubr.bf16.gmra.mrb[56].mxu0 %v2027_v12  ;;  %936 = vmatmul.mubr.bf16.gmra.mrb[56].mxu1 %v2028_v13  ;;  %v92_v12 = vld [vmem:[#allocation2 + $0x28] sm:$0xff] }
  0xb2   :  { %815 = vmatprep.mubr.bf16.mxu0 %v2029_v14  ;;  %943 = vmatprep.mubr.bf16.mxu1 %v2031_v15  ;;  %v124_v13 = vld [vmem:[#allocation2 + $0x128] sm:$0xff] }
  0xb9   :  { %816 = vmatmul.mubr.bf16.gmra.mrb[60].mxu0 %v2033_v16  ;;  %944 = vmatmul.mubr.bf16.gmra.mrb[60].mxu1 %v2034_v17 }
 0x114   :  { %v697_v20 = vpop.f32.mrb[0].mxu0  ;;  %v825_v21 = vpop.f32.mrb[0].mxu1 }
 0x115   :  { %v952_v24 = vadd.f32 %v697_v20, %v87_v18  ;;  %v984_v25 = vadd.f32 %v825_v21, %v119_v19  ;;  %v699_v26 = vpop.f32.mrb[1].mxu0  ;;  %v827_v27 = vpop.f32.mrb[1].mxu1 }
 0x116   :  { %v700_v28 = vpop.f32.mrb[2].mxu0  ;;  %v828_v29 = vpop.f32.mrb[2].mxu1 }
 0x117   :  { %1017 = vst.msk [vmem:[#allocation2] sm:$0xff] %vm22_vm0, %v952_v24  ;;  %1049 = vst.msk [vmem:[#allocation2 + $0x100] sm:$0xff] %vm22_vm0, %v984_v25  ;;  %v953_v30 = vadd.f32 %v700_v28, %v88_v22  ;;  %v985_v31 = vadd.f32 %v828_v29, %v120_v23  ;;  %v702_v32 = vpop.f32.mrb[3].mxu0  ;;  %v830_v33 = vpop.f32.mrb[3].mxu1 }
 0x119   :  { %1018 = vst.msk [vmem:[#allocation2 + $0x8] sm:$0xff] %vm22_vm0, %v953_v30  ;;  %1050 = vst.msk [vmem:[#allocation2 + $0x108] sm:$0xff] %vm22_vm0, %v985_v31 }
 0x11c   :  { %v705_v37 = vpop.f32.mrb[4].mxu0  ;;  %v833_v38 = vpop.f32.mrb[4].mxu1 }
 0x11d   :  { %v954_v41 = vadd.f32 %v705_v37, %v89_v34  ;;  %v986_v42 = vadd.f32 %v833_v38, %v121_v35  ;;  %v707_v43 = vpop.f32.mrb[5].mxu0  ;;  %v835_v44 = vpop.f32.mrb[5].mxu1 }
 0x11e   :  { %v1084_v45 = vld [vmem:[#allocation2] sm:$0xff]  ;;  %v708_v48 = vpop.f32.mrb[6].mxu0  ;;  %v836_v49 = vpop.f32.mrb[6].mxu1  ;;  %v94_v43 = vld [vmem:[#allocation2 + $0x38] sm:$0xff] }
 0x11f   :  { %v1116_v47 = vld [vmem:[#allocation2 + $0x100] sm:$0xff]  ;;  %v1155_v50 = vmul.f32 %v2475_v36, %v1084_v45  ;;  %1019 = vst.msk [vmem:[#allocation2 + $0x10] sm:$0xff] %vm22_vm0, %v954_v41  ;;  %1051 = vst.msk [vmem:[#allocation2 + $0x110] sm:$0xff] %vm22_vm0, %v986_v42  ;;  %v955_v52 = vadd.f32 %v708_v48, %v90_v39  ;;  %v987_v53 = vadd.f32 %v836_v49, %v122_v40  ;;  %v710_v54 = vpop.f32.mrb[7].mxu0  ;;  %v838_v55 = vpop.f32.mrb[7].mxu1  ;;  %v93_v39 = vld [vmem:[#allocation2 + $0x30] sm:$0xff] }
 0x120   :  { %v1187_v51 = vmul.f32 %v2475_v36, %v1116_v47  ;;  %v1085_v56 = vld [vmem:[#allocation2 + $0x8] sm:$0xff]  ;;  %v125_v40 = vld [vmem:[#allocation2 + $0x130] sm:$0xff]  ;;  %v126_v44 = vld [vmem:[#allocation2 + $0x138] sm:$0xff] }
 0x121   :  { %v1117_v57 = vld [vmem:[#allocation2 + $0x108] sm:$0xff]  ;;  %v1226_v58 = vadd.f32 %v2480_v46, %v1155_v50  ;;  %v1156_v60 = vmul.f32 %v2475_v36, %v1085_v56  ;;  %1020 = vst.msk [vmem:[#allocation2 + $0x18] sm:$0xff] %vm22_vm0, %v955_v52  ;;  %1052 = vst.msk [vmem:[#allocation2 + $0x118] sm:$0xff] %vm22_vm0, %v987_v53 }
 0x122   :  { %v1258_v59 = vadd.f32 %v2480_v46, %v1187_v51  ;;  %v1188_v61 = vmul.f32 %v2475_v36, %v1117_v57 }
 0x123   :  { %v1290_v62 = vmax.f32 %v1226_v58, 0.0  ;;  %v1227_v0 = vadd.f32 %v2480_v46, %v1156_v60 }
 0x124   :  { %v1322_v63 = vmax.f32 %v1258_v59, 0.0  ;;  %v1259_v1 = vadd.f32 %v2480_v46, %v1188_v61  ;;  %v713_v4 = vpop.f32.mrb[8].mxu0  ;;  %v841_v5 = vpop.f32.mrb[8].mxu1 }
 0x125   :  { %v1825_v6 = vpack.c.bf16 %v1290_v62, %v1290_v62  ;;  %v1291_v8 = vmax.f32 %v1227_v0, 0.0  ;;  %v715_v10 = vpop.f32.mrb[9].mxu0  ;;  %v843_v11 = vpop.f32.mrb[9].mxu1  ;;  %v956_v16 = vadd.f32 %v713_v4, %v91_v2  ;;  %v988_v17 = vadd.f32 %v841_v5, %v123_v3 }
 0x126   :  { %v1857_v7 = vpack.c.bf16 %v1322_v63, %v1322_v63  ;;  %v1323_v9 = vmax.f32 %v1259_v1, 0.0  ;;  %v1086_v14 = vld [vmem:[#allocation2 + $0x10] sm:$0xff]  ;;  %v716_v18 = vpop.f32.mrb[10].mxu0  ;;  %v844_v19 = vpop.f32.mrb[10].mxu1 }
 0x127   :  { %v1118_v15 = vld [vmem:[#allocation2 + $0x110] sm:$0xff]  ;;  %1611 = vst.msk [vmem:[%s2940_s4] sm:$0xf] %vm1610_vm1, %v1825_v6  ;;  %v1826_v20 = vpack.c.bf16 %v1291_v8, %v1291_v8  ;;  %v1157_v22 = vmul.f32 %v2475_v36, %v1086_v14  ;;  %v718_v24 = vpop.f32.mrb[11].mxu0  ;;  %v846_v25 = vpop.f32.mrb[11].mxu1  ;;  %v957_v28 = vadd.f32 %v716_v18, %v92_v12  ;;  %v989_v29 = vadd.f32 %v844_v19, %v124_v13  ;;  %v95_v8 = vld [vmem:[#allocation2 + $0x40] sm:$0xff] }
 0x128   :  { %1643 = vst.msk [vmem:[%s2940_s4 + $0x80] sm:$0xf] %vm1610_vm1, %v1857_v7  ;;  %v1858_v21 = vpack.c.bf16 %v1323_v9, %v1323_v9  ;;  %v1189_v23 = vmul.f32 %v2475_v36, %v1118_v15  ;;  %v1087_v26 = vld [vmem:[#allocation2 + $0x18] sm:$0xff]  ;;  %v127_v9 = vld [vmem:[#allocation2 + $0x140] sm:$0xff] }
 0x129   :  { %v1119_v27 = vld [vmem:[#allocation2 + $0x118] sm:$0xff]  ;;  %1021 = vst.msk [vmem:[#allocation2 + $0x20] sm:$0xff] %vm22_vm0, %v956_v16  ;;  %1053 = vst.msk [vmem:[#allocation2 + $0x120] sm:$0xff] %vm22_vm0, %v988_v17  ;;  %v1228_v30 = vadd.f32 %v2480_v46, %v1157_v22  ;;  %v1158_v32 = vmul.f32 %v2475_v36, %v1087_v26  ;;  %v96_v16 = vld [vmem:[#allocation2 + $0x48] sm:$0xff] }
 0x12a   :  { %1612 = vst.msk [vmem:[%s2940_s4 + $0x4] sm:$0xf] %vm1610_vm1, %v1826_v20  ;;  %1644 = vst.msk [vmem:[%s2940_s4 + $0x84] sm:$0xf] %vm1610_vm1, %v1858_v21  ;;  %v1260_v31 = vadd.f32 %v2480_v46, %v1189_v23  ;;  %v1190_v33 = vmul.f32 %v2475_v36, %v1119_v27  ;;  %v128_v17 = vld [vmem:[#allocation2 + $0x148] sm:$0xff] }
 0x12b   :  { %1022 = vst.msk [vmem:[#allocation2 + $0x28] sm:$0xff] %vm22_vm0, %v957_v28  ;;  %1054 = vst.msk [vmem:[#allocation2 + $0x128] sm:$0xff] %vm22_vm0, %v989_v29  ;;  %v1292_v34 = vmax.f32 %v1228_v30, 0.0  ;;  %v1229_v37 = vadd.f32 %v2480_v46, %v1158_v32 }
 0x12c   :  { %v1324_v35 = vmax.f32 %v1260_v31, 0.0  ;;  %v1261_v38 = vadd.f32 %v2480_v46, %v1190_v33  ;;  %v721_v41 = vpop.f32.mrb[12].mxu0  ;;  %v849_v42 = vpop.f32.mrb[12].mxu1 }
 0x12d   :  { %v1827_v45 = vpack.c.bf16 %v1292_v34, %v1292_v34  ;;  %v1293_v48 = vmax.f32 %v1229_v37, 0.0  ;;  %v723_v50 = vpop.f32.mrb[13].mxu0  ;;  %v851_v51 = vpop.f32.mrb[13].mxu1  ;;  %v958_v52 = vadd.f32 %v721_v41, %v93_v39  ;;  %v990_v53 = vadd.f32 %v849_v42, %v125_v40 }
 0x12e   :  { %v1859_v47 = vpack.c.bf16 %v1324_v35, %v1324_v35  ;;  %v1325_v49 = vmax.f32 %v1261_v38, 0.0  ;;  %v724_v54 = vpop.f32.mrb[14].mxu0  ;;  %v852_v55 = vpop.f32.mrb[14].mxu1 }
 0x12f   :  { %1613 = vst.msk [vmem:[%s2940_s4 + $0x8] sm:$0xf] %vm1610_vm1, %v1827_v45  ;;  %v1828_v56 = vpack.c.bf16 %v1293_v48, %v1293_v48  ;;  %v959_v60 = vadd.f32 %v724_v54, %v94_v43  ;;  %v991_v61 = vadd.f32 %v852_v55, %v126_v44  ;;  %v726_v62 = vpop.f32.mrb[15].mxu0  ;;  %v854_v63 = vpop.f32.mrb[15].mxu1  ;;  %v97_v45 = vld [vmem:[#allocation2 + $0x50] sm:$0xff] }
 0x130   :  { %1645 = vst.msk [vmem:[%s2940_s4 + $0x88] sm:$0xf] %vm1610_vm1, %v1859_v47  ;;  %v1860_v57 = vpack.c.bf16 %v1325_v49, %v1325_v49  ;;  %v1088_v58 = vld [vmem:[#allocation2 + $0x20] sm:$0xff]  ;;  %v129_v47 = vld [vmem:[#allocation2 + $0x150] sm:$0xff] }
 0x131   :  { %v1120_v59 = vld [vmem:[#allocation2 + $0x120] sm:$0xff]  ;;  %v1159_v0 = vmul.f32 %v2475_v36, %v1088_v58  ;;  %1023 = vst.msk [vmem:[#allocation2 + $0x30] sm:$0xff] %vm22_vm0, %v958_v52  ;;  %1055 = vst.msk [vmem:[#allocation2 + $0x130] sm:$0xff] %vm22_vm0, %v990_v53 }
 0x132   :  { %v1191_v1 = vmul.f32 %v2475_v36, %v1120_v59  ;;  %1614 = vst.msk [vmem:[%s2940_s4 + $0xc] sm:$0xf] %vm1610_vm1, %v1828_v56  ;;  %1646 = vst.msk [vmem:[%s2940_s4 + $0x8c] sm:$0xf] %vm1610_vm1, %v1860_v57  ;;  %v1089_v2 = vld [vmem:[#allocation2 + $0x28] sm:$0xff] }
 0x133   :  { %v1121_v3 = vld [vmem:[#allocation2 + $0x128] sm:$0xff]  ;;  %1024 = vst.msk [vmem:[#allocation2 + $0x38] sm:$0xff] %vm22_vm0, %v959_v60  ;;  %1056 = vst.msk [vmem:[#allocation2 + $0x138] sm:$0xff] %vm22_vm0, %v991_v61  ;;  %v1230_v4 = vadd.f32 %v2480_v46, %v1159_v0  ;;  %v1160_v6 = vmul.f32 %v2475_v36, %v1089_v2  ;;  %v98_v60 = vld [vmem:[#allocation2 + $0x58] sm:$0xff] }
 0x134   :  { %v1262_v5 = vadd.f32 %v2480_v46, %v1191_v1  ;;  %v1192_v7 = vmul.f32 %v2475_v36, %v1121_v3  ;;  %v729_v14 = vpop.f32.mrb[16].mxu0  ;;  %v857_v15 = vpop.f32.mrb[16].mxu1  ;;  %v130_v61 = vld [vmem:[#allocation2 + $0x158] sm:$0xff] }
 0x135   :  { %v1294_v10 = vmax.f32 %v1230_v4, 0.0  ;;  %v1231_v12 = vadd.f32 %v2480_v46, %v1160_v6  ;;  %v960_v18 = vadd.f32 %v729_v14, %v95_v8  ;;  %v992_v19 = vadd.f32 %v857_v15, %v127_v9  ;;  %v731_v20 = vpop.f32.mrb[17].mxu0  ;;  %v859_v21 = vpop.f32.mrb[17].mxu1 }
 0x136   :  { %v1326_v11 = vmax.f32 %v1262_v5, 0.0  ;;  %v1263_v13 = vadd.f32 %v2480_v46, %v1192_v7  ;;  %v732_v26 = vpop.f32.mrb[18].mxu0  ;;  %v860_v27 = vpop.f32.mrb[18].mxu1 }
 0x137   :  { %v1829_v22 = vpack.c.bf16 %v1294_v10, %v1294_v10  ;;  %v1295_v24 = vmax.f32 %v1231_v12, 0.0  ;;  %1025 = vst.msk [vmem:[#allocation2 + $0x40] sm:$0xff] %vm22_vm0, %v960_v18  ;;  %1057 = vst.msk [vmem:[#allocation2 + $0x140] sm:$0xff] %vm22_vm0, %v992_v19  ;;  %v961_v30 = vadd.f32 %v732_v26, %v96_v16  ;;  %v993_v31 = vadd.f32 %v860_v27, %v128_v17  ;;  %v734_v32 = vpop.f32.mrb[19].mxu0  ;;  %v862_v33 = vpop.f32.mrb[19].mxu1 }
 0x138   :  { %v1861_v23 = vpack.c.bf16 %v1326_v11, %v1326_v11  ;;  %v1327_v25 = vmax.f32 %v1263_v13, 0.0  ;;  %v1090_v28 = vld [vmem:[#allocation2 + $0x30] sm:$0xff]  ;;  %v100_v32 = vld [vmem:[#allocation2 + $0x68] sm:$0xff] }
 0x139   :  { %v1122_v29 = vld [vmem:[#allocation2 + $0x130] sm:$0xff]  ;;  %1615 = vst.msk [vmem:[%s2940_s4 + $0x10] sm:$0xf] %vm1610_vm1, %v1829_v22  ;;  %v1830_v34 = vpack.c.bf16 %v1295_v24, %v1295_v24  ;;  %v1161_v37 = vmul.f32 %v2475_v36, %v1090_v28  ;;  %v99_v22 = vld [vmem:[#allocation2 + $0x60] sm:$0xff]  ;;  %v132_v33 = vld [vmem:[#allocation2 + $0x168] sm:$0xff] }
 0x13a   :  { %1647 = vst.msk [vmem:[%s2940_s4 + $0x90] sm:$0xf] %vm1610_vm1, %v1861_v23  ;;  %v1862_v35 = vpack.c.bf16 %v1327_v25, %v1327_v25  ;;  %v1193_v38 = vmul.f32 %v2475_v36, %v1122_v29  ;;  %v1091_v39 = vld [vmem:[#allocation2 + $0x38] sm:$0xff]  ;;  %v131_v23 = vld [vmem:[#allocation2 + $0x160] sm:$0xff] }
 0x13b   :  { %v1123_v40 = vld [vmem:[#allocation2 + $0x138] sm:$0xff]  ;;  %v1162_v41 = vmul.f32 %v2475_v36, %v1091_v39  ;;  %1026 = vst.msk [vmem:[#allocation2 + $0x48] sm:$0xff] %vm22_vm0, %v961_v30  ;;  %1058 = vst.msk [vmem:[#allocation2 + $0x148] sm:$0xff] %vm22_vm0, %v993_v31  ;;  %v1232_v43 = vadd.f32 %v2480_v46, %v1161_v37 }
 0x13c   :  { %v1194_v42 = vmul.f32 %v2475_v36, %v1123_v40  ;;  %1616 = vst.msk [vmem:[%s2940_s4 + $0x14] sm:$0xf] %vm1610_vm1, %v1830_v34  ;;  %1648 = vst.msk [vmem:[%s2940_s4 + $0x94] sm:$0xf] %vm1610_vm1, %v1862_v35  ;;  %v1264_v44 = vadd.f32 %v2480_v46, %v1193_v38  ;;  %v737_v52 = vpop.f32.mrb[20].mxu0  ;;  %v865_v53 = vpop.f32.mrb[20].mxu1 }
 0x13d   :  { %v1233_v48 = vadd.f32 %v2480_v46, %v1162_v41  ;;  %v1296_v50 = vmax.f32 %v1232_v43, 0.0  ;;  %v962_v56 = vadd.f32 %v737_v52, %v97_v45  ;;  %v994_v57 = vadd.f32 %v865_v53, %v129_v47  ;;  %v739_v58 = vpop.f32.mrb[21].mxu0  ;;  %v867_v59 = vpop.f32.mrb[21].mxu1 }
 0x13e   :  { %v1265_v49 = vadd.f32 %v2480_v46, %v1194_v42  ;;  %v1328_v51 = vmax.f32 %v1264_v44, 0.0  ;;  %v1092_v0 = vld [vmem:[#allocation2 + $0x40] sm:$0xff]  ;;  %v740_v2 = vpop.f32.mrb[22].mxu0  ;;  %v868_v3 = vpop.f32.mrb[22].mxu1 }
 0x13f   :  { %v1297_v54 = vmax.f32 %v1233_v48, 0.0  ;;  %v1831_v62 = vpack.c.bf16 %v1296_v50, %v1296_v50  ;;  %v1124_v1 = vld [vmem:[#allocation2 + $0x140] sm:$0xff]  ;;  %v1163_v6 = vmul.f32 %v2475_v36, %v1092_v0  ;;  %1027 = vst.msk [vmem:[#allocation2 + $0x50] sm:$0xff] %vm22_vm0, %v962_v56  ;;  %1059 = vst.msk [vmem:[#allocation2 + $0x150] sm:$0xff] %vm22_vm0, %v994_v57  ;;  %v742_v8 = vpop.f32.mrb[23].mxu0  ;;  %v870_v9 = vpop.f32.mrb[23].mxu1  ;;  %v963_v12 = vadd.f32 %v740_v2, %v98_v60 }
 0x140   :  { %v1329_v55 = vmax.f32 %v1265_v49, 0.0  ;;  %v1863_v63 = vpack.c.bf16 %v1328_v51, %v1328_v51  ;;  %v1195_v7 = vmul.f32 %v2475_v36, %v1124_v1  ;;  %v995_v13 = vadd.f32 %v868_v3, %v130_v61  ;;  %v101_v56 = vld [vmem:[#allocation2 + $0x70] sm:$0xff]  ;;  %v102_v0 = vld [vmem:[#allocation2 + $0x78] sm:$0xff] }
 0x141   :  { %v1832_v4 = vpack.c.bf16 %v1297_v54, %v1297_v54  ;;  %1617 = vst.msk [vmem:[%s2940_s4 + $0x18] sm:$0xf] %vm1610_vm1, %v1831_v62  ;;  %v1234_v14 = vadd.f32 %v2480_v46, %v1163_v6  ;;  %v133_v57 = vld [vmem:[#allocation2 + $0x170] sm:$0xff]  ;;  %v134_v1 = vld [vmem:[#allocation2 + $0x178] sm:$0xff] }
 0x142   :  { %v1864_v5 = vpack.c.bf16 %v1329_v55, %v1329_v55  ;;  %1649 = vst.msk [vmem:[%s2940_s4 + $0x98] sm:$0xf] %vm1610_vm1, %v1863_v63  ;;  %v1093_v10 = vld [vmem:[#allocation2 + $0x48] sm:$0xff]  ;;  %v1266_v15 = vadd.f32 %v2480_v46, %v1195_v7 }
 0x143   :  { %v1125_v11 = vld [vmem:[#allocation2 + $0x148] sm:$0xff]  ;;  %1618 = vst.msk [vmem:[%s2940_s4 + $0x1c] sm:$0xf] %vm1610_vm1, %v1832_v4  ;;  %v1164_v16 = vmul.f32 %v2475_v36, %v1093_v10  ;;  %v1298_v18 = vmax.f32 %v1234_v14, 0.0 }
 0x144   :  { %1650 = vst.msk [vmem:[%s2940_s4 + $0x9c] sm:$0xf] %vm1610_vm1, %v1864_v5  ;;  %v1196_v17 = vmul.f32 %v2475_v36, %v1125_v11  ;;  %v1330_v19 = vmax.f32 %v1266_v15, 0.0  ;;  %v745_v24 = vpop.f32.mrb[24].mxu0  ;;  %v873_v25 = vpop.f32.mrb[24].mxu1 }
 0x145   :  { %1028 = vst.msk [vmem:[#allocation2 + $0x58] sm:$0xff] %vm22_vm0, %v963_v12  ;;  %1060 = vst.msk [vmem:[#allocation2 + $0x158] sm:$0xff] %vm22_vm0, %v995_v13  ;;  %v1235_v20 = vadd.f32 %v2480_v46, %v1164_v16  ;;  %v1833_v26 = vpack.c.bf16 %v1298_v18, %v1298_v18  ;;  %v747_v30 = vpop.f32.mrb[25].mxu0  ;;  %v875_v31 = vpop.f32.mrb[25].mxu1  ;;  %v964_v37 = vadd.f32 %v745_v24, %v99_v22 }
 0x146   :  { %v1267_v21 = vadd.f32 %v2480_v46, %v1196_v17  ;;  %v1865_v27 = vpack.c.bf16 %v1330_v19, %v1330_v19  ;;  %v1094_v34 = vld [vmem:[#allocation2 + $0x50] sm:$0xff]  ;;  %v996_v38 = vadd.f32 %v873_v25, %v131_v23  ;;  %v748_v39 = vpop.f32.mrb[26].mxu0  ;;  %v876_v40 = vpop.f32.mrb[26].mxu1 }
 0x147   :  { %v1299_v28 = vmax.f32 %v1235_v20, 0.0  ;;  %v1126_v35 = vld [vmem:[#allocation2 + $0x150] sm:$0xff]  ;;  %1619 = vst.msk [vmem:[%s2940_s4 + $0x20] sm:$0xf] %vm1610_vm1, %v1833_v26  ;;  %v1165_v43 = vmul.f32 %v2475_v36, %v1094_v34  ;;  %v750_v45 = vpop.f32.mrb[27].mxu0  ;;  %v878_v47 = vpop.f32.mrb[27].mxu1  ;;  %v965_v48 = vadd.f32 %v748_v39, %v100_v32  ;;  %v997_v49 = vadd.f32 %v876_v40, %v132_v33 }
 0x148   :  { %v1331_v29 = vmax.f32 %v1267_v21, 0.0  ;;  %1651 = vst.msk [vmem:[%s2940_s4 + $0xa0] sm:$0xf] %vm1610_vm1, %v1865_v27  ;;  %v1197_v44 = vmul.f32 %v2475_v36, %v1126_v35 }
 0x149   :  { %v1834_v41 = vpack.c.bf16 %v1299_v28, %v1299_v28  ;;  %1029 = vst.msk [vmem:[#allocation2 + $0x60] sm:$0xff] %vm22_vm0, %v964_v37  ;;  %1061 = vst.msk [vmem:[#allocation2 + $0x160] sm:$0xff] %vm22_vm0, %v996_v38  ;;  %v1236_v50 = vadd.f32 %v2480_v46, %v1165_v43  ;;  %v103_v28 = vld [vmem:[#allocation2 + $0x80] sm:$0xff]  ;;  %v104_v37 = vld [vmem:[#allocation2 + $0x88] sm:$0xff] }
 0x14a   :  { %v1866_v42 = vpack.c.bf16 %v1331_v29, %v1331_v29  ;;  %v1268_v51 = vadd.f32 %v2480_v46, %v1197_v44  ;;  %1030 = vst.msk [vmem:[#allocation2 + $0x68] sm:$0xff] %vm22_vm0, %v965_v48  ;;  %1062 = vst.msk [vmem:[#allocation2 + $0x168] sm:$0xff] %vm22_vm0, %v997_v49  ;;  %v135_v29 = vld [vmem:[#allocation2 + $0x180] sm:$0xff]  ;;  %v136_v38 = vld [vmem:[#allocation2 + $0x188] sm:$0xff] }
 0x14b   :  { %1620 = vst.msk [vmem:[%s2940_s4 + $0x24] sm:$0xf] %vm1610_vm1, %v1834_v41  ;;  %v1300_v58 = vmax.f32 %v1236_v50, 0.0 }
 0x14c   :  { %1652 = vst.msk [vmem:[%s2940_s4 + $0xa4] sm:$0xf] %vm1610_vm1, %v1866_v42  ;;  %v1095_v52 = vld [vmem:[#allocation2 + $0x58] sm:$0xff]  ;;  %v1332_v59 = vmax.f32 %v1268_v51, 0.0  ;;  %v753_v62 = vpop.f32.mrb[28].mxu0  ;;  %v881_v63 = vpop.f32.mrb[28].mxu1 }
 0x14d   :  { %v1127_v53 = vld [vmem:[#allocation2 + $0x158] sm:$0xff]  ;;  %v1166_v54 = vmul.f32 %v2475_v36, %v1095_v52  ;;  %v1835_v2 = vpack.c.bf16 %v1300_v58, %v1300_v58  ;;  %v966_v4 = vadd.f32 %v753_v62, %v101_v56  ;;  %v998_v5 = vadd.f32 %v881_v63, %v133_v57  ;;  %v755_v6 = vpop.f32.mrb[29].mxu0  ;;  %v883_v7 = vpop.f32.mrb[29].mxu1 }
 0x14e   :  { %v1198_v55 = vmul.f32 %v2475_v36, %v1127_v53  ;;  %v1867_v3 = vpack.c.bf16 %v1332_v59, %v1332_v59  ;;  %v756_v10 = vpop.f32.mrb[30].mxu0  ;;  %v884_v11 = vpop.f32.mrb[30].mxu1  ;;  %v105_v6 = vld [vmem:[#allocation2 + $0x90] sm:$0xff] }
 0x14f   :  { %v1237_v60 = vadd.f32 %v2480_v46, %v1166_v54  ;;  %1621 = vst.msk [vmem:[%s2940_s4 + $0x28] sm:$0xf] %vm1610_vm1, %v1835_v2  ;;  %v967_v14 = vadd.f32 %v756_v10, %v102_v0  ;;  %v999_v15 = vadd.f32 %v884_v11, %v134_v1  ;;  %v758_v16 = vpop.f32.mrb[31].mxu0  ;;  %v886_v17 = vpop.f32.mrb[31].mxu1  ;;  %v137_v7 = vld [vmem:[#allocation2 + $0x190] sm:$0xff] }
 0x150   :  { %v1269_v61 = vadd.f32 %v2480_v46, %v1198_v55  ;;  %1653 = vst.msk [vmem:[%s2940_s4 + $0xa8] sm:$0xf] %vm1610_vm1, %v1867_v3  ;;  %v1096_v12 = vld [vmem:[#allocation2 + $0x60] sm:$0xff]  ;;  %v106_v16 = vld [vmem:[#allocation2 + $0x98] sm:$0xff] }
 0x151   :  { %v1301_v8 = vmax.f32 %v1237_v60, 0.0  ;;  %v1128_v13 = vld [vmem:[#allocation2 + $0x160] sm:$0xff]  ;;  %1031 = vst.msk [vmem:[#allocation2 + $0x70] sm:$0xff] %vm22_vm0, %v966_v4  ;;  %1063 = vst.msk [vmem:[#allocation2 + $0x170] sm:$0xff] %vm22_vm0, %v998_v5  ;;  %v1167_v20 = vmul.f32 %v2475_v36, %v1096_v12  ;;  %v1097_v22 = vld [vmem:[#allocation2 + $0x68] sm:$0xff] }
 0x152   :  { %v1333_v9 = vmax.f32 %v1269_v61, 0.0  ;;  %v1199_v21 = vmul.f32 %v2475_v36, %v1128_v13  ;;  %v1129_v23 = vld [vmem:[#allocation2 + $0x168] sm:$0xff]  ;;  %1032 = vst.msk [vmem:[#allocation2 + $0x78] sm:$0xff] %vm22_vm0, %v967_v14  ;;  %1064 = vst.msk [vmem:[#allocation2 + $0x178] sm:$0xff] %vm22_vm0, %v999_v15  ;;  %v1168_v26 = vmul.f32 %v2475_v36, %v1097_v22  ;;  %v138_v17 = vld [vmem:[#allocation2 + $0x198] sm:$0xff] }
 0x153   :  { %v1836_v18 = vpack.c.bf16 %v1301_v8, %v1301_v8  ;;  %v1238_v24 = vadd.f32 %v2480_v46, %v1167_v20  ;;  %v1200_v27 = vmul.f32 %v2475_v36, %v1129_v23 }
 0x154   :  { %v1868_v19 = vpack.c.bf16 %v1333_v9, %v1333_v9  ;;  %v1270_v25 = vadd.f32 %v2480_v46, %v1199_v21  ;;  %v1239_v32 = vadd.f32 %v2480_v46, %v1168_v26  ;;  %v761_v34 = vpop.f32.mrb[32].mxu0  ;;  %v889_v35 = vpop.f32.mrb[32].mxu1 }
 0x155   :  { %1622 = vst.msk [vmem:[%s2940_s4 + $0x2c] sm:$0xf] %vm1610_vm1, %v1836_v18  ;;  %v1302_v30 = vmax.f32 %v1238_v24, 0.0  ;;  %v1271_v33 = vadd.f32 %v2480_v46, %v1200_v27  ;;  %v968_v39 = vadd.f32 %v761_v34, %v103_v28  ;;  %v1000_v40 = vadd.f32 %v889_v35, %v135_v29  ;;  %v763_v41 = vpop.f32.mrb[33].mxu0  ;;  %v891_v42 = vpop.f32.mrb[33].mxu1 }
 0x156   :  { %1654 = vst.msk [vmem:[%s2940_s4 + $0xac] sm:$0xf] %vm1610_vm1, %v1868_v19  ;;  %v1334_v31 = vmax.f32 %v1270_v25, 0.0  ;;  %v1303_v45 = vmax.f32 %v1239_v32, 0.0  ;;  %v764_v50 = vpop.f32.mrb[34].mxu0  ;;  %v892_v51 = vpop.f32.mrb[34].mxu1 }
 0x157   :  { %v1837_v43 = vpack.c.bf16 %v1302_v30, %v1302_v30  ;;  %v1335_v47 = vmax.f32 %v1271_v33, 0.0  ;;  %1033 = vst.msk [vmem:[#allocation2 + $0x80] sm:$0xff] %vm22_vm0, %v968_v39  ;;  %1065 = vst.msk [vmem:[#allocation2 + $0x180] sm:$0xff] %vm22_vm0, %v1000_v40  ;;  %v969_v54 = vadd.f32 %v764_v50, %v104_v37  ;;  %v1001_v55 = vadd.f32 %v892_v51, %v136_v38  ;;  %v766_v56 = vpop.f32.mrb[35].mxu0  ;;  %v894_v57 = vpop.f32.mrb[35].mxu1 }
 0x158   :  { %v1869_v44 = vpack.c.bf16 %v1334_v31, %v1334_v31  ;;  %v1098_v48 = vld [vmem:[#allocation2 + $0x70] sm:$0xff]  ;;  %v1838_v58 = vpack.c.bf16 %v1303_v45, %v1303_v45 }
 0x159   :  { %v1130_v49 = vld [vmem:[#allocation2 + $0x170] sm:$0xff]  ;;  %v1169_v52 = vmul.f32 %v2475_v36, %v1098_v48  ;;  %1623 = vst.msk [vmem:[%s2940_s4 + $0x30] sm:$0xf] %vm1610_vm1, %v1837_v43  ;;  %v1870_v59 = vpack.c.bf16 %v1335_v47, %v1335_v47  ;;  %v1099_v60 = vld [vmem:[#allocation2 + $0x78] sm:$0xff]  ;;  %v107_v43 = vld [vmem:[#allocation2 + $0xa0] sm:$0xff] }
 0x15a   :  { %v1201_v53 = vmul.f32 %v2475_v36, %v1130_v49  ;;  %1655 = vst.msk [vmem:[%s2940_s4 + $0xb0] sm:$0xf] %vm1610_vm1, %v1869_v44  ;;  %v1131_v61 = vld [vmem:[#allocation2 + $0x178] sm:$0xff]  ;;  %v1170_v0 = vmul.f32 %v2475_v36, %v1099_v60  ;;  %1624 = vst.msk [vmem:[%s2940_s4 + $0x34] sm:$0xf] %vm1610_vm1, %v1838_v58  ;;  %v139_v44 = vld [vmem:[#allocation2 + $0x1a0] sm:$0xff] }
 0x15b   :  { %v1240_v62 = vadd.f32 %v2480_v46, %v1169_v52  ;;  %v1202_v1 = vmul.f32 %v2475_v36, %v1131_v61  ;;  %1034 = vst.msk [vmem:[#allocation2 + $0x88] sm:$0xff] %vm22_vm0, %v969_v54  ;;  %1066 = vst.msk [vmem:[#allocation2 + $0x188] sm:$0xff] %vm22_vm0, %v1001_v55  ;;  %v108_v48 = vld [vmem:[#allocation2 + $0xa8] sm:$0xff] }
 0x15c   :  { %v1272_v63 = vadd.f32 %v2480_v46, %v1201_v53  ;;  %1656 = vst.msk [vmem:[%s2940_s4 + $0xb4] sm:$0xf] %vm1610_vm1, %v1870_v59  ;;  %v1241_v4 = vadd.f32 %v2480_v46, %v1170_v0  ;;  %v769_v8 = vpop.f32.mrb[36].mxu0  ;;  %v897_v9 = vpop.f32.mrb[36].mxu1  ;;  %v140_v49 = vld [vmem:[#allocation2 + $0x1a8] sm:$0xff] }
 0x15d   :  { %v1304_v2 = vmax.f32 %v1240_v62, 0.0  ;;  %v1273_v5 = vadd.f32 %v2480_v46, %v1202_v1  ;;  %v771_v14 = vpop.f32.mrb[37].mxu0  ;;  %v899_v15 = vpop.f32.mrb[37].mxu1  ;;  %v970_v20 = vadd.f32 %v769_v8, %v105_v6  ;;  %v1002_v21 = vadd.f32 %v897_v9, %v137_v7 }
 0x15e   :  { %v1336_v3 = vmax.f32 %v1272_v63, 0.0  ;;  %v1305_v12 = vmax.f32 %v1241_v4, 0.0  ;;  %v1100_v18 = vld [vmem:[#allocation2 + $0x80] sm:$0xff]  ;;  %v772_v22 = vpop.f32.mrb[38].mxu0  ;;  %v900_v23 = vpop.f32.mrb[38].mxu1 }
 0x15f   :  { %v1839_v10 = vpack.c.bf16 %v1304_v2, %v1304_v2  ;;  %v1337_v13 = vmax.f32 %v1273_v5, 0.0  ;;  %v1132_v19 = vld [vmem:[#allocation2 + $0x180] sm:$0xff]  ;;  %v1171_v26 = vmul.f32 %v2475_v36, %v1100_v18  ;;  %v774_v28 = vpop.f32.mrb[39].mxu0  ;;  %v902_v29 = vpop.f32.mrb[39].mxu1  ;;  %1035 = vst.msk [vmem:[#allocation2 + $0x90] sm:$0xff] %vm22_vm0, %v970_v20  ;;  %1067 = vst.msk [vmem:[#allocation2 + $0x190] sm:$0xff] %vm22_vm0, %v1002_v21  ;;  %v971_v32 = vadd.f32 %v772_v22, %v106_v16 }
 0x160   :  { %v1871_v11 = vpack.c.bf16 %v1336_v3, %v1336_v3  ;;  %v1840_v24 = vpack.c.bf16 %v1305_v12, %v1305_v12  ;;  %v1203_v27 = vmul.f32 %v2475_v36, %v1132_v19  ;;  %v1003_v33 = vadd.f32 %v900_v23, %v138_v17  ;;  %v109_v12 = vld [vmem:[#allocation2 + $0xb0] sm:$0xff]  ;;  %v110_v20 = vld [vmem:[#allocation2 + $0xb8] sm:$0xff] }
 0x161   :  { %1625 = vst.msk [vmem:[%s2940_s4 + $0x38] sm:$0xf] %vm1610_vm1, %v1839_v10  ;;  %v1872_v25 = vpack.c.bf16 %v1337_v13, %v1337_v13  ;;  %v1242_v34 = vadd.f32 %v2480_v46, %v1171_v26  ;;  %v141_v13 = vld [vmem:[#allocation2 + $0x1b0] sm:$0xff]  ;;  %v142_v21 = vld [vmem:[#allocation2 + $0x1b8] sm:$0xff] }
 0x162   :  { %1657 = vst.msk [vmem:[%s2940_s4 + $0xb8] sm:$0xf] %vm1610_vm1, %v1871_v11  ;;  %v1101_v30 = vld [vmem:[#allocation2 + $0x88] sm:$0xff]  ;;  %1626 = vst.msk [vmem:[%s2940_s4 + $0x3c] sm:$0xf] %vm1610_vm1, %v1840_v24  ;;  %v1274_v35 = vadd.f32 %v2480_v46, %v1203_v27 }
 0x163   :  { %v1133_v31 = vld [vmem:[#allocation2 + $0x188] sm:$0xff]  ;;  %1658 = vst.msk [vmem:[%s2940_s4 + $0xbc] sm:$0xf] %vm1610_vm1, %v1872_v25  ;;  %v1172_v37 = vmul.f32 %v2475_v36, %v1101_v30  ;;  %v1306_v39 = vmax.f32 %v1242_v34, 0.0 }
 0x164   :  { %v1204_v38 = vmul.f32 %v2475_v36, %v1133_v31  ;;  %1036 = vst.msk [vmem:[#allocation2 + $0x98] sm:$0xff] %vm22_vm0, %v971_v32  ;;  %1068 = vst.msk [vmem:[#allocation2 + $0x198] sm:$0xff] %vm22_vm0, %v1003_v33  ;;  %v1338_v40 = vmax.f32 %v1274_v35, 0.0  ;;  %v777_v45 = vpop.f32.mrb[40].mxu0  ;;  %v905_v47 = vpop.f32.mrb[40].mxu1 }
 0x165   :  { %v1243_v41 = vadd.f32 %v2480_v46, %v1172_v37  ;;  %v1841_v50 = vpack.c.bf16 %v1306_v39, %v1306_v39  ;;  %v779_v54 = vpop.f32.mrb[41].mxu0  ;;  %v907_v55 = vpop.f32.mrb[41].mxu1  ;;  %v972_v56 = vadd.f32 %v777_v45, %v107_v43  ;;  %v1004_v57 = vadd.f32 %v905_v47, %v139_v44 }
 0x166   :  { %v1275_v42 = vadd.f32 %v2480_v46, %v1204_v38  ;;  %v1873_v51 = vpack.c.bf16 %v1338_v40, %v1338_v40  ;;  %v780_v58 = vpop.f32.mrb[42].mxu0  ;;  %v908_v59 = vpop.f32.mrb[42].mxu1  ;;  %v1102_v62 = vld [vmem:[#allocation2 + $0x90] sm:$0xff] }
 0x167   :  { %v1307_v52 = vmax.f32 %v1243_v41, 0.0  ;;  %1627 = vst.msk [vmem:[%s2940_s4 + $0x40] sm:$0xf] %vm1610_vm1, %v1841_v50  ;;  %v1134_v63 = vld [vmem:[#allocation2 + $0x190] sm:$0xff]  ;;  %v973_v0 = vadd.f32 %v780_v58, %v108_v48  ;;  %v1005_v1 = vadd.f32 %v908_v59, %v140_v49  ;;  %v782_v2 = vpop.f32.mrb[43].mxu0  ;;  %v910_v3 = vpop.f32.mrb[43].mxu1  ;;  %v1173_v4 = vmul.f32 %v2475_v36, %v1102_v62 }
 0x168   :  { %v1339_v53 = vmax.f32 %v1275_v42, 0.0  ;;  %1659 = vst.msk [vmem:[%s2940_s4 + $0xc0] sm:$0xf] %vm1610_vm1, %v1873_v51  ;;  %v1205_v5 = vmul.f32 %v2475_v36, %v1134_v63  ;;  %v111_v50 = vld [vmem:[#allocation2 + $0xc0] sm:$0xff] }
 0x169   :  { %v1842_v60 = vpack.c.bf16 %v1307_v52, %v1307_v52  ;;  %1037 = vst.msk [vmem:[#allocation2 + $0xa0] sm:$0xff] %vm22_vm0, %v972_v56  ;;  %1069 = vst.msk [vmem:[#allocation2 + $0x1a0] sm:$0xff] %vm22_vm0, %v1004_v57  ;;  %v1244_v8 = vadd.f32 %v2480_v46, %v1173_v4  ;;  %v143_v51 = vld [vmem:[#allocation2 + $0x1c0] sm:$0xff] }
 0x16a   :  { %v1874_v61 = vpack.c.bf16 %v1339_v53, %v1339_v53  ;;  %1038 = vst.msk [vmem:[#allocation2 + $0xa8] sm:$0xff] %vm22_vm0, %v973_v0  ;;  %1070 = vst.msk [vmem:[#allocation2 + $0x1a8] sm:$0xff] %vm22_vm0, %v1005_v1  ;;  %v1276_v9 = vadd.f32 %v2480_v46, %v1205_v5  ;;  %v112_v0 = vld [vmem:[#allocation2 + $0xc8] sm:$0xff] }
 0x16b   :  { %1628 = vst.msk [vmem:[%s2940_s4 + $0x44] sm:$0xf] %vm1610_vm1, %v1842_v60  ;;  %v1103_v6 = vld [vmem:[#allocation2 + $0x98] sm:$0xff]  ;;  %v1308_v14 = vmax.f32 %v1244_v8, 0.0  ;;  %v144_v1 = vld [vmem:[#allocation2 + $0x1c8] sm:$0xff] }
 0x16c   :  { %1660 = vst.msk [vmem:[%s2940_s4 + $0xc4] sm:$0xf] %vm1610_vm1, %v1874_v61  ;;  %v1135_v7 = vld [vmem:[#allocation2 + $0x198] sm:$0xff]  ;;  %v1174_v10 = vmul.f32 %v2475_v36, %v1103_v6  ;;  %v1340_v15 = vmax.f32 %v1276_v9, 0.0  ;;  %v785_v18 = vpop.f32.mrb[44].mxu0  ;;  %v913_v19 = vpop.f32.mrb[44].mxu1 }
 0x16d   :  { %v1206_v11 = vmul.f32 %v2475_v36, %v1135_v7  ;;  %v974_v22 = vadd.f32 %v785_v18, %v109_v12  ;;  %v1006_v23 = vadd.f32 %v913_v19, %v141_v13  ;;  %v787_v24 = vpop.f32.mrb[45].mxu0  ;;  %v915_v25 = vpop.f32.mrb[45].mxu1  ;;  %v1843_v26 = vpack.c.bf16 %v1308_v14, %v1308_v14  ;;  %v2799_v19 = vld [vmem:[%s2938_s2] ss:$0 sm:$0xff] }
 0x16e   :  { %v1245_v16 = vadd.f32 %v2480_v46, %v1174_v10  ;;  %v1875_v27 = vpack.c.bf16 %v1340_v15, %v1340_v15  ;;  %v788_v30 = vpop.f32.mrb[46].mxu0  ;;  %v916_v31 = vpop.f32.mrb[46].mxu1 }
 0x16f   :  { %v1277_v17 = vadd.f32 %v2480_v46, %v1206_v11  ;;  %1039 = vst.msk [vmem:[#allocation2 + $0xb0] sm:$0xff] %vm22_vm0, %v974_v22  ;;  %1071 = vst.msk [vmem:[#allocation2 + $0x1b0] sm:$0xff] %vm22_vm0, %v1006_v23  ;;  %v975_v34 = vadd.f32 %v788_v30, %v110_v20  ;;  %v1007_v35 = vadd.f32 %v916_v31, %v142_v21  ;;  %v790_v37 = vpop.f32.mrb[47].mxu0  ;;  %v918_v38 = vpop.f32.mrb[47].mxu1 }
 0x170   :  { %v1309_v28 = vmax.f32 %v1245_v16, 0.0  ;;  %v1104_v32 = vld [vmem:[#allocation2 + $0xa0] sm:$0xff]  ;;  %1629 = vst.msk [vmem:[%s2940_s4 + $0x48] sm:$0xf] %vm1610_vm1, %v1843_v26  ;;  %1661 = vst.msk [vmem:[%s2940_s4 + $0xc8] sm:$0xf] %vm1610_vm1, %v1875_v27 }
 0x171   :  { %v1341_v29 = vmax.f32 %v1277_v17, 0.0  ;;  %v1136_v33 = vld [vmem:[#allocation2 + $0x1a0] sm:$0xff]  ;;  %v1175_v41 = vmul.f32 %v2475_v36, %v1104_v32  ;;  %v1105_v43 = vld [vmem:[#allocation2 + $0xa8] sm:$0xff]  ;;  %1040 = vst.msk [vmem:[#allocation2 + $0xb8] sm:$0xff] %vm22_vm0, %v975_v34  ;;  %1072 = vst.msk [vmem:[#allocation2 + $0x1b8] sm:$0xff] %vm22_vm0, %v1007_v35 }
 0x172   :  { %v1844_v39 = vpack.c.bf16 %v1309_v28, %v1309_v28  ;;  %v1207_v42 = vmul.f32 %v2475_v36, %v1136_v33  ;;  %v1137_v44 = vld [vmem:[#allocation2 + $0x1a8] sm:$0xff]  ;;  %v1176_v45 = vmul.f32 %v2475_v36, %v1105_v43  ;;  %v113_v26 = vld [vmem:[#allocation2 + $0xd0] sm:$0xff]  ;;  %v114_v37 = vld [vmem:[#allocation2 + $0xd8] sm:$0xff] }
 0x173   :  { %v1876_v40 = vpack.c.bf16 %v1341_v29, %v1341_v29  ;;  %v1208_v47 = vmul.f32 %v2475_v36, %v1137_v44  ;;  %v1246_v48 = vadd.f32 %v2480_v46, %v1175_v41  ;;  %v145_v27 = vld [vmem:[#allocation2 + $0x1d0] sm:$0xff]  ;;  %v146_v38 = vld [vmem:[#allocation2 + $0x1d8] sm:$0xff] }
 0x174   :  { %1630 = vst.msk [vmem:[%s2940_s4 + $0x4c] sm:$0xf] %vm1610_vm1, %v1844_v39  ;;  %v1278_v49 = vadd.f32 %v2480_v46, %v1207_v42  ;;  %v1247_v52 = vadd.f32 %v2480_v46, %v1176_v45  ;;  %v793_v56 = vpop.f32.mrb[48].mxu0  ;;  %v921_v57 = vpop.f32.mrb[48].mxu1 }
 0x175   :  { %1662 = vst.msk [vmem:[%s2940_s4 + $0xcc] sm:$0xf] %vm1610_vm1, %v1876_v40  ;;  %v1279_v53 = vadd.f32 %v2480_v46, %v1208_v47  ;;  %v1310_v54 = vmax.f32 %v1246_v48, 0.0  ;;  %v976_v60 = vadd.f32 %v793_v56, %v111_v50  ;;  %v1008_v61 = vadd.f32 %v921_v57, %v143_v51  ;;  %v795_v62 = vpop.f32.mrb[49].mxu0  ;;  %v923_v63 = vpop.f32.mrb[49].mxu1 }
 0x176   :  { %v1342_v55 = vmax.f32 %v1278_v49, 0.0  ;;  %v1311_v58 = vmax.f32 %v1247_v52, 0.0  ;;  %v1106_v4 = vld [vmem:[#allocation2 + $0xb0] sm:$0xff]  ;;  %v796_v6 = vpop.f32.mrb[50].mxu0  ;;  %v924_v7 = vpop.f32.mrb[50].mxu1 }
 0x177   :  { %v1343_v59 = vmax.f32 %v1279_v53, 0.0  ;;  %v1845_v2 = vpack.c.bf16 %v1310_v54, %v1310_v54  ;;  %v1138_v5 = vld [vmem:[#allocation2 + $0x1b0] sm:$0xff]  ;;  %v1177_v10 = vmul.f32 %v2475_v36, %v1106_v4  ;;  %1041 = vst.msk [vmem:[#allocation2 + $0xc0] sm:$0xff] %vm22_vm0, %v976_v60  ;;  %1073 = vst.msk [vmem:[#allocation2 + $0x1c0] sm:$0xff] %vm22_vm0, %v1008_v61  ;;  %v798_v12 = vpop.f32.mrb[51].mxu0  ;;  %v926_v13 = vpop.f32.mrb[51].mxu1  ;;  %v977_v16 = vadd.f32 %v796_v6, %v112_v0 }
 0x178   :  { %v1877_v3 = vpack.c.bf16 %v1342_v55, %v1342_v55  ;;  %v1846_v8 = vpack.c.bf16 %v1311_v58, %v1311_v58  ;;  %v1209_v11 = vmul.f32 %v2475_v36, %v1138_v5  ;;  %v1107_v14 = vld [vmem:[#allocation2 + $0xb8] sm:$0xff]  ;;  %v1009_v36 = vadd.f32 %v924_v7, %v144_v1  ;;  %v2830_v53 = vld [vmem:[%s2939_s3] ss:$0 sm:$0xff]  ;;  %v116_v4 = vld [vmem:[#allocation2 + $0xe8] sm:$0xff] }
 0x179   :  { %v1878_v9 = vpack.c.bf16 %v1343_v59, %v1343_v59  ;;  %1631 = vst.msk [vmem:[%s2940_s4 + $0x50] sm:$0xf] %vm1610_vm1, %v1845_v2  ;;  %v1139_v15 = vld [vmem:[#allocation2 + $0x1b8] sm:$0xff]  ;;  %v1248_v17 = vadd.f32 %v2480_v46, %v1177_v10  ;;  %v1178_v20 = vmul.f32 %v2799_v19, %v1107_v14  ;;  %v115_v60 = vld [vmem:[#allocation2 + $0xe0] sm:$0xff]  ;;  %v148_v5 = vld [vmem:[#allocation2 + $0x1e8] sm:$0xff] }
 0x17a   :  { %1663 = vst.msk [vmem:[%s2940_s4 + $0xd0] sm:$0xf] %vm1610_vm1, %v1877_v3  ;;  %1632 = vst.msk [vmem:[%s2940_s4 + $0x54] sm:$0xf] %vm1610_vm1, %v1846_v8  ;;  %v1280_v18 = vadd.f32 %v2480_v46, %v1209_v11  ;;  %v1210_v21 = vmul.f32 %v2799_v19, %v1139_v15  ;;  %v147_v61 = vld [vmem:[#allocation2 + $0x1e0] sm:$0xff] }
 0x17b   :  { %1664 = vst.msk [vmem:[%s2940_s4 + $0xd4] sm:$0xf] %vm1610_vm1, %v1878_v9  ;;  %v1312_v22 = vmax.f32 %v1248_v17, 0.0  ;;  %v1249_v24 = vadd.f32 %v2480_v46, %v1178_v20 }
 0x17c   :  { %1042 = vst.msk [vmem:[#allocation2 + $0xc8] sm:$0xff] %vm22_vm0, %v977_v16  ;;  %1074 = vst.msk [vmem:[#allocation2 + $0x1c8] sm:$0xff] %vm22_vm0, %v1009_v36  ;;  %v1344_v23 = vmax.f32 %v1280_v18, 0.0  ;;  %v1281_v25 = vadd.f32 %v2480_v46, %v1210_v21  ;;  %v801_v28 = vpop.f32.mrb[52].mxu0  ;;  %v929_v29 = vpop.f32.mrb[52].mxu1 }
 0x17d   :  { %v1847_v30 = vpack.c.bf16 %v1312_v22, %v1312_v22  ;;  %v1313_v32 = vmax.f32 %v1249_v24, 0.0  ;;  %v803_v34 = vpop.f32.mrb[53].mxu0  ;;  %v931_v35 = vpop.f32.mrb[53].mxu1  ;;  %v978_v41 = vadd.f32 %v801_v28, %v113_v26  ;;  %v1010_v42 = vadd.f32 %v929_v29, %v145_v27 }
 0x17e   :  { %v1879_v31 = vpack.c.bf16 %v1344_v23, %v1344_v23  ;;  %v1345_v33 = vmax.f32 %v1281_v25, 0.0  ;;  %v1108_v39 = vld [vmem:[#allocation2 + $0xc0] sm:$0xff]  ;;  %v804_v43 = vpop.f32.mrb[54].mxu0  ;;  %v932_v44 = vpop.f32.mrb[54].mxu1 }
 0x17f   :  { %v1140_v40 = vld [vmem:[#allocation2 + $0x1c0] sm:$0xff]  ;;  %1633 = vst.msk [vmem:[%s2940_s4 + $0x58] sm:$0xf] %vm1610_vm1, %v1847_v30  ;;  %v1848_v46 = vpack.c.bf16 %v1313_v32, %v1313_v32  ;;  %v1179_v47 = vmul.f32 %v2799_v19, %v1108_v39  ;;  %v806_v49 = vpop.f32.mrb[55].mxu0  ;;  %v934_v50 = vpop.f32.mrb[55].mxu1  ;;  %v979_v51 = vadd.f32 %v804_v43, %v114_v37  ;;  %v1011_v52 = vadd.f32 %v932_v44, %v146_v38  ;;  %v117_v32 = vld [vmem:[#allocation2 + $0xf0] sm:$0xff] }
 0x180   :  { %1665 = vst.msk [vmem:[%s2940_s4 + $0xd8] sm:$0xf] %vm1610_vm1, %v1879_v31  ;;  %v1880_v45 = vpack.c.bf16 %v1345_v33, %v1345_v33  ;;  %v1211_v48 = vmul.f32 %v2799_v19, %v1140_v40  ;;  %v149_v33 = vld [vmem:[#allocation2 + $0x1f0] sm:$0xff] }
 0x181   :  { %1043 = vst.msk [vmem:[#allocation2 + $0xd0] sm:$0xff] %vm22_vm0, %v978_v41  ;;  %1075 = vst.msk [vmem:[#allocation2 + $0x1d0] sm:$0xff] %vm22_vm0, %v1010_v42  ;;  %v1250_v54 = vadd.f32 %v2830_v53, %v1179_v47  ;;  %v118_v41 = vld [vmem:[#allocation2 + $0xf8] sm:$0xff] }
 0x182   :  { %1634 = vst.msk [vmem:[%s2940_s4 + $0x5c] sm:$0xf] %vm1610_vm1, %v1848_v46  ;;  %1666 = vst.msk [vmem:[%s2940_s4 + $0xdc] sm:$0xf] %vm1610_vm1, %v1880_v45  ;;  %v1282_v55 = vadd.f32 %v2830_v53, %v1211_v48  ;;  %v150_v42 = vld [vmem:[#allocation2 + $0x1f8] sm:$0xff] }
 0x183   :  { %v1109_v56 = vld [vmem:[#allocation2 + $0xc8] sm:$0xff]  ;;  %1044 = vst.msk [vmem:[#allocation2 + $0xd8] sm:$0xff] %vm22_vm0, %v979_v51  ;;  %1076 = vst.msk [vmem:[#allocation2 + $0x1d8] sm:$0xff] %vm22_vm0, %v1011_v52  ;;  %v1314_v62 = vmax.f32 %v1250_v54, 0.0 }
 0x184   :  { %v1141_v57 = vld [vmem:[#allocation2 + $0x1c8] sm:$0xff]  ;;  %v1180_v58 = vmul.f32 %v2799_v19, %v1109_v56  ;;  %v1346_v63 = vmax.f32 %v1282_v55, 0.0  ;;  %v809_v2 = vpop.f32.mrb[56].mxu0  ;;  %v937_v3 = vpop.f32.mrb[56].mxu1 }
 0x185   :  { %v1212_v59 = vmul.f32 %v2799_v19, %v1141_v57  ;;  %v1849_v6 = vpack.c.bf16 %v1314_v62, %v1314_v62  ;;  %v980_v8 = vadd.f32 %v809_v2, %v115_v60  ;;  %v1012_v9 = vadd.f32 %v937_v3, %v147_v61  ;;  %v811_v10 = vpop.f32.mrb[57].mxu0  ;;  %v939_v11 = vpop.f32.mrb[57].mxu1 }
 0x186   :  { %v1251_v0 = vadd.f32 %v2830_v53, %v1180_v58  ;;  %v1881_v7 = vpack.c.bf16 %v1346_v63, %v1346_v63  ;;  %v812_v14 = vpop.f32.mrb[58].mxu0  ;;  %v940_v15 = vpop.f32.mrb[58].mxu1 }
 0x187   :  { %v1283_v1 = vadd.f32 %v2830_v53, %v1212_v59  ;;  %1635 = vst.msk [vmem:[%s2940_s4 + $0x60] sm:$0xf] %vm1610_vm1, %v1849_v6  ;;  %v981_v17 = vadd.f32 %v812_v14, %v116_v4  ;;  %v1013_v18 = vadd.f32 %v940_v15, %v148_v5  ;;  %v814_v20 = vpop.f32.mrb[59].mxu0  ;;  %v942_v21 = vpop.f32.mrb[59].mxu1 }
 0x188   :  { %v1315_v12 = vmax.f32 %v1251_v0, 0.0  ;;  %1667 = vst.msk [vmem:[%s2940_s4 + $0xe0] sm:$0xf] %vm1610_vm1, %v1881_v7  ;;  %v1110_v16 = vld [vmem:[#allocation2 + $0xd0] sm:$0xff] }
 0x189   :  { %v1347_v13 = vmax.f32 %v1283_v1, 0.0  ;;  %v1142_v36 = vld [vmem:[#allocation2 + $0x1d0] sm:$0xff]  ;;  %1045 = vst.msk [vmem:[#allocation2 + $0xe0] sm:$0xff] %vm22_vm0, %v980_v8  ;;  %1077 = vst.msk [vmem:[#allocation2 + $0x1e0] sm:$0xff] %vm22_vm0, %v1012_v9  ;;  %v1181_v24 = vmul.f32 %v2799_v19, %v1110_v16 }
 0x18a   :  { %v1850_v22 = vpack.c.bf16 %v1315_v12, %v1315_v12  ;;  %v1213_v25 = vmul.f32 %v2799_v19, %v1142_v36  ;;  %v1111_v26 = vld [vmem:[#allocation2 + $0xd8] sm:$0xff]  ;;  %1046 = vst.msk [vmem:[#allocation2 + $0xe8] sm:$0xff] %vm22_vm0, %v981_v17  ;;  %1078 = vst.msk [vmem:[#allocation2 + $0x1e8] sm:$0xff] %vm22_vm0, %v1013_v18 }
 0x18b   :  { %v1882_v23 = vpack.c.bf16 %v1347_v13, %v1347_v13  ;;  %v1143_v27 = vld [vmem:[#allocation2 + $0x1d8] sm:$0xff]  ;;  %v1252_v28 = vadd.f32 %v2830_v53, %v1181_v24  ;;  %v1182_v30 = vmul.f32 %v2799_v19, %v1111_v26 }
 0x18c   :  { %1636 = vst.msk [vmem:[%s2940_s4 + $0x64] sm:$0xf] %vm1610_vm1, %v1850_v22  ;;  %v1284_v29 = vadd.f32 %v2830_v53, %v1213_v25  ;;  %v1214_v31 = vmul.f32 %v2799_v19, %v1143_v27  ;;  %v817_v39 = vpop.f32.mrb[60].mxu0  ;;  %v945_v40 = vpop.f32.mrb[60].mxu1 }
 0x18d   :  { %1668 = vst.msk [vmem:[%s2940_s4 + $0xe4] sm:$0xf] %vm1610_vm1, %v1882_v23  ;;  %v1316_v34 = vmax.f32 %v1252_v28, 0.0  ;;  %v1253_v37 = vadd.f32 %v2830_v53, %v1182_v30  ;;  %v982_v43 = vadd.f32 %v817_v39, %v117_v32  ;;  %v1014_v44 = vadd.f32 %v945_v40, %v149_v33  ;;  %v819_v46 = vpop.f32.mrb[61].mxu0  ;;  %v947_v45 = vpop.f32.mrb[61].mxu1 }
 0x18e   :  { %v1348_v35 = vmax.f32 %v1284_v29, 0.0  ;;  %v1285_v38 = vadd.f32 %v2830_v53, %v1214_v31  ;;  %v820_v54 = vpop.f32.mrb[62].mxu0  ;;  %v948_v55 = vpop.f32.mrb[62].mxu1 }
 0x18f   :  { %v1851_v47 = vpack.c.bf16 %v1316_v34, %v1316_v34  ;;  %v1317_v49 = vmax.f32 %v1253_v37, 0.0  ;;  %1047 = vst.msk [vmem:[#allocation2 + $0xf0] sm:$0xff] %vm22_vm0, %v982_v43  ;;  %1079 = vst.msk [vmem:[#allocation2 + $0x1f0] sm:$0xff] %vm22_vm0, %v1014_v44  ;;  %v983_v58 = vadd.f32 %v820_v54, %v118_v41  ;;  %v1015_v59 = vadd.f32 %v948_v55, %v150_v42  ;;  %v822_v60 = vpop.f32.mrb[63].mxu0  ;;  %v950_v61 = vpop.f32.mrb[63].mxu1 }
 0x190   :  { %v1883_v48 = vpack.c.bf16 %v1348_v35, %v1348_v35  ;;  %v1349_v50 = vmax.f32 %v1285_v38, 0.0  ;;  %v1112_v51 = vld [vmem:[#allocation2 + $0xe0] sm:$0xff] }
 0x191   :  { %v1144_v52 = vld [vmem:[#allocation2 + $0x1e0] sm:$0xff]  ;;  %v1183_v56 = vmul.f32 %v2799_v19, %v1112_v51  ;;  %1637 = vst.msk [vmem:[%s2940_s4 + $0x68] sm:$0xf] %vm1610_vm1, %v1851_v47  ;;  %v1852_v62 = vpack.c.bf16 %v1317_v49, %v1317_v49  ;;  %v1113_v0 = vld [vmem:[#allocation2 + $0xe8] sm:$0xff] }
 0x192   :  { %v1215_v57 = vmul.f32 %v2799_v19, %v1144_v52  ;;  %1669 = vst.msk [vmem:[%s2940_s4 + $0xe8] sm:$0xf] %vm1610_vm1, %v1883_v48  ;;  %v1884_v63 = vpack.c.bf16 %v1349_v50, %v1349_v50  ;;  %v1145_v1 = vld [vmem:[#allocation2 + $0x1e8] sm:$0xff]  ;;  %v1184_v4 = vmul.f32 %v2799_v19, %v1113_v0 }
 0x193   :  { %v1254_v2 = vadd.f32 %v2830_v53, %v1183_v56  ;;  %v1216_v5 = vmul.f32 %v2799_v19, %v1145_v1  ;;  %1048 = vst.msk [vmem:[#allocation2 + $0xf8] sm:$0xff] %vm22_vm0, %v983_v58  ;;  %1080 = vst.msk [vmem:[#allocation2 + $0x1f8] sm:$0xff] %vm22_vm0, %v1015_v59 }
 0x194   :  { %v1286_v3 = vadd.f32 %v2830_v53, %v1215_v57  ;;  %1638 = vst.msk [vmem:[%s2940_s4 + $0x6c] sm:$0xf] %vm1610_vm1, %v1852_v62  ;;  %1670 = vst.msk [vmem:[%s2940_s4 + $0xec] sm:$0xf] %vm1610_vm1, %v1884_v63  ;;  %v1255_v8 = vadd.f32 %v2830_v53, %v1184_v4 }
 0x195   :  { %v1318_v6 = vmax.f32 %v1254_v2, 0.0  ;;  %v1287_v9 = vadd.f32 %v2830_v53, %v1216_v5 }
 0x196   :  { %v1350_v7 = vmax.f32 %v1286_v3, 0.0  ;;  %v1319_v12 = vmax.f32 %v1255_v8, 0.0  ;;  %v1114_v14 = vld [vmem:[#allocation2 + $0xf0] sm:$0xff] }
 0x197   :  { %v1853_v10 = vpack.c.bf16 %v1318_v6, %v1318_v6  ;;  %v1351_v13 = vmax.f32 %v1287_v9, 0.0  ;;  %v1146_v15 = vld [vmem:[#allocation2 + $0x1f0] sm:$0xff]  ;;  %v1185_v17 = vmul.f32 %v2799_v19, %v1114_v14 }
 0x198   :  { %v1885_v11 = vpack.c.bf16 %v1350_v7, %v1350_v7  ;;  %v1854_v16 = vpack.c.bf16 %v1319_v12, %v1319_v12  ;;  %v1217_v18 = vmul.f32 %v2799_v19, %v1146_v15 }
 0x199   :  { %1639 = vst.msk [vmem:[%s2940_s4 + $0x70] sm:$0xf] %vm1610_vm1, %v1853_v10  ;;  %v1886_v36 = vpack.c.bf16 %v1351_v13, %v1351_v13  ;;  %v1256_v22 = vadd.f32 %v2830_v53, %v1185_v17 }
 0x19a   :  { %1671 = vst.msk [vmem:[%s2940_s4 + $0xf0] sm:$0xf] %vm1610_vm1, %v1885_v11  ;;  %v1115_v20 = vld [vmem:[#allocation2 + $0xf8] sm:$0xff]  ;;  %1640 = vst.msk [vmem:[%s2940_s4 + $0x74] sm:$0xf] %vm1610_vm1, %v1854_v16  ;;  %v1288_v23 = vadd.f32 %v2830_v53, %v1217_v18 }
 0x19b   :  { %v1147_v21 = vld [vmem:[#allocation2 + $0x1f8] sm:$0xff]  ;;  %1672 = vst.msk [vmem:[%s2940_s4 + $0xf4] sm:$0xf] %vm1610_vm1, %v1886_v36  ;;  %v1186_v24 = vmul.f32 %v2799_v19, %v1115_v20  ;;  %v1320_v26 = vmax.f32 %v1256_v22, 0.0 }
 0x19c   :  { %v1218_v25 = vmul.f32 %v2799_v19, %v1147_v21  ;;  %v1352_v27 = vmax.f32 %v1288_v23, 0.0 }
 0x19d   :  { %v1257_v28 = vadd.f32 %v2830_v53, %v1186_v24  ;;  %v1855_v30 = vpack.c.bf16 %v1320_v26, %v1320_v26 }
 0x19e   :  { %v1289_v29 = vadd.f32 %v2830_v53, %v1218_v25  ;;  %v1887_v31 = vpack.c.bf16 %v1352_v27, %v1352_v27 }
 0x19f   :  { %v1321_v32 = vmax.f32 %v1257_v28, 0.0  ;;  %1641 = vst.msk [vmem:[%s2940_s4 + $0x78] sm:$0xf] %vm1610_vm1, %v1855_v30 }
 0x1a0   :  { %v1353_v33 = vmax.f32 %v1289_v29, 0.0  ;;  %1673 = vst.msk [vmem:[%s2940_s4 + $0xf8] sm:$0xf] %vm1610_vm1, %v1887_v31 }
 0x1a1   :  { %v1856_v19 = vpack.c.bf16 %v1321_v32, %v1321_v32 }
 0x1a2   :  { %v1888_v34 = vpack.c.bf16 %v1353_v33, %v1353_v33 }
 0x1a3   :  { %1642 = vst.msk [vmem:[%s2940_s4 + $0x7c] sm:$0xf] %vm1610_vm1, %v1856_v19 }
 0x1a4   :  { %1674 = vst.msk [vmem:[%s2940_s4 + $0xfc] sm:$0xf] %vm1610_vm1, %v1888_v34 }

// kernel: resnet18_forward.24
= control target key start
LH: loop header
LB: loop body
LE: loop exit
PB: predicated region body
PF: predicated region fallthrough
CT: control target
= control target key end

     0   :  { %s1229_s15 = smov 0   ;;  %s1231_s16 = smov 0   ;;  %s1472_s0 = inlined_call_operand.vmem [shape: bf16[128,640], index: 0, kind: input, shape index: {}]   ;;  %s1473_s1 = inlined_call_operand.vmem [shape: bf16[640,64], index: 1, kind: input, shape index: {}]   ;;  %s1474_s2 = inlined_call_operand.vmem [shape: f32[1,64], index: 2, kind: input, shape index: {}]   ;;  %s1475_s3 = inlined_call_operand.vmem [shape: f32[1,64], index: 3, kind: input, shape index: {}]   ;;  %s1476_s4 = inlined_call_operand.vmem [shape: bf16[128,64], index: 4, kind: output, shape index: {}]  }
   0x1   :  { %s1233_s17 = smov 0   ;;  %s1235_s18 = smov 0  }
   0x2   :  { %s1237_s19 = smov 0  }
   0x3 LB: > { %s26_s20 = sadd.s32 1, %s1197_s18  ;;  %p49_p1 = scmp.ne.s32.totalorder %s1189_s16, %s1185_s15  ;;  %s1201_s19 = sphi %s1237_s19, %s14_s19   ;;  %s1197_s18 = sphi %s1235_s18, %s1480_s18   ;;  %s1193_s17 = sphi %s1233_s17, %s1479_s17   ;;  %s1189_s16 = sphi %s1231_s16, %s1478_s16   ;;  %s1185_s15 = sphi %s1229_s15, %s1477_s15  }
   0x4   : > { %p27_p0 = scmp.ge.s32.totalorder %s26_s20, 5  ;;  %p50_p2 = scmp.eq.s32.totalorder %s1201_s19, 0 }
   0x5   : > { %s42_s22 = sadd.s32 1, %s1189_s16  ;;  %p979_p5 = scmp.ge.s32.totalorder %s1201_s19, 5 }
   0x6   : > { %s1482_s20 = smov (%p27_p0, %s26_s20), 0  ;;  %p51_p3 = por %p50_p2, %p49_p1 }
   0x7   : > { %s38_s21 = ssub.s32 %s1197_s18, %s1482_s20  ;;  %195 = sbr.rel (%p979_p5) target bundleno = 28 (0x1c), region = 24 }
   0x8   : > { %p40_p4 = scmp.eq.s32.totalorder %s38_s21, 0 }
   0xa   : > { %s1264_s23 = scalar_select %p40_p4, %s1189_s16, %s42_s22  }
   0xe   : > { %198 = sbr.rel (!%p51_p3) target bundleno = 28 (0x1c), region = 28  ;;  %s200_s24 = sand.u32 (%p51_p3), 1, %s1189_s16  }
   0xf   : > { %s981_s25 = sshll.u32 (%p51_p3), %s1197_s18, 2  ;;  %s980_s26 = sshll.u32 (%p51_p3), %s200_s24, 6 }
  0x10   : > { %s1272_s29 = scalar_lea.vmem (%p51_p3), %s1472_s0, %s981_s25  ;;  %s202_s30 = scalar_lea.vmem (%p51_p3), [#allocation3], %s980_s26 }
  0x11   : > { %v223_v0 = vld [vmem:[%s1272_s29] sm:$0xf] (%p51_p3)  ;;  %v225_v1 = vld [vmem:[%s1272_s29 + $0x14] sm:$0xf] (%p51_p3)  ;;  %v227_v2 = vld [vmem:[%s1272_s29 + $0x28] sm:$0xf] (%p51_p3) }
  0x12   : > { %224 = vst [vmem:[%s202_s30] sm:$0xf] (%p51_p3), %v223_v0  ;;  %226 = vst [vmem:[%s202_s30 + $0x4] sm:$0xf] (%p51_p3), %v225_v1  ;;  %v229_v3 = vld [vmem:[%s1272_s29 + $0x3c] sm:$0xf] (%p51_p3) }
  0x13   : > { %v231_v4 = vld [vmem:[%s1272_s29 + $0x50] sm:$0xf] (%p51_p3)  ;;  %228 = vst [vmem:[%s202_s30 + $0x8] sm:$0xf] (%p51_p3), %v227_v2  ;;  %230 = vst [vmem:[%s202_s30 + $0xc] sm:$0xf] (%p51_p3), %v229_v3 }
  0x14   : > { %232 = vst [vmem:[%s202_s30 + $0x10] sm:$0xf] (%p51_p3), %v231_v4  ;;  %v233_v5 = vld [vmem:[%s1272_s29 + $0x64] sm:$0xf] (%p51_p3)  ;;  %v235_v6 = vld [vmem:[%s1272_s29 + $0x78] sm:$0xf] (%p51_p3) }
  0x15   : > { %v237_v7 = vld [vmem:[%s1272_s29 + $0x8c] sm:$0xf]  ;;  %234 = vst [vmem:[%s202_s30 + $0x14] sm:$0xf] %v233_v5  ;;  %236 = vst [vmem:[%s202_s30 + $0x18] sm:$0xf] %v235_v6 }
  0x16   : > { %238 = vst [vmem:[%s202_s30 + $0x1c] sm:$0xf] %v237_v7  ;;  %v239_v8 = vld [vmem:[%s1272_s29 + $0xa0] sm:$0xf]  ;;  %v241_v9 = vld [vmem:[%s1272_s29 + $0xb4] sm:$0xf] }
  0x17   : > { %v243_v10 = vld [vmem:[%s1272_s29 + $0xc8] sm:$0xf]  ;;  %240 = vst [vmem:[%s202_s30 + $0x20] sm:$0xf] %v239_v8  ;;  %242 = vst [vmem:[%s202_s30 + $0x24] sm:$0xf] %v241_v9 }
  0x18   : > { %244 = vst [vmem:[%s202_s30 + $0x28] sm:$0xf] %v243_v10  ;;  %v245_v11 = vld [vmem:[%s1272_s29 + $0xdc] sm:$0xf]  ;;  %v247_v12 = vld [vmem:[%s1272_s29 + $0xf0] sm:$0xf] }
  0x19   : > { %v249_v13 = vld [vmem:[%s1272_s29 + $0x104] sm:$0xf]  ;;  %246 = vst [vmem:[%s202_s30 + $0x2c] sm:$0xf] %v245_v11  ;;  %248 = vst [vmem:[%s202_s30 + $0x30] sm:$0xf] %v247_v12 }
  0x1a   : > { %250 = vst [vmem:[%s202_s30 + $0x34] sm:$0xf] %v249_v13  ;;  %v251_v14 = vld [vmem:[%s1272_s29 + $0x118] sm:$0xf]  ;;  %v253_v15 = vld [vmem:[%s1272_s29 + $0x12c] sm:$0xf] }
  0x1b   : > { %252 = vst [vmem:[%s202_s30 + $0x38] sm:$0xf] %v251_v14  ;;  %254 = vst [vmem:[%s202_s30 + $0x3c] sm:$0xf] %v253_v15 }
  0x1c PF: > { %p982_p6 = scmp.ge.s32.totalorder %s1201_s19, 1  ;;  %p320_p7 = scmp.lt.s32.totalorder %s1201_s19, 6 }
  0x1e   : > { %p321_p8 = pnand %p982_p6, %p320_p7 }
  0x1f   : > { %s327_s5 = sand.u32 (!%p321_p8), 1, %s1185_s15   ;;  %s984_s6 = sshll.u32 (!%p321_p8), %s1193_s17, 4 }
  0x20   : > { %324 = sbr.rel (%p321_p8) target bundleno = 326 (0x146), region = 73  ;;  %s983_s7 = sshll.u32 (!%p321_p8), %s327_s5, 6 }
  0x21   : > { %p371_p9 = scmp.lt.s32.totalorder (!%p321_p8), %s984_s6, 79  ;;  %s1299_s12 = scalar_lea.vmem (!%p321_p8), [#allocation3], %s983_s7 }
  0x22   : > { %p986_p10 = scmp.ne.s32.totalorder (!%p321_p8), %s1193_s17, 0 }
  0x27   : > { %s1484_s6 = smov (!%p371_p9, %s984_s6), 79  ;;  %398 = sbr.rel (%p986_p10) target bundleno = 49 (0x31), region = 81 }
  0x28   : > { %s985_s8 = sshll.u32 %s1484_s6, 2  ;;  %vm399_vm0 = vcmask (!%p986_p10), 523264   ;;  %v1203_v16 = vmov (!%p986_p10), 0.0  }
  0x29   : > { %s1297_s11 = scalar_lea.vmem %s1473_s1, %s985_s8  ;;  %400 = vst.msk [vmem:[#allocation2] sm:$0xff] (!%p986_p10), %vm399_vm0, %v1203_v16  ;;  %401 = vst.msk [vmem:[#allocation2 + $0x8] sm:$0xff] (!%p986_p10), %vm399_vm0, %v1203_v16 }
  0x2a   : > { %402 = vst.msk [vmem:[#allocation2 + $0x10] sm:$0xff] (!%p986_p10), %vm399_vm0, %v1203_v16  ;;  %403 = vst.msk [vmem:[#allocation2 + $0x18] sm:$0xff] (!%p986_p10), %vm399_vm0, %v1203_v16 }
  0x2b   : > { %404 = vst.msk [vmem:[#allocation2 + $0x20] sm:$0xff] (!%p986_p10), %vm399_vm0, %v1203_v16  ;;  %405 = vst.msk [vmem:[#allocation2 + $0x28] sm:$0xff] (!%p986_p10), %vm399_vm0, %v1203_v16 }
  0x2c   : > { %406 = vst.msk [vmem:[#allocation2 + $0x30] sm:$0xff] (!%p986_p10), %vm399_vm0, %v1203_v16  ;;  %407 = vst.msk [vmem:[#allocation2 + $0x38] sm:$0xff] (!%p986_p10), %vm399_vm0, %v1203_v16 }
  0x2d   : > { %408 = vst.msk [vmem:[#allocation2 + $0x40] sm:$0xff] (!%p986_p10), %vm399_vm0, %v1203_v16  ;;  %409 = vst.msk [vmem:[#allocation2 + $0x48] sm:$0xff] (!%p986_p10), %vm399_vm0, %v1203_v16 }
  0x2e   : > { %410 = vst.msk [vmem:[#allocation2 + $0x50] sm:$0xff] %vm399_vm0, %v1203_v16  ;;  %411 = vst.msk [vmem:[#allocation2 + $0x58] sm:$0xff] %vm399_vm0, %v1203_v16 }
  0x2f   : > { %412 = vst.msk [vmem:[#allocation2 + $0x60] sm:$0xff] %vm399_vm0, %v1203_v16  ;;  %413 = vst.msk [vmem:[#allocation2 + $0x68] sm:$0xff] %vm399_vm0, %v1203_v16 }
  0x30   : > { %414 = vst.msk [vmem:[#allocation2 + $0x70] sm:$0xff] %vm399_vm0, %v1203_v16  ;;  %415 = vst.msk [vmem:[#allocation2 + $0x78] sm:$0xff] %vm399_vm0, %v1203_v16 }
  0x31 PF: > { %v1147_v17 = vld [vmem:[%s1297_s11] sm:$0xff]   ;;  %v1148_v18 = vld [vmem:[%s1297_s11 + $0x8] sm:$0xff]   ;;  %v1149_v19 = vld [vmem:[%s1297_s11 + $0x10] sm:$0xff]   ;;  %vm673_vm1 = vcmask 523264   ;;  %p1003_p11 = scmp.ne.s32.totalorder %s1193_s17, 4 }
  0x32   : > { %1058 = vmatprep.subr.bf16.mxu0 %v1147_v17  ;;  %1090 = vmatprep.subr.bf16.mxu1 %v1147_v17  ;;  %v1150_v20 = vld [vmem:[%s1297_s11 + $0x18] sm:$0xff]   ;;  %v1155_v21 = vld [vmem:[%s1299_s12] sm:$0xff]   ;;  %v1152_v24 = vld [vmem:[%s1297_s11 + $0x28] sm:$0xff]   ;;  %vm836_vm2 = vcmask (!%p1003_p11), 519168  }
  0x33   : > { %1059 = vmatpush3.bf16.msra.mxu0 %v1147_v17  ;;  %1098 = vmatpush3.bf16.msra.mxu1 %v1147_v17  ;;  %v1156_v22 = vld [vmem:[%s1299_s12 + $0x20] sm:$0xff]   ;;  %v1153_v25 = vld [vmem:[%s1297_s11 + $0x30] sm:$0xff]   ;;  %v1154_v26 = vld [vmem:[%s1297_s11 + $0x38] sm:$0xff]  }
  0x34   : > { %1060 = vmatprep.subr.bf16.mxu0 %v1148_v18  ;;  %1091 = vmatprep.subr.bf16.mxu1 %v1148_v18  ;;  %v1151_v23 = vld [vmem:[%s1297_s11 + $0x20] sm:$0xff]   ;;  %v1157_v27 = vld [vmem:[%s1299_s12 + $0x8] sm:$0xff]   ;;  %v1159_v29 = vld [vmem:[%s1299_s12 + $0x10] sm:$0xff]  }
  0x35   : > { %1074 = vmatprep.mubr.bf16.mxu0 %v1155_v21  ;;  %1082 = vmatprep.mubr.bf16.mxu1 %v1156_v22  ;;  %v1158_v28 = vld [vmem:[%s1299_s12 + $0x28] sm:$0xff]   ;;  %v1160_v30 = vld [vmem:[%s1299_s12 + $0x30] sm:$0xff]   ;;  %v1161_v31 = vld [vmem:[%s1299_s12 + $0x18] sm:$0xff]  }
  0x36   : > { %v1162_v32 = vld [vmem:[%s1299_s12 + $0x38] sm:$0xff]   ;;  %v418_v33 = vld [vmem:[#allocation2 + $0x10] sm:$0xff]  ;;  %v416_v35 = vld [vmem:[#allocation2] sm:$0xff] }
  0x37   : > { %1061 = vmatpush3.bf16.msra.mxu0 %v1148_v18  ;;  %1099 = vmatpush3.bf16.msra.mxu1 %v1148_v18  ;;  %v426_v34 = vld [vmem:[#allocation2 + $0x50] sm:$0xff]  ;;  %v424_v36 = vld [vmem:[#allocation2 + $0x40] sm:$0xff]  ;;  %v419_v39 = vld [vmem:[#allocation2 + $0x18] sm:$0xff] }
  0x38   : > { %1062 = vmatprep.subr.bf16.mxu0 %v1149_v19  ;;  %1092 = vmatprep.subr.bf16.mxu1 %v1149_v19  ;;  %v427_v40 = vld [vmem:[#allocation2 + $0x58] sm:$0xff]  ;;  %v417_v45 = vld [vmem:[#allocation2 + $0x8] sm:$0xff]  ;;  %v422_v57 = vld [vmem:[#allocation2 + $0x30] sm:$0xff] }
  0x39   : > { %v425_v46 = vld [vmem:[#allocation2 + $0x48] sm:$0xff]  ;;  %v430_v58 = vld [vmem:[#allocation2 + $0x70] sm:$0xff]  ;;  %v420_v59 = vld [vmem:[#allocation2 + $0x20] sm:$0xff] }
  0x3a   : > { %v428_v60 = vld [vmem:[#allocation2 + $0x60] sm:$0xff]  ;;  %v423_v63 = vld [vmem:[#allocation2 + $0x38] sm:$0xff]  ;;  %v421_v5 = vld [vmem:[#allocation2 + $0x28] sm:$0xff] }
  0x3b   : > { %1063 = vmatpush3.bf16.msra.mxu0 %v1149_v19  ;;  %1100 = vmatpush3.bf16.msra.mxu1 %v1149_v19  ;;  %v431_v0 = vld [vmem:[#allocation2 + $0x78] sm:$0xff]  ;;  %v429_v6 = vld [vmem:[#allocation2 + $0x68] sm:$0xff]  ;;  %v1354_v18 = vld [vmem:[%s1474_s2] ss:$0 sm:$0xff] (!%p1003_p11) }
  0x3c   : > { %1064 = vmatprep.subr.bf16.mxu0 %v1150_v20  ;;  %1093 = vmatprep.subr.bf16.mxu1 %v1150_v20  ;;  %v1359_v19 = vld [vmem:[%s1475_s3] ss:$0 sm:$0xff] (!%p1003_p11) }
  0x3f   : > { %1065 = vmatpush3.bf16.msra.mxu0 %v1150_v20  ;;  %1101 = vmatpush3.bf16.msra.mxu1 %v1150_v20 }
  0x40   : > { %1066 = vmatprep.subr.bf16.mxu0 %v1151_v23  ;;  %1094 = vmatprep.subr.bf16.mxu1 %v1151_v23 }
  0x43   : > { %1067 = vmatpush3.bf16.msra.mxu0 %v1151_v23  ;;  %1102 = vmatpush3.bf16.msra.mxu1 %v1151_v23 }
  0x44   : > { %1068 = vmatprep.subr.bf16.mxu0 %v1152_v24  ;;  %1095 = vmatprep.subr.bf16.mxu1 %v1152_v24 }
  0x47   : > { %1069 = vmatpush3.bf16.msra.mxu0 %v1152_v24  ;;  %1103 = vmatpush3.bf16.msra.mxu1 %v1152_v24 }
  0x48   : > { %1070 = vmatprep.subr.bf16.mxu0 %v1153_v25  ;;  %1096 = vmatprep.subr.bf16.mxu1 %v1153_v25 }
  0x4b   : > { %1071 = vmatpush3.bf16.msra.mxu0 %v1153_v25  ;;  %1104 = vmatpush3.bf16.msra.mxu1 %v1153_v25 }
  0x4c   : > { %1072 = vmatprep.subr.bf16.mxu0 %v1154_v26  ;;  %1097 = vmatprep.subr.bf16.mxu1 %v1154_v26 }
  0x4f   : > { %1073 = vmatpush3.bf16.msra.mxu0 %v1154_v26  ;;  %1105 = vmatpush3.bf16.msra.mxu1 %v1154_v26 }
  0x52   : > { %1075 = vmatmul.mubr.bf16.vlgmr.msra.gmra.mrb[0].mxu0 %v1157_v27  ;;  %1083 = vmatmul.mubr.bf16.vlgmr.msra.gmra.mrb[0].mxu1 %v1158_v28 }
  0x53   : > { %1078 = vmatprep.mubr.bf16.mxu0 %v1159_v29  ;;  %1086 = vmatprep.mubr.bf16.mxu1 %v1160_v30 }
  0x5a   : > { %1079 = vmatmul.mubr.bf16.gmra.mrb[4].mxu0 %v1161_v31  ;;  %1087 = vmatmul.mubr.bf16.gmra.mrb[4].mxu1 %v1162_v32 }
 0x125   : > { %v1076_v37 = vpop.f32.mrb[0].mxu0  ;;  %v1084_v38 = vpop.f32.mrb[0].mxu1 }
 0x126   : > { %v659_v41 = vadd.f32 %v1076_v37, %v418_v33  ;;  %v667_v42 = vadd.f32 %v1084_v38, %v426_v34  ;;  %v594_v43 = vpop.f32.mrb[1].mxu0  ;;  %v626_v44 = vpop.f32.mrb[1].mxu1 }
 0x127   : > { %v657_v47 = vadd.f32 %v594_v43, %v416_v35  ;;  %v665_v48 = vadd.f32 %v626_v44, %v424_v36  ;;  %v1077_v49 = vpop.f32.mrb[2].mxu0  ;;  %v1085_v50 = vpop.f32.mrb[2].mxu1 }
 0x128   : > { %676 = vst.msk [vmem:[#allocation2 + $0x10] sm:$0xff] %vm673_vm1, %v659_v41  ;;  %684 = vst.msk [vmem:[#allocation2 + $0x50] sm:$0xff] %vm673_vm1, %v667_v42  ;;  %v660_v51 = vadd.f32 %v1077_v49, %v419_v39  ;;  %v668_v52 = vadd.f32 %v1085_v50, %v427_v40  ;;  %v597_v53 = vpop.f32.mrb[3].mxu0  ;;  %v629_v54 = vpop.f32.mrb[3].mxu1 }
 0x129   : > { %674 = vst.msk [vmem:[#allocation2] sm:$0xff] %vm673_vm1, %v657_v47  ;;  %682 = vst.msk [vmem:[#allocation2 + $0x40] sm:$0xff] %vm673_vm1, %v665_v48  ;;  %v658_v55 = vadd.f32 %v597_v53, %v417_v45  ;;  %v666_v56 = vadd.f32 %v629_v54, %v425_v46 }
 0x12a   : > { %677 = vst.msk [vmem:[#allocation2 + $0x18] sm:$0xff] %vm673_vm1, %v660_v51  ;;  %685 = vst.msk [vmem:[#allocation2 + $0x58] sm:$0xff] %vm673_vm1, %v668_v52 }
 0x12b   : > { %675 = vst.msk [vmem:[#allocation2 + $0x8] sm:$0xff] %vm673_vm1, %v658_v55  ;;  %683 = vst.msk [vmem:[#allocation2 + $0x48] sm:$0xff] %vm673_vm1, %v666_v56 }
 0x12d   : > { %v1080_v61 = vpop.f32.mrb[4].mxu0  ;;  %v1088_v62 = vpop.f32.mrb[4].mxu1  ;;  %693 = sbr.rel (%p1003_p11) target bundleno = 326 (0x146), region = 85 }
 0x12e   : > { %v663_v1 = vadd.f32 %v1080_v61, %v422_v57  ;;  %v671_v2 = vadd.f32 %v1088_v62, %v430_v58  ;;  %v610_v3 = vpop.f32.mrb[5].mxu0  ;;  %v642_v4 = vpop.f32.mrb[5].mxu1 }
 0x12f   : > { %v661_v7 = vadd.f32 %v610_v3, %v420_v59  ;;  %v669_v8 = vadd.f32 %v642_v4, %v428_v60  ;;  %v1081_v9 = vpop.f32.mrb[6].mxu0  ;;  %v1089_v10 = vpop.f32.mrb[6].mxu1  ;;  %v696_v22 = vld [vmem:[#allocation2 + $0x10] sm:$0xff] (!%p1003_p11) }
 0x130   : > { %680 = vst.msk [vmem:[#allocation2 + $0x30] sm:$0xff] %vm673_vm1, %v663_v1  ;;  %688 = vst.msk [vmem:[#allocation2 + $0x70] sm:$0xff] %vm673_vm1, %v671_v2  ;;  %v664_v11 = vadd.f32 %v1081_v9, %v423_v63  ;;  %v672_v12 = vadd.f32 %v1089_v10, %v431_v0  ;;  %v613_v13 = vpop.f32.mrb[7].mxu0  ;;  %v645_v14 = vpop.f32.mrb[7].mxu1  ;;  %v694_v17 = vld [vmem:[#allocation2] sm:$0xff] (!%p1003_p11)  ;;  %v719_v25 = vmul.f32 (!%p1003_p11), %v1354_v18, %v696_v22  ;;  %v704_v53 = vld [vmem:[#allocation2 + $0x50] sm:$0xff] (!%p1003_p11) }
 0x131   : > { %678 = vst.msk [vmem:[#allocation2 + $0x20] sm:$0xff] %vm673_vm1, %v661_v7  ;;  %686 = vst.msk [vmem:[#allocation2 + $0x60] sm:$0xff] %vm673_vm1, %v669_v8  ;;  %v662_v15 = vadd.f32 %v613_v13, %v421_v5  ;;  %v670_v16 = vadd.f32 %v645_v14, %v429_v6  ;;  %v717_v20 = vmul.f32 (!%p1003_p11), %v1354_v18, %v694_v17  ;;  %v697_v23 = vld [vmem:[#allocation2 + $0x18] sm:$0xff] (!%p1003_p11)  ;;  %v702_v47 = vld [vmem:[#allocation2 + $0x40] sm:$0xff] (!%p1003_p11) }
 0x132   : > { %681 = vst.msk [vmem:[#allocation2 + $0x38] sm:$0xff] %vm673_vm1, %v664_v11  ;;  %689 = vst.msk [vmem:[#allocation2 + $0x78] sm:$0xff] %vm673_vm1, %v672_v12  ;;  %v695_v21 = vld [vmem:[#allocation2 + $0x8] sm:$0xff] (!%p1003_p11)  ;;  %v720_v26 = vmul.f32 (!%p1003_p11), %v1354_v18, %v697_v23  ;;  %v742_v36 = vadd.f32 (!%p1003_p11), %v1359_v19, %v719_v25  ;;  %v705_v54 = vld [vmem:[#allocation2 + $0x58] sm:$0xff] (!%p1003_p11)  ;;  %v725_v1 = vmul.f32 (!%p1003_p11), %v1354_v18, %v702_v47 }
 0x133   : > { %679 = vst.msk [vmem:[#allocation2 + $0x28] sm:$0xff] %vm673_vm1, %v662_v15  ;;  %687 = vst.msk [vmem:[#allocation2 + $0x68] sm:$0xff] %vm673_vm1, %v670_v16  ;;  %v718_v24 = vmul.f32 (!%p1003_p11), %v1354_v18, %v695_v21  ;;  %v740_v30 = vadd.f32 (!%p1003_p11), %v1359_v19, %v717_v20  ;;  %v703_v52 = vld [vmem:[#allocation2 + $0x48] sm:$0xff] (!%p1003_p11)  ;;  %v727_v5 = vmul.f32 (!%p1003_p11), %v1354_v18, %v704_v53 }
 0x134   : > { %v743_v37 = vadd.f32 %v1359_v19, %v720_v26  ;;  %v758_v44 = vmax.f32 %v742_v36, 0.0  ;;  %v726_v4 = vmul.f32 %v1354_v18, %v703_v52  ;;  %v728_v6 = vmul.f32 %v1354_v18, %v705_v54 }
 0x135   : > { %v741_v35 = vadd.f32 %v1359_v19, %v718_v24  ;;  %v756_v39 = vmax.f32 %v740_v30, 0.0  ;;  %v748_v7 = vadd.f32 %v1359_v19, %v725_v1  ;;  %v750_v12 = vadd.f32 %v1359_v19, %v727_v5 }
 0x136   : > { %v759_v45 = vmax.f32 %v743_v37, 0.0  ;;  %v1028_v56 = vpack.c.bf16 %v758_v44, %v758_v44  ;;  %v749_v11 = vadd.f32 %v1359_v19, %v726_v4  ;;  %v751_v13 = vadd.f32 %v1359_v19, %v728_v6 }
 0x137   : > { %v700_v29 = vld [vmem:[#allocation2 + $0x30] sm:$0xff]  ;;  %v757_v43 = vmax.f32 %v741_v35, 0.0  ;;  %v1026_v48 = vpack.c.bf16 %v756_v39, %v756_v39  ;;  %v764_v15 = vmax.f32 %v748_v7, 0.0  ;;  %v766_v22 = vmax.f32 %v750_v12, 0.0 }
 0x138   : > { %v698_v27 = vld [vmem:[#allocation2 + $0x20] sm:$0xff]  ;;  %v723_v33 = vmul.f32 %v1354_v18, %v700_v29  ;;  %v1029_v57 = vpack.c.bf16 %v759_v45, %v759_v45  ;;  %v708_v61 = vld [vmem:[#allocation2 + $0x70] sm:$0xff]  ;;  %839 = vst.msk [vmem:[%s1476_s4 + $0x8] sm:$0xf] %vm836_vm2, %v1028_v56  ;;  %v765_v21 = vmax.f32 %v749_v11, 0.0  ;;  %v767_v23 = vmax.f32 %v751_v13, 0.0 }
 0x139   : > { %v721_v31 = vmul.f32 %v1354_v18, %v698_v27  ;;  %v701_v34 = vld [vmem:[#allocation2 + $0x38] sm:$0xff]  ;;  %v1027_v55 = vpack.c.bf16 %v757_v43, %v757_v43  ;;  %v706_v59 = vld [vmem:[#allocation2 + $0x60] sm:$0xff]  ;;  %837 = vst.msk [vmem:[%s1476_s4] sm:$0xf] %vm836_vm2, %v1026_v48  ;;  %v731_v10 = vmul.f32 %v1354_v18, %v708_v61  ;;  %v1034_v25 = vpack.c.bf16 %v764_v15, %v764_v15 }
 0x13a   : > { %v699_v28 = vld [vmem:[#allocation2 + $0x28] sm:$0xff]  ;;  %v724_v38 = vmul.f32 %v1354_v18, %v701_v34  ;;  %v746_v42 = vadd.f32 %v1359_v19, %v723_v33  ;;  %v709_v2 = vld [vmem:[#allocation2 + $0x78] sm:$0xff]  ;;  %840 = vst.msk [vmem:[%s1476_s4 + $0xc] sm:$0xf] %vm836_vm2, %v1029_v57  ;;  %v729_v8 = vmul.f32 %v1354_v18, %v706_v59  ;;  %v1035_v29 = vpack.c.bf16 %v765_v21, %v765_v21 }
 0x13b   : > { %v722_v32 = vmul.f32 %v1354_v18, %v699_v28  ;;  %v744_v40 = vadd.f32 %v1359_v19, %v721_v31  ;;  %v707_v60 = vld [vmem:[#allocation2 + $0x68] sm:$0xff]  ;;  %838 = vst.msk [vmem:[%s1476_s4 + $0x4] sm:$0xf] %vm836_vm2, %v1027_v55  ;;  %v732_v14 = vmul.f32 %v1354_v18, %v709_v2  ;;  %v754_v20 = vadd.f32 %v1359_v19, %v731_v10 }
 0x13c   : > { %v747_v46 = vadd.f32 %v1359_v19, %v724_v38  ;;  %v762_v51 = vmax.f32 %v746_v42, 0.0  ;;  %v730_v9 = vmul.f32 %v1354_v18, %v707_v60  ;;  %v752_v16 = vadd.f32 %v1359_v19, %v729_v8  ;;  %845 = vst.msk [vmem:[%s1476_s4 + $0x20] sm:$0xf] %vm836_vm2, %v1034_v25  ;;  %846 = vst.msk [vmem:[%s1476_s4 + $0x24] sm:$0xf] %vm836_vm2, %v1035_v29 }
 0x13d   : > { %v745_v41 = vadd.f32 %v1359_v19, %v722_v32  ;;  %v760_v49 = vmax.f32 %v744_v40, 0.0  ;;  %v755_v24 = vadd.f32 %v1359_v19, %v732_v14  ;;  %v770_v28 = vmax.f32 %v754_v20, 0.0 }
 0x13e   : > { %v763_v58 = vmax.f32 %v747_v46, 0.0  ;;  %v1032_v0 = vpack.c.bf16 %v762_v51, %v762_v51  ;;  %v753_v17 = vadd.f32 %v1359_v19, %v730_v9  ;;  %v768_v26 = vmax.f32 %v752_v16, 0.0 }
 0x13f   : > { %v761_v50 = vmax.f32 %v745_v41, 0.0  ;;  %v1030_v62 = vpack.c.bf16 %v760_v49, %v760_v49  ;;  %v1036_v30 = vpack.c.bf16 %v766_v22, %v766_v22  ;;  %v1037_v31 = vpack.c.bf16 %v767_v23, %v767_v23 }
 0x140   : > { %v1033_v3 = vpack.c.bf16 %v763_v58, %v763_v58  ;;  %843 = vst.msk [vmem:[%s1476_s4 + $0x18] sm:$0xf] %vm836_vm2, %v1032_v0  ;;  %v769_v27 = vmax.f32 %v753_v17, 0.0  ;;  %v771_v18 = vmax.f32 %v755_v24, 0.0  ;;  %v1038_v32 = vpack.c.bf16 %v768_v26, %v768_v26 }
 0x141   : > { %v1031_v63 = vpack.c.bf16 %v761_v50, %v761_v50  ;;  %841 = vst.msk [vmem:[%s1476_s4 + $0x10] sm:$0xf] %vm836_vm2, %v1030_v62  ;;  %v1040_v34 = vpack.c.bf16 %v770_v28, %v770_v28  ;;  %847 = vst.msk [vmem:[%s1476_s4 + $0x28] sm:$0xf] %vm836_vm2, %v1036_v30 }
 0x142   : > { %844 = vst.msk [vmem:[%s1476_s4 + $0x1c] sm:$0xf] %vm836_vm2, %v1033_v3  ;;  %v1039_v33 = vpack.c.bf16 %v769_v27, %v769_v27  ;;  %848 = vst.msk [vmem:[%s1476_s4 + $0x2c] sm:$0xf] %vm836_vm2, %v1037_v31  ;;  %v1041_v19 = vpack.c.bf16 %v771_v18, %v771_v18 }
 0x143   : > { %842 = vst.msk [vmem:[%s1476_s4 + $0x14] sm:$0xf] %vm836_vm2, %v1031_v63  ;;  %849 = vst.msk [vmem:[%s1476_s4 + $0x30] sm:$0xf] %vm836_vm2, %v1038_v32 }
 0x144   : > { %850 = vst.msk [vmem:[%s1476_s4 + $0x34] sm:$0xf] %vm836_vm2, %v1039_v33  ;;  %851 = vst.msk [vmem:[%s1476_s4 + $0x38] sm:$0xf] %vm836_vm2, %v1040_v34 }
 0x145   : > { %852 = vst.msk [vmem:[%s1476_s4 + $0x3c] sm:$0xf] %vm836_vm2, %v1041_v19 }
 0x146 PF: > { %s14_s19 = sadd.s32 1, %s1201_s19   ;;  %s1477_s15 = smov %s1189_s16 }
 0x147   : > { %p11_p12 = scmp.ge.s32.totalorder %s14_s19, 7   ;;  %s1478_s16 = smov %s1264_s23 }
 0x148   : > { %s1479_s17 = smov %s1197_s18  ;;  %s1480_s18 = smov %s1482_s20 }
 0x149   :  { %13 = sbr.rel (!%p11_p12) target bundleno = 3 (0x3), region = 129 }

// kernel: resnet18_forward.25
= control target key start
LH: loop header
LB: loop body
LE: loop exit
PB: predicated region body
PF: predicated region fallthrough
CT: control target
= control target key end

     0   :  { %s1400_s18 = smov 0   ;;  %s1402_s19 = smov 0   ;;  %s1667_s0 = inlined_call_operand.vmem [shape: bf16[128,640], index: 0, kind: input, shape index: {}]   ;;  %s1668_s1 = inlined_call_operand.vmem [shape: bf16[640,64], index: 1, kind: input, shape index: {}]   ;;  %s1669_s2 = inlined_call_operand.vmem [shape: f32[1,64], index: 2, kind: input, shape index: {}]   ;;  %s1670_s3 = inlined_call_operand.vmem [shape: f32[1,64], index: 3, kind: input, shape index: {}]   ;;  %s1671_s4 = inlined_call_operand.vmem [shape: bf16[128,64], index: 4, kind: input, shape index: {}]   ;;  %s1672_s5 = inlined_call_operand.vmem [shape: bf16[128,64], index: 5, kind: output, shape index: {}]  }
   0x1   :  { %s1404_s20 = smov 0   ;;  %s1406_s21 = smov 0  }
   0x2   :  { %s1408_s22 = smov 0  }
   0x3 LB: > { %s27_s23 = sadd.s32 1, %s1363_s21  ;;  %p50_p1 = scmp.ne.s32.totalorder %s1355_s19, %s1351_s18  ;;  %s1367_s22 = sphi %s1408_s22, %s15_s22   ;;  %s1363_s21 = sphi %s1406_s21, %s1676_s21   ;;  %s1359_s20 = sphi %s1404_s20, %s1675_s20   ;;  %s1355_s19 = sphi %s1402_s19, %s1674_s19   ;;  %s1351_s18 = sphi %s1400_s18, %s1673_s18  }
   0x4   : > { %p28_p0 = scmp.ge.s32.totalorder %s27_s23, 5  ;;  %p51_p2 = scmp.eq.s32.totalorder %s1367_s22, 0 }
   0x5   : > { %s43_s25 = sadd.s32 1, %s1355_s19  ;;  %p1106_p5 = scmp.ge.s32.totalorder %s1367_s22, 5 }
   0x6   : > { %s1678_s23 = smov (%p28_p0, %s27_s23), 0  ;;  %p52_p3 = por %p51_p2, %p50_p1 }
   0x7   : > { %s39_s24 = ssub.s32 %s1363_s21, %s1678_s23  ;;  %236 = sbr.rel (%p1106_p5) target bundleno = 28 (0x1c), region = 28 }
   0x8   : > { %p41_p4 = scmp.eq.s32.totalorder %s39_s24, 0 }
   0xa   : > { %s1435_s26 = scalar_select %p41_p4, %s1355_s19, %s43_s25  }
   0xe   : > { %239 = sbr.rel (!%p52_p3) target bundleno = 28 (0x1c), region = 32  ;;  %s241_s27 = sand.u32 (%p52_p3), 1, %s1355_s19  }
   0xf   : > { %s1108_s28 = sshll.u32 (%p52_p3), %s1363_s21, 2  ;;  %s1107_s29 = sshll.u32 (%p52_p3), %s241_s27, 6 }
  0x10   : > { %s1443_s7 = scalar_lea.vmem (%p52_p3), %s1667_s0, %s1108_s28  ;;  %s243_s8 = scalar_lea.vmem (%p52_p3), [#allocation3], %s1107_s29 }
  0x11   : > { %v264_v0 = vld [vmem:[%s1443_s7] sm:$0xf] (%p52_p3)  ;;  %v266_v1 = vld [vmem:[%s1443_s7 + $0x14] sm:$0xf] (%p52_p3)  ;;  %v268_v2 = vld [vmem:[%s1443_s7 + $0x28] sm:$0xf] (%p52_p3) }
  0x12   : > { %265 = vst [vmem:[%s243_s8] sm:$0xf] (%p52_p3), %v264_v0  ;;  %267 = vst [vmem:[%s243_s8 + $0x4] sm:$0xf] (%p52_p3), %v266_v1  ;;  %v270_v3 = vld [vmem:[%s1443_s7 + $0x3c] sm:$0xf] (%p52_p3) }
  0x13   : > { %v272_v4 = vld [vmem:[%s1443_s7 + $0x50] sm:$0xf] (%p52_p3)  ;;  %269 = vst [vmem:[%s243_s8 + $0x8] sm:$0xf] (%p52_p3), %v268_v2  ;;  %271 = vst [vmem:[%s243_s8 + $0xc] sm:$0xf] (%p52_p3), %v270_v3 }
  0x14   : > { %273 = vst [vmem:[%s243_s8 + $0x10] sm:$0xf] (%p52_p3), %v272_v4  ;;  %v274_v5 = vld [vmem:[%s1443_s7 + $0x64] sm:$0xf] (%p52_p3)  ;;  %v276_v6 = vld [vmem:[%s1443_s7 + $0x78] sm:$0xf] (%p52_p3) }
  0x15   : > { %v278_v7 = vld [vmem:[%s1443_s7 + $0x8c] sm:$0xf]  ;;  %275 = vst [vmem:[%s243_s8 + $0x14] sm:$0xf] %v274_v5  ;;  %277 = vst [vmem:[%s243_s8 + $0x18] sm:$0xf] %v276_v6 }
  0x16   : > { %279 = vst [vmem:[%s243_s8 + $0x1c] sm:$0xf] %v278_v7  ;;  %v280_v8 = vld [vmem:[%s1443_s7 + $0xa0] sm:$0xf]  ;;  %v282_v9 = vld [vmem:[%s1443_s7 + $0xb4] sm:$0xf] }
  0x17   : > { %v284_v10 = vld [vmem:[%s1443_s7 + $0xc8] sm:$0xf]  ;;  %281 = vst [vmem:[%s243_s8 + $0x20] sm:$0xf] %v280_v8  ;;  %283 = vst [vmem:[%s243_s8 + $0x24] sm:$0xf] %v282_v9 }
  0x18   : > { %285 = vst [vmem:[%s243_s8 + $0x28] sm:$0xf] %v284_v10  ;;  %v286_v11 = vld [vmem:[%s1443_s7 + $0xdc] sm:$0xf]  ;;  %v288_v12 = vld [vmem:[%s1443_s7 + $0xf0] sm:$0xf] }
  0x19   : > { %v290_v13 = vld [vmem:[%s1443_s7 + $0x104] sm:$0xf]  ;;  %287 = vst [vmem:[%s243_s8 + $0x2c] sm:$0xf] %v286_v11  ;;  %289 = vst [vmem:[%s243_s8 + $0x30] sm:$0xf] %v288_v12 }
  0x1a   : > { %291 = vst [vmem:[%s243_s8 + $0x34] sm:$0xf] %v290_v13  ;;  %v292_v14 = vld [vmem:[%s1443_s7 + $0x118] sm:$0xf]  ;;  %v294_v15 = vld [vmem:[%s1443_s7 + $0x12c] sm:$0xf] }
  0x1b   : > { %293 = vst [vmem:[%s243_s8 + $0x38] sm:$0xf] %v292_v14  ;;  %295 = vst [vmem:[%s243_s8 + $0x3c] sm:$0xf] %v294_v15 }
  0x1c PF: > { %p1109_p6 = scmp.ge.s32.totalorder %s1367_s22, 1  ;;  %p361_p7 = scmp.lt.s32.totalorder %s1367_s22, 6 }
  0x1e   : > { %p362_p8 = pnand %p1109_p6, %p361_p7 }
  0x1f   : > { %s368_s9 = sand.u32 (!%p362_p8), 1, %s1351_s18   ;;  %s1111_s10 = sshll.u32 (!%p362_p8), %s1359_s20, 4 }
  0x20   : > { %365 = sbr.rel (%p362_p8) target bundleno = 335 (0x14f), region = 77  ;;  %s1110_s11 = sshll.u32 (!%p362_p8), %s368_s9, 6 }
  0x21   : > { %p422_p9 = scmp.lt.s32.totalorder (!%p362_p8), %s1111_s10, 79  ;;  %s1470_s16 = scalar_lea.vmem (!%p362_p8), [#allocation3], %s1110_s11 }
  0x22   : > { %p1113_p10 = scmp.ne.s32.totalorder (!%p362_p8), %s1359_s20, 0 }
  0x27   : > { %s1680_s10 = smov (!%p422_p9, %s1111_s10), 79  ;;  %458 = sbr.rel (%p1113_p10) target bundleno = 49 (0x31), region = 85 }
  0x28   : > { %s1112_s12 = sshll.u32 %s1680_s10, 2  ;;  %vm459_vm0 = vcmask (!%p1113_p10), 523264   ;;  %v1369_v16 = vmov (!%p1113_p10), 0.0  }
  0x29   : > { %s1468_s15 = scalar_lea.vmem %s1668_s1, %s1112_s12  ;;  %460 = vst.msk [vmem:[#allocation2] sm:$0xff] (!%p1113_p10), %vm459_vm0, %v1369_v16  ;;  %461 = vst.msk [vmem:[#allocation2 + $0x8] sm:$0xff] (!%p1113_p10), %vm459_vm0, %v1369_v16 }
  0x2a   : > { %462 = vst.msk [vmem:[#allocation2 + $0x10] sm:$0xff] (!%p1113_p10), %vm459_vm0, %v1369_v16  ;;  %463 = vst.msk [vmem:[#allocation2 + $0x18] sm:$0xff] (!%p1113_p10), %vm459_vm0, %v1369_v16 }
  0x2b   : > { %464 = vst.msk [vmem:[#allocation2 + $0x20] sm:$0xff] (!%p1113_p10), %vm459_vm0, %v1369_v16  ;;  %465 = vst.msk [vmem:[#allocation2 + $0x28] sm:$0xff] (!%p1113_p10), %vm459_vm0, %v1369_v16 }
  0x2c   : > { %466 = vst.msk [vmem:[#allocation2 + $0x30] sm:$0xff] (!%p1113_p10), %vm459_vm0, %v1369_v16  ;;  %467 = vst.msk [vmem:[#allocation2 + $0x38] sm:$0xff] (!%p1113_p10), %vm459_vm0, %v1369_v16 }
  0x2d   : > { %468 = vst.msk [vmem:[#allocation2 + $0x40] sm:$0xff] (!%p1113_p10), %vm459_vm0, %v1369_v16  ;;  %469 = vst.msk [vmem:[#allocation2 + $0x48] sm:$0xff] (!%p1113_p10), %vm459_vm0, %v1369_v16 }
  0x2e   : > { %470 = vst.msk [vmem:[#allocation2 + $0x50] sm:$0xff] %vm459_vm0, %v1369_v16  ;;  %471 = vst.msk [vmem:[#allocation2 + $0x58] sm:$0xff] %vm459_vm0, %v1369_v16 }
  0x2f   : > { %472 = vst.msk [vmem:[#allocation2 + $0x60] sm:$0xff] %vm459_vm0, %v1369_v16  ;;  %473 = vst.msk [vmem:[#allocation2 + $0x68] sm:$0xff] %vm459_vm0, %v1369_v16 }
  0x30   : > { %474 = vst.msk [vmem:[#allocation2 + $0x70] sm:$0xff] %vm459_vm0, %v1369_v16  ;;  %475 = vst.msk [vmem:[#allocation2 + $0x78] sm:$0xff] %vm459_vm0, %v1369_v16 }
  0x31 PF: > { %v1313_v17 = vld [vmem:[%s1468_s15] sm:$0xff]   ;;  %v1314_v18 = vld [vmem:[%s1468_s15 + $0x8] sm:$0xff]   ;;  %v1315_v19 = vld [vmem:[%s1468_s15 + $0x10] sm:$0xff]   ;;  %vm733_vm1 = vcmask 523264   ;;  %p1130_p11 = scmp.ne.s32.totalorder %s1359_s20, 4 }
  0x32   : > { %1224 = vmatprep.subr.bf16.mxu0 %v1313_v17  ;;  %1256 = vmatprep.subr.bf16.mxu1 %v1313_v17  ;;  %v1316_v20 = vld [vmem:[%s1468_s15 + $0x18] sm:$0xff]   ;;  %v1321_v21 = vld [vmem:[%s1470_s16] sm:$0xff]   ;;  %v1318_v24 = vld [vmem:[%s1468_s15 + $0x28] sm:$0xff]   ;;  %vm944_vm2 = vcmask (!%p1130_p11), 519168  }
  0x33   : > { %1225 = vmatpush3.bf16.msra.mxu0 %v1313_v17  ;;  %1264 = vmatpush3.bf16.msra.mxu1 %v1313_v17  ;;  %v1322_v22 = vld [vmem:[%s1470_s16 + $0x20] sm:$0xff]   ;;  %v1319_v25 = vld [vmem:[%s1468_s15 + $0x30] sm:$0xff]   ;;  %v1320_v26 = vld [vmem:[%s1468_s15 + $0x38] sm:$0xff]  }
  0x34   : > { %1226 = vmatprep.subr.bf16.mxu0 %v1314_v18  ;;  %1257 = vmatprep.subr.bf16.mxu1 %v1314_v18  ;;  %v1317_v23 = vld [vmem:[%s1468_s15 + $0x20] sm:$0xff]   ;;  %v1323_v27 = vld [vmem:[%s1470_s16 + $0x8] sm:$0xff]   ;;  %v1325_v29 = vld [vmem:[%s1470_s16 + $0x10] sm:$0xff]  }
  0x35   : > { %1240 = vmatprep.mubr.bf16.mxu0 %v1321_v21  ;;  %1248 = vmatprep.mubr.bf16.mxu1 %v1322_v22  ;;  %v1324_v28 = vld [vmem:[%s1470_s16 + $0x28] sm:$0xff]   ;;  %v1326_v30 = vld [vmem:[%s1470_s16 + $0x30] sm:$0xff]   ;;  %v1327_v31 = vld [vmem:[%s1470_s16 + $0x18] sm:$0xff]  }
  0x36   : > { %v1328_v32 = vld [vmem:[%s1470_s16 + $0x38] sm:$0xff]   ;;  %v478_v33 = vld [vmem:[#allocation2 + $0x10] sm:$0xff]  ;;  %v476_v35 = vld [vmem:[#allocation2] sm:$0xff] }
  0x37   : > { %1227 = vmatpush3.bf16.msra.mxu0 %v1314_v18  ;;  %1265 = vmatpush3.bf16.msra.mxu1 %v1314_v18  ;;  %v486_v34 = vld [vmem:[#allocation2 + $0x50] sm:$0xff]  ;;  %v484_v36 = vld [vmem:[#allocation2 + $0x40] sm:$0xff]  ;;  %v479_v39 = vld [vmem:[#allocation2 + $0x18] sm:$0xff] }
  0x38   : > { %1228 = vmatprep.subr.bf16.mxu0 %v1315_v19  ;;  %1258 = vmatprep.subr.bf16.mxu1 %v1315_v19  ;;  %v487_v40 = vld [vmem:[#allocation2 + $0x58] sm:$0xff]  ;;  %v477_v45 = vld [vmem:[#allocation2 + $0x8] sm:$0xff]  ;;  %v482_v57 = vld [vmem:[#allocation2 + $0x30] sm:$0xff] }
  0x39   : > { %v485_v46 = vld [vmem:[#allocation2 + $0x48] sm:$0xff]  ;;  %v490_v58 = vld [vmem:[#allocation2 + $0x70] sm:$0xff]  ;;  %v480_v59 = vld [vmem:[#allocation2 + $0x20] sm:$0xff] }
  0x3a   : > { %v488_v60 = vld [vmem:[#allocation2 + $0x60] sm:$0xff]  ;;  %v483_v63 = vld [vmem:[#allocation2 + $0x38] sm:$0xff]  ;;  %v481_v5 = vld [vmem:[#allocation2 + $0x28] sm:$0xff] }
  0x3b   : > { %1229 = vmatpush3.bf16.msra.mxu0 %v1315_v19  ;;  %1266 = vmatpush3.bf16.msra.mxu1 %v1315_v19  ;;  %v491_v0 = vld [vmem:[#allocation2 + $0x78] sm:$0xff]  ;;  %v489_v6 = vld [vmem:[#allocation2 + $0x68] sm:$0xff]  ;;  %v1525_v18 = vld [vmem:[%s1669_s2] ss:$0 sm:$0xff] (!%p1130_p11) }
  0x3c   : > { %1230 = vmatprep.subr.bf16.mxu0 %v1316_v20  ;;  %1259 = vmatprep.subr.bf16.mxu1 %v1316_v20  ;;  %v1530_v19 = vld [vmem:[%s1670_s3] ss:$0 sm:$0xff] (!%p1130_p11) }
  0x3d   : > { %v1170_v21 = vld [vmem:[%s1671_s4] sm:$0xff] (!%p1130_p11)  }
  0x3f   : > { %1231 = vmatpush3.bf16.msra.mxu0 %v1316_v20  ;;  %1267 = vmatpush3.bf16.msra.mxu1 %v1316_v20 }
  0x40   : > { %1232 = vmatprep.subr.bf16.mxu0 %v1317_v23  ;;  %1260 = vmatprep.subr.bf16.mxu1 %v1317_v23 }
  0x43   : > { %1233 = vmatpush3.bf16.msra.mxu0 %v1317_v23  ;;  %1268 = vmatpush3.bf16.msra.mxu1 %v1317_v23 }
  0x44   : > { %1234 = vmatprep.subr.bf16.mxu0 %v1318_v24  ;;  %1261 = vmatprep.subr.bf16.mxu1 %v1318_v24 }
  0x47   : > { %1235 = vmatpush3.bf16.msra.mxu0 %v1318_v24  ;;  %1269 = vmatpush3.bf16.msra.mxu1 %v1318_v24  ;;  %v1171_v24 = vunpack.c.l.bf16 (!%p1130_p11), %v1170_v21 }
  0x48   : > { %1236 = vmatprep.subr.bf16.mxu0 %v1319_v25  ;;  %1262 = vmatprep.subr.bf16.mxu1 %v1319_v25 }
  0x4b   : > { %1237 = vmatpush3.bf16.msra.mxu0 %v1319_v25  ;;  %1270 = vmatpush3.bf16.msra.mxu1 %v1319_v25 }
  0x4c   : > { %1238 = vmatprep.subr.bf16.mxu0 %v1320_v26  ;;  %1263 = vmatprep.subr.bf16.mxu1 %v1320_v26 }
  0x4f   : > { %1239 = vmatpush3.bf16.msra.mxu0 %v1320_v26  ;;  %1271 = vmatpush3.bf16.msra.mxu1 %v1320_v26  ;;  %v1172_v26 = vunpack.c.h.bf16 (!%p1130_p11), %v1170_v21 }
  0x52   : > { %1241 = vmatmul.mubr.bf16.vlgmr.msra.gmra.mrb[0].mxu0 %v1323_v27  ;;  %1249 = vmatmul.mubr.bf16.vlgmr.msra.gmra.mrb[0].mxu1 %v1324_v28  ;;  %v1201_v28 = vld [vmem:[%s1671_s4 + $0x8] sm:$0xff] (!%p1130_p11)  }
  0x53   : > { %1244 = vmatprep.mubr.bf16.mxu0 %v1325_v29  ;;  %1252 = vmatprep.mubr.bf16.mxu1 %v1326_v30 }
  0x5a   : > { %1245 = vmatmul.mubr.bf16.gmra.mrb[4].mxu0 %v1327_v31  ;;  %1253 = vmatmul.mubr.bf16.gmra.mrb[4].mxu1 %v1328_v32  ;;  %v1175_v32 = vunpack.c.l.bf16 (!%p1130_p11), %v1201_v28 }
 0x125   : > { %v1242_v37 = vpop.f32.mrb[0].mxu0  ;;  %v1250_v38 = vpop.f32.mrb[0].mxu1 }
 0x126   : > { %v719_v41 = vadd.f32 %v1242_v37, %v478_v33  ;;  %v727_v42 = vadd.f32 %v1250_v38, %v486_v34  ;;  %v654_v43 = vpop.f32.mrb[1].mxu0  ;;  %v686_v44 = vpop.f32.mrb[1].mxu1  ;;  %v1176_v34 = vunpack.c.h.bf16 (!%p1130_p11), %v1201_v28 }
 0x127   : > { %v717_v47 = vadd.f32 %v654_v43, %v476_v35  ;;  %v725_v48 = vadd.f32 %v686_v44, %v484_v36  ;;  %v1243_v49 = vpop.f32.mrb[2].mxu0  ;;  %v1251_v50 = vpop.f32.mrb[2].mxu1  ;;  %v1202_v35 = vld [vmem:[%s1671_s4 + $0x10] sm:$0xff] (!%p1130_p11)  }
 0x128   : > { %736 = vst.msk [vmem:[#allocation2 + $0x10] sm:$0xff] %vm733_vm1, %v719_v41  ;;  %744 = vst.msk [vmem:[#allocation2 + $0x50] sm:$0xff] %vm733_vm1, %v727_v42  ;;  %v720_v51 = vadd.f32 %v1243_v49, %v479_v39  ;;  %v728_v52 = vadd.f32 %v1251_v50, %v487_v40  ;;  %v657_v53 = vpop.f32.mrb[3].mxu0  ;;  %v689_v54 = vpop.f32.mrb[3].mxu1  ;;  %v1179_v41 = vunpack.c.l.bf16 (!%p1130_p11), %v1202_v35  ;;  %v1203_v42 = vld [vmem:[%s1671_s4 + $0x18] sm:$0xff] (!%p1130_p11)  }
 0x129   : > { %734 = vst.msk [vmem:[#allocation2] sm:$0xff] %vm733_vm1, %v717_v47  ;;  %742 = vst.msk [vmem:[#allocation2 + $0x40] sm:$0xff] %vm733_vm1, %v725_v48  ;;  %v718_v55 = vadd.f32 %v657_v53, %v477_v45  ;;  %v726_v56 = vadd.f32 %v689_v54, %v485_v46  ;;  %v1180_v46 = vunpack.c.h.bf16 (!%p1130_p11), %v1202_v35 }
 0x12a   : > { %737 = vst.msk [vmem:[#allocation2 + $0x18] sm:$0xff] %vm733_vm1, %v720_v51  ;;  %745 = vst.msk [vmem:[#allocation2 + $0x58] sm:$0xff] %vm733_vm1, %v728_v52 }
 0x12b   : > { %735 = vst.msk [vmem:[#allocation2 + $0x8] sm:$0xff] %vm733_vm1, %v718_v55  ;;  %743 = vst.msk [vmem:[#allocation2 + $0x48] sm:$0xff] %vm733_vm1, %v726_v56  ;;  %v1183_v55 = vunpack.c.l.bf16 (!%p1130_p11), %v1203_v42 }
 0x12d   : > { %v1246_v61 = vpop.f32.mrb[4].mxu0  ;;  %v1254_v62 = vpop.f32.mrb[4].mxu1  ;;  %753 = sbr.rel (%p1130_p11) target bundleno = 335 (0x14f), region = 89 }
 0x12e   : > { %v723_v1 = vadd.f32 %v1246_v61, %v482_v57  ;;  %v731_v2 = vadd.f32 %v1254_v62, %v490_v58  ;;  %v670_v3 = vpop.f32.mrb[5].mxu0  ;;  %v702_v4 = vpop.f32.mrb[5].mxu1 }
 0x12f   : > { %v721_v7 = vadd.f32 %v670_v3, %v480_v59  ;;  %v729_v8 = vadd.f32 %v702_v4, %v488_v60  ;;  %v1247_v9 = vpop.f32.mrb[6].mxu0  ;;  %v1255_v10 = vpop.f32.mrb[6].mxu1  ;;  %v756_v23 = vld [vmem:[#allocation2 + $0x10] sm:$0xff] (!%p1130_p11) }
 0x130   : > { %740 = vst.msk [vmem:[#allocation2 + $0x30] sm:$0xff] %vm733_vm1, %v723_v1  ;;  %748 = vst.msk [vmem:[#allocation2 + $0x70] sm:$0xff] %vm733_vm1, %v731_v2  ;;  %v724_v11 = vadd.f32 %v1247_v9, %v483_v63  ;;  %v732_v12 = vadd.f32 %v1255_v10, %v491_v0  ;;  %v673_v13 = vpop.f32.mrb[7].mxu0  ;;  %v705_v14 = vpop.f32.mrb[7].mxu1  ;;  %v754_v17 = vld [vmem:[#allocation2] sm:$0xff] (!%p1130_p11)  ;;  %v779_v27 = vmul.f32 (!%p1130_p11), %v1525_v18, %v756_v23  ;;  %v1184_v10 = vunpack.c.h.bf16 (!%p1130_p11), %v1203_v42 }
 0x131   : > { %738 = vst.msk [vmem:[#allocation2 + $0x20] sm:$0xff] %vm733_vm1, %v721_v7  ;;  %746 = vst.msk [vmem:[#allocation2 + $0x60] sm:$0xff] %vm733_vm1, %v729_v8  ;;  %v722_v15 = vadd.f32 %v673_v13, %v481_v5  ;;  %v730_v16 = vadd.f32 %v705_v14, %v489_v6  ;;  %v777_v20 = vmul.f32 (!%p1130_p11), %v1525_v18, %v754_v17  ;;  %v757_v29 = vld [vmem:[#allocation2 + $0x18] sm:$0xff] (!%p1130_p11)  ;;  %v762_v0 = vld [vmem:[#allocation2 + $0x40] sm:$0xff] (!%p1130_p11) }
 0x132   : > { %741 = vst.msk [vmem:[#allocation2 + $0x38] sm:$0xff] %vm733_vm1, %v724_v11  ;;  %749 = vst.msk [vmem:[#allocation2 + $0x78] sm:$0xff] %vm733_vm1, %v732_v12  ;;  %v755_v22 = vld [vmem:[#allocation2 + $0x8] sm:$0xff] (!%p1130_p11)  ;;  %v780_v33 = vmul.f32 (!%p1130_p11), %v1525_v18, %v757_v29  ;;  %v802_v39 = vadd.f32 (!%p1130_p11), %v1530_v19, %v779_v27  ;;  %v1204_v1 = vld [vmem:[%s1671_s4 + $0x20] sm:$0xff] (!%p1130_p11)  }
 0x133   : > { %739 = vst.msk [vmem:[#allocation2 + $0x28] sm:$0xff] %vm733_vm1, %v722_v15  ;;  %747 = vst.msk [vmem:[#allocation2 + $0x68] sm:$0xff] %vm733_vm1, %v730_v16  ;;  %v778_v25 = vmul.f32 (!%p1130_p11), %v1525_v18, %v755_v22  ;;  %v800_v31 = vadd.f32 (!%p1130_p11), %v1530_v19, %v777_v20  ;;  %v763_v6 = vld [vmem:[#allocation2 + $0x48] sm:$0xff] (!%p1130_p11)  ;;  %v764_v11 = vld [vmem:[#allocation2 + $0x50] sm:$0xff] (!%p1130_p11)  ;;  %v785_v15 = vmul.f32 (!%p1130_p11), %v1525_v18, %v762_v0  ;;  %v1187_v16 = vunpack.c.l.bf16 (!%p1130_p11), %v1204_v1 }
 0x134   : > { %v803_v44 = vadd.f32 %v1530_v19, %v780_v33  ;;  %v850_v48 = vadd.f32 %v1175_v32, %v802_v39  ;;  %v1205_v12 = vld [vmem:[%s1671_s4 + $0x28] sm:$0xff]   ;;  %v765_v17 = vld [vmem:[#allocation2 + $0x58] sm:$0xff]  ;;  %v786_v22 = vmul.f32 %v1525_v18, %v763_v6  ;;  %v1188_v23 = vunpack.c.h.bf16 %v1204_v1 }
 0x135   : > { %v801_v38 = vadd.f32 %v1530_v19, %v778_v25  ;;  %v848_v43 = vadd.f32 %v1171_v24, %v800_v31  ;;  %v1206_v25 = vld [vmem:[%s1671_s4 + $0x30] sm:$0xff]   ;;  %v808_v27 = vadd.f32 %v1530_v19, %v785_v15  ;;  %v787_v28 = vmul.f32 %v1525_v18, %v764_v11 }
 0x136   : > { %v851_v53 = vadd.f32 %v1176_v34, %v803_v44  ;;  %v866_v57 = vmax.f32 %v850_v48, 0.0  ;;  %v1191_v29 = vunpack.c.l.bf16 %v1205_v12  ;;  %v809_v32 = vadd.f32 %v1530_v19, %v786_v22  ;;  %v1207_v44 = vld [vmem:[%s1671_s4 + $0x38] sm:$0xff]  }
 0x137   : > { %v760_v37 = vld [vmem:[#allocation2 + $0x30] sm:$0xff]  ;;  %v849_v47 = vadd.f32 %v1172_v26, %v801_v38  ;;  %v864_v52 = vmax.f32 %v848_v43, 0.0  ;;  %v788_v33 = vmul.f32 %v1525_v18, %v765_v17  ;;  %v1192_v34 = vunpack.c.h.bf16 %v1205_v12 }
 0x138   : > { %v758_v30 = vld [vmem:[#allocation2 + $0x20] sm:$0xff]  ;;  %v783_v50 = vmul.f32 %v1525_v18, %v760_v37  ;;  %v867_v61 = vmax.f32 %v851_v53, 0.0  ;;  %v1155_v3 = vpack.c.bf16 %v866_v57, %v866_v57  ;;  %v856_v35 = vadd.f32 %v1187_v16, %v808_v27  ;;  %v768_v39 = vld [vmem:[#allocation2 + $0x70] sm:$0xff] }
 0x139   : > { %v781_v40 = vmul.f32 %v1525_v18, %v758_v30  ;;  %v761_v51 = vld [vmem:[#allocation2 + $0x38] sm:$0xff]  ;;  %v865_v56 = vmax.f32 %v849_v47, 0.0  ;;  %v1153_v60 = vpack.c.bf16 %v864_v52, %v864_v52  ;;  %v766_v24 = vld [vmem:[#allocation2 + $0x60] sm:$0xff]  ;;  %v1195_v38 = vunpack.c.l.bf16 %v1206_v25 }
 0x13a   : > { %v759_v36 = vld [vmem:[#allocation2 + $0x28] sm:$0xff]  ;;  %v806_v59 = vadd.f32 %v1530_v19, %v783_v50  ;;  %v784_v63 = vmul.f32 %v1525_v18, %v761_v51  ;;  %v1156_v7 = vpack.c.bf16 %v867_v61, %v867_v61  ;;  %947 = vst.msk [vmem:[%s1672_s5 + $0x8] sm:$0xf] %vm944_vm2, %v1155_v3  ;;  %v789_v37 = vmul.f32 %v1525_v18, %v766_v24  ;;  %v769_v53 = vld [vmem:[#allocation2 + $0x78] sm:$0xff] }
 0x13b   : > { %v782_v45 = vmul.f32 %v1525_v18, %v759_v36  ;;  %v804_v49 = vadd.f32 %v1530_v19, %v781_v40  ;;  %v1154_v2 = vpack.c.bf16 %v865_v56, %v865_v56  ;;  %945 = vst.msk [vmem:[%s1672_s5] sm:$0xf] %vm944_vm2, %v1153_v60  ;;  %v767_v30 = vld [vmem:[#allocation2 + $0x68] sm:$0xff]  ;;  %v810_v36 = vadd.f32 %v1530_v19, %v787_v28 }
 0x13c   : > { %v854_v5 = vadd.f32 %v1183_v55, %v806_v59  ;;  %v807_v9 = vadd.f32 %v1530_v19, %v784_v63  ;;  %948 = vst.msk [vmem:[%s1672_s5 + $0xc] sm:$0xf] %vm944_vm2, %v1156_v7  ;;  %v811_v42 = vadd.f32 %v1530_v19, %v788_v33  ;;  %v790_v43 = vmul.f32 %v1525_v18, %v767_v30 }
 0x13d   : > { %v805_v54 = vadd.f32 %v1530_v19, %v782_v45  ;;  %v852_v58 = vadd.f32 %v1179_v41, %v804_v49  ;;  %946 = vst.msk [vmem:[%s1672_s5 + $0x4] sm:$0xf] %vm944_vm2, %v1154_v2  ;;  %v857_v41 = vadd.f32 %v1188_v23, %v809_v32  ;;  %v872_v45 = vmax.f32 %v856_v35, 0.0 }
 0x13e   : > { %v870_v14 = vmax.f32 %v854_v5, 0.0  ;;  %v855_v21 = vadd.f32 %v1184_v10, %v807_v9  ;;  %v812_v47 = vadd.f32 %v1530_v19, %v789_v37  ;;  %v1196_v48 = vunpack.c.h.bf16 %v1206_v25 }
 0x13f   : > { %v853_v62 = vadd.f32 %v1180_v46, %v805_v54  ;;  %v868_v4 = vmax.f32 %v852_v58, 0.0  ;;  %v858_v46 = vadd.f32 %v1191_v29, %v810_v36  ;;  %v873_v49 = vmax.f32 %v857_v41, 0.0 }
 0x140   : > { %v1159_v26 = vpack.c.bf16 %v870_v14, %v870_v14  ;;  %v871_v31 = vmax.f32 %v855_v21, 0.0  ;;  %v859_v50 = vadd.f32 %v1192_v34, %v811_v42  ;;  %v813_v51 = vadd.f32 %v1530_v19, %v790_v43 }
 0x141   : > { %v869_v8 = vmax.f32 %v853_v62, 0.0  ;;  %v1157_v13 = vpack.c.bf16 %v868_v4, %v868_v4  ;;  %v791_v52 = vmul.f32 %v1525_v18, %v768_v39  ;;  %v1161_v54 = vpack.c.bf16 %v872_v45, %v872_v45 }
 0x142   : > { %951 = vst.msk [vmem:[%s1672_s5 + $0x18] sm:$0xf] %vm944_vm2, %v1159_v26  ;;  %v1160_v40 = vpack.c.bf16 %v871_v31, %v871_v31  ;;  %v874_v55 = vmax.f32 %v858_v46, 0.0  ;;  %v860_v56 = vadd.f32 %v1195_v38, %v812_v47  ;;  %v1199_v57 = vunpack.c.l.bf16 %v1207_v44 }
 0x143   : > { %v1158_v20 = vpack.c.bf16 %v869_v8, %v869_v8  ;;  %949 = vst.msk [vmem:[%s1672_s5 + $0x10] sm:$0xf] %vm944_vm2, %v1157_v13  ;;  %v1162_v58 = vpack.c.bf16 %v873_v49, %v873_v49  ;;  %v875_v59 = vmax.f32 %v859_v50, 0.0  ;;  %v861_v60 = vadd.f32 %v1196_v48, %v813_v51  ;;  %953 = vst.msk [vmem:[%s1672_s5 + $0x20] sm:$0xf] %vm944_vm2, %v1161_v54 }
 0x144   : > { %952 = vst.msk [vmem:[%s1672_s5 + $0x1c] sm:$0xf] %vm944_vm2, %v1160_v40  ;;  %v814_v61 = vadd.f32 %v1530_v19, %v791_v52  ;;  %v1163_v62 = vpack.c.bf16 %v874_v55, %v874_v55  ;;  %v876_v63 = vmax.f32 %v860_v56, 0.0  ;;  %v792_v0 = vmul.f32 %v1525_v18, %v769_v53 }
 0x145   : > { %950 = vst.msk [vmem:[%s1672_s5 + $0x14] sm:$0xf] %vm944_vm2, %v1158_v20  ;;  %v1200_v1 = vunpack.c.h.bf16 %v1207_v44  ;;  %954 = vst.msk [vmem:[%s1672_s5 + $0x24] sm:$0xf] %vm944_vm2, %v1162_v58  ;;  %v1164_v2 = vpack.c.bf16 %v875_v59, %v875_v59  ;;  %v877_v3 = vmax.f32 %v861_v60, 0.0 }
 0x146   : > { %v862_v4 = vadd.f32 %v1199_v57, %v814_v61  ;;  %955 = vst.msk [vmem:[%s1672_s5 + $0x28] sm:$0xf] %vm944_vm2, %v1163_v62  ;;  %v1165_v5 = vpack.c.bf16 %v876_v63, %v876_v63  ;;  %v815_v6 = vadd.f32 %v1530_v19, %v792_v0 }
 0x147   : > { %956 = vst.msk [vmem:[%s1672_s5 + $0x2c] sm:$0xf] %vm944_vm2, %v1164_v2  ;;  %v1166_v18 = vpack.c.bf16 %v877_v3, %v877_v3 }
 0x148   : > { %v878_v7 = vmax.f32 %v862_v4, 0.0  ;;  %957 = vst.msk [vmem:[%s1672_s5 + $0x30] sm:$0xf] %vm944_vm2, %v1165_v5  ;;  %v863_v8 = vadd.f32 %v1200_v1, %v815_v6 }
 0x149   : > { %958 = vst.msk [vmem:[%s1672_s5 + $0x34] sm:$0xf] %vm944_vm2, %v1166_v18 }
 0x14a   : > { %v1167_v9 = vpack.c.bf16 %v878_v7, %v878_v7  ;;  %v879_v19 = vmax.f32 %v863_v8, 0.0 }
 0x14c   : > { %959 = vst.msk [vmem:[%s1672_s5 + $0x38] sm:$0xf] %vm944_vm2, %v1167_v9  ;;  %v1168_v10 = vpack.c.bf16 %v879_v19, %v879_v19 }
 0x14e   : > { %960 = vst.msk [vmem:[%s1672_s5 + $0x3c] sm:$0xf] %vm944_vm2, %v1168_v10 }
 0x14f PF: > { %s15_s22 = sadd.s32 1, %s1367_s22   ;;  %s1673_s18 = smov %s1355_s19 }
 0x150   : > { %p12_p12 = scmp.ge.s32.totalorder %s15_s22, 7   ;;  %s1674_s19 = smov %s1435_s26 }
 0x151   : > { %s1675_s20 = smov %s1363_s21  ;;  %s1676_s21 = smov %s1678_s23 }
 0x152   :  { %14 = sbr.rel (!%p12_p12) target bundleno = 3 (0x3), region = 136 }

// kernel: resnet18_forward.28
= control target key start
LH: loop header
LB: loop body
LE: loop exit
PB: predicated region body
PF: predicated region fallthrough
CT: control target
= control target key end

     0   :  { %s867_s15 = smov 0   ;;  %s869_s16 = smov 0   ;;  %s963_s0 = inlined_call_operand.vmem [shape: bf16[32,640], index: 0, kind: input, shape index: {}]   ;;  %s964_s1 = inlined_call_operand.vmem [shape: bf16[640,128], index: 1, kind: input, shape index: {}]   ;;  %s965_s2 = inlined_call_operand.vmem [shape: f32[1,128], index: 2, kind: input, shape index: {}]   ;;  %s966_s3 = inlined_call_operand.vmem [shape: f32[1,128], index: 3, kind: input, shape index: {}]   ;;  %s967_s4 = inlined_call_operand.vmem [shape: bf16[32,128], index: 4, kind: output, shape index: {}]  }
   0x1   :  { %s871_s17 = smov 0   ;;  %s873_s18 = smov 0  }
   0x2   :  { %s875_s19 = smov 0  }
   0x3 LB: > { %s26_s20 = sadd.s32 1, %s835_s18  ;;  %p49_p1 = scmp.ne.s32.totalorder %s827_s16, %s823_s15  ;;  %s839_s19 = sphi %s875_s19, %s14_s19   ;;  %s835_s18 = sphi %s873_s18, %s971_s18   ;;  %s831_s17 = sphi %s871_s17, %s970_s17   ;;  %s827_s16 = sphi %s869_s16, %s969_s16   ;;  %s823_s15 = sphi %s867_s15, %s968_s15  }
   0x4   : > { %p27_p0 = scmp.ge.s32.totalorder %s26_s20, 5  ;;  %p50_p2 = scmp.eq.s32.totalorder %s839_s19, 0 }
   0x5   : > { %s42_s22 = sadd.s32 1, %s827_s16  ;;  %p676_p5 = scmp.ge.s32.totalorder %s839_s19, 5 }
   0x6   : > { %s973_s20 = smov (%p27_p0, %s26_s20), 0  ;;  %p51_p3 = por %p50_p2, %p49_p1 }
   0x7   : > { %s38_s21 = ssub.s32 %s835_s18, %s973_s20  ;;  %195 = sbr.rel (%p676_p5) target bundleno = 21 (0x15), region = 24 }
   0x8   : > { %p40_p4 = scmp.eq.s32.totalorder %s38_s21, 0 }
   0xa   : > { %s902_s23 = scalar_select %p40_p4, %s827_s16, %s42_s22  }
   0xe   : > { %198 = sbr.rel (!%p51_p3) target bundleno = 21 (0x15), region = 28  ;;  %s200_s24 = sand.u32 (%p51_p3), 1, %s827_s16  }
   0xf   : > { %s678_s25 = sshll.u32 (%p51_p3), %s835_s18, 2  ;;  %s677_s26 = sshll.u32 (%p51_p3), %s200_s24, 4 }
  0x10   : > { %s207_s29 = scalar_lea.vmem (%p51_p3), %s963_s0, %s678_s25  ;;  %s202_s30 = scalar_lea.vmem (%p51_p3), [#allocation3], %s677_s26 }
  0x11   : > { %v223_v0 = vld [vmem:[%s207_s29] sm:$0xf] (%p51_p3)  ;;  %v225_v1 = vld [vmem:[%s207_s29 + $0x14] sm:$0xf] (%p51_p3)  ;;  %v227_v2 = vld [vmem:[%s207_s29 + $0x28] sm:$0xf] (%p51_p3) }
  0x12   : > { %224 = vst [vmem:[%s202_s30] sm:$0xf] (%p51_p3), %v223_v0  ;;  %226 = vst [vmem:[%s202_s30 + $0x4] sm:$0xf] (%p51_p3), %v225_v1  ;;  %v229_v3 = vld [vmem:[%s207_s29 + $0x3c] sm:$0xf] (%p51_p3) }
  0x13   : > { %228 = vst [vmem:[%s202_s30 + $0x8] sm:$0xf] (%p51_p3), %v227_v2  ;;  %230 = vst [vmem:[%s202_s30 + $0xc] sm:$0xf] (%p51_p3), %v229_v3 }
  0x15 PF: > { %p679_p6 = scmp.ge.s32.totalorder %s839_s19, 1  ;;  %p272_p7 = scmp.lt.s32.totalorder %s839_s19, 6 }
  0x17   : > { %p273_p8 = pnand %p679_p6, %p272_p7 }
  0x18   : > { %s279_s5 = sand.u32 (!%p273_p8), 1, %s823_s15   ;;  %s681_s6 = sshll.u32 (!%p273_p8), %s831_s17, 4 }
  0x19   : > { %276 = sbr.rel (%p273_p8) target bundleno = 306 (0x132), region = 73  ;;  %s914_s7 = sshll.u32 (!%p273_p8), %s279_s5, 4 }
  0x1a   : > { %p323_p9 = scmp.lt.s32.totalorder (!%p273_p8), %s681_s6, 79  ;;  %s281_s12 = scalar_lea.vmem (!%p273_p8), [#allocation3], %s914_s7 }
  0x1b   : > { %p683_p10 = scmp.ne.s32.totalorder (!%p273_p8), %s831_s17, 0 }
  0x20   : > { %s975_s6 = smov (!%p323_p9, %s681_s6), 79  ;;  %350 = sbr.rel (%p683_p10) target bundleno = 39 (0x27), region = 81 }
  0x21   : > { %s682_s8 = sshll.u32 %s975_s6, 2  ;;  %v841_v4 = vmov (!%p683_p10), 0.0  }
  0x22   : > { %s919_s11 = scalar_lea.vmem %s964_s1, %s682_s8  ;;  %351 = vst [vmem:[#allocation2] sm:$0xff] (!%p683_p10), %v841_v4  ;;  %352 = vst [vmem:[#allocation2 + $0x8] sm:$0xff] (!%p683_p10), %v841_v4 }
  0x23   : > { %353 = vst [vmem:[#allocation2 + $0x10] sm:$0xff] (!%p683_p10), %v841_v4  ;;  %354 = vst [vmem:[#allocation2 + $0x18] sm:$0xff] (!%p683_p10), %v841_v4 }
  0x27 PF: > { %v791_v5 = vld [vmem:[%s919_s11] sm:$0xff]   ;;  %v792_v6 = vld [vmem:[%s919_s11 + $0x8] sm:$0xff]   ;;  %v793_v7 = vld [vmem:[%s919_s11 + $0x10] sm:$0xff]   ;;  %p694_p11 = scmp.ne.s32.totalorder %s831_s17, 4 }
  0x28   : > { %730 = vmatprep.subr.bf16.mxu0 %v791_v5  ;;  %v794_v8 = vld [vmem:[%s919_s11 + $0x18] sm:$0xff]   ;;  %v799_v9 = vld [vmem:[%s281_s12] sm:$0xff]   ;;  %v796_v11 = vld [vmem:[%s919_s11 + $0x28] sm:$0xff]  }
  0x29   : > { %731 = vmatpush3.bf16.msra.mxu0 %v791_v5  ;;  %746 = vmatprep.mubr.bf16.mxu0 %v799_v9  ;;  %v795_v10 = vld [vmem:[%s919_s11 + $0x20] sm:$0xff]   ;;  %v797_v12 = vld [vmem:[%s919_s11 + $0x30] sm:$0xff]   ;;  %v798_v13 = vld [vmem:[%s919_s11 + $0x38] sm:$0xff]  }
  0x2a   : > { %732 = vmatprep.subr.bf16.mxu0 %v792_v6  ;;  %v800_v14 = vld [vmem:[%s281_s12 + $0x8] sm:$0xff]   ;;  %v357_v15 = vld [vmem:[#allocation2 + $0x10] sm:$0xff]  ;;  %v355_v16 = vld [vmem:[#allocation2] sm:$0xff] }
  0x2b   : > { %v358_v18 = vld [vmem:[#allocation2 + $0x18] sm:$0xff]  ;;  %v356_v21 = vld [vmem:[#allocation2 + $0x8] sm:$0xff]  ;;  %v695_v29 = vld [vmem:[%s965_s2] ss:$0 sm:$0xff] (!%p694_p11) }
  0x2c   : > { %v696_v32 = vld [vmem:[%s966_s3] ss:$0 sm:$0xff] (!%p694_p11) }
  0x2d   : > { %733 = vmatpush3.bf16.msra.mxu0 %v792_v6 }
  0x2e   : > { %734 = vmatprep.subr.bf16.mxu0 %v793_v7 }
  0x31   : > { %735 = vmatpush3.bf16.msra.mxu0 %v793_v7 }
  0x32   : > { %736 = vmatprep.subr.bf16.mxu0 %v794_v8 }
  0x35   : > { %737 = vmatpush3.bf16.msra.mxu0 %v794_v8 }
  0x36   : > { %738 = vmatprep.subr.bf16.mxu0 %v795_v10 }
  0x39   : > { %739 = vmatpush3.bf16.msra.mxu0 %v795_v10 }
  0x3a   : > { %740 = vmatprep.subr.bf16.mxu0 %v796_v11 }
  0x3d   : > { %741 = vmatpush3.bf16.msra.mxu0 %v796_v11 }
  0x3e   : > { %742 = vmatprep.subr.bf16.mxu0 %v797_v12 }
  0x41   : > { %743 = vmatpush3.bf16.msra.mxu0 %v797_v12 }
  0x42   : > { %744 = vmatprep.subr.bf16.mxu0 %v798_v13 }
  0x45   : > { %745 = vmatpush3.bf16.msra.mxu0 %v798_v13 }
  0x48   : > { %747 = vmatmul.mubr.bf16.vlgmr.msra.gmra.mrb[0].mxu0 %v800_v14 }
 0x11b   : > { %v748_v17 = vpop.f32.mrb[0].mxu0  ;;  %499 = sbr.rel (%p694_p11) target bundleno = 306 (0x132), region = 85 }
 0x11c   : > { %v490_v19 = vadd.f32 %v748_v17, %v357_v15  ;;  %v473_v20 = vpop.f32.mrb[1].mxu0 }
 0x11d   : > { %v488_v22 = vadd.f32 %v473_v20, %v355_v16  ;;  %v749_v23 = vpop.f32.mrb[2].mxu0 }
 0x11e   : > { %494 = vst [vmem:[#allocation2 + $0x10] sm:$0xff] %v490_v19  ;;  %v491_v24 = vadd.f32 %v749_v23, %v358_v18  ;;  %v476_v25 = vpop.f32.mrb[3].mxu0 }
 0x11f   : > { %492 = vst [vmem:[#allocation2] sm:$0xff] %v488_v22  ;;  %v489_v26 = vadd.f32 %v476_v25, %v356_v21 }
 0x120   : > { %495 = vst [vmem:[#allocation2 + $0x18] sm:$0xff] %v491_v24 }
 0x121   : > { %493 = vst [vmem:[#allocation2 + $0x8] sm:$0xff] %v489_v26 }
 0x125   : > { %v502_v33 = vld [vmem:[#allocation2 + $0x10] sm:$0xff] }
 0x126   : > { %v500_v27 = vld [vmem:[#allocation2] sm:$0xff]  ;;  %v513_v35 = vmul.f32 %v695_v29, %v502_v33 }
 0x127   : > { %v511_v30 = vmul.f32 %v695_v29, %v500_v27  ;;  %v503_v34 = vld [vmem:[#allocation2 + $0x18] sm:$0xff] }
 0x128   : > { %v501_v28 = vld [vmem:[#allocation2 + $0x8] sm:$0xff]  ;;  %v514_v36 = vmul.f32 %v695_v29, %v503_v34  ;;  %v524_v39 = vadd.f32 %v696_v32, %v513_v35 }
 0x129   : > { %v512_v31 = vmul.f32 %v695_v29, %v501_v28  ;;  %v522_v37 = vadd.f32 %v696_v32, %v511_v30 }
 0x12a   : > { %v525_v40 = vadd.f32 %v696_v32, %v514_v36  ;;  %v528_v43 = vmax.f32 %v524_v39, 0.0 }
 0x12b   : > { %v523_v38 = vadd.f32 %v696_v32, %v512_v31  ;;  %v526_v41 = vmax.f32 %v522_v37, 0.0 }
 0x12c   : > { %v529_v44 = vmax.f32 %v525_v40, 0.0 }
 0x12d   : > { %v527_v42 = vmax.f32 %v523_v38, 0.0 }
 0x12e   : > { %v717_v46 = vpack.c.bf16 %v529_v44, %v528_v43 }
 0x12f   : > { %v712_v45 = vpack.c.bf16 %v527_v42, %v526_v41 }
 0x130   : > { %719 = vst [vmem:[%s967_s4 + $0x8] sm:$0xff] %v717_v46  }
 0x131   : > { %713 = vst [vmem:[%s967_s4] sm:$0xff] %v712_v45  }
 0x132 PF: > { %s14_s19 = sadd.s32 1, %s839_s19   ;;  %s968_s15 = smov %s827_s16 }
 0x133   : > { %p11_p12 = scmp.ge.s32.totalorder %s14_s19, 7   ;;  %s969_s16 = smov %s902_s23 }
 0x134   : > { %s970_s17 = smov %s835_s18  ;;  %s971_s18 = smov %s973_s20 }
 0x135   :  { %13 = sbr.rel (!%p11_p12) target bundleno = 3 (0x3), region = 129 }

// kernel: resnet18_forward.29
= control target key start
LH: loop header
LB: loop body
LE: loop exit
PB: predicated region body
PF: predicated region fallthrough
CT: control target
= control target key end

     0   :  { %s358_s1 = inlined_call_operand.vmem [shape: bf16[128,128], index: 1, kind: input, shape index: {}]   ;;  %s359_s0 = inlined_call_operand.vmem [shape: bf16[32,128], index: 0, kind: input, shape index: {}]   ;;  %s360_s2 = inlined_call_operand.vmem [shape: f32[1,128], index: 2, kind: input, shape index: {}]   ;;  %s361_s3 = inlined_call_operand.vmem [shape: f32[1,128], index: 3, kind: input, shape index: {}]   ;;  %s362_s4 = inlined_call_operand.vmem [shape: bf16[32,128], index: 4, kind: output, shape index: {}]  }
   0x1   :  { %v281_v0 = vld [vmem:[%s358_s1] sm:$0xff]   ;;  %v282_v1 = vld [vmem:[%s358_s1 + $0x8] sm:$0xff]   ;;  %v283_v2 = vld [vmem:[%s358_s1 + $0x10] sm:$0xff]  }
   0x2   :  { %261 = vmatprep.subr.bf16.mxu0 %v281_v0  ;;  %v284_v3 = vld [vmem:[%s358_s1 + $0x18] sm:$0xff]   ;;  %v289_v4 = vld [vmem:[%s359_s0] sm:$0xff]   ;;  %v286_v6 = vld [vmem:[%s358_s1 + $0x28] sm:$0xff]  }
   0x3   :  { %262 = vmatpush3.bf16.msra.mxu0 %v281_v0  ;;  %277 = vmatprep.mubr.bf16.mxu0 %v289_v4  ;;  %v285_v5 = vld [vmem:[%s358_s1 + $0x20] sm:$0xff]   ;;  %v287_v7 = vld [vmem:[%s358_s1 + $0x30] sm:$0xff]   ;;  %v288_v8 = vld [vmem:[%s358_s1 + $0x38] sm:$0xff]  }
   0x4   :  { %263 = vmatprep.subr.bf16.mxu0 %v282_v1  ;;  %v290_v9 = vld [vmem:[%s359_s0 + $0x8] sm:$0xff]   ;;  %v230_v10 = vld [vmem:[%s360_s2] ss:$0 sm:$0xff] }
   0x5   :  { %v231_v14 = vld [vmem:[%s361_s3] ss:$0 sm:$0xff] }
   0x7   :  { %264 = vmatpush3.bf16.msra.mxu0 %v282_v1 }
   0x8   :  { %265 = vmatprep.subr.bf16.mxu0 %v283_v2 }
   0xb   :  { %266 = vmatpush3.bf16.msra.mxu0 %v283_v2 }
   0xc   :  { %267 = vmatprep.subr.bf16.mxu0 %v284_v3 }
   0xf   :  { %268 = vmatpush3.bf16.msra.mxu0 %v284_v3 }
  0x10   :  { %269 = vmatprep.subr.bf16.mxu0 %v285_v5 }
  0x13   :  { %270 = vmatpush3.bf16.msra.mxu0 %v285_v5 }
  0x14   :  { %271 = vmatprep.subr.bf16.mxu0 %v286_v6 }
  0x17   :  { %272 = vmatpush3.bf16.msra.mxu0 %v286_v6 }
  0x18   :  { %273 = vmatprep.subr.bf16.mxu0 %v287_v7 }
  0x1b   :  { %274 = vmatpush3.bf16.msra.mxu0 %v287_v7 }
  0x1c   :  { %275 = vmatprep.subr.bf16.mxu0 %v288_v8 }
  0x1f   :  { %276 = vmatpush3.bf16.msra.mxu0 %v288_v8 }
  0x22   :  { %278 = vmatmul.mubr.bf16.vlgmr.msra.gmra.mrb[0].mxu0 %v290_v9 }
  0xf5   :  { %v279_v11 = vpop.f32.mrb[0].mxu0 }
  0xf6   :  { %v183_v12 = vmul.f32 %v279_v11, %v230_v10  ;;  %v144_v13 = vpop.f32.mrb[1].mxu0 }
  0xf7   :  { %v181_v15 = vmul.f32 %v230_v10, %v144_v13  ;;  %v280_v16 = vpop.f32.mrb[2].mxu0 }
  0xf8   :  { %v184_v17 = vmul.f32 %v280_v16, %v230_v10  ;;  %v147_v18 = vpop.f32.mrb[3].mxu0  ;;  %v194_v20 = vadd.f32 %v231_v14, %v183_v12 }
  0xf9   :  { %v182_v19 = vmul.f32 %v230_v10, %v147_v18  ;;  %v192_v22 = vadd.f32 %v231_v14, %v181_v15 }
  0xfa   :  { %v195_v21 = vadd.f32 %v231_v14, %v184_v17 }
  0xfb   :  { %v193_v23 = vadd.f32 %v231_v14, %v182_v19 }
  0xfc   :  { %v248_v24 = vpack.c.bf16 %v195_v21, %v194_v20 }
  0xfd   :  { %v243_v25 = vpack.c.bf16 %v193_v23, %v192_v22 }
  0xfe   :  { %250 = vst [vmem:[%s362_s4 + $0x8] sm:$0xff] %v248_v24  }
  0xff   :  { %244 = vst [vmem:[%s362_s4] sm:$0xff] %v243_v25  }

// kernel: resnet18_forward.30
= control target key start
LH: loop header
LB: loop body
LE: loop exit
PB: predicated region body
PF: predicated region fallthrough
CT: control target
= control target key end

     0   :  { %s1247_s18 = smov 0   ;;  %s1249_s19 = smov 0   ;;  %s1366_s0 = inlined_call_operand.vmem [shape: bf16[32,1152], index: 0, kind: input, shape index: {}]   ;;  %s1367_s1 = inlined_call_operand.vmem [shape: bf16[1152,128], index: 1, kind: input, shape index: {}]   ;;  %s1368_s2 = inlined_call_operand.vmem [shape: f32[1,128], index: 2, kind: input, shape index: {}]   ;;  %s1369_s3 = inlined_call_operand.vmem [shape: f32[1,128], index: 3, kind: input, shape index: {}]   ;;  %s1370_s4 = inlined_call_operand.vmem [shape: bf16[32,128], index: 4, kind: input, shape index: {}]   ;;  %s1371_s5 = inlined_call_operand.vmem [shape: bf16[32,128], index: 5, kind: output, shape index: {}]  }
   0x1   :  { %s1251_s20 = smov 0   ;;  %s1253_s21 = smov 0  }
   0x2   :  { %s1255_s22 = smov 0  }
   0x3 LB: > { %s27_s23 = sadd.s32 1, %s1210_s21  ;;  %p50_p1 = scmp.ne.s32.totalorder %s1202_s19, %s1198_s18  ;;  %s1214_s22 = sphi %s1255_s22, %s15_s22   ;;  %s1210_s21 = sphi %s1253_s21, %s1375_s21   ;;  %s1206_s20 = sphi %s1251_s20, %s1374_s20   ;;  %s1202_s19 = sphi %s1249_s19, %s1373_s19   ;;  %s1198_s18 = sphi %s1247_s18, %s1372_s18  }
   0x4   : > { %p28_p0 = scmp.ge.s32.totalorder %s27_s23, 3  ;;  %p51_p2 = scmp.eq.s32.totalorder %s1214_s22, 0 }
   0x5   : > { %s43_s25 = sadd.s32 1, %s1202_s19  ;;  %p964_p5 = scmp.ge.s32.totalorder %s1214_s22, 3 }
   0x6   : > { %s1377_s23 = smov (%p28_p0, %s27_s23), 0  ;;  %p52_p3 = por %p51_p2, %p50_p1 }
   0x7   : > { %s39_s24 = ssub.s32 %s1210_s21, %s1377_s23  ;;  %236 = sbr.rel (%p964_p5) target bundleno = 23 (0x17), region = 28 }
   0x8   : > { %p41_p4 = scmp.eq.s32.totalorder %s39_s24, 0 }
   0xa   : > { %s1282_s26 = scalar_select %p41_p4, %s1202_s19, %s43_s25  }
   0xe   : > { %239 = sbr.rel (!%p52_p3) target bundleno = 23 (0x17), region = 32  ;;  %s241_s27 = sand.u32 (%p52_p3), 1, %s1202_s19  }
   0xf   : > { %s1018_s28 = smul.u32 (%p52_p3), 12, %s1210_s21 }
  0x10   : > { %s1101_s29 = smul.u32 (%p52_p3), 48, %s241_s27 }
  0x11   : > { %s249_s7 = scalar_lea.vmem (%p52_p3), %s1366_s0, %s1018_s28 }
  0x12   : > { %v264_v0 = vld [vmem:[%s249_s7] sm:$0xff] (%p52_p3)  ;;  %v268_v2 = vld [vmem:[%s249_s7 + $0x48] sm:$0xff] (%p52_p3)  ;;  %s243_s8 = scalar_lea.vmem (%p52_p3), [#allocation3], %s1101_s29  ;;  %v970_v6 = vld [vmem:[%s249_s7 + $0x50] sm:$0xf] (%p52_p3) }
  0x13   : > { %v266_v1 = vld [vmem:[%s249_s7 + $0x24] sm:$0xff] (%p52_p3)  ;;  %265 = vst [vmem:[%s243_s8] sm:$0xff] (%p52_p3), %v264_v0  ;;  %269 = vst [vmem:[%s243_s8 + $0x18] sm:$0xff] (%p52_p3), %v268_v2  ;;  %v270_v3 = vld [vmem:[%s249_s7 + $0x6c] sm:$0xff] (%p52_p3) }
  0x14   : > { %267 = vst [vmem:[%s243_s8 + $0xc] sm:$0xff] (%p52_p3), %v266_v1  ;;  %v966_v4 = vld [vmem:[%s249_s7 + $0x8] sm:$0xf] (%p52_p3)  ;;  %v968_v5 = vld [vmem:[%s249_s7 + $0x2c] sm:$0xf] (%p52_p3)  ;;  %271 = vst [vmem:[%s243_s8 + $0x24] sm:$0xff] (%p52_p3), %v270_v3 }
  0x15   : > { %967 = vst [vmem:[%s243_s8 + $0x8] sm:$0xf] %v966_v4  ;;  %969 = vst [vmem:[%s243_s8 + $0x14] sm:$0xf] %v968_v5  ;;  %v972_v7 = vld [vmem:[%s249_s7 + $0x74] sm:$0xf] }
  0x16   : > { %971 = vst [vmem:[%s243_s8 + $0x20] sm:$0xf] %v970_v6  ;;  %973 = vst [vmem:[%s243_s8 + $0x2c] sm:$0xf] %v972_v7 }
  0x17 PF: > { %p974_p6 = scmp.ge.s32.totalorder %s1214_s22, 1  ;;  %p303_p7 = scmp.lt.s32.totalorder %s1214_s22, 4 }
  0x19   : > { %p304_p8 = pnand %p974_p6, %p303_p7 }
  0x1a   : > { %s310_s9 = sand.u32 (!%p304_p8), 1, %s1198_s18   ;;  %s364_s10 = smul.u32 (!%p304_p8), 48, %s1206_s20 }
  0x1b   : > { %307 = sbr.rel (%p304_p8) target bundleno = 322 (0x142), region = 62  ;;  %p976_p10 = scmp.ne.s32.totalorder (!%p304_p8), %s1206_s20, 0 }
  0x1c   : > { %s1102_s11 = smul.u32 (!%p304_p8), 48, %s310_s9  ;;  %p365_p9 = scmp.lt.s32.totalorder (!%p304_p8), %s364_s10, 143 }
  0x1e   : > { %s1299_s16 = scalar_lea.vmem (!%p304_p8), [#allocation3], %s1102_s11 }
  0x22   : > { %s1379_s10 = smov (!%p365_p9, %s364_s10), 143  ;;  %401 = sbr.rel (%p976_p10) target bundleno = 41 (0x29), region = 70 }
  0x23   : > { %s975_s12 = sshll.u32 %s1379_s10, 2  ;;  %v1216_v8 = vmov (!%p976_p10), 0.0  }
  0x24   : > { %s1297_s15 = scalar_lea.vmem %s1367_s1, %s975_s12  ;;  %402 = vst [vmem:[#allocation2] sm:$0xff] (!%p976_p10), %v1216_v8  ;;  %403 = vst [vmem:[#allocation2 + $0x8] sm:$0xff] (!%p976_p10), %v1216_v8 }
  0x25   : > { %404 = vst [vmem:[#allocation2 + $0x10] sm:$0xff] (!%p976_p10), %v1216_v8  ;;  %405 = vst [vmem:[#allocation2 + $0x18] sm:$0xff] (!%p976_p10), %v1216_v8 }
  0x29 PF: > { %v1144_v9 = vld [vmem:[%s1297_s15 + $0x40] sm:$0xff]   ;;  %v1147_v12 = vld [vmem:[%s1297_s15 + $0x48] sm:$0xff]   ;;  %v1150_v15 = vld [vmem:[%s1297_s15 + $0x50] sm:$0xff]   ;;  %p1007_p11 = scmp.ne.s32.totalorder %s1206_s20, 2 }
  0x2a   : > { %v1145_v10 = vld [vmem:[%s1297_s15] sm:$0xff]   ;;  %1043 = vmatprep.subr.bf16.mxu0 %v1144_v9  ;;  %v1148_v13 = vld [vmem:[%s1297_s15 + $0x8] sm:$0xff]   ;;  %v1151_v16 = vld [vmem:[%s1297_s15 + $0x10] sm:$0xff]  }
  0x2b   : > { %v1146_v11 = vld [vmem:[%s1297_s15 + $0x80] sm:$0xff]   ;;  %1044 = vmatpush3.bf16.msra.mxu0 %v1145_v10  ;;  %v1149_v14 = vld [vmem:[%s1297_s15 + $0x88] sm:$0xff]   ;;  %v1152_v17 = vld [vmem:[%s1297_s15 + $0x90] sm:$0xff]  }
  0x2c   : > { %1081 = vmatprep.subr.bf16.mxu1 %v1146_v11  ;;  %1045 = vmatprep.subr.bf16.mxu0 %v1147_v12  ;;  %v1153_v18 = vld [vmem:[%s1297_s15 + $0x58] sm:$0xff]   ;;  %v1156_v21 = vld [vmem:[%s1297_s15 + $0x60] sm:$0xff]   ;;  %v1159_v24 = vld [vmem:[%s1297_s15 + $0x68] sm:$0xff]  }
  0x2d   : > { %1082 = vmatpush3.bf16.msra.mxu1 %v1146_v11  ;;  %v1154_v19 = vld [vmem:[%s1297_s15 + $0x18] sm:$0xff]   ;;  %v1158_v22 = vld [vmem:[%s1297_s15 + $0xa0] sm:$0xff]   ;;  %v1161_v25 = vld [vmem:[%s1297_s15 + $0xa8] sm:$0xff]  }
  0x2e   : > { %1083 = vmatprep.subr.bf16.mxu1 %v1149_v14  ;;  %v1155_v20 = vld [vmem:[%s1297_s15 + $0x98] sm:$0xff]   ;;  %v1157_v23 = vld [vmem:[%s1297_s15 + $0x20] sm:$0xff]   ;;  %v1160_v26 = vld [vmem:[%s1297_s15 + $0x28] sm:$0xff]  }
  0x2f   : > { %1046 = vmatpush3.bf16.msra.mxu0 %v1148_v13  ;;  %v1162_v27 = vld [vmem:[%s1297_s15 + $0x70] sm:$0xff]   ;;  %v1165_v30 = vld [vmem:[%s1297_s15 + $0x78] sm:$0xff]   ;;  %v406_v45 = vld [vmem:[#allocation2] sm:$0xff] }
  0x30   : > { %1047 = vmatprep.subr.bf16.mxu0 %v1150_v15  ;;  %v1163_v28 = vld [vmem:[%s1297_s15 + $0x30] sm:$0xff]   ;;  %v1167_v31 = vld [vmem:[%s1297_s15 + $0xb8] sm:$0xff]   ;;  %v407_v50 = vld [vmem:[#allocation2 + $0x8] sm:$0xff] }
  0x31   : > { %1084 = vmatpush3.bf16.msra.mxu1 %v1149_v14  ;;  %v1164_v29 = vld [vmem:[%s1297_s15 + $0xb0] sm:$0xff]   ;;  %v1166_v34 = vld [vmem:[%s1297_s15 + $0x38] sm:$0xff]   ;;  %v1008_v5 = vld [vmem:[%s1368_s2] ss:$0 sm:$0xff] (!%p1007_p11) }
  0x32   : > { %1085 = vmatprep.subr.bf16.mxu1 %v1152_v17  ;;  %v1170_v32 = vld [vmem:[%s1299_s16 + $0x4] ss:$12 sps:$4 sm:$0xff]   ;;  %v1171_v33 = vld [vmem:[%s1299_s16 + $0x8] ss:$12 sps:$4 sm:$0xff]   ;;  %v1168_v35 = vld [vmem:[%s1299_s16] ss:$12 sps:$4 sm:$0xff]  }
  0x33   : > { %1048 = vmatpush3.bf16.msra.mxu0 %v1151_v16  ;;  %674 = vmatprep.mubr.bf16.mxu0 %v1170_v32  ;;  %v1173_v36 = vld [vmem:[%s1299_s16 + $0x1c] ss:$12 sps:$4 sm:$0xff]   ;;  %v1172_v37 = vld [vmem:[%s1299_s16 + $0x20] ss:$12 sps:$4 sm:$0xff]   ;;  %v1175_v38 = vld [vmem:[%s1299_s16 + $0x18] ss:$12 sps:$4 sm:$0xff]  }
  0x34   : > { %1049 = vmatprep.subr.bf16.mxu0 %v1153_v18  ;;  %1097 = vmatprep.mubr.bf16.mxu1 %v1171_v33  ;;  %v408_v59 = vld [vmem:[#allocation2 + $0x10] sm:$0xff]  ;;  %v409_v63 = vld [vmem:[#allocation2 + $0x18] sm:$0xff]  ;;  %v1009_v8 = vld [vmem:[%s1369_s3] ss:$0 sm:$0xff] (!%p1007_p11) }
  0x35   : > { %1086 = vmatpush3.bf16.msra.mxu1 %v1152_v17  ;;  %v1024_v9 = vld [vmem:[%s1370_s4] sm:$0xff] (!%p1007_p11)   ;;  %v1041_v15 = vld [vmem:[%s1370_s4 + $0x8] sm:$0xff] (!%p1007_p11)  }
  0x36   : > { %1087 = vmatprep.subr.bf16.mxu1 %v1155_v20  ;;  %v1025_v11 = vunpack.c.l.bf16 (!%p1007_p11), %v1024_v9  ;;  %v1026_v12 = vunpack.c.h.bf16 (!%p1007_p11), %v1024_v9 }
  0x37   : > { %1050 = vmatpush3.bf16.msra.mxu0 %v1154_v19  ;;  %v1029_v19 = vunpack.c.l.bf16 (!%p1007_p11), %v1041_v15 }
  0x38   : > { %1051 = vmatprep.subr.bf16.mxu0 %v1156_v21  ;;  %v1030_v21 = vunpack.c.h.bf16 (!%p1007_p11), %v1041_v15 }
  0x39   : > { %1088 = vmatpush3.bf16.msra.mxu1 %v1155_v20 }
  0x3a   : > { %1089 = vmatprep.subr.bf16.mxu1 %v1158_v22 }
  0x3b   : > { %1052 = vmatpush3.bf16.msra.mxu0 %v1157_v23 }
  0x3c   : > { %1053 = vmatprep.subr.bf16.mxu0 %v1159_v24 }
  0x3d   : > { %1090 = vmatpush3.bf16.msra.mxu1 %v1158_v22 }
  0x3e   : > { %1091 = vmatprep.subr.bf16.mxu1 %v1161_v25 }
  0x3f   : > { %1054 = vmatpush3.bf16.msra.mxu0 %v1160_v26 }
  0x40   : > { %1055 = vmatprep.subr.bf16.mxu0 %v1162_v27 }
  0x41   : > { %1092 = vmatpush3.bf16.msra.mxu1 %v1161_v25 }
  0x42   : > { %1093 = vmatprep.subr.bf16.mxu1 %v1164_v29 }
  0x43   : > { %1056 = vmatpush3.bf16.msra.mxu0 %v1163_v28 }
  0x44   : > { %1057 = vmatprep.subr.bf16.mxu0 %v1165_v30 }
  0x45   : > { %1094 = vmatpush3.bf16.msra.mxu1 %v1164_v29 }
  0x46   : > { %1095 = vmatprep.subr.bf16.mxu1 %v1167_v31 }
  0x47   : > { %1058 = vmatpush3.bf16.msra.mxu0 %v1166_v34 }
  0x49   : > { %1096 = vmatpush3.bf16.msra.mxu1 %v1167_v31 }
  0x4a   : > { %675 = vmatmul.mubr.bf16.vlgmr.msra.gmra.mrb[0].mxu0 %v1168_v35 }
  0x4b   : > { %682 = vmatprep.mubr.bf16.mxu0 %v1173_v36 }
  0x4c   : > { %1098 = vmatmul.mubr.bf16.vlgmr.msra.gmra.mrb[0].mxu1 %v1172_v37 }
  0x52   : > { %683 = vmatmul.mubr.bf16.gmra.mrb[4].mxu0 %v1175_v38 }
 0x11d   : > { %v1059_v39 = vpop.f32.mrb[0].mxu0 }
 0x11e   : > { %v1060_v40 = vpop.f32.mrb[1].mxu0 }
 0x11f   : > { %v1061_v41 = vadd.f32 %v1060_v40, %v1059_v39  ;;  %v1062_v42 = vpop.f32.mrb[2].mxu0  ;;  %v1099_v43 = vpop.f32.mrb[0].mxu1 }
 0x120   : > { %v1063_v44 = vpop.f32.mrb[3].mxu0  ;;  %v725_v46 = vpop.f32.mrb[1].mxu1 }
 0x121   : > { %v1064_v47 = vadd.f32 %v1063_v44, %v1062_v42  ;;  %v726_v48 = vadd.f32 %v1061_v41, %v725_v46  ;;  %v1100_v49 = vpop.f32.mrb[2].mxu1 }
 0x122   : > { %v728_v51 = vpop.f32.mrb[3].mxu1 }
 0x123   : > { %v740_v52 = vadd.f32 %v726_v48, %v406_v45  ;;  %v729_v53 = vadd.f32 %v1064_v47, %v728_v51 }
 0x125   : > { %744 = vst [vmem:[#allocation2] sm:$0xff] %v740_v52  ;;  %v741_v54 = vadd.f32 %v729_v53, %v407_v50  ;;  %v1065_v55 = vpop.f32.mrb[4].mxu0 }
 0x126   : > { %v1066_v56 = vpop.f32.mrb[5].mxu0 }
 0x127   : > { %745 = vst [vmem:[#allocation2 + $0x8] sm:$0xff] %v741_v54  ;;  %v1067_v57 = vadd.f32 %v1066_v56, %v1065_v55  ;;  %v1068_v58 = vpop.f32.mrb[6].mxu0 }
 0x128   : > { %v1069_v60 = vpop.f32.mrb[7].mxu0 }
 0x129   : > { %v734_v61 = vadd.f32 %v1099_v43, %v1067_v57  ;;  %v1070_v62 = vadd.f32 %v1069_v60, %v1068_v58  ;;  %751 = sbr.rel (%p1007_p11) target bundleno = 322 (0x142), region = 74 }
 0x12b   : > { %v742_v0 = vadd.f32 %v734_v61, %v408_v59  ;;  %v737_v1 = vadd.f32 %v1100_v49, %v1070_v62 }
 0x12c   : > { %v752_v3 = vld [vmem:[#allocation2] sm:$0xff] (!%p1007_p11) }
 0x12d   : > { %746 = vst [vmem:[#allocation2 + $0x10] sm:$0xff] %v742_v0  ;;  %v743_v2 = vadd.f32 %v737_v1, %v409_v63  ;;  %v763_v6 = vmul.f32 (!%p1007_p11), %v1008_v5, %v752_v3 }
 0x12e   : > { %v753_v4 = vld [vmem:[#allocation2 + $0x8] sm:$0xff] (!%p1007_p11) }
 0x12f   : > { %747 = vst [vmem:[#allocation2 + $0x18] sm:$0xff] %v743_v2  ;;  %v764_v7 = vmul.f32 (!%p1007_p11), %v1008_v5, %v753_v4  ;;  %v774_v16 = vadd.f32 (!%p1007_p11), %v1009_v8, %v763_v6 }
 0x131   : > { %v775_v17 = vadd.f32 %v1009_v8, %v764_v7  ;;  %v786_v22 = vadd.f32 %v1025_v11, %v774_v16 }
 0x133   : > { %v787_v23 = vadd.f32 %v1026_v12, %v775_v17  ;;  %v790_v26 = vmax.f32 %v786_v22, 0.0 }
 0x134   : > { %v754_v10 = vld [vmem:[#allocation2 + $0x10] sm:$0xff] }
 0x135   : > { %v765_v14 = vmul.f32 %v1008_v5, %v754_v10  ;;  %v791_v27 = vmax.f32 %v787_v23, 0.0 }
 0x136   : > { %v755_v13 = vld [vmem:[#allocation2 + $0x18] sm:$0xff] }
 0x137   : > { %v766_v18 = vmul.f32 %v1008_v5, %v755_v13  ;;  %v776_v20 = vadd.f32 %v1009_v8, %v765_v14  ;;  %v1034_v30 = vpack.c.bf16 %v791_v27, %v790_v26 }
 0x139   : > { %v777_v24 = vadd.f32 %v1009_v8, %v766_v18  ;;  %v788_v25 = vadd.f32 %v1029_v19, %v776_v20  ;;  %1035 = vst [vmem:[%s1371_s5] sm:$0xff] %v1034_v30  }
 0x13b   : > { %v789_v28 = vadd.f32 %v1030_v21, %v777_v24  ;;  %v792_v29 = vmax.f32 %v788_v25, 0.0 }
 0x13d   : > { %v793_v31 = vmax.f32 %v789_v28, 0.0 }
 0x13f   : > { %v1039_v32 = vpack.c.bf16 %v793_v31, %v792_v29 }
 0x141   : > { %1042 = vst [vmem:[%s1371_s5 + $0x8] sm:$0xff] %v1039_v32  }
 0x142 PF: > { %s15_s22 = sadd.s32 1, %s1214_s22   ;;  %s1372_s18 = smov %s1202_s19 }
 0x143   : > { %p12_p12 = scmp.ge.s32.totalorder %s15_s22, 5   ;;  %s1373_s19 = smov %s1282_s26 }
 0x144   : > { %s1374_s20 = smov %s1210_s21  ;;  %s1375_s21 = smov %s1377_s23 }
 0x145   :  { %14 = sbr.rel (!%p12_p12) target bundleno = 3 (0x3), region = 127 }

// kernel: resnet18_forward.31
= control target key start
LH: loop header
LB: loop body
LE: loop exit
PB: predicated region body
PF: predicated region fallthrough
CT: control target
= control target key end

     0   :  { %s1142_s15 = smov 0   ;;  %s1144_s16 = smov 0   ;;  %s1255_s0 = inlined_call_operand.vmem [shape: bf16[32,1152], index: 0, kind: input, shape index: {}]   ;;  %s1256_s1 = inlined_call_operand.vmem [shape: bf16[1152,128], index: 1, kind: input, shape index: {}]   ;;  %s1257_s2 = inlined_call_operand.vmem [shape: f32[1,128], index: 2, kind: input, shape index: {}]   ;;  %s1258_s3 = inlined_call_operand.vmem [shape: f32[1,128], index: 3, kind: input, shape index: {}]   ;;  %s1259_s4 = inlined_call_operand.vmem [shape: bf16[32,128], index: 4, kind: output, shape index: {}]  }
   0x1   :  { %s1146_s17 = smov 0   ;;  %s1148_s18 = smov 0  }
   0x2   :  { %s1150_s19 = smov 0  }
   0x3 LB: > { %s26_s20 = sadd.s32 1, %s1110_s18  ;;  %p49_p1 = scmp.ne.s32.totalorder %s1102_s16, %s1098_s15  ;;  %s1114_s19 = sphi %s1150_s19, %s14_s19   ;;  %s1110_s18 = sphi %s1148_s18, %s1263_s18   ;;  %s1106_s17 = sphi %s1146_s17, %s1262_s17   ;;  %s1102_s16 = sphi %s1144_s16, %s1261_s16   ;;  %s1098_s15 = sphi %s1142_s15, %s1260_s15  }
   0x4   : > { %p27_p0 = scmp.ge.s32.totalorder %s26_s20, 3  ;;  %p50_p2 = scmp.eq.s32.totalorder %s1114_s19, 0 }
   0x5   : > { %s42_s22 = sadd.s32 1, %s1102_s16  ;;  %p873_p5 = scmp.ge.s32.totalorder %s1114_s19, 3 }
   0x6   : > { %s1265_s20 = smov (%p27_p0, %s26_s20), 0  ;;  %p51_p3 = por %p50_p2, %p49_p1 }
   0x7   : > { %s38_s21 = ssub.s32 %s1110_s18, %s1265_s20  ;;  %195 = sbr.rel (%p873_p5) target bundleno = 23 (0x17), region = 24 }
   0x8   : > { %p40_p4 = scmp.eq.s32.totalorder %s38_s21, 0 }
   0xa   : > { %s1177_s23 = scalar_select %p40_p4, %s1102_s16, %s42_s22  }
   0xe   : > { %198 = sbr.rel (!%p51_p3) target bundleno = 23 (0x17), region = 28  ;;  %s200_s24 = sand.u32 (%p51_p3), 1, %s1102_s16  }
   0xf   : > { %s927_s25 = smul.u32 (%p51_p3), 12, %s1110_s18 }
  0x10   : > { %s1001_s26 = smul.u32 (%p51_p3), 48, %s200_s24 }
  0x11   : > { %s208_s29 = scalar_lea.vmem (%p51_p3), %s1255_s0, %s927_s25 }
  0x12   : > { %v223_v0 = vld [vmem:[%s208_s29] sm:$0xff] (%p51_p3)  ;;  %v227_v2 = vld [vmem:[%s208_s29 + $0x48] sm:$0xff] (%p51_p3)  ;;  %s202_s30 = scalar_lea.vmem (%p51_p3), [#allocation3], %s1001_s26  ;;  %v879_v6 = vld [vmem:[%s208_s29 + $0x50] sm:$0xf] (%p51_p3) }
  0x13   : > { %v225_v1 = vld [vmem:[%s208_s29 + $0x24] sm:$0xff] (%p51_p3)  ;;  %224 = vst [vmem:[%s202_s30] sm:$0xff] (%p51_p3), %v223_v0  ;;  %228 = vst [vmem:[%s202_s30 + $0x18] sm:$0xff] (%p51_p3), %v227_v2  ;;  %v229_v3 = vld [vmem:[%s208_s29 + $0x6c] sm:$0xff] (%p51_p3) }
  0x14   : > { %226 = vst [vmem:[%s202_s30 + $0xc] sm:$0xff] (%p51_p3), %v225_v1  ;;  %v875_v4 = vld [vmem:[%s208_s29 + $0x8] sm:$0xf] (%p51_p3)  ;;  %v877_v5 = vld [vmem:[%s208_s29 + $0x2c] sm:$0xf] (%p51_p3)  ;;  %230 = vst [vmem:[%s202_s30 + $0x24] sm:$0xff] (%p51_p3), %v229_v3 }
  0x15   : > { %876 = vst [vmem:[%s202_s30 + $0x8] sm:$0xf] %v875_v4  ;;  %878 = vst [vmem:[%s202_s30 + $0x14] sm:$0xf] %v877_v5  ;;  %v881_v7 = vld [vmem:[%s208_s29 + $0x74] sm:$0xf] }
  0x16   : > { %880 = vst [vmem:[%s202_s30 + $0x20] sm:$0xf] %v879_v6  ;;  %882 = vst [vmem:[%s202_s30 + $0x2c] sm:$0xf] %v881_v7 }
  0x17 PF: > { %p883_p6 = scmp.ge.s32.totalorder %s1114_s19, 1  ;;  %p262_p7 = scmp.lt.s32.totalorder %s1114_s19, 4 }
  0x19   : > { %p263_p8 = pnand %p883_p6, %p262_p7 }
  0x1a   : > { %s269_s5 = sand.u32 (!%p263_p8), 1, %s1098_s15   ;;  %s313_s6 = smul.u32 (!%p263_p8), 48, %s1106_s17 }
  0x1b   : > { %266 = sbr.rel (%p263_p8) target bundleno = 320 (0x140), region = 58  ;;  %p885_p10 = scmp.ne.s32.totalorder (!%p263_p8), %s1106_s17, 0 }
  0x1c   : > { %s1002_s7 = smul.u32 (!%p263_p8), 48, %s269_s5  ;;  %p314_p9 = scmp.lt.s32.totalorder (!%p263_p8), %s313_s6, 143 }
  0x1e   : > { %s1194_s12 = scalar_lea.vmem (!%p263_p8), [#allocation3], %s1002_s7 }
  0x22   : > { %s1267_s6 = smov (!%p314_p9, %s313_s6), 143  ;;  %341 = sbr.rel (%p885_p10) target bundleno = 41 (0x29), region = 66 }
  0x23   : > { %s884_s8 = sshll.u32 %s1267_s6, 2  ;;  %v1116_v8 = vmov (!%p885_p10), 0.0  }
  0x24   : > { %s1192_s11 = scalar_lea.vmem %s1256_s1, %s884_s8  ;;  %342 = vst [vmem:[#allocation2] sm:$0xff] (!%p885_p10), %v1116_v8  ;;  %343 = vst [vmem:[#allocation2 + $0x8] sm:$0xff] (!%p885_p10), %v1116_v8 }
  0x25   : > { %344 = vst [vmem:[#allocation2 + $0x10] sm:$0xff] (!%p885_p10), %v1116_v8  ;;  %345 = vst [vmem:[#allocation2 + $0x18] sm:$0xff] (!%p885_p10), %v1116_v8 }
  0x29 PF: > { %v1044_v9 = vld [vmem:[%s1192_s11 + $0x40] sm:$0xff]   ;;  %v1047_v12 = vld [vmem:[%s1192_s11 + $0x48] sm:$0xff]   ;;  %v1050_v15 = vld [vmem:[%s1192_s11 + $0x50] sm:$0xff]   ;;  %p916_p11 = scmp.ne.s32.totalorder %s1106_s17, 2 }
  0x2a   : > { %v1045_v10 = vld [vmem:[%s1192_s11] sm:$0xff]   ;;  %943 = vmatprep.subr.bf16.mxu0 %v1044_v9  ;;  %v1048_v13 = vld [vmem:[%s1192_s11 + $0x8] sm:$0xff]   ;;  %v1051_v16 = vld [vmem:[%s1192_s11 + $0x10] sm:$0xff]  }
  0x2b   : > { %v1046_v11 = vld [vmem:[%s1192_s11 + $0x80] sm:$0xff]   ;;  %944 = vmatpush3.bf16.msra.mxu0 %v1045_v10  ;;  %v1049_v14 = vld [vmem:[%s1192_s11 + $0x88] sm:$0xff]   ;;  %v1052_v17 = vld [vmem:[%s1192_s11 + $0x90] sm:$0xff]  }
  0x2c   : > { %981 = vmatprep.subr.bf16.mxu1 %v1046_v11  ;;  %945 = vmatprep.subr.bf16.mxu0 %v1047_v12  ;;  %v1053_v18 = vld [vmem:[%s1192_s11 + $0x58] sm:$0xff]   ;;  %v1056_v21 = vld [vmem:[%s1192_s11 + $0x60] sm:$0xff]   ;;  %v1059_v24 = vld [vmem:[%s1192_s11 + $0x68] sm:$0xff]  }
  0x2d   : > { %982 = vmatpush3.bf16.msra.mxu1 %v1046_v11  ;;  %v1054_v19 = vld [vmem:[%s1192_s11 + $0x18] sm:$0xff]   ;;  %v1058_v22 = vld [vmem:[%s1192_s11 + $0xa0] sm:$0xff]   ;;  %v1061_v25 = vld [vmem:[%s1192_s11 + $0xa8] sm:$0xff]  }
  0x2e   : > { %983 = vmatprep.subr.bf16.mxu1 %v1049_v14  ;;  %v1055_v20 = vld [vmem:[%s1192_s11 + $0x98] sm:$0xff]   ;;  %v1057_v23 = vld [vmem:[%s1192_s11 + $0x20] sm:$0xff]   ;;  %v1060_v26 = vld [vmem:[%s1192_s11 + $0x28] sm:$0xff]  }
  0x2f   : > { %946 = vmatpush3.bf16.msra.mxu0 %v1048_v13  ;;  %v1062_v27 = vld [vmem:[%s1192_s11 + $0x70] sm:$0xff]   ;;  %v1065_v30 = vld [vmem:[%s1192_s11 + $0x78] sm:$0xff]   ;;  %v346_v45 = vld [vmem:[#allocation2] sm:$0xff] }
  0x30   : > { %947 = vmatprep.subr.bf16.mxu0 %v1050_v15  ;;  %v1063_v28 = vld [vmem:[%s1192_s11 + $0x30] sm:$0xff]   ;;  %v1067_v31 = vld [vmem:[%s1192_s11 + $0xb8] sm:$0xff]   ;;  %v347_v50 = vld [vmem:[#allocation2 + $0x8] sm:$0xff] }
  0x31   : > { %984 = vmatpush3.bf16.msra.mxu1 %v1049_v14  ;;  %v1064_v29 = vld [vmem:[%s1192_s11 + $0xb0] sm:$0xff]   ;;  %v1066_v34 = vld [vmem:[%s1192_s11 + $0x38] sm:$0xff]   ;;  %v917_v5 = vld [vmem:[%s1257_s2] ss:$0 sm:$0xff] (!%p916_p11) }
  0x32   : > { %985 = vmatprep.subr.bf16.mxu1 %v1052_v17  ;;  %v1070_v32 = vld [vmem:[%s1194_s12 + $0x4] ss:$12 sps:$4 sm:$0xff]   ;;  %v1071_v33 = vld [vmem:[%s1194_s12 + $0x8] ss:$12 sps:$4 sm:$0xff]   ;;  %v1068_v35 = vld [vmem:[%s1194_s12] ss:$12 sps:$4 sm:$0xff]  }
  0x33   : > { %948 = vmatpush3.bf16.msra.mxu0 %v1051_v16  ;;  %614 = vmatprep.mubr.bf16.mxu0 %v1070_v32  ;;  %v1073_v36 = vld [vmem:[%s1194_s12 + $0x1c] ss:$12 sps:$4 sm:$0xff]   ;;  %v1072_v37 = vld [vmem:[%s1194_s12 + $0x20] ss:$12 sps:$4 sm:$0xff]   ;;  %v1075_v38 = vld [vmem:[%s1194_s12 + $0x18] ss:$12 sps:$4 sm:$0xff]  }
  0x34   : > { %949 = vmatprep.subr.bf16.mxu0 %v1053_v18  ;;  %997 = vmatprep.mubr.bf16.mxu1 %v1071_v33  ;;  %v348_v59 = vld [vmem:[#allocation2 + $0x10] sm:$0xff]  ;;  %v349_v63 = vld [vmem:[#allocation2 + $0x18] sm:$0xff]  ;;  %v918_v8 = vld [vmem:[%s1258_s3] ss:$0 sm:$0xff] (!%p916_p11) }
  0x35   : > { %986 = vmatpush3.bf16.msra.mxu1 %v1052_v17 }
  0x36   : > { %987 = vmatprep.subr.bf16.mxu1 %v1055_v20 }
  0x37   : > { %950 = vmatpush3.bf16.msra.mxu0 %v1054_v19 }
  0x38   : > { %951 = vmatprep.subr.bf16.mxu0 %v1056_v21 }
  0x39   : > { %988 = vmatpush3.bf16.msra.mxu1 %v1055_v20 }
  0x3a   : > { %989 = vmatprep.subr.bf16.mxu1 %v1058_v22 }
  0x3b   : > { %952 = vmatpush3.bf16.msra.mxu0 %v1057_v23 }
  0x3c   : > { %953 = vmatprep.subr.bf16.mxu0 %v1059_v24 }
  0x3d   : > { %990 = vmatpush3.bf16.msra.mxu1 %v1058_v22 }
  0x3e   : > { %991 = vmatprep.subr.bf16.mxu1 %v1061_v25 }
  0x3f   : > { %954 = vmatpush3.bf16.msra.mxu0 %v1060_v26 }
  0x40   : > { %955 = vmatprep.subr.bf16.mxu0 %v1062_v27 }
  0x41   : > { %992 = vmatpush3.bf16.msra.mxu1 %v1061_v25 }
  0x42   : > { %993 = vmatprep.subr.bf16.mxu1 %v1064_v29 }
  0x43   : > { %956 = vmatpush3.bf16.msra.mxu0 %v1063_v28 }
  0x44   : > { %957 = vmatprep.subr.bf16.mxu0 %v1065_v30 }
  0x45   : > { %994 = vmatpush3.bf16.msra.mxu1 %v1064_v29 }
  0x46   : > { %995 = vmatprep.subr.bf16.mxu1 %v1067_v31 }
  0x47   : > { %958 = vmatpush3.bf16.msra.mxu0 %v1066_v34 }
  0x49   : > { %996 = vmatpush3.bf16.msra.mxu1 %v1067_v31 }
  0x4a   : > { %615 = vmatmul.mubr.bf16.vlgmr.msra.gmra.mrb[0].mxu0 %v1068_v35 }
  0x4b   : > { %622 = vmatprep.mubr.bf16.mxu0 %v1073_v36 }
  0x4c   : > { %998 = vmatmul.mubr.bf16.vlgmr.msra.gmra.mrb[0].mxu1 %v1072_v37 }
  0x52   : > { %623 = vmatmul.mubr.bf16.gmra.mrb[4].mxu0 %v1075_v38 }
 0x11d   : > { %v959_v39 = vpop.f32.mrb[0].mxu0 }
 0x11e   : > { %v960_v40 = vpop.f32.mrb[1].mxu0 }
 0x11f   : > { %v961_v41 = vadd.f32 %v960_v40, %v959_v39  ;;  %v962_v42 = vpop.f32.mrb[2].mxu0  ;;  %v999_v43 = vpop.f32.mrb[0].mxu1 }
 0x120   : > { %v963_v44 = vpop.f32.mrb[3].mxu0  ;;  %v665_v46 = vpop.f32.mrb[1].mxu1 }
 0x121   : > { %v964_v47 = vadd.f32 %v963_v44, %v962_v42  ;;  %v666_v48 = vadd.f32 %v961_v41, %v665_v46  ;;  %v1000_v49 = vpop.f32.mrb[2].mxu1 }
 0x122   : > { %v668_v51 = vpop.f32.mrb[3].mxu1 }
 0x123   : > { %v680_v52 = vadd.f32 %v666_v48, %v346_v45  ;;  %v669_v53 = vadd.f32 %v964_v47, %v668_v51 }
 0x125   : > { %684 = vst [vmem:[#allocation2] sm:$0xff] %v680_v52  ;;  %v681_v54 = vadd.f32 %v669_v53, %v347_v50  ;;  %v965_v55 = vpop.f32.mrb[4].mxu0 }
 0x126   : > { %v966_v56 = vpop.f32.mrb[5].mxu0 }
 0x127   : > { %685 = vst [vmem:[#allocation2 + $0x8] sm:$0xff] %v681_v54  ;;  %v967_v57 = vadd.f32 %v966_v56, %v965_v55  ;;  %v968_v58 = vpop.f32.mrb[6].mxu0 }
 0x128   : > { %v969_v60 = vpop.f32.mrb[7].mxu0 }
 0x129   : > { %v674_v61 = vadd.f32 %v999_v43, %v967_v57  ;;  %v970_v62 = vadd.f32 %v969_v60, %v968_v58  ;;  %691 = sbr.rel (%p916_p11) target bundleno = 320 (0x140), region = 70 }
 0x12b   : > { %v682_v0 = vadd.f32 %v674_v61, %v348_v59  ;;  %v677_v1 = vadd.f32 %v1000_v49, %v970_v62 }
 0x12c   : > { %v692_v3 = vld [vmem:[#allocation2] sm:$0xff] (!%p916_p11) }
 0x12d   : > { %686 = vst [vmem:[#allocation2 + $0x10] sm:$0xff] %v682_v0  ;;  %v683_v2 = vadd.f32 %v677_v1, %v349_v63  ;;  %v703_v6 = vmul.f32 (!%p916_p11), %v917_v5, %v692_v3 }
 0x12e   : > { %v693_v4 = vld [vmem:[#allocation2 + $0x8] sm:$0xff] (!%p916_p11) }
 0x12f   : > { %687 = vst [vmem:[#allocation2 + $0x18] sm:$0xff] %v683_v2  ;;  %v704_v7 = vmul.f32 (!%p916_p11), %v917_v5, %v693_v4  ;;  %v714_v13 = vadd.f32 (!%p916_p11), %v918_v8, %v703_v6 }
 0x131   : > { %v715_v14 = vadd.f32 %v918_v8, %v704_v7  ;;  %v718_v17 = vmax.f32 %v714_v13, 0.0 }
 0x133   : > { %v719_v18 = vmax.f32 %v715_v14, 0.0 }
 0x134   : > { %v694_v9 = vld [vmem:[#allocation2 + $0x10] sm:$0xff] }
 0x135   : > { %v705_v11 = vmul.f32 %v917_v5, %v694_v9  ;;  %v935_v21 = vpack.c.bf16 %v719_v18, %v718_v17 }
 0x136   : > { %v695_v10 = vld [vmem:[#allocation2 + $0x18] sm:$0xff] }
 0x137   : > { %v706_v12 = vmul.f32 %v917_v5, %v695_v10  ;;  %v716_v15 = vadd.f32 %v918_v8, %v705_v11  ;;  %936 = vst [vmem:[%s1259_s4] sm:$0xff] %v935_v21  }
 0x139   : > { %v717_v16 = vadd.f32 %v918_v8, %v706_v12  ;;  %v720_v19 = vmax.f32 %v716_v15, 0.0 }
 0x13b   : > { %v721_v20 = vmax.f32 %v717_v16, 0.0 }
 0x13d   : > { %v940_v22 = vpack.c.bf16 %v721_v20, %v720_v19 }
 0x13f   : > { %942 = vst [vmem:[%s1259_s4 + $0x8] sm:$0xff] %v940_v22  }
 0x140 PF: > { %s14_s19 = sadd.s32 1, %s1114_s19   ;;  %s1260_s15 = smov %s1102_s16 }
 0x141   : > { %p11_p12 = scmp.ge.s32.totalorder %s14_s19, 5   ;;  %s1261_s16 = smov %s1177_s23 }
 0x142   : > { %s1262_s17 = smov %s1110_s18  ;;  %s1263_s18 = smov %s1265_s20 }
 0x143   :  { %13 = sbr.rel (!%p11_p12) target bundleno = 3 (0x3), region = 120 }

// kernel: resnet18_forward.33
= control target key start
LH: loop header
LB: loop body
LE: loop exit
PB: predicated region body
PF: predicated region fallthrough
CT: control target
= control target key end

     0   :  { %s1114_s15 = smov 0   ;;  %s1116_s16 = smov 0   ;;  %s1216_s0 = inlined_call_operand.vmem [shape: bf16[8,1152], index: 0, kind: input, shape index: {}]   ;;  %s1217_s1 = inlined_call_operand.vmem [shape: bf16[1152,256], index: 1, kind: input, shape index: {}]   ;;  %s1218_s2 = inlined_call_operand.vmem [shape: f32[1,256], index: 2, kind: input, shape index: {}]   ;;  %s1219_s3 = inlined_call_operand.vmem [shape: f32[1,256], index: 3, kind: input, shape index: {}]   ;;  %s1220_s4 = inlined_call_operand.vmem [shape: bf16[8,256], index: 4, kind: output, shape index: {}]  }
   0x1   :  { %s1118_s17 = smov 0  }
   0x2 LB: > { %s26_s18 = sadd.s32 1, %s1081_s16  ;;  %p898_p0 = scmp.ge.s32.totalorder %s1085_s17, 1  ;;  %s1085_s17 = sphi %s1118_s17, %s14_s17   ;;  %s1081_s16 = sphi %s1116_s16, %s1222_s16   ;;  %s1077_s15 = sphi %s1114_s15, %s1221_s15  }
   0x3   : > { %p27_p1 = scmp.ge.s32.totalorder %s26_s18, 3  ;;  %p229_p2 = scmp.lt.s32.totalorder %s1085_s17, 4 }
   0x5   : > { %s1224_s18 = smov (%p27_p1, %s26_s18), 0  ;;  %p230_p3 = pnand %p898_p0, %p229_p2 }
   0x6   : > { %s281_s19 = smul.u32 (!%p230_p3), 3, %s1077_s15  ;;  %p902_p6 = scmp.ne.s32.totalorder (!%p230_p3), %s1077_s15, 0 }
   0x7   : > { %233 = sbr.rel (%p230_p3) target bundleno = 323 (0x143), region = 36 }
   0x8   : > { %s291_s20 = smul.u32 (!%p230_p3), 48, %s1077_s15  ;;  %p284_p4 = scmp.lt.s32.totalorder (!%p230_p3), %s281_s19, 8 }
   0xa   : > { %p293_p5 = scmp.lt.s32.totalorder (!%p230_p3), %s291_s20, 143 }
   0xe   : > { %s1226_s19 = smov (!%p284_p4, %s281_s19), 8  ;;  %s1228_s20 = smov (!%p293_p5, %s291_s20), 143 }
   0xf   : > { %s899_s21 = sshll.u32 %s1226_s19, 2  ;;  %s960_s25 = sshll.u32 %s1228_s20, 3  ;;  %v1087_v0 = vmov (!%p902_p6), 0.0  }
  0x10   : > { %s1139_s24 = scalar_lea.vmem %s1216_s0, %s899_s21  ;;  %s1144_s28 = scalar_lea.vmem %s1217_s1, %s960_s25  ;;  %328 = vst [vmem:[#allocation2] sm:$0xff] (!%p902_p6), %v1087_v0  ;;  %329 = vst [vmem:[#allocation2 + $0x8] sm:$0xff] (!%p902_p6), %v1087_v0 }
  0x11   : > { %327 = sbr.rel (%p902_p6) target bundleno = 24 (0x18), region = 40 }
  0x18 PF: > { %v988_v1 = vld [vmem:[%s1144_s28 + $0x4] ss:$8 sps:$4 sm:$0xff]   ;;  %v990_v2 = vld [vmem:[%s1144_s28] ss:$8 sps:$4 sm:$0xff]   ;;  %v1088_v3 = vmov 0   ;;  %p954_p7 = scmp.ne.s32.totalorder %s1077_s15, 2 }
  0x19   : > { %706 = vmatprep.mubr.bf16.mxu1 %v1088_v3  ;;  %633 = vmatprep.subr.bf16.mxu0 %v988_v1  ;;  %v991_v4 = vld [vmem:[%s1144_s28 + $0x14] ss:$8 sps:$4 sm:$0xff]   ;;  %v993_v5 = vld [vmem:[%s1144_s28 + $0x10] ss:$8 sps:$4 sm:$0xff]   ;;  %v994_v6 = vld [vmem:[%s1144_s28 + $0x24] ss:$8 sps:$4 sm:$0xff]  }
  0x1a   : > { %634 = vmatpush1.bf16.msra.mxu0 %v990_v2  ;;  %v996_v7 = vld [vmem:[%s1144_s28 + $0x20] ss:$8 sps:$4 sm:$0xff]   ;;  %v997_v8 = vld [vmem:[%s1144_s28 + $0x34] ss:$8 sps:$4 sm:$0xff]   ;;  %v999_v9 = vld [vmem:[%s1144_s28 + $0x30] ss:$8 sps:$4 sm:$0xff]  }
  0x1b   : > { %635 = vmatprep.subr.bf16.mxu0 %v991_v4  ;;  %v1012_v10 = vld [vmem:[%s1144_s28 + $0x104] ss:$8 sps:$4 sm:$0xff]   ;;  %v1014_v11 = vld [vmem:[%s1144_s28 + $0x100] ss:$8 sps:$4 sm:$0xff]   ;;  %v1018_v13 = vld [vmem:[%s1144_s28 + $0x114] ss:$8 sps:$4 sm:$0xff]   ;;  %v727_v4 = vlaneseq (!%p954_p7) }
  0x1c   : > { %v1000_v12 = vld [vmem:[%s1144_s28 + $0x44] ss:$8 sps:$4 sm:$0xff]   ;;  %674 = vmatprep.subr.bf16.mxu1 %v1012_v10  ;;  %v1020_v14 = vld [vmem:[%s1144_s28 + $0x110] ss:$8 sps:$4 sm:$0xff]   ;;  %v1002_v15 = vld [vmem:[%s1144_s28 + $0x40] ss:$8 sps:$4 sm:$0xff]  }
  0x1d   : > { %675 = vmatpush1.bf16.msra.mxu1 %v1014_v11  ;;  %v1003_v16 = vld [vmem:[%s1144_s28 + $0x54] ss:$8 sps:$4 sm:$0xff]   ;;  %v1024_v17 = vld [vmem:[%s1144_s28 + $0x124] ss:$8 sps:$4 sm:$0xff]   ;;  %v1026_v18 = vld [vmem:[%s1144_s28 + $0x120] ss:$8 sps:$4 sm:$0xff]  }
  0x1e   : > { %636 = vmatpush1.bf16.msra.mxu0 %v993_v5  ;;  %676 = vmatprep.subr.bf16.mxu1 %v1018_v13  ;;  %v1005_v19 = vld [vmem:[%s1144_s28 + $0x50] ss:$8 sps:$4 sm:$0xff]   ;;  %v1030_v20 = vld [vmem:[%s1144_s28 + $0x134] ss:$8 sps:$4 sm:$0xff]   ;;  %v1006_v21 = vld [vmem:[%s1144_s28 + $0x64] ss:$8 sps:$4 sm:$0xff]  }
  0x1f   : > { %637 = vmatprep.subr.bf16.mxu0 %v994_v6  ;;  %v1032_v22 = vld [vmem:[%s1144_s28 + $0x130] ss:$8 sps:$4 sm:$0xff]   ;;  %v1008_v23 = vld [vmem:[%s1144_s28 + $0x60] ss:$8 sps:$4 sm:$0xff]   ;;  %v1036_v24 = vld [vmem:[%s1144_s28 + $0x144] ss:$8 sps:$4 sm:$0xff]  }
  0x20   : > { %v1009_v25 = vld [vmem:[%s1144_s28 + $0x74] ss:$8 sps:$4 sm:$0xff]   ;;  %v1038_v26 = vld [vmem:[%s1144_s28 + $0x140] ss:$8 sps:$4 sm:$0xff]   ;;  %v1011_v27 = vld [vmem:[%s1144_s28 + $0x70] ss:$8 sps:$4 sm:$0xff]  }
  0x21   : > { %677 = vmatpush1.bf16.msra.mxu1 %v1020_v14  ;;  %v1042_v28 = vld [vmem:[%s1144_s28 + $0x154] ss:$8 sps:$4 sm:$0xff]   ;;  %v1015_v29 = vld [vmem:[%s1144_s28 + $0x84] ss:$8 sps:$4 sm:$0xff]   ;;  %v1044_v30 = vld [vmem:[%s1144_s28 + $0x150] ss:$8 sps:$4 sm:$0xff]  }
  0x22   : > { %638 = vmatpush1.bf16.msra.mxu0 %v996_v7  ;;  %678 = vmatprep.subr.bf16.mxu1 %v1024_v17  ;;  %v1017_v31 = vld [vmem:[%s1144_s28 + $0x80] ss:$8 sps:$4 sm:$0xff]   ;;  %v1048_v32 = vld [vmem:[%s1144_s28 + $0x164] ss:$8 sps:$4 sm:$0xff]   ;;  %v1021_v33 = vld [vmem:[%s1144_s28 + $0x94] ss:$8 sps:$4 sm:$0xff]  }
  0x23   : > { %639 = vmatprep.subr.bf16.mxu0 %v997_v8  ;;  %v332_v34 = vld [vmem:[%s1139_s24] sm:$0xff]  ;;  %v1023_v37 = vld [vmem:[%s1144_s28 + $0x90] ss:$8 sps:$4 sm:$0xff]   ;;  %v1054_v38 = vld [vmem:[%s1144_s28 + $0x174] ss:$8 sps:$4 sm:$0xff]   ;;  %v728_v5 = vshrl.u32 (!%p954_p7), %v727_v4, 7 }
  0x24   : > { %v904_v35 = vcombine.high %v332_v34, %v332_v34  ;;  %v1050_v36 = vld [vmem:[%s1144_s28 + $0x160] ss:$8 sps:$4 sm:$0xff]   ;;  %v1027_v39 = vld [vmem:[%s1144_s28 + $0xa4] ss:$8 sps:$4 sm:$0xff]   ;;  %v1056_v40 = vld [vmem:[%s1144_s28 + $0x170] ss:$8 sps:$4 sm:$0xff]   ;;  %v903_v53 = vcombine.low %v332_v34, %v332_v34 }
  0x25   : > { %679 = vmatpush1.bf16.msra.mxu1 %v1026_v18  ;;  %v1029_v41 = vld [vmem:[%s1144_s28 + $0xa0] ss:$8 sps:$4 sm:$0xff]   ;;  %v1033_v42 = vld [vmem:[%s1144_s28 + $0xb4] ss:$8 sps:$4 sm:$0xff]   ;;  %v1035_v44 = vld [vmem:[%s1144_s28 + $0xb0] ss:$8 sps:$4 sm:$0xff]  }
  0x26   : > { %640 = vmatpush1.bf16.msra.mxu0 %v999_v9  ;;  %680 = vmatprep.subr.bf16.mxu1 %v1030_v20  ;;  %v1060_v43 = vld [vmem:[%s1139_s24 + $0x8] ss:$0 sps:$4 sm:$0xff]   ;;  %v1039_v45 = vld [vmem:[%s1144_s28 + $0xc4] ss:$8 sps:$4 sm:$0xff]   ;;  %v1045_v47 = vld [vmem:[%s1144_s28 + $0xd4] ss:$8 sps:$4 sm:$0xff]  }
  0x27   : > { %641 = vmatprep.subr.bf16.mxu0 %v1000_v12  ;;  %665 = vmatprep.mubr.bf16.mxu0 %v904_v35  ;;  %v1041_v46 = vld [vmem:[%s1144_s28 + $0xc0] ss:$8 sps:$4 sm:$0xff]   ;;  %v1047_v48 = vld [vmem:[%s1144_s28 + $0xd0] ss:$8 sps:$4 sm:$0xff]   ;;  %v1051_v49 = vld [vmem:[%s1144_s28 + $0xe4] ss:$8 sps:$4 sm:$0xff]  }
  0x28   : > { %v1053_v50 = vld [vmem:[%s1144_s28 + $0xe0] ss:$8 sps:$4 sm:$0xff]   ;;  %v1057_v51 = vld [vmem:[%s1144_s28 + $0xf4] ss:$8 sps:$4 sm:$0xff]   ;;  %v1059_v52 = vld [vmem:[%s1144_s28 + $0xf0] ss:$8 sps:$4 sm:$0xff]  }
  0x29   : > { %681 = vmatpush1.bf16.msra.mxu1 %v1032_v22  ;;  %v330_v58 = vld [vmem:[#allocation2] sm:$0xff]  ;;  %v331_v61 = vld [vmem:[#allocation2 + $0x8] sm:$0xff]  ;;  %v729_v8 = vsub.s32 (!%p954_p7), 0, %v728_v5  ;;  %v733_v9 = vsub.s32 (!%p954_p7), 1, %v728_v5 }
  0x2a   : > { %642 = vmatpush1.bf16.msra.mxu0 %v1002_v15  ;;  %682 = vmatprep.subr.bf16.mxu1 %v1036_v24  ;;  %v725_v6 = vld [vmem:[%s1218_s2] sm:$0x3] (!%p954_p7) }
  0x2b   : > { %643 = vmatprep.subr.bf16.mxu0 %v1003_v16  ;;  %v739_v7 = vld [vmem:[%s1219_s3] sm:$0x3] (!%p954_p7)  ;;  %v730_v12 = vrot.slane (!%p954_p7), %v725_v6, %v729_v8  ;;  %v734_v13 = vrot.slane (!%p954_p7), %v725_v6, %v733_v9 }
  0x2c   : > { %v744_v14 = vrot.slane (!%p954_p7), %v739_v7, %v729_v8  ;;  %v748_v15 = vrot.slane (!%p954_p7), %v739_v7, %v733_v9 }
  0x2d   : > { %683 = vmatpush1.bf16.msra.mxu1 %v1038_v26 }
  0x2e   : > { %644 = vmatpush1.bf16.msra.mxu0 %v1005_v19  ;;  %684 = vmatprep.subr.bf16.mxu1 %v1042_v28 }
  0x2f   : > { %645 = vmatprep.subr.bf16.mxu0 %v1006_v21 }
  0x31   : > { %685 = vmatpush1.bf16.msra.mxu1 %v1044_v30 }
  0x32   : > { %646 = vmatpush1.bf16.msra.mxu0 %v1008_v23  ;;  %686 = vmatprep.subr.bf16.mxu1 %v1048_v32 }
  0x33   : > { %647 = vmatprep.subr.bf16.mxu0 %v1009_v25 }
  0x35   : > { %687 = vmatpush1.bf16.msra.mxu1 %v1050_v36 }
  0x36   : > { %648 = vmatpush1.bf16.msra.mxu0 %v1011_v27  ;;  %688 = vmatprep.subr.bf16.mxu1 %v1054_v38 }
  0x37   : > { %649 = vmatprep.subr.bf16.mxu0 %v1015_v29 }
  0x39   : > { %689 = vmatpush1.bf16.msra.mxu1 %v1056_v40 }
  0x3a   : > { %650 = vmatpush1.bf16.msra.mxu0 %v1017_v31 }
  0x3b   : > { %651 = vmatprep.subr.bf16.mxu0 %v1021_v33 }
  0x3c   : > { %707 = vmatmul.mubr.bf16.vlgmr.msra.gmra.mrb[0].mxu1 %v1060_v43 }
  0x3e   : > { %652 = vmatpush1.bf16.msra.mxu0 %v1023_v37 }
  0x3f   : > { %653 = vmatprep.subr.bf16.mxu0 %v1027_v39 }
  0x42   : > { %654 = vmatpush1.bf16.msra.mxu0 %v1029_v41 }
  0x43   : > { %655 = vmatprep.subr.bf16.mxu0 %v1033_v42 }
  0x46   : > { %656 = vmatpush1.bf16.msra.mxu0 %v1035_v44 }
  0x47   : > { %657 = vmatprep.subr.bf16.mxu0 %v1039_v45 }
  0x4a   : > { %658 = vmatpush1.bf16.msra.mxu0 %v1041_v46 }
  0x4b   : > { %659 = vmatprep.subr.bf16.mxu0 %v1045_v47 }
  0x4e   : > { %660 = vmatpush1.bf16.msra.mxu0 %v1047_v48 }
  0x4f   : > { %661 = vmatprep.subr.bf16.mxu0 %v1051_v49 }
  0x52   : > { %662 = vmatpush1.bf16.msra.mxu0 %v1053_v50 }
  0x53   : > { %663 = vmatprep.subr.bf16.mxu0 %v1057_v51 }
  0x56   : > { %664 = vmatpush1.bf16.msra.mxu0 %v1059_v52 }
  0x59   : > { %666 = vmatmul.mubr.bf16.vlgmr.msra.gmra.mrb[0].mxu0 %v903_v53 }
 0x10f   : > { %v708_v54 = vpop.f32.mrb[0].mxu1 }
 0x110   : > { %v710_v55 = vpop.f32.mrb[1].mxu1 }
 0x111   : > { %v712_v56 = vpop.f32.mrb[2].mxu1 }
 0x112   : > { %v713_v57 = vpop.f32.mrb[3].mxu1 }
 0x12c   : > { %v667_v59 = vpop.f32.mrb[0].mxu0  ;;  %722 = sbr.rel (%p954_p7) target bundleno = 323 (0x143), region = 44 }
 0x12d   : > { %v709_v60 = vadd.f32 %v708_v54, %v667_v59  ;;  %v669_v62 = vpop.f32.mrb[1].mxu0 }
 0x12e   : > { %v711_v63 = vadd.f32 %v710_v55, %v669_v62  ;;  %v671_v0 = vpop.f32.mrb[2].mxu0 }
 0x12f   : > { %v715_v1 = vadd.f32 %v709_v60, %v330_v58  ;;  %v672_v2 = vpop.f32.mrb[3].mxu0 }
 0x130   : > { %v716_v3 = vadd.f32 %v711_v63, %v331_v61 }
 0x131   : > { %717 = vst [vmem:[#allocation2] sm:$0xff] %v715_v1 }
 0x132   : > { %718 = vst [vmem:[#allocation2 + $0x8] sm:$0xff] %v716_v3 }
 0x138   : > { %v723_v10 = vld [vmem:[#allocation2] sm:$0xff] }
 0x139   : > { %v724_v11 = vld [vmem:[#allocation2 + $0x8] sm:$0xff]  ;;  %v737_v16 = vmul.f32 %v730_v12, %v723_v10 }
 0x13a   : > { %v738_v17 = vmul.f32 %v734_v13, %v724_v11 }
 0x13b   : > { %v751_v18 = vadd.f32 %v744_v14, %v737_v16 }
 0x13c   : > { %v752_v19 = vadd.f32 %v748_v15, %v738_v17 }
 0x13d   : > { %v753_v20 = vmax.f32 %v751_v18, 0.0 }
 0x13e   : > { %v754_v21 = vmax.f32 %v752_v19, 0.0 }
 0x140   : > { %v961_v22 = vpack.c.bf16 %v754_v21, %v753_v20 }
 0x142   : > { %763 = vst [vmem:[%s1220_s4] sm:$0xff] %v961_v22 }
 0x143 PF: > { %s14_s17 = sadd.s32 1, %s1085_s17   ;;  %s1221_s15 = smov %s1081_s16 }
 0x144   : > { %p11_p8 = scmp.ge.s32.totalorder %s14_s17, 5   ;;  %s1222_s16 = smov %s1224_s18 }
 0x146   :  { %13 = sbr.rel (!%p11_p8) target bundleno = 2 (0x2), region = 83 }

// kernel: resnet18_forward.34
= control target key start
LH: loop header
LB: loop body
LE: loop exit
PB: predicated region body
PF: predicated region fallthrough
CT: control target
= control target key end

     0   :  { %v257_v1 = vmov 0   ;;  %v175_v18 = vlaneseq  ;;  %s343_s1 = inlined_call_operand.vmem [shape: bf16[128,256], index: 1, kind: input, shape index: {}]   ;;  %s344_s0 = inlined_call_operand.vmem [shape: bf16[8,128], index: 0, kind: input, shape index: {}]   ;;  %s345_s2 = inlined_call_operand.vmem [shape: f32[1,256], index: 2, kind: input, shape index: {}]   ;;  %s346_s3 = inlined_call_operand.vmem [shape: f32[1,256], index: 3, kind: input, shape index: {}]   ;;  %s347_s4 = inlined_call_operand.vmem [shape: bf16[8,256], index: 4, kind: output, shape index: {}]  }
   0x1   :  { %v233_v0 = vld [vmem:[%s343_s1 + $0x4] ss:$8 sps:$4 sm:$0xff]   ;;  %155 = vmatprep.mubr.bf16.mxu0 %v257_v1  ;;  %v235_v2 = vld [vmem:[%s343_s1] ss:$8 sps:$4 sm:$0xff]   ;;  %v236_v3 = vld [vmem:[%s343_s1 + $0x14] ss:$8 sps:$4 sm:$0xff]  }
   0x2   :  { %123 = vmatprep.subr.bf16.mxu0 %v233_v0  ;;  %v238_v4 = vld [vmem:[%s343_s1 + $0x10] ss:$8 sps:$4 sm:$0xff]   ;;  %v239_v5 = vld [vmem:[%s343_s1 + $0x24] ss:$8 sps:$4 sm:$0xff]   ;;  %v241_v6 = vld [vmem:[%s343_s1 + $0x20] ss:$8 sps:$4 sm:$0xff]  }
   0x3   :  { %124 = vmatpush1.bf16.msra.mxu0 %v235_v2  ;;  %v242_v7 = vld [vmem:[%s343_s1 + $0x34] ss:$8 sps:$4 sm:$0xff]   ;;  %v244_v8 = vld [vmem:[%s343_s1 + $0x30] ss:$8 sps:$4 sm:$0xff]   ;;  %v245_v9 = vld [vmem:[%s343_s1 + $0x44] ss:$8 sps:$4 sm:$0xff]  }
   0x4   :  { %125 = vmatprep.subr.bf16.mxu0 %v236_v3  ;;  %v247_v10 = vld [vmem:[%s343_s1 + $0x40] ss:$8 sps:$4 sm:$0xff]   ;;  %v248_v11 = vld [vmem:[%s343_s1 + $0x54] ss:$8 sps:$4 sm:$0xff]   ;;  %v250_v12 = vld [vmem:[%s343_s1 + $0x50] ss:$8 sps:$4 sm:$0xff]  }
   0x5   :  { %v251_v13 = vld [vmem:[%s343_s1 + $0x64] ss:$8 sps:$4 sm:$0xff]   ;;  %v253_v14 = vld [vmem:[%s343_s1 + $0x60] ss:$8 sps:$4 sm:$0xff]   ;;  %v254_v15 = vld [vmem:[%s343_s1 + $0x74] ss:$8 sps:$4 sm:$0xff]  }
   0x6   :  { %v256_v16 = vld [vmem:[%s343_s1 + $0x70] ss:$8 sps:$4 sm:$0xff]   ;;  %v26_v17 = vld [vmem:[%s344_s0] sm:$0xf]  ;;  %v176_v19 = vshrl.u32 %v175_v18, 7 }
   0x7   :  { %126 = vmatpush1.bf16.msra.mxu0 %v238_v4  ;;  %v173_v21 = vld [vmem:[%s345_s2] sm:$0x3] }
   0x8   :  { %127 = vmatprep.subr.bf16.mxu0 %v239_v5  ;;  %v177_v20 = vsub.s32 0, %v176_v19  ;;  %v181_v22 = vsub.s32 1, %v176_v19  ;;  %v187_v23 = vld [vmem:[%s346_s3] sm:$0x3] }
   0xa   :  { %v178_v24 = vrot.slane %v173_v21, %v177_v20  ;;  %v182_v25 = vrot.slane %v173_v21, %v181_v22  ;;  %v192_v26 = vrot.slane %v187_v23, %v177_v20  ;;  %v196_v28 = vrot.slane %v187_v23, %v181_v22 }
   0xb   :  { %128 = vmatpush1.bf16.msra.mxu0 %v241_v6 }
   0xc   :  { %129 = vmatprep.subr.bf16.mxu0 %v242_v7 }
   0xf   :  { %130 = vmatpush1.bf16.msra.mxu0 %v244_v8 }
  0x10   :  { %131 = vmatprep.subr.bf16.mxu0 %v245_v9 }
  0x13   :  { %132 = vmatpush1.bf16.msra.mxu0 %v247_v10 }
  0x14   :  { %133 = vmatprep.subr.bf16.mxu0 %v248_v11 }
  0x17   :  { %134 = vmatpush1.bf16.msra.mxu0 %v250_v12 }
  0x18   :  { %135 = vmatprep.subr.bf16.mxu0 %v251_v13 }
  0x1b   :  { %136 = vmatpush1.bf16.msra.mxu0 %v253_v14 }
  0x1c   :  { %137 = vmatprep.subr.bf16.mxu0 %v254_v15 }
  0x1f   :  { %138 = vmatpush1.bf16.msra.mxu0 %v256_v16 }
  0x22   :  { %156 = vmatmul.mubr.bf16.vlgmr.msra.gmra.mrb[0].mxu0 %v26_v17 }
  0xf5   :  { %v157_v27 = vpop.f32.mrb[0].mxu0 }
  0xf6   :  { %v185_v29 = vmul.f32 %v178_v24, %v157_v27  ;;  %v159_v30 = vpop.f32.mrb[1].mxu0 }
  0xf7   :  { %v186_v31 = vmul.f32 %v182_v25, %v159_v30  ;;  %v161_v32 = vpop.f32.mrb[2].mxu0 }
  0xf8   :  { %v199_v33 = vadd.f32 %v192_v26, %v185_v29  ;;  %v162_v34 = vpop.f32.mrb[3].mxu0 }
  0xf9   :  { %v200_v35 = vadd.f32 %v196_v28, %v186_v31 }
  0xfb   :  { %v231_v36 = vpack.c.bf16 %v200_v35, %v199_v33 }
  0xfd   :  { %209 = vst [vmem:[%s347_s4] sm:$0xff] %v231_v36 }

// kernel: resnet18_forward.35
= control target key start
LH: loop header
LB: loop body
LE: loop exit
PB: predicated region body
PF: predicated region fallthrough
CT: control target
= control target key end

     0   :  { %s1209_s18 = smov 0   ;;  %s1211_s19 = smov 0   ;;  %s1314_s0 = inlined_call_operand.vmem [shape: bf16[8,2304], index: 0, kind: input, shape index: {}]   ;;  %s1315_s1 = inlined_call_operand.vmem [shape: bf16[2304,256], index: 1, kind: input, shape index: {}]   ;;  %s1316_s2 = inlined_call_operand.vmem [shape: f32[1,256], index: 2, kind: input, shape index: {}]   ;;  %s1317_s3 = inlined_call_operand.vmem [shape: f32[1,256], index: 3, kind: input, shape index: {}]   ;;  %s1318_s4 = inlined_call_operand.vmem [shape: bf16[8,256], index: 4, kind: input, shape index: {}]   ;;  %s1319_s5 = inlined_call_operand.vmem [shape: bf16[8,256], index: 5, kind: output, shape index: {}]  }
   0x1   :  { %s1213_s20 = smov 0  }
   0x2 LB: > { %s27_s21 = sadd.s32 1, %s1171_s19  ;;  %p988_p0 = scmp.ge.s32.totalorder %s1175_s20, 1  ;;  %s1175_s20 = sphi %s1213_s20, %s15_s20   ;;  %s1171_s19 = sphi %s1211_s19, %s1321_s19   ;;  %s1167_s18 = sphi %s1209_s18, %s1320_s18  }
   0x3   : > { %p28_p1 = scmp.ge.s32.totalorder %s27_s21, 6  ;;  %p271_p2 = scmp.lt.s32.totalorder %s1175_s20, 7 }
   0x5   : > { %s1323_s21 = smov (%p28_p1, %s27_s21), 0  ;;  %p272_p3 = pnand %p988_p0, %p271_p2 }
   0x6   : > { %s334_s22 = smul.u32 (!%p272_p3), 3, %s1167_s18  ;;  %p992_p6 = scmp.ne.s32.totalorder (!%p272_p3), %s1167_s18, 0 }
   0x7   : > { %275 = sbr.rel (%p272_p3) target bundleno = 325 (0x145), region = 40 }
   0x8   : > { %s344_s23 = smul.u32 (!%p272_p3), 48, %s1167_s18  ;;  %p337_p4 = scmp.lt.s32.totalorder (!%p272_p3), %s334_s22, 17 }
   0xa   : > { %p346_p5 = scmp.lt.s32.totalorder (!%p272_p3), %s344_s23, 287 }
   0xe   : > { %s1325_s22 = smov (!%p337_p4, %s334_s22), 17  ;;  %s1327_s23 = smov (!%p346_p5, %s344_s23), 287 }
   0xf   : > { %s989_s24 = sshll.u32 %s1325_s22, 2  ;;  %s1050_s28 = sshll.u32 %s1327_s23, 3  ;;  %v1177_v0 = vmov (!%p992_p6), 0.0  }
  0x10   : > { %s1234_s27 = scalar_lea.vmem %s1314_s0, %s989_s24  ;;  %s1239_s6 = scalar_lea.vmem %s1315_s1, %s1050_s28  ;;  %391 = vst [vmem:[#allocation2] sm:$0xff] (!%p992_p6), %v1177_v0  ;;  %392 = vst [vmem:[#allocation2 + $0x8] sm:$0xff] (!%p992_p6), %v1177_v0 }
  0x11   : > { %390 = sbr.rel (%p992_p6) target bundleno = 24 (0x18), region = 44 }
  0x18 PF: > { %v1078_v1 = vld [vmem:[%s1239_s6 + $0x4] ss:$8 sps:$4 sm:$0xff]   ;;  %v1080_v2 = vld [vmem:[%s1239_s6] ss:$8 sps:$4 sm:$0xff]   ;;  %v1178_v3 = vmov 0   ;;  %p1044_p7 = scmp.ne.s32.totalorder %s1167_s18, 5 }
  0x19   : > { %769 = vmatprep.mubr.bf16.mxu1 %v1178_v3  ;;  %696 = vmatprep.subr.bf16.mxu0 %v1078_v1  ;;  %v1081_v4 = vld [vmem:[%s1239_s6 + $0x14] ss:$8 sps:$4 sm:$0xff]   ;;  %v1083_v5 = vld [vmem:[%s1239_s6 + $0x10] ss:$8 sps:$4 sm:$0xff]   ;;  %v1084_v6 = vld [vmem:[%s1239_s6 + $0x24] ss:$8 sps:$4 sm:$0xff]  }
  0x1a   : > { %697 = vmatpush1.bf16.msra.mxu0 %v1080_v2  ;;  %v1086_v7 = vld [vmem:[%s1239_s6 + $0x20] ss:$8 sps:$4 sm:$0xff]   ;;  %v1087_v8 = vld [vmem:[%s1239_s6 + $0x34] ss:$8 sps:$4 sm:$0xff]   ;;  %v1089_v9 = vld [vmem:[%s1239_s6 + $0x30] ss:$8 sps:$4 sm:$0xff]  }
  0x1b   : > { %698 = vmatprep.subr.bf16.mxu0 %v1081_v4  ;;  %v1102_v10 = vld [vmem:[%s1239_s6 + $0x104] ss:$8 sps:$4 sm:$0xff]   ;;  %v1104_v11 = vld [vmem:[%s1239_s6 + $0x100] ss:$8 sps:$4 sm:$0xff]   ;;  %v1108_v13 = vld [vmem:[%s1239_s6 + $0x114] ss:$8 sps:$4 sm:$0xff]   ;;  %v790_v4 = vlaneseq (!%p1044_p7) }
  0x1c   : > { %v1090_v12 = vld [vmem:[%s1239_s6 + $0x44] ss:$8 sps:$4 sm:$0xff]   ;;  %737 = vmatprep.subr.bf16.mxu1 %v1102_v10  ;;  %v1110_v14 = vld [vmem:[%s1239_s6 + $0x110] ss:$8 sps:$4 sm:$0xff]   ;;  %v1092_v15 = vld [vmem:[%s1239_s6 + $0x40] ss:$8 sps:$4 sm:$0xff]  }
  0x1d   : > { %738 = vmatpush1.bf16.msra.mxu1 %v1104_v11  ;;  %v1093_v16 = vld [vmem:[%s1239_s6 + $0x54] ss:$8 sps:$4 sm:$0xff]   ;;  %v1114_v17 = vld [vmem:[%s1239_s6 + $0x124] ss:$8 sps:$4 sm:$0xff]   ;;  %v1116_v18 = vld [vmem:[%s1239_s6 + $0x120] ss:$8 sps:$4 sm:$0xff]  }
  0x1e   : > { %699 = vmatpush1.bf16.msra.mxu0 %v1083_v5  ;;  %739 = vmatprep.subr.bf16.mxu1 %v1108_v13  ;;  %v1095_v19 = vld [vmem:[%s1239_s6 + $0x50] ss:$8 sps:$4 sm:$0xff]   ;;  %v1120_v20 = vld [vmem:[%s1239_s6 + $0x134] ss:$8 sps:$4 sm:$0xff]   ;;  %v1096_v21 = vld [vmem:[%s1239_s6 + $0x64] ss:$8 sps:$4 sm:$0xff]  }
  0x1f   : > { %700 = vmatprep.subr.bf16.mxu0 %v1084_v6  ;;  %v1122_v22 = vld [vmem:[%s1239_s6 + $0x130] ss:$8 sps:$4 sm:$0xff]   ;;  %v1098_v23 = vld [vmem:[%s1239_s6 + $0x60] ss:$8 sps:$4 sm:$0xff]   ;;  %v1126_v24 = vld [vmem:[%s1239_s6 + $0x144] ss:$8 sps:$4 sm:$0xff]  }
  0x20   : > { %v1099_v25 = vld [vmem:[%s1239_s6 + $0x74] ss:$8 sps:$4 sm:$0xff]   ;;  %v1128_v26 = vld [vmem:[%s1239_s6 + $0x140] ss:$8 sps:$4 sm:$0xff]   ;;  %v1101_v27 = vld [vmem:[%s1239_s6 + $0x70] ss:$8 sps:$4 sm:$0xff]  }
  0x21   : > { %740 = vmatpush1.bf16.msra.mxu1 %v1110_v14  ;;  %v1132_v28 = vld [vmem:[%s1239_s6 + $0x154] ss:$8 sps:$4 sm:$0xff]   ;;  %v1105_v29 = vld [vmem:[%s1239_s6 + $0x84] ss:$8 sps:$4 sm:$0xff]   ;;  %v1134_v30 = vld [vmem:[%s1239_s6 + $0x150] ss:$8 sps:$4 sm:$0xff]  }
  0x22   : > { %701 = vmatpush1.bf16.msra.mxu0 %v1086_v7  ;;  %741 = vmatprep.subr.bf16.mxu1 %v1114_v17  ;;  %v1107_v31 = vld [vmem:[%s1239_s6 + $0x80] ss:$8 sps:$4 sm:$0xff]   ;;  %v1138_v32 = vld [vmem:[%s1239_s6 + $0x164] ss:$8 sps:$4 sm:$0xff]   ;;  %v1111_v33 = vld [vmem:[%s1239_s6 + $0x94] ss:$8 sps:$4 sm:$0xff]  }
  0x23   : > { %702 = vmatprep.subr.bf16.mxu0 %v1087_v8  ;;  %v395_v34 = vld [vmem:[%s1234_s27] sm:$0xff]  ;;  %v1113_v37 = vld [vmem:[%s1239_s6 + $0x90] ss:$8 sps:$4 sm:$0xff]   ;;  %v1144_v38 = vld [vmem:[%s1239_s6 + $0x174] ss:$8 sps:$4 sm:$0xff]   ;;  %v791_v5 = vshrl.u32 (!%p1044_p7), %v790_v4, 7 }
  0x24   : > { %v994_v35 = vcombine.high %v395_v34, %v395_v34  ;;  %v1140_v36 = vld [vmem:[%s1239_s6 + $0x160] ss:$8 sps:$4 sm:$0xff]   ;;  %v1117_v39 = vld [vmem:[%s1239_s6 + $0xa4] ss:$8 sps:$4 sm:$0xff]   ;;  %v1146_v40 = vld [vmem:[%s1239_s6 + $0x170] ss:$8 sps:$4 sm:$0xff]   ;;  %v993_v53 = vcombine.low %v395_v34, %v395_v34 }
  0x25   : > { %742 = vmatpush1.bf16.msra.mxu1 %v1116_v18  ;;  %v1119_v41 = vld [vmem:[%s1239_s6 + $0xa0] ss:$8 sps:$4 sm:$0xff]   ;;  %v1123_v42 = vld [vmem:[%s1239_s6 + $0xb4] ss:$8 sps:$4 sm:$0xff]   ;;  %v1125_v44 = vld [vmem:[%s1239_s6 + $0xb0] ss:$8 sps:$4 sm:$0xff]  }
  0x26   : > { %703 = vmatpush1.bf16.msra.mxu0 %v1089_v9  ;;  %743 = vmatprep.subr.bf16.mxu1 %v1120_v20  ;;  %v1150_v43 = vld [vmem:[%s1234_s27 + $0x8] ss:$0 sps:$4 sm:$0xff]   ;;  %v1129_v45 = vld [vmem:[%s1239_s6 + $0xc4] ss:$8 sps:$4 sm:$0xff]   ;;  %v1135_v47 = vld [vmem:[%s1239_s6 + $0xd4] ss:$8 sps:$4 sm:$0xff]  }
  0x27   : > { %704 = vmatprep.subr.bf16.mxu0 %v1090_v12  ;;  %728 = vmatprep.mubr.bf16.mxu0 %v994_v35  ;;  %v1131_v46 = vld [vmem:[%s1239_s6 + $0xc0] ss:$8 sps:$4 sm:$0xff]   ;;  %v1137_v48 = vld [vmem:[%s1239_s6 + $0xd0] ss:$8 sps:$4 sm:$0xff]   ;;  %v1141_v49 = vld [vmem:[%s1239_s6 + $0xe4] ss:$8 sps:$4 sm:$0xff]  }
  0x28   : > { %v1143_v50 = vld [vmem:[%s1239_s6 + $0xe0] ss:$8 sps:$4 sm:$0xff]   ;;  %v1147_v51 = vld [vmem:[%s1239_s6 + $0xf4] ss:$8 sps:$4 sm:$0xff]   ;;  %v1149_v52 = vld [vmem:[%s1239_s6 + $0xf0] ss:$8 sps:$4 sm:$0xff]  }
  0x29   : > { %744 = vmatpush1.bf16.msra.mxu1 %v1122_v22  ;;  %v393_v58 = vld [vmem:[#allocation2] sm:$0xff]  ;;  %v394_v61 = vld [vmem:[#allocation2 + $0x8] sm:$0xff]  ;;  %v792_v8 = vsub.s32 (!%p1044_p7), 0, %v791_v5  ;;  %v796_v9 = vsub.s32 (!%p1044_p7), 1, %v791_v5 }
  0x2a   : > { %705 = vmatpush1.bf16.msra.mxu0 %v1092_v15  ;;  %745 = vmatprep.subr.bf16.mxu1 %v1126_v24  ;;  %v788_v6 = vld [vmem:[%s1316_s2] sm:$0x3] (!%p1044_p7) }
  0x2b   : > { %706 = vmatprep.subr.bf16.mxu0 %v1093_v16  ;;  %v802_v7 = vld [vmem:[%s1317_s3] sm:$0x3] (!%p1044_p7)  ;;  %v793_v13 = vrot.slane (!%p1044_p7), %v788_v6, %v792_v8  ;;  %v797_v14 = vrot.slane (!%p1044_p7), %v788_v6, %v796_v9 }
  0x2c   : > { %v816_v12 = vld [vmem:[%s1318_s4] sm:$0xff] (!%p1044_p7)  ;;  %v807_v15 = vrot.slane (!%p1044_p7), %v802_v7, %v792_v8  ;;  %v811_v16 = vrot.slane (!%p1044_p7), %v802_v7, %v796_v9 }
  0x2d   : > { %746 = vmatpush1.bf16.msra.mxu1 %v1128_v26  ;;  %v818_v20 = vunpack.c.h.bf16 (!%p1044_p7), %v816_v12 }
  0x2e   : > { %707 = vmatpush1.bf16.msra.mxu0 %v1095_v19  ;;  %747 = vmatprep.subr.bf16.mxu1 %v1132_v28  ;;  %v817_v19 = vunpack.c.l.bf16 (!%p1044_p7), %v816_v12 }
  0x2f   : > { %708 = vmatprep.subr.bf16.mxu0 %v1096_v21 }
  0x31   : > { %748 = vmatpush1.bf16.msra.mxu1 %v1134_v30 }
  0x32   : > { %709 = vmatpush1.bf16.msra.mxu0 %v1098_v23  ;;  %749 = vmatprep.subr.bf16.mxu1 %v1138_v32 }
  0x33   : > { %710 = vmatprep.subr.bf16.mxu0 %v1099_v25 }
  0x35   : > { %750 = vmatpush1.bf16.msra.mxu1 %v1140_v36 }
  0x36   : > { %711 = vmatpush1.bf16.msra.mxu0 %v1101_v27  ;;  %751 = vmatprep.subr.bf16.mxu1 %v1144_v38 }
  0x37   : > { %712 = vmatprep.subr.bf16.mxu0 %v1105_v29 }
  0x39   : > { %752 = vmatpush1.bf16.msra.mxu1 %v1146_v40 }
  0x3a   : > { %713 = vmatpush1.bf16.msra.mxu0 %v1107_v31 }
  0x3b   : > { %714 = vmatprep.subr.bf16.mxu0 %v1111_v33 }
  0x3c   : > { %770 = vmatmul.mubr.bf16.vlgmr.msra.gmra.mrb[0].mxu1 %v1150_v43 }
  0x3e   : > { %715 = vmatpush1.bf16.msra.mxu0 %v1113_v37 }
  0x3f   : > { %716 = vmatprep.subr.bf16.mxu0 %v1117_v39 }
  0x42   : > { %717 = vmatpush1.bf16.msra.mxu0 %v1119_v41 }
  0x43   : > { %718 = vmatprep.subr.bf16.mxu0 %v1123_v42 }
  0x46   : > { %719 = vmatpush1.bf16.msra.mxu0 %v1125_v44 }
  0x47   : > { %720 = vmatprep.subr.bf16.mxu0 %v1129_v45 }
  0x4a   : > { %721 = vmatpush1.bf16.msra.mxu0 %v1131_v46 }
  0x4b   : > { %722 = vmatprep.subr.bf16.mxu0 %v1135_v47 }
  0x4e   : > { %723 = vmatpush1.bf16.msra.mxu0 %v1137_v48 }
  0x4f   : > { %724 = vmatprep.subr.bf16.mxu0 %v1141_v49 }
  0x52   : > { %725 = vmatpush1.bf16.msra.mxu0 %v1143_v50 }
  0x53   : > { %726 = vmatprep.subr.bf16.mxu0 %v1147_v51 }
  0x56   : > { %727 = vmatpush1.bf16.msra.mxu0 %v1149_v52 }
  0x59   : > { %729 = vmatmul.mubr.bf16.vlgmr.msra.gmra.mrb[0].mxu0 %v993_v53 }
 0x10f   : > { %v771_v54 = vpop.f32.mrb[0].mxu1 }
 0x110   : > { %v773_v55 = vpop.f32.mrb[1].mxu1 }
 0x111   : > { %v775_v56 = vpop.f32.mrb[2].mxu1 }
 0x112   : > { %v776_v57 = vpop.f32.mrb[3].mxu1 }
 0x12c   : > { %v730_v59 = vpop.f32.mrb[0].mxu0  ;;  %785 = sbr.rel (%p1044_p7) target bundleno = 325 (0x145), region = 48 }
 0x12d   : > { %v772_v60 = vadd.f32 %v771_v54, %v730_v59  ;;  %v732_v62 = vpop.f32.mrb[1].mxu0 }
 0x12e   : > { %v774_v63 = vadd.f32 %v773_v55, %v732_v62  ;;  %v734_v0 = vpop.f32.mrb[2].mxu0 }
 0x12f   : > { %v778_v1 = vadd.f32 %v772_v60, %v393_v58  ;;  %v735_v2 = vpop.f32.mrb[3].mxu0 }
 0x130   : > { %v779_v3 = vadd.f32 %v774_v63, %v394_v61 }
 0x131   : > { %780 = vst [vmem:[#allocation2] sm:$0xff] %v778_v1 }
 0x132   : > { %781 = vst [vmem:[#allocation2 + $0x8] sm:$0xff] %v779_v3 }
 0x138   : > { %v786_v10 = vld [vmem:[#allocation2] sm:$0xff] }
 0x139   : > { %v787_v11 = vld [vmem:[#allocation2 + $0x8] sm:$0xff]  ;;  %v800_v17 = vmul.f32 %v793_v13, %v786_v10 }
 0x13a   : > { %v801_v18 = vmul.f32 %v797_v14, %v787_v11 }
 0x13b   : > { %v814_v21 = vadd.f32 %v807_v15, %v800_v17 }
 0x13c   : > { %v815_v22 = vadd.f32 %v811_v16, %v801_v18 }
 0x13d   : > { %v819_v23 = vadd.f32 %v817_v19, %v814_v21 }
 0x13e   : > { %v820_v24 = vadd.f32 %v818_v20, %v815_v22 }
 0x13f   : > { %v821_v25 = vmax.f32 %v819_v23, 0.0 }
 0x140   : > { %v822_v26 = vmax.f32 %v820_v24, 0.0 }
 0x142   : > { %v1051_v27 = vpack.c.bf16 %v822_v26, %v821_v25 }
 0x144   : > { %831 = vst [vmem:[%s1319_s5] sm:$0xff] %v1051_v27 }
 0x145 PF: > { %s15_s20 = sadd.s32 1, %s1175_s20   ;;  %s1320_s18 = smov %s1171_s19 }
 0x146   : > { %p12_p8 = scmp.ge.s32.totalorder %s15_s20, 8   ;;  %s1321_s19 = smov %s1323_s21 }
 0x148   :  { %14 = sbr.rel (!%p12_p8) target bundleno = 2 (0x2), region = 90 }

// kernel: resnet18_forward.36
= control target key start
LH: loop header
LB: loop body
LE: loop exit
PB: predicated region body
PF: predicated region fallthrough
CT: control target
= control target key end

     0   :  { %s1114_s15 = smov 0   ;;  %s1116_s16 = smov 0   ;;  %s1216_s0 = inlined_call_operand.vmem [shape: bf16[8,2304], index: 0, kind: input, shape index: {}]   ;;  %s1217_s1 = inlined_call_operand.vmem [shape: bf16[2304,256], index: 1, kind: input, shape index: {}]   ;;  %s1218_s2 = inlined_call_operand.vmem [shape: f32[1,256], index: 2, kind: input, shape index: {}]   ;;  %s1219_s3 = inlined_call_operand.vmem [shape: f32[1,256], index: 3, kind: input, shape index: {}]   ;;  %s1220_s4 = inlined_call_operand.vmem [shape: bf16[8,256], index: 4, kind: output, shape index: {}]  }
   0x1   :  { %s1118_s17 = smov 0  }
   0x2 LB: > { %s26_s18 = sadd.s32 1, %s1081_s16  ;;  %p898_p0 = scmp.ge.s32.totalorder %s1085_s17, 1  ;;  %s1085_s17 = sphi %s1118_s17, %s14_s17   ;;  %s1081_s16 = sphi %s1116_s16, %s1222_s16   ;;  %s1077_s15 = sphi %s1114_s15, %s1221_s15  }
   0x3   : > { %p27_p1 = scmp.ge.s32.totalorder %s26_s18, 6  ;;  %p229_p2 = scmp.lt.s32.totalorder %s1085_s17, 7 }
   0x5   : > { %s1224_s18 = smov (%p27_p1, %s26_s18), 0  ;;  %p230_p3 = pnand %p898_p0, %p229_p2 }
   0x6   : > { %s281_s19 = smul.u32 (!%p230_p3), 3, %s1077_s15  ;;  %p902_p6 = scmp.ne.s32.totalorder (!%p230_p3), %s1077_s15, 0 }
   0x7   : > { %233 = sbr.rel (%p230_p3) target bundleno = 323 (0x143), region = 36 }
   0x8   : > { %s291_s20 = smul.u32 (!%p230_p3), 48, %s1077_s15  ;;  %p284_p4 = scmp.lt.s32.totalorder (!%p230_p3), %s281_s19, 17 }
   0xa   : > { %p293_p5 = scmp.lt.s32.totalorder (!%p230_p3), %s291_s20, 287 }
   0xe   : > { %s1226_s19 = smov (!%p284_p4, %s281_s19), 17  ;;  %s1228_s20 = smov (!%p293_p5, %s291_s20), 287 }
   0xf   : > { %s899_s21 = sshll.u32 %s1226_s19, 2  ;;  %s960_s25 = sshll.u32 %s1228_s20, 3  ;;  %v1087_v0 = vmov (!%p902_p6), 0.0  }
  0x10   : > { %s1139_s24 = scalar_lea.vmem %s1216_s0, %s899_s21  ;;  %s1144_s28 = scalar_lea.vmem %s1217_s1, %s960_s25  ;;  %328 = vst [vmem:[#allocation2] sm:$0xff] (!%p902_p6), %v1087_v0  ;;  %329 = vst [vmem:[#allocation2 + $0x8] sm:$0xff] (!%p902_p6), %v1087_v0 }
  0x11   : > { %327 = sbr.rel (%p902_p6) target bundleno = 24 (0x18), region = 40 }
  0x18 PF: > { %v988_v1 = vld [vmem:[%s1144_s28 + $0x4] ss:$8 sps:$4 sm:$0xff]   ;;  %v990_v2 = vld [vmem:[%s1144_s28] ss:$8 sps:$4 sm:$0xff]   ;;  %v1088_v3 = vmov 0   ;;  %p954_p7 = scmp.ne.s32.totalorder %s1077_s15, 5 }
  0x19   : > { %706 = vmatprep.mubr.bf16.mxu1 %v1088_v3  ;;  %633 = vmatprep.subr.bf16.mxu0 %v988_v1  ;;  %v991_v4 = vld [vmem:[%s1144_s28 + $0x14] ss:$8 sps:$4 sm:$0xff]   ;;  %v993_v5 = vld [vmem:[%s1144_s28 + $0x10] ss:$8 sps:$4 sm:$0xff]   ;;  %v994_v6 = vld [vmem:[%s1144_s28 + $0x24] ss:$8 sps:$4 sm:$0xff]  }
  0x1a   : > { %634 = vmatpush1.bf16.msra.mxu0 %v990_v2  ;;  %v996_v7 = vld [vmem:[%s1144_s28 + $0x20] ss:$8 sps:$4 sm:$0xff]   ;;  %v997_v8 = vld [vmem:[%s1144_s28 + $0x34] ss:$8 sps:$4 sm:$0xff]   ;;  %v999_v9 = vld [vmem:[%s1144_s28 + $0x30] ss:$8 sps:$4 sm:$0xff]  }
  0x1b   : > { %635 = vmatprep.subr.bf16.mxu0 %v991_v4  ;;  %v1012_v10 = vld [vmem:[%s1144_s28 + $0x104] ss:$8 sps:$4 sm:$0xff]   ;;  %v1014_v11 = vld [vmem:[%s1144_s28 + $0x100] ss:$8 sps:$4 sm:$0xff]   ;;  %v1018_v13 = vld [vmem:[%s1144_s28 + $0x114] ss:$8 sps:$4 sm:$0xff]   ;;  %v727_v4 = vlaneseq (!%p954_p7) }
  0x1c   : > { %v1000_v12 = vld [vmem:[%s1144_s28 + $0x44] ss:$8 sps:$4 sm:$0xff]   ;;  %674 = vmatprep.subr.bf16.mxu1 %v1012_v10  ;;  %v1020_v14 = vld [vmem:[%s1144_s28 + $0x110] ss:$8 sps:$4 sm:$0xff]   ;;  %v1002_v15 = vld [vmem:[%s1144_s28 + $0x40] ss:$8 sps:$4 sm:$0xff]  }
  0x1d   : > { %675 = vmatpush1.bf16.msra.mxu1 %v1014_v11  ;;  %v1003_v16 = vld [vmem:[%s1144_s28 + $0x54] ss:$8 sps:$4 sm:$0xff]   ;;  %v1024_v17 = vld [vmem:[%s1144_s28 + $0x124] ss:$8 sps:$4 sm:$0xff]   ;;  %v1026_v18 = vld [vmem:[%s1144_s28 + $0x120] ss:$8 sps:$4 sm:$0xff]  }
  0x1e   : > { %636 = vmatpush1.bf16.msra.mxu0 %v993_v5  ;;  %676 = vmatprep.subr.bf16.mxu1 %v1018_v13  ;;  %v1005_v19 = vld [vmem:[%s1144_s28 + $0x50] ss:$8 sps:$4 sm:$0xff]   ;;  %v1030_v20 = vld [vmem:[%s1144_s28 + $0x134] ss:$8 sps:$4 sm:$0xff]   ;;  %v1006_v21 = vld [vmem:[%s1144_s28 + $0x64] ss:$8 sps:$4 sm:$0xff]  }
  0x1f   : > { %637 = vmatprep.subr.bf16.mxu0 %v994_v6  ;;  %v1032_v22 = vld [vmem:[%s1144_s28 + $0x130] ss:$8 sps:$4 sm:$0xff]   ;;  %v1008_v23 = vld [vmem:[%s1144_s28 + $0x60] ss:$8 sps:$4 sm:$0xff]   ;;  %v1036_v24 = vld [vmem:[%s1144_s28 + $0x144] ss:$8 sps:$4 sm:$0xff]  }
  0x20   : > { %v1009_v25 = vld [vmem:[%s1144_s28 + $0x74] ss:$8 sps:$4 sm:$0xff]   ;;  %v1038_v26 = vld [vmem:[%s1144_s28 + $0x140] ss:$8 sps:$4 sm:$0xff]   ;;  %v1011_v27 = vld [vmem:[%s1144_s28 + $0x70] ss:$8 sps:$4 sm:$0xff]  }
  0x21   : > { %677 = vmatpush1.bf16.msra.mxu1 %v1020_v14  ;;  %v1042_v28 = vld [vmem:[%s1144_s28 + $0x154] ss:$8 sps:$4 sm:$0xff]   ;;  %v1015_v29 = vld [vmem:[%s1144_s28 + $0x84] ss:$8 sps:$4 sm:$0xff]   ;;  %v1044_v30 = vld [vmem:[%s1144_s28 + $0x150] ss:$8 sps:$4 sm:$0xff]  }
  0x22   : > { %638 = vmatpush1.bf16.msra.mxu0 %v996_v7  ;;  %678 = vmatprep.subr.bf16.mxu1 %v1024_v17  ;;  %v1017_v31 = vld [vmem:[%s1144_s28 + $0x80] ss:$8 sps:$4 sm:$0xff]   ;;  %v1048_v32 = vld [vmem:[%s1144_s28 + $0x164] ss:$8 sps:$4 sm:$0xff]   ;;  %v1021_v33 = vld [vmem:[%s1144_s28 + $0x94] ss:$8 sps:$4 sm:$0xff]  }
  0x23   : > { %639 = vmatprep.subr.bf16.mxu0 %v997_v8  ;;  %v332_v34 = vld [vmem:[%s1139_s24] sm:$0xff]  ;;  %v1023_v37 = vld [vmem:[%s1144_s28 + $0x90] ss:$8 sps:$4 sm:$0xff]   ;;  %v1054_v38 = vld [vmem:[%s1144_s28 + $0x174] ss:$8 sps:$4 sm:$0xff]   ;;  %v728_v5 = vshrl.u32 (!%p954_p7), %v727_v4, 7 }
  0x24   : > { %v904_v35 = vcombine.high %v332_v34, %v332_v34  ;;  %v1050_v36 = vld [vmem:[%s1144_s28 + $0x160] ss:$8 sps:$4 sm:$0xff]   ;;  %v1027_v39 = vld [vmem:[%s1144_s28 + $0xa4] ss:$8 sps:$4 sm:$0xff]   ;;  %v1056_v40 = vld [vmem:[%s1144_s28 + $0x170] ss:$8 sps:$4 sm:$0xff]   ;;  %v903_v53 = vcombine.low %v332_v34, %v332_v34 }
  0x25   : > { %679 = vmatpush1.bf16.msra.mxu1 %v1026_v18  ;;  %v1029_v41 = vld [vmem:[%s1144_s28 + $0xa0] ss:$8 sps:$4 sm:$0xff]   ;;  %v1033_v42 = vld [vmem:[%s1144_s28 + $0xb4] ss:$8 sps:$4 sm:$0xff]   ;;  %v1035_v44 = vld [vmem:[%s1144_s28 + $0xb0] ss:$8 sps:$4 sm:$0xff]  }
  0x26   : > { %640 = vmatpush1.bf16.msra.mxu0 %v999_v9  ;;  %680 = vmatprep.subr.bf16.mxu1 %v1030_v20  ;;  %v1060_v43 = vld [vmem:[%s1139_s24 + $0x8] ss:$0 sps:$4 sm:$0xff]   ;;  %v1039_v45 = vld [vmem:[%s1144_s28 + $0xc4] ss:$8 sps:$4 sm:$0xff]   ;;  %v1045_v47 = vld [vmem:[%s1144_s28 + $0xd4] ss:$8 sps:$4 sm:$0xff]  }
  0x27   : > { %641 = vmatprep.subr.bf16.mxu0 %v1000_v12  ;;  %665 = vmatprep.mubr.bf16.mxu0 %v904_v35  ;;  %v1041_v46 = vld [vmem:[%s1144_s28 + $0xc0] ss:$8 sps:$4 sm:$0xff]   ;;  %v1047_v48 = vld [vmem:[%s1144_s28 + $0xd0] ss:$8 sps:$4 sm:$0xff]   ;;  %v1051_v49 = vld [vmem:[%s1144_s28 + $0xe4] ss:$8 sps:$4 sm:$0xff]  }
  0x28   : > { %v1053_v50 = vld [vmem:[%s1144_s28 + $0xe0] ss:$8 sps:$4 sm:$0xff]   ;;  %v1057_v51 = vld [vmem:[%s1144_s28 + $0xf4] ss:$8 sps:$4 sm:$0xff]   ;;  %v1059_v52 = vld [vmem:[%s1144_s28 + $0xf0] ss:$8 sps:$4 sm:$0xff]  }
  0x29   : > { %681 = vmatpush1.bf16.msra.mxu1 %v1032_v22  ;;  %v330_v58 = vld [vmem:[#allocation2] sm:$0xff]  ;;  %v331_v61 = vld [vmem:[#allocation2 + $0x8] sm:$0xff]  ;;  %v729_v8 = vsub.s32 (!%p954_p7), 0, %v728_v5  ;;  %v733_v9 = vsub.s32 (!%p954_p7), 1, %v728_v5 }
  0x2a   : > { %642 = vmatpush1.bf16.msra.mxu0 %v1002_v15  ;;  %682 = vmatprep.subr.bf16.mxu1 %v1036_v24  ;;  %v725_v6 = vld [vmem:[%s1218_s2] sm:$0x3] (!%p954_p7) }
  0x2b   : > { %643 = vmatprep.subr.bf16.mxu0 %v1003_v16  ;;  %v739_v7 = vld [vmem:[%s1219_s3] sm:$0x3] (!%p954_p7)  ;;  %v730_v12 = vrot.slane (!%p954_p7), %v725_v6, %v729_v8  ;;  %v734_v13 = vrot.slane (!%p954_p7), %v725_v6, %v733_v9 }
  0x2c   : > { %v744_v14 = vrot.slane (!%p954_p7), %v739_v7, %v729_v8  ;;  %v748_v15 = vrot.slane (!%p954_p7), %v739_v7, %v733_v9 }
  0x2d   : > { %683 = vmatpush1.bf16.msra.mxu1 %v1038_v26 }
  0x2e   : > { %644 = vmatpush1.bf16.msra.mxu0 %v1005_v19  ;;  %684 = vmatprep.subr.bf16.mxu1 %v1042_v28 }
  0x2f   : > { %645 = vmatprep.subr.bf16.mxu0 %v1006_v21 }
  0x31   : > { %685 = vmatpush1.bf16.msra.mxu1 %v1044_v30 }
  0x32   : > { %646 = vmatpush1.bf16.msra.mxu0 %v1008_v23  ;;  %686 = vmatprep.subr.bf16.mxu1 %v1048_v32 }
  0x33   : > { %647 = vmatprep.subr.bf16.mxu0 %v1009_v25 }
  0x35   : > { %687 = vmatpush1.bf16.msra.mxu1 %v1050_v36 }
  0x36   : > { %648 = vmatpush1.bf16.msra.mxu0 %v1011_v27  ;;  %688 = vmatprep.subr.bf16.mxu1 %v1054_v38 }
  0x37   : > { %649 = vmatprep.subr.bf16.mxu0 %v1015_v29 }
  0x39   : > { %689 = vmatpush1.bf16.msra.mxu1 %v1056_v40 }
  0x3a   : > { %650 = vmatpush1.bf16.msra.mxu0 %v1017_v31 }
  0x3b   : > { %651 = vmatprep.subr.bf16.mxu0 %v1021_v33 }
  0x3c   : > { %707 = vmatmul.mubr.bf16.vlgmr.msra.gmra.mrb[0].mxu1 %v1060_v43 }
  0x3e   : > { %652 = vmatpush1.bf16.msra.mxu0 %v1023_v37 }
  0x3f   : > { %653 = vmatprep.subr.bf16.mxu0 %v1027_v39 }
  0x42   : > { %654 = vmatpush1.bf16.msra.mxu0 %v1029_v41 }
  0x43   : > { %655 = vmatprep.subr.bf16.mxu0 %v1033_v42 }
  0x46   : > { %656 = vmatpush1.bf16.msra.mxu0 %v1035_v44 }
  0x47   : > { %657 = vmatprep.subr.bf16.mxu0 %v1039_v45 }
  0x4a   : > { %658 = vmatpush1.bf16.msra.mxu0 %v1041_v46 }
  0x4b   : > { %659 = vmatprep.subr.bf16.mxu0 %v1045_v47 }
  0x4e   : > { %660 = vmatpush1.bf16.msra.mxu0 %v1047_v48 }
  0x4f   : > { %661 = vmatprep.subr.bf16.mxu0 %v1051_v49 }
  0x52   : > { %662 = vmatpush1.bf16.msra.mxu0 %v1053_v50 }
  0x53   : > { %663 = vmatprep.subr.bf16.mxu0 %v1057_v51 }
  0x56   : > { %664 = vmatpush1.bf16.msra.mxu0 %v1059_v52 }
  0x59   : > { %666 = vmatmul.mubr.bf16.vlgmr.msra.gmra.mrb[0].mxu0 %v903_v53 }
 0x10f   : > { %v708_v54 = vpop.f32.mrb[0].mxu1 }
 0x110   : > { %v710_v55 = vpop.f32.mrb[1].mxu1 }
 0x111   : > { %v712_v56 = vpop.f32.mrb[2].mxu1 }
 0x112   : > { %v713_v57 = vpop.f32.mrb[3].mxu1 }
 0x12c   : > { %v667_v59 = vpop.f32.mrb[0].mxu0  ;;  %722 = sbr.rel (%p954_p7) target bundleno = 323 (0x143), region = 44 }
 0x12d   : > { %v709_v60 = vadd.f32 %v708_v54, %v667_v59  ;;  %v669_v62 = vpop.f32.mrb[1].mxu0 }
 0x12e   : > { %v711_v63 = vadd.f32 %v710_v55, %v669_v62  ;;  %v671_v0 = vpop.f32.mrb[2].mxu0 }
 0x12f   : > { %v715_v1 = vadd.f32 %v709_v60, %v330_v58  ;;  %v672_v2 = vpop.f32.mrb[3].mxu0 }
 0x130   : > { %v716_v3 = vadd.f32 %v711_v63, %v331_v61 }
 0x131   : > { %717 = vst [vmem:[#allocation2] sm:$0xff] %v715_v1 }
 0x132   : > { %718 = vst [vmem:[#allocation2 + $0x8] sm:$0xff] %v716_v3 }
 0x138   : > { %v723_v10 = vld [vmem:[#allocation2] sm:$0xff] }
 0x139   : > { %v724_v11 = vld [vmem:[#allocation2 + $0x8] sm:$0xff]  ;;  %v737_v16 = vmul.f32 %v730_v12, %v723_v10 }
 0x13a   : > { %v738_v17 = vmul.f32 %v734_v13, %v724_v11 }
 0x13b   : > { %v751_v18 = vadd.f32 %v744_v14, %v737_v16 }
 0x13c   : > { %v752_v19 = vadd.f32 %v748_v15, %v738_v17 }
 0x13d   : > { %v753_v20 = vmax.f32 %v751_v18, 0.0 }
 0x13e   : > { %v754_v21 = vmax.f32 %v752_v19, 0.0 }
 0x140   : > { %v961_v22 = vpack.c.bf16 %v754_v21, %v753_v20 }
 0x142   : > { %763 = vst [vmem:[%s1220_s4] sm:$0xff] %v961_v22 }
 0x143 PF: > { %s14_s17 = sadd.s32 1, %s1085_s17   ;;  %s1221_s15 = smov %s1081_s16 }
 0x144   : > { %p11_p8 = scmp.ge.s32.totalorder %s14_s17, 8   ;;  %s1222_s16 = smov %s1224_s18 }
 0x146   :  { %13 = sbr.rel (!%p11_p8) target bundleno = 2 (0x2), region = 83 }

// kernel: resnet18_forward.38
= control target key start
LH: loop header
LB: loop body
LE: loop exit
PB: predicated region body
PF: predicated region fallthrough
CT: control target
= control target key end

     0   :  { %s1394_s15 = smov 0   ;;  %s1396_s16 = smov 0   ;;  %s1666_s0 = inlined_call_operand.vmem [shape: bf16[8,2304], index: 0, kind: input, shape index: {}]   ;;  %s1667_s1 = inlined_call_operand.vmem [shape: bf16[2304,512], index: 1, kind: input, shape index: {}]   ;;  %s1668_s2 = inlined_call_operand.vmem [shape: f32[1,512], index: 2, kind: input, shape index: {}]   ;;  %s1669_s3 = inlined_call_operand.vmem [shape: f32[1,512], index: 3, kind: input, shape index: {}]   ;;  %s1670_s4 = inlined_call_operand.vmem [shape: bf16[8,512], index: 4, kind: output, shape index: {}]  }
   0x1   :  { %s1398_s17 = smov 0   ;;  %s1400_s18 = smov 0  }
   0x2   :  { %s1402_s19 = smov 0   ;;  %s1404_s20 = smov 0  }
   0x3   :  { %s1406_s21 = smov 0  }
   0x4 LB: > { %s26_s22 = sadd.s32 1, %s1357_s19  ;;  %s29_s23 = sadd.s32 1, %s1361_s20  ;;  %s1365_s21 = sphi %s1406_s21, %s14_s21   ;;  %s1361_s20 = sphi %s1404_s20, %s1676_s20   ;;  %s1357_s19 = sphi %s1402_s19, %s1675_s19   ;;  %s1353_s18 = sphi %s1400_s18, %s1674_s18   ;;  %s1349_s17 = sphi %s1398_s17, %s1673_s17   ;;  %s1345_s16 = sphi %s1396_s16, %s1672_s16   ;;  %s1341_s15 = sphi %s1394_s15, %s1671_s15  }
   0x5   : > { %p27_p0 = scmp.ge.s32.totalorder %s26_s22, 6  ;;  %p77_p1 = scmp.ne.s32.totalorder %s1345_s16, %s1341_s15 }
   0x6   : > { %p78_p2 = scmp.eq.s32.totalorder %s1365_s21, 0  ;;  %s70_s27 = sadd.s32 1, %s1345_s16 }
   0x7   : > { %s1678_s22 = smov (%p27_p0, %s26_s22), 0  ;;  %s1680_s23 = smov (!%p27_p0, %s29_s23), %s1361_s20 }
   0x8   : > { %p79_p3 = por %p78_p2, %p77_p1  ;;  %p31_p4 = scmp.ge.s32.totalorder %s1680_s23, 2 }
   0x9   : > { %s65_s24 = ssub.s32 %s1357_s19, %s1678_s22  ;;  %p1108_p6 = scmp.ge.s32.totalorder %s1365_s21, 12 }
   0xa   : > { %s1682_s23 = smov (%p31_p4, %s1680_s23), 0 }
   0xb   : > { %s66_s25 = ssub.s32 %s1361_s20, %s1682_s23  ;;  %183 = sbr.rel (%p1108_p6) target bundleno = 50 (0x32), region = 16 }
   0xc   : > { %s67_s26 = sor.u32 %s66_s25, %s65_s24 }
   0xd   : > { %p68_p5 = scmp.eq.s32.totalorder %s67_s26, 0 }
   0xf   : > { %s1445_s28 = scalar_select %p68_p5, %s1345_s16, %s70_s27  }
  0x12   : > { %199 = sbr.rel (!%p79_p3) target bundleno = 50 (0x32), region = 24  ;;  %s201_s29 = sand.u32 (%p79_p3), 1, %s1345_s16  }
  0x13   : > { %s1176_s30 = smul.u32 (%p79_p3), 384, %s201_s29  ;;  %s1109_s5 = sshll.u32 (%p79_p3), %s1361_s20, 1 }
  0x14   : > { %s1174_s6 = smul.u32 (%p79_p3), 192, %s1357_s19 }
  0x15   : > { %s1459_s12 = scalar_lea.vmem (%p79_p3), [#allocation3], %s1176_s30 }
  0x16   : > { %s207_s7 = sadd.s32 (%p79_p3), %s1174_s6, %s1109_s5 }
  0x17   : > { %s1111_s8 = sshll.u32 (%p79_p3), %s207_s7, 2 }
  0x18   : > { %s1454_s11 = scalar_lea.vmem (%p79_p3), %s1667_s1, %s1111_s8 }
  0x19   : > { %v331_v0 = vld [vmem:[%s1454_s11] sm:$0xff]  ;;  %v333_v1 = vld [vmem:[%s1454_s11 + $0x10] sm:$0xff] }
  0x1a   : > { %v335_v2 = vld [vmem:[%s1454_s11 + $0x20] sm:$0xff]  ;;  %332 = vst [vmem:[%s1459_s12] sm:$0xff] %v331_v0  ;;  %334 = vst [vmem:[%s1459_s12 + $0x8] sm:$0xff] %v333_v1  ;;  %v337_v3 = vld [vmem:[%s1454_s11 + $0x30] sm:$0xff] }
  0x1b   : > { %336 = vst [vmem:[%s1459_s12 + $0x10] sm:$0xff] %v335_v2  ;;  %v339_v4 = vld [vmem:[%s1454_s11 + $0x40] sm:$0xff]  ;;  %v341_v5 = vld [vmem:[%s1454_s11 + $0x50] sm:$0xff]  ;;  %338 = vst [vmem:[%s1459_s12 + $0x18] sm:$0xff] %v337_v3 }
  0x1c   : > { %340 = vst [vmem:[%s1459_s12 + $0x20] sm:$0xff] %v339_v4  ;;  %342 = vst [vmem:[%s1459_s12 + $0x28] sm:$0xff] %v341_v5  ;;  %v343_v6 = vld [vmem:[%s1454_s11 + $0x60] sm:$0xff]  ;;  %v345_v7 = vld [vmem:[%s1454_s11 + $0x70] sm:$0xff] }
  0x1d   : > { %v347_v8 = vld [vmem:[%s1454_s11 + $0x80] sm:$0xff]  ;;  %344 = vst [vmem:[%s1459_s12 + $0x30] sm:$0xff] %v343_v6  ;;  %346 = vst [vmem:[%s1459_s12 + $0x38] sm:$0xff] %v345_v7  ;;  %v349_v9 = vld [vmem:[%s1454_s11 + $0x90] sm:$0xff] }
  0x1e   : > { %348 = vst [vmem:[%s1459_s12 + $0x40] sm:$0xff] %v347_v8  ;;  %v351_v10 = vld [vmem:[%s1454_s11 + $0xa0] sm:$0xff]  ;;  %v353_v11 = vld [vmem:[%s1454_s11 + $0xb0] sm:$0xff]  ;;  %350 = vst [vmem:[%s1459_s12 + $0x48] sm:$0xff] %v349_v9 }
  0x1f   : > { %352 = vst [vmem:[%s1459_s12 + $0x50] sm:$0xff] %v351_v10  ;;  %354 = vst [vmem:[%s1459_s12 + $0x58] sm:$0xff] %v353_v11  ;;  %v355_v12 = vld [vmem:[%s1454_s11 + $0xc0] sm:$0xff]  ;;  %v357_v13 = vld [vmem:[%s1454_s11 + $0xd0] sm:$0xff] }
  0x20   : > { %v359_v14 = vld [vmem:[%s1454_s11 + $0xe0] sm:$0xff]  ;;  %356 = vst [vmem:[%s1459_s12 + $0x60] sm:$0xff] %v355_v12  ;;  %358 = vst [vmem:[%s1459_s12 + $0x68] sm:$0xff] %v357_v13  ;;  %v361_v15 = vld [vmem:[%s1454_s11 + $0xf0] sm:$0xff] }
  0x21   : > { %360 = vst [vmem:[%s1459_s12 + $0x70] sm:$0xff] %v359_v14  ;;  %v363_v16 = vld [vmem:[%s1454_s11 + $0x100] sm:$0xff]  ;;  %v365_v17 = vld [vmem:[%s1454_s11 + $0x110] sm:$0xff]  ;;  %362 = vst [vmem:[%s1459_s12 + $0x78] sm:$0xff] %v361_v15 }
  0x22   : > { %364 = vst [vmem:[%s1459_s12 + $0x80] sm:$0xff] %v363_v16  ;;  %366 = vst [vmem:[%s1459_s12 + $0x88] sm:$0xff] %v365_v17  ;;  %v367_v18 = vld [vmem:[%s1454_s11 + $0x120] sm:$0xff]  ;;  %v369_v19 = vld [vmem:[%s1454_s11 + $0x130] sm:$0xff] }
  0x23   : > { %v371_v20 = vld [vmem:[%s1454_s11 + $0x140] sm:$0xff]  ;;  %368 = vst [vmem:[%s1459_s12 + $0x90] sm:$0xff] %v367_v18  ;;  %370 = vst [vmem:[%s1459_s12 + $0x98] sm:$0xff] %v369_v19  ;;  %v373_v21 = vld [vmem:[%s1454_s11 + $0x150] sm:$0xff] }
  0x24   : > { %372 = vst [vmem:[%s1459_s12 + $0xa0] sm:$0xff] %v371_v20  ;;  %v375_v22 = vld [vmem:[%s1454_s11 + $0x160] sm:$0xff]  ;;  %v377_v23 = vld [vmem:[%s1454_s11 + $0x170] sm:$0xff]  ;;  %374 = vst [vmem:[%s1459_s12 + $0xa8] sm:$0xff] %v373_v21 }
  0x25   : > { %376 = vst [vmem:[%s1459_s12 + $0xb0] sm:$0xff] %v375_v22  ;;  %378 = vst [vmem:[%s1459_s12 + $0xb8] sm:$0xff] %v377_v23  ;;  %v379_v24 = vld [vmem:[%s1454_s11 + $0x180] sm:$0xff]  ;;  %v381_v25 = vld [vmem:[%s1454_s11 + $0x190] sm:$0xff] }
  0x26   : > { %v383_v26 = vld [vmem:[%s1454_s11 + $0x1a0] sm:$0xff]  ;;  %380 = vst [vmem:[%s1459_s12 + $0xc0] sm:$0xff] %v379_v24  ;;  %382 = vst [vmem:[%s1459_s12 + $0xc8] sm:$0xff] %v381_v25  ;;  %v385_v27 = vld [vmem:[%s1454_s11 + $0x1b0] sm:$0xff] }
  0x27   : > { %384 = vst [vmem:[%s1459_s12 + $0xd0] sm:$0xff] %v383_v26  ;;  %v387_v28 = vld [vmem:[%s1454_s11 + $0x1c0] sm:$0xff]  ;;  %v389_v29 = vld [vmem:[%s1454_s11 + $0x1d0] sm:$0xff]  ;;  %386 = vst [vmem:[%s1459_s12 + $0xd8] sm:$0xff] %v385_v27 }
  0x28   : > { %388 = vst [vmem:[%s1459_s12 + $0xe0] sm:$0xff] %v387_v28  ;;  %390 = vst [vmem:[%s1459_s12 + $0xe8] sm:$0xff] %v389_v29  ;;  %v391_v30 = vld [vmem:[%s1454_s11 + $0x1e0] sm:$0xff]  ;;  %v393_v31 = vld [vmem:[%s1454_s11 + $0x1f0] sm:$0xff] }
  0x29   : > { %v395_v32 = vld [vmem:[%s1454_s11 + $0x200] sm:$0xff]  ;;  %392 = vst [vmem:[%s1459_s12 + $0xf0] sm:$0xff] %v391_v30  ;;  %394 = vst [vmem:[%s1459_s12 + $0xf8] sm:$0xff] %v393_v31  ;;  %v397_v33 = vld [vmem:[%s1454_s11 + $0x210] sm:$0xff] }
  0x2a   : > { %396 = vst [vmem:[%s1459_s12 + $0x100] sm:$0xff] %v395_v32  ;;  %v399_v34 = vld [vmem:[%s1454_s11 + $0x220] sm:$0xff]  ;;  %v401_v35 = vld [vmem:[%s1454_s11 + $0x230] sm:$0xff]  ;;  %398 = vst [vmem:[%s1459_s12 + $0x108] sm:$0xff] %v397_v33 }
  0x2b   : > { %400 = vst [vmem:[%s1459_s12 + $0x110] sm:$0xff] %v399_v34  ;;  %402 = vst [vmem:[%s1459_s12 + $0x118] sm:$0xff] %v401_v35  ;;  %v403_v36 = vld [vmem:[%s1454_s11 + $0x240] sm:$0xff]  ;;  %v405_v37 = vld [vmem:[%s1454_s11 + $0x250] sm:$0xff] }
  0x2c   : > { %v407_v38 = vld [vmem:[%s1454_s11 + $0x260] sm:$0xff]  ;;  %404 = vst [vmem:[%s1459_s12 + $0x120] sm:$0xff] %v403_v36  ;;  %406 = vst [vmem:[%s1459_s12 + $0x128] sm:$0xff] %v405_v37  ;;  %v409_v39 = vld [vmem:[%s1454_s11 + $0x270] sm:$0xff] }
  0x2d   : > { %408 = vst [vmem:[%s1459_s12 + $0x130] sm:$0xff] %v407_v38  ;;  %v411_v40 = vld [vmem:[%s1454_s11 + $0x280] sm:$0xff]  ;;  %v413_v41 = vld [vmem:[%s1454_s11 + $0x290] sm:$0xff]  ;;  %410 = vst [vmem:[%s1459_s12 + $0x138] sm:$0xff] %v409_v39 }
  0x2e   : > { %412 = vst [vmem:[%s1459_s12 + $0x140] sm:$0xff] %v411_v40  ;;  %414 = vst [vmem:[%s1459_s12 + $0x148] sm:$0xff] %v413_v41  ;;  %v415_v42 = vld [vmem:[%s1454_s11 + $0x2a0] sm:$0xff]  ;;  %v417_v43 = vld [vmem:[%s1454_s11 + $0x2b0] sm:$0xff] }
  0x2f   : > { %v419_v44 = vld [vmem:[%s1454_s11 + $0x2c0] sm:$0xff]  ;;  %416 = vst [vmem:[%s1459_s12 + $0x150] sm:$0xff] %v415_v42  ;;  %418 = vst [vmem:[%s1459_s12 + $0x158] sm:$0xff] %v417_v43  ;;  %v421_v45 = vld [vmem:[%s1454_s11 + $0x2d0] sm:$0xff] }
  0x30   : > { %420 = vst [vmem:[%s1459_s12 + $0x160] sm:$0xff] %v419_v44  ;;  %v423_v46 = vld [vmem:[%s1454_s11 + $0x2e0] sm:$0xff]  ;;  %v425_v47 = vld [vmem:[%s1454_s11 + $0x2f0] sm:$0xff]  ;;  %422 = vst [vmem:[%s1459_s12 + $0x168] sm:$0xff] %v421_v45 }
  0x31   : > { %424 = vst [vmem:[%s1459_s12 + $0x170] sm:$0xff] %v423_v46  ;;  %426 = vst [vmem:[%s1459_s12 + $0x178] sm:$0xff] %v425_v47 }
  0x32 PF: > { %p1112_p7 = scmp.ge.s32.totalorder %s1365_s21, 1  ;;  %p447_p8 = scmp.lt.s32.totalorder %s1365_s21, 13 }
  0x34   : > { %p448_p9 = pnand %p1112_p7, %p447_p8 }
  0x35   : > { %s454_s13 = sand.u32 (!%p448_p9), 1, %s1341_s15   ;;  %s500_s14 = smul.u32 (!%p448_p9), 3, %s1349_s17 }
  0x36   : > { %451 = sbr.rel (%p448_p9) target bundleno = 370 (0x172), region = 70  ;;  %s1114_s25 = sshll.u32 (!%p448_p9), %s1353_s18, 1 }
  0x37   : > { %s1177_s24 = smul.u32 (!%p448_p9), 384, %s454_s13  ;;  %p503_p10 = scmp.lt.s32.totalorder (!%p448_p9), %s500_s14, 17 }
  0x38   : > { %p513_p11 = scmp.lt.s32.totalorder (!%p448_p9), %s1114_s25, 3  ;;  %p1118_p12 = scmp.ne.s32.totalorder (!%p448_p9), %s1349_s17, 0 }
  0x39   : > { %s1580_s13 = scalar_lea.vmem (!%p448_p9), [#allocation3], %s1177_s24 }
  0x3d   : > { %s1684_s14 = smov (!%p503_p10, %s500_s14), 17  ;;  %s1686_s25 = smov (!%p513_p11, %s1114_s25), 3 }
  0x3e   : > { %s1113_s26 = sshll.u32 %s1684_s14, 2  ;;  %s515_s15 = scalar_lea.vmem %s1668_s2, %s1686_s25  ;;  %v1367_v48 = vmov (!%p1118_p12), 0.0  }
  0x3f   : > { %s1564_s30 = scalar_lea.vmem %s1666_s0, %s1113_s26  ;;  %s520_s8 = scalar_lea.vmem %s1669_s3, %s1686_s25  ;;  %537 = vst [vmem:[#allocation2] sm:$0xff] (!%p1118_p12), %v1367_v48  ;;  %538 = vst [vmem:[#allocation2 + $0x8] sm:$0xff] (!%p1118_p12), %v1367_v48 }
  0x40   : > { %s1117_s9 = sshll.u32 %s1686_s25, 2  ;;  %536 = sbr.rel (%p1118_p12) target bundleno = 71 (0x47), region = 78 }
  0x41   : > { %s1578_s12 = scalar_lea.vmem %s1670_s4, %s1117_s9 }
  0x47 PF: > { %v1236_v49 = vld [vmem:[%s1580_s13 + $0x4] ss:$8 sps:$4 sm:$0xff]   ;;  %v1238_v50 = vld [vmem:[%s1580_s13] ss:$8 sps:$4 sm:$0xff]   ;;  %v1368_v51 = vmov 0   ;;  %v541_v18 = vld [vmem:[%s1564_s30] sm:$0xff] }
  0x48   : > { %915 = vmatprep.mubr.bf16.mxu1 %v1368_v51  ;;  %842 = vmatprep.subr.bf16.mxu0 %v1236_v49  ;;  %v1239_v52 = vld [vmem:[%s1580_s13 + $0x14] ss:$8 sps:$4 sm:$0xff]   ;;  %v1241_v53 = vld [vmem:[%s1580_s13 + $0x10] ss:$8 sps:$4 sm:$0xff]   ;;  %v1242_v54 = vld [vmem:[%s1580_s13 + $0x24] ss:$8 sps:$4 sm:$0xff]   ;;  %v1120_v19 = vcombine.high %v541_v18, %v541_v18  ;;  %v1119_v37 = vcombine.low %v541_v18, %v541_v18 }
  0x49   : > { %843 = vmatpush1.bf16.msra.mxu0 %v1238_v50  ;;  %v1244_v55 = vld [vmem:[%s1580_s13 + $0x20] ss:$8 sps:$4 sm:$0xff]   ;;  %v1245_v56 = vld [vmem:[%s1580_s13 + $0x34] ss:$8 sps:$4 sm:$0xff]   ;;  %v1247_v57 = vld [vmem:[%s1580_s13 + $0x30] ss:$8 sps:$4 sm:$0xff]  }
  0x4a   : > { %844 = vmatprep.subr.bf16.mxu0 %v1239_v52  ;;  %v1260_v58 = vld [vmem:[%s1580_s13 + $0x104] ss:$8 sps:$4 sm:$0xff]   ;;  %v1262_v59 = vld [vmem:[%s1580_s13 + $0x100] ss:$8 sps:$4 sm:$0xff]   ;;  %v1266_v61 = vld [vmem:[%s1580_s13 + $0x114] ss:$8 sps:$4 sm:$0xff]   ;;  %874 = vmatprep.mubr.bf16.mxu0 %v1120_v19 }
  0x4b   : > { %v1248_v60 = vld [vmem:[%s1580_s13 + $0x44] ss:$8 sps:$4 sm:$0xff]   ;;  %883 = vmatprep.subr.bf16.mxu1 %v1260_v58  ;;  %v1268_v62 = vld [vmem:[%s1580_s13 + $0x110] ss:$8 sps:$4 sm:$0xff]   ;;  %v1250_v63 = vld [vmem:[%s1580_s13 + $0x40] ss:$8 sps:$4 sm:$0xff]  }
  0x4c   : > { %884 = vmatpush1.bf16.msra.mxu1 %v1262_v59  ;;  %v1251_v0 = vld [vmem:[%s1580_s13 + $0x54] ss:$8 sps:$4 sm:$0xff]   ;;  %v1272_v1 = vld [vmem:[%s1580_s13 + $0x124] ss:$8 sps:$4 sm:$0xff]   ;;  %v1274_v2 = vld [vmem:[%s1580_s13 + $0x120] ss:$8 sps:$4 sm:$0xff]  }
  0x4d   : > { %845 = vmatpush1.bf16.msra.mxu0 %v1241_v53  ;;  %885 = vmatprep.subr.bf16.mxu1 %v1266_v61  ;;  %v1253_v3 = vld [vmem:[%s1580_s13 + $0x50] ss:$8 sps:$4 sm:$0xff]   ;;  %v1278_v4 = vld [vmem:[%s1580_s13 + $0x134] ss:$8 sps:$4 sm:$0xff]   ;;  %v1254_v5 = vld [vmem:[%s1580_s13 + $0x64] ss:$8 sps:$4 sm:$0xff]  }
  0x4e   : > { %846 = vmatprep.subr.bf16.mxu0 %v1242_v54  ;;  %v1280_v6 = vld [vmem:[%s1580_s13 + $0x130] ss:$8 sps:$4 sm:$0xff]   ;;  %v1256_v7 = vld [vmem:[%s1580_s13 + $0x60] ss:$8 sps:$4 sm:$0xff]   ;;  %v1284_v8 = vld [vmem:[%s1580_s13 + $0x144] ss:$8 sps:$4 sm:$0xff]  }
  0x4f   : > { %v1257_v9 = vld [vmem:[%s1580_s13 + $0x74] ss:$8 sps:$4 sm:$0xff]   ;;  %v1286_v10 = vld [vmem:[%s1580_s13 + $0x140] ss:$8 sps:$4 sm:$0xff]   ;;  %v1259_v11 = vld [vmem:[%s1580_s13 + $0x70] ss:$8 sps:$4 sm:$0xff]  }
  0x50   : > { %886 = vmatpush1.bf16.msra.mxu1 %v1268_v62  ;;  %v1290_v12 = vld [vmem:[%s1580_s13 + $0x154] ss:$8 sps:$4 sm:$0xff]   ;;  %v1263_v13 = vld [vmem:[%s1580_s13 + $0x84] ss:$8 sps:$4 sm:$0xff]   ;;  %v1292_v14 = vld [vmem:[%s1580_s13 + $0x150] ss:$8 sps:$4 sm:$0xff]  }
  0x51   : > { %847 = vmatpush1.bf16.msra.mxu0 %v1244_v55  ;;  %887 = vmatprep.subr.bf16.mxu1 %v1272_v1  ;;  %v1265_v15 = vld [vmem:[%s1580_s13 + $0x80] ss:$8 sps:$4 sm:$0xff]   ;;  %v1296_v16 = vld [vmem:[%s1580_s13 + $0x164] ss:$8 sps:$4 sm:$0xff]   ;;  %v1269_v17 = vld [vmem:[%s1580_s13 + $0x94] ss:$8 sps:$4 sm:$0xff]  }
  0x52   : > { %848 = vmatprep.subr.bf16.mxu0 %v1245_v56  ;;  %v1298_v20 = vld [vmem:[%s1580_s13 + $0x160] ss:$8 sps:$4 sm:$0xff]   ;;  %v1271_v21 = vld [vmem:[%s1580_s13 + $0x90] ss:$8 sps:$4 sm:$0xff]   ;;  %v1302_v22 = vld [vmem:[%s1580_s13 + $0x174] ss:$8 sps:$4 sm:$0xff]  }
  0x53   : > { %v1275_v23 = vld [vmem:[%s1580_s13 + $0xa4] ss:$8 sps:$4 sm:$0xff]   ;;  %v1304_v24 = vld [vmem:[%s1580_s13 + $0x170] ss:$8 sps:$4 sm:$0xff]   ;;  %v1277_v25 = vld [vmem:[%s1580_s13 + $0xa0] ss:$8 sps:$4 sm:$0xff]  }
  0x54   : > { %888 = vmatpush1.bf16.msra.mxu1 %v1274_v2  ;;  %v1281_v26 = vld [vmem:[%s1580_s13 + $0xb4] ss:$8 sps:$4 sm:$0xff]   ;;  %v1308_v27 = vld [vmem:[%s1564_s30 + $0x8] ss:$0 sps:$4 sm:$0xff]   ;;  %v1287_v29 = vld [vmem:[%s1580_s13 + $0xc4] ss:$8 sps:$4 sm:$0xff]  }
  0x55   : > { %849 = vmatpush1.bf16.msra.mxu0 %v1247_v57  ;;  %889 = vmatprep.subr.bf16.mxu1 %v1278_v4  ;;  %v1283_v28 = vld [vmem:[%s1580_s13 + $0xb0] ss:$8 sps:$4 sm:$0xff]   ;;  %v1289_v30 = vld [vmem:[%s1580_s13 + $0xc0] ss:$8 sps:$4 sm:$0xff]   ;;  %v1293_v31 = vld [vmem:[%s1580_s13 + $0xd4] ss:$8 sps:$4 sm:$0xff]  }
  0x56   : > { %850 = vmatprep.subr.bf16.mxu0 %v1248_v60  ;;  %v1295_v32 = vld [vmem:[%s1580_s13 + $0xd0] ss:$8 sps:$4 sm:$0xff]   ;;  %v1299_v33 = vld [vmem:[%s1580_s13 + $0xe4] ss:$8 sps:$4 sm:$0xff]   ;;  %v1301_v34 = vld [vmem:[%s1580_s13 + $0xe0] ss:$8 sps:$4 sm:$0xff]  }
  0x57   : > { %v1305_v35 = vld [vmem:[%s1580_s13 + $0xf4] ss:$8 sps:$4 sm:$0xff]   ;;  %v1307_v36 = vld [vmem:[%s1580_s13 + $0xf0] ss:$8 sps:$4 sm:$0xff]   ;;  %p1170_p13 = scmp.ne.s32.totalorder %s1349_s17, 5 }
  0x58   : > { %890 = vmatpush1.bf16.msra.mxu1 %v1280_v6  ;;  %v539_v42 = vld [vmem:[#allocation2] sm:$0xff]  ;;  %v540_v45 = vld [vmem:[#allocation2 + $0x8] sm:$0xff]  ;;  %v936_v52 = vlaneseq (!%p1170_p13) }
  0x59   : > { %851 = vmatpush1.bf16.msra.mxu0 %v1250_v63  ;;  %891 = vmatprep.subr.bf16.mxu1 %v1284_v8  ;;  %v934_v54 = vld [vmem:[%s515_s15] sm:$0x3] (!%p1170_p13) }
  0x5a   : > { %852 = vmatprep.subr.bf16.mxu0 %v1251_v0  ;;  %v937_v53 = vshrl.u32 (!%p1170_p13), %v936_v52, 7  ;;  %v948_v55 = vld [vmem:[%s520_s8] sm:$0x3] (!%p1170_p13) }
  0x5c   : > { %892 = vmatpush1.bf16.msra.mxu1 %v1286_v10  ;;  %v938_v56 = vsub.s32 (!%p1170_p13), 0, %v937_v53  ;;  %v942_v57 = vsub.s32 (!%p1170_p13), 1, %v937_v53 }
  0x5d   : > { %853 = vmatpush1.bf16.msra.mxu0 %v1253_v3  ;;  %893 = vmatprep.subr.bf16.mxu1 %v1290_v12 }
  0x5e   : > { %854 = vmatprep.subr.bf16.mxu0 %v1254_v5  ;;  %v939_v60 = vrot.slane (!%p1170_p13), %v934_v54, %v938_v56  ;;  %v943_v61 = vrot.slane (!%p1170_p13), %v934_v54, %v942_v57  ;;  %v953_v62 = vrot.slane (!%p1170_p13), %v948_v55, %v938_v56  ;;  %v957_v63 = vrot.slane (!%p1170_p13), %v948_v55, %v942_v57 }
  0x60   : > { %894 = vmatpush1.bf16.msra.mxu1 %v1292_v14 }
  0x61   : > { %855 = vmatpush1.bf16.msra.mxu0 %v1256_v7  ;;  %895 = vmatprep.subr.bf16.mxu1 %v1296_v16 }
  0x62   : > { %856 = vmatprep.subr.bf16.mxu0 %v1257_v9 }
  0x64   : > { %896 = vmatpush1.bf16.msra.mxu1 %v1298_v20 }
  0x65   : > { %857 = vmatpush1.bf16.msra.mxu0 %v1259_v11  ;;  %897 = vmatprep.subr.bf16.mxu1 %v1302_v22 }
  0x66   : > { %858 = vmatprep.subr.bf16.mxu0 %v1263_v13 }
  0x68   : > { %898 = vmatpush1.bf16.msra.mxu1 %v1304_v24 }
  0x69   : > { %859 = vmatpush1.bf16.msra.mxu0 %v1265_v15 }
  0x6a   : > { %860 = vmatprep.subr.bf16.mxu0 %v1269_v17 }
  0x6b   : > { %916 = vmatmul.mubr.bf16.vlgmr.msra.gmra.mrb[0].mxu1 %v1308_v27 }
  0x6d   : > { %861 = vmatpush1.bf16.msra.mxu0 %v1271_v21 }
  0x6e   : > { %862 = vmatprep.subr.bf16.mxu0 %v1275_v23 }
  0x71   : > { %863 = vmatpush1.bf16.msra.mxu0 %v1277_v25 }
  0x72   : > { %864 = vmatprep.subr.bf16.mxu0 %v1281_v26 }
  0x75   : > { %865 = vmatpush1.bf16.msra.mxu0 %v1283_v28 }
  0x76   : > { %866 = vmatprep.subr.bf16.mxu0 %v1287_v29 }
  0x79   : > { %867 = vmatpush1.bf16.msra.mxu0 %v1289_v30 }
  0x7a   : > { %868 = vmatprep.subr.bf16.mxu0 %v1293_v31 }
  0x7d   : > { %869 = vmatpush1.bf16.msra.mxu0 %v1295_v32 }
  0x7e   : > { %870 = vmatprep.subr.bf16.mxu0 %v1299_v33 }
  0x81   : > { %871 = vmatpush1.bf16.msra.mxu0 %v1301_v34 }
  0x82   : > { %872 = vmatprep.subr.bf16.mxu0 %v1305_v35 }
  0x85   : > { %873 = vmatpush1.bf16.msra.mxu0 %v1307_v36 }
  0x88   : > { %875 = vmatmul.mubr.bf16.vlgmr.msra.gmra.mrb[0].mxu0 %v1119_v37 }
 0x13e   : > { %v917_v38 = vpop.f32.mrb[0].mxu1 }
 0x13f   : > { %v919_v39 = vpop.f32.mrb[1].mxu1 }
 0x140   : > { %v921_v40 = vpop.f32.mrb[2].mxu1 }
 0x141   : > { %v922_v41 = vpop.f32.mrb[3].mxu1 }
 0x15b   : > { %v876_v43 = vpop.f32.mrb[0].mxu0  ;;  %931 = sbr.rel (%p1170_p13) target bundleno = 370 (0x172), region = 82 }
 0x15c   : > { %v918_v44 = vadd.f32 %v917_v38, %v876_v43  ;;  %v878_v46 = vpop.f32.mrb[1].mxu0 }
 0x15d   : > { %v920_v47 = vadd.f32 %v919_v39, %v878_v46  ;;  %v880_v48 = vpop.f32.mrb[2].mxu0 }
 0x15e   : > { %v924_v49 = vadd.f32 %v918_v44, %v539_v42  ;;  %v881_v50 = vpop.f32.mrb[3].mxu0 }
 0x15f   : > { %v925_v51 = vadd.f32 %v920_v47, %v540_v45 }
 0x160   : > { %926 = vst [vmem:[#allocation2] sm:$0xff] %v924_v49 }
 0x161   : > { %927 = vst [vmem:[#allocation2 + $0x8] sm:$0xff] %v925_v51 }
 0x167   : > { %v932_v58 = vld [vmem:[#allocation2] sm:$0xff] }
 0x168   : > { %v933_v59 = vld [vmem:[#allocation2 + $0x8] sm:$0xff]  ;;  %v946_v0 = vmul.f32 %v939_v60, %v932_v58 }
 0x169   : > { %v947_v1 = vmul.f32 %v943_v61, %v933_v59 }
 0x16a   : > { %v960_v2 = vadd.f32 %v953_v62, %v946_v0 }
 0x16b   : > { %v961_v3 = vadd.f32 %v957_v63, %v947_v1 }
 0x16c   : > { %v962_v4 = vmax.f32 %v960_v2, 0.0 }
 0x16d   : > { %v963_v5 = vmax.f32 %v961_v3, 0.0 }
 0x16f   : > { %v1175_v6 = vpack.c.bf16 %v963_v5, %v962_v4 }
 0x171   : > { %972 = vst [vmem:[%s1578_s12] sm:$0xff] %v1175_v6 }
 0x172 PF: > { %s14_s21 = sadd.s32 1, %s1365_s21   ;;  %s1671_s15 = smov %s1345_s16 }
 0x173   : > { %p11_p0 = scmp.ge.s32.totalorder %s14_s21, 14   ;;  %s1672_s16 = smov %s1445_s28 }
 0x174   : > { %s1673_s17 = smov %s1357_s19  ;;  %s1674_s18 = smov %s1361_s20 }
 0x175   : > { %s1675_s19 = smov %s1678_s22  ;;  %s1676_s20 = smov %s1682_s23 }
 0x176   :  { %13 = sbr.rel (!%p11_p0) target bundleno = 4 (0x4), region = 126 }

// kernel: resnet18_forward.39
= control target key start
LH: loop header
LB: loop body
LE: loop exit
PB: predicated region body
PF: predicated region fallthrough
CT: control target
= control target key end

     0   :  { %s1103_s15 = smov 0   ;;  %s1105_s16 = smov 0   ;;  %s1285_s0 = inlined_call_operand.vmem [shape: bf16[8,256], index: 0, kind: input, shape index: {}]   ;;  %s1286_s1 = inlined_call_operand.vmem [shape: bf16[256,512], index: 1, kind: input, shape index: {}]   ;;  %s1287_s2 = inlined_call_operand.vmem [shape: f32[1,512], index: 2, kind: input, shape index: {}]   ;;  %s1288_s3 = inlined_call_operand.vmem [shape: f32[1,512], index: 3, kind: input, shape index: {}]   ;;  %s1289_s4 = inlined_call_operand.vmem [shape: bf16[8,512], index: 4, kind: output, shape index: {}]  }
   0x1   :  { %s1107_s17 = smov 0   ;;  %s1109_s18 = smov 0  }
   0x2   :  { %s1111_s19 = smov 0  }
   0x3 LB: > { %s29_s20 = sadd.s32 1, %s1072_s18  ;;  %p77_p1 = scmp.ne.s32.totalorder %s1064_s16, %s1060_s15  ;;  %s1076_s19 = sphi %s1111_s19, %s14_s19   ;;  %s1072_s18 = sphi %s1109_s18, %s1293_s18   ;;  %s1068_s17 = sphi %s1107_s17, %s1292_s17   ;;  %s1064_s16 = sphi %s1105_s16, %s1291_s16   ;;  %s1060_s15 = sphi %s1103_s15, %s1290_s15  }
   0x4   : > { %p31_p0 = scmp.ge.s32.totalorder %s29_s20, 2  ;;  %p78_p2 = scmp.eq.s32.totalorder %s1076_s19, 0 }
   0x5   : > { %s70_s22 = sadd.s32 1, %s1064_s16  ;;  %p899_p5 = scmp.ge.s32.totalorder %s1076_s19, 2 }
   0x6   : > { %s1295_s20 = smov (%p31_p0, %s29_s20), 0  ;;  %p79_p3 = por %p78_p2, %p77_p1 }
   0x7   : > { %s66_s21 = ssub.s32 %s1072_s18, %s1295_s20  ;;  %196 = sbr.rel (%p899_p5) target bundleno = 34 (0x22), region = 20 }
   0x8   : > { %p68_p4 = scmp.eq.s32.totalorder %s66_s21, 0 }
   0xa   : > { %s1138_s23 = scalar_select %p68_p4, %s1064_s16, %s70_s22  }
   0xe   : > { %199 = sbr.rel (!%p79_p3) target bundleno = 34 (0x22), region = 24  ;;  %s201_s24 = sand.u32 (%p79_p3), 1, %s1064_s16  }
   0xf   : > { %s946_s25 = sshll.u32 (%p79_p3), %s1072_s18, 3  ;;  %s900_s26 = sshll.u32 (%p79_p3), %s201_s24, 8 }
  0x10   : > { %s1146_s29 = scalar_lea.vmem (%p79_p3), %s1286_s1, %s946_s25  ;;  %s1151_s30 = scalar_lea.vmem (%p79_p3), [#allocation3], %s900_s26 }
  0x11   : > { %v299_v0 = vld [vmem:[%s1146_s29] sm:$0xff] (%p79_p3)  ;;  %v301_v1 = vld [vmem:[%s1146_s29 + $0x10] sm:$0xff] (%p79_p3) }
  0x12   : > { %v303_v2 = vld [vmem:[%s1146_s29 + $0x20] sm:$0xff] (%p79_p3)  ;;  %300 = vst [vmem:[%s1151_s30] sm:$0xff] (%p79_p3), %v299_v0  ;;  %302 = vst [vmem:[%s1151_s30 + $0x8] sm:$0xff] (%p79_p3), %v301_v1  ;;  %v305_v3 = vld [vmem:[%s1146_s29 + $0x30] sm:$0xff] (%p79_p3) }
  0x13   : > { %304 = vst [vmem:[%s1151_s30 + $0x10] sm:$0xff] (%p79_p3), %v303_v2  ;;  %v307_v4 = vld [vmem:[%s1146_s29 + $0x40] sm:$0xff] (%p79_p3)  ;;  %v309_v5 = vld [vmem:[%s1146_s29 + $0x50] sm:$0xff] (%p79_p3)  ;;  %306 = vst [vmem:[%s1151_s30 + $0x18] sm:$0xff] (%p79_p3), %v305_v3 }
  0x14   : > { %308 = vst [vmem:[%s1151_s30 + $0x20] sm:$0xff] (%p79_p3), %v307_v4  ;;  %310 = vst [vmem:[%s1151_s30 + $0x28] sm:$0xff] (%p79_p3), %v309_v5  ;;  %v311_v6 = vld [vmem:[%s1146_s29 + $0x60] sm:$0xff] (%p79_p3)  ;;  %v313_v7 = vld [vmem:[%s1146_s29 + $0x70] sm:$0xff] (%p79_p3) }
  0x15   : > { %v315_v8 = vld [vmem:[%s1146_s29 + $0x80] sm:$0xff]  ;;  %312 = vst [vmem:[%s1151_s30 + $0x30] sm:$0xff] %v311_v6  ;;  %314 = vst [vmem:[%s1151_s30 + $0x38] sm:$0xff] %v313_v7  ;;  %v317_v9 = vld [vmem:[%s1146_s29 + $0x90] sm:$0xff] }
  0x16   : > { %316 = vst [vmem:[%s1151_s30 + $0x40] sm:$0xff] %v315_v8  ;;  %v319_v10 = vld [vmem:[%s1146_s29 + $0xa0] sm:$0xff]  ;;  %v321_v11 = vld [vmem:[%s1146_s29 + $0xb0] sm:$0xff]  ;;  %318 = vst [vmem:[%s1151_s30 + $0x48] sm:$0xff] %v317_v9 }
  0x17   : > { %320 = vst [vmem:[%s1151_s30 + $0x50] sm:$0xff] %v319_v10  ;;  %322 = vst [vmem:[%s1151_s30 + $0x58] sm:$0xff] %v321_v11  ;;  %v323_v12 = vld [vmem:[%s1146_s29 + $0xc0] sm:$0xff]  ;;  %v325_v13 = vld [vmem:[%s1146_s29 + $0xd0] sm:$0xff] }
  0x18   : > { %v327_v14 = vld [vmem:[%s1146_s29 + $0xe0] sm:$0xff]  ;;  %324 = vst [vmem:[%s1151_s30 + $0x60] sm:$0xff] %v323_v12  ;;  %326 = vst [vmem:[%s1151_s30 + $0x68] sm:$0xff] %v325_v13  ;;  %v329_v15 = vld [vmem:[%s1146_s29 + $0xf0] sm:$0xff] }
  0x19   : > { %328 = vst [vmem:[%s1151_s30 + $0x70] sm:$0xff] %v327_v14  ;;  %v331_v16 = vld [vmem:[%s1146_s29 + $0x100] sm:$0xff]  ;;  %v333_v17 = vld [vmem:[%s1146_s29 + $0x110] sm:$0xff]  ;;  %330 = vst [vmem:[%s1151_s30 + $0x78] sm:$0xff] %v329_v15 }
  0x1a   : > { %332 = vst [vmem:[%s1151_s30 + $0x80] sm:$0xff] %v331_v16  ;;  %334 = vst [vmem:[%s1151_s30 + $0x88] sm:$0xff] %v333_v17  ;;  %v335_v18 = vld [vmem:[%s1146_s29 + $0x120] sm:$0xff]  ;;  %v337_v19 = vld [vmem:[%s1146_s29 + $0x130] sm:$0xff] }
  0x1b   : > { %v339_v20 = vld [vmem:[%s1146_s29 + $0x140] sm:$0xff]  ;;  %336 = vst [vmem:[%s1151_s30 + $0x90] sm:$0xff] %v335_v18  ;;  %338 = vst [vmem:[%s1151_s30 + $0x98] sm:$0xff] %v337_v19  ;;  %v341_v21 = vld [vmem:[%s1146_s29 + $0x150] sm:$0xff] }
  0x1c   : > { %340 = vst [vmem:[%s1151_s30 + $0xa0] sm:$0xff] %v339_v20  ;;  %v343_v22 = vld [vmem:[%s1146_s29 + $0x160] sm:$0xff]  ;;  %v345_v23 = vld [vmem:[%s1146_s29 + $0x170] sm:$0xff]  ;;  %342 = vst [vmem:[%s1151_s30 + $0xa8] sm:$0xff] %v341_v21 }
  0x1d   : > { %344 = vst [vmem:[%s1151_s30 + $0xb0] sm:$0xff] %v343_v22  ;;  %346 = vst [vmem:[%s1151_s30 + $0xb8] sm:$0xff] %v345_v23  ;;  %v347_v24 = vld [vmem:[%s1146_s29 + $0x180] sm:$0xff]  ;;  %v349_v25 = vld [vmem:[%s1146_s29 + $0x190] sm:$0xff] }
  0x1e   : > { %v351_v26 = vld [vmem:[%s1146_s29 + $0x1a0] sm:$0xff]  ;;  %348 = vst [vmem:[%s1151_s30 + $0xc0] sm:$0xff] %v347_v24  ;;  %350 = vst [vmem:[%s1151_s30 + $0xc8] sm:$0xff] %v349_v25  ;;  %v353_v27 = vld [vmem:[%s1146_s29 + $0x1b0] sm:$0xff] }
  0x1f   : > { %352 = vst [vmem:[%s1151_s30 + $0xd0] sm:$0xff] %v351_v26  ;;  %v355_v28 = vld [vmem:[%s1146_s29 + $0x1c0] sm:$0xff]  ;;  %v357_v29 = vld [vmem:[%s1146_s29 + $0x1d0] sm:$0xff]  ;;  %354 = vst [vmem:[%s1151_s30 + $0xd8] sm:$0xff] %v353_v27 }
  0x20   : > { %356 = vst [vmem:[%s1151_s30 + $0xe0] sm:$0xff] %v355_v28  ;;  %358 = vst [vmem:[%s1151_s30 + $0xe8] sm:$0xff] %v357_v29  ;;  %v359_v30 = vld [vmem:[%s1146_s29 + $0x1e0] sm:$0xff]  ;;  %v361_v31 = vld [vmem:[%s1146_s29 + $0x1f0] sm:$0xff] }
  0x21   : > { %360 = vst [vmem:[%s1151_s30 + $0xf0] sm:$0xff] %v359_v30  ;;  %362 = vst [vmem:[%s1151_s30 + $0xf8] sm:$0xff] %v361_v31 }
  0x22 PF: > { %p903_p6 = scmp.ge.s32.totalorder %s1076_s19, 1  ;;  %p383_p7 = scmp.lt.s32.totalorder %s1076_s19, 3 }
  0x24   : > { %p384_p8 = pnand %p903_p6, %p383_p7 }
  0x25   : > { %s390_s5 = sand.u32 (!%p384_p8), 1, %s1060_s15   ;;  %v1220_v32 = vld [vmem:[%s1285_s0] sm:$0xff] (!%p384_p8)  ;;  %s905_s10 = sshll.u32 (!%p384_p8), %s1068_s17, 1  ;;  %v728_v3 = vlaneseq (!%p384_p8) }
  0x26   : > { %387 = sbr.rel (%p384_p8) target bundleno = 325 (0x145), region = 70  ;;  %s904_s8 = sshll.u32 (!%p384_p8), %s390_s5, 8  ;;  %v910_v33 = vcombine.high (!%p384_p8), %v1220_v32, %v1220_v32  ;;  %v909_v2 = vcombine.low (!%p384_p8), %v1220_v32, %v1220_v32 }
  0x27   : > { %s1224_s9 = scalar_lea.vmem (!%p384_p8), [#allocation3], %s904_s8  ;;  %p449_p9 = scmp.lt.s32.totalorder (!%p384_p8), %s905_s10, 3  ;;  %v729_v4 = vshrl.u32 (!%p384_p8), %v728_v3, 7 }
  0x28   : > { %v988_v34 = vld [vmem:[%s1224_s9 + $0x4] ss:$8 sps:$4 sm:$0xff] (!%p384_p8)   ;;  %708 = vmatprep.mubr.bf16.mxu0 (!%p384_p8), %v910_v33  ;;  %v990_v35 = vld [vmem:[%s1224_s9] ss:$8 sps:$4 sm:$0xff] (!%p384_p8)   ;;  %v991_v36 = vld [vmem:[%s1224_s9 + $0x14] ss:$8 sps:$4 sm:$0xff] (!%p384_p8)  }
  0x29   : > { %676 = vmatprep.subr.bf16.mxu0 (!%p384_p8), %v988_v34  ;;  %v993_v37 = vld [vmem:[%s1224_s9 + $0x10] ss:$8 sps:$4 sm:$0xff] (!%p384_p8)   ;;  %v994_v38 = vld [vmem:[%s1224_s9 + $0x24] ss:$8 sps:$4 sm:$0xff] (!%p384_p8)   ;;  %v996_v39 = vld [vmem:[%s1224_s9 + $0x20] ss:$8 sps:$4 sm:$0xff] (!%p384_p8)  }
  0x2a   : > { %677 = vmatpush1.bf16.msra.mxu0 (!%p384_p8), %v990_v35  ;;  %v997_v40 = vld [vmem:[%s1224_s9 + $0x34] ss:$8 sps:$4 sm:$0xff] (!%p384_p8)   ;;  %v999_v41 = vld [vmem:[%s1224_s9 + $0x30] ss:$8 sps:$4 sm:$0xff] (!%p384_p8)   ;;  %v1000_v42 = vld [vmem:[%s1224_s9 + $0x44] ss:$8 sps:$4 sm:$0xff] (!%p384_p8)  }
  0x2b   : > { %678 = vmatprep.subr.bf16.mxu0 (!%p384_p8), %v991_v36  ;;  %v1002_v43 = vld [vmem:[%s1224_s9 + $0x40] ss:$8 sps:$4 sm:$0xff] (!%p384_p8)   ;;  %v1003_v44 = vld [vmem:[%s1224_s9 + $0x54] ss:$8 sps:$4 sm:$0xff] (!%p384_p8)   ;;  %v1005_v45 = vld [vmem:[%s1224_s9 + $0x50] ss:$8 sps:$4 sm:$0xff] (!%p384_p8)  }
  0x2c   : > { %v1006_v46 = vld [vmem:[%s1224_s9 + $0x64] ss:$8 sps:$4 sm:$0xff] (!%p384_p8)   ;;  %v1008_v47 = vld [vmem:[%s1224_s9 + $0x60] ss:$8 sps:$4 sm:$0xff] (!%p384_p8)   ;;  %v1009_v48 = vld [vmem:[%s1224_s9 + $0x74] ss:$8 sps:$4 sm:$0xff] (!%p384_p8)  }
  0x2d   : > { %v1011_v49 = vld [vmem:[%s1224_s9 + $0x70] ss:$8 sps:$4 sm:$0xff]   ;;  %v1012_v50 = vld [vmem:[%s1224_s9 + $0x84] ss:$8 sps:$4 sm:$0xff]   ;;  %v1014_v51 = vld [vmem:[%s1224_s9 + $0x80] ss:$8 sps:$4 sm:$0xff]  }
  0x2e   : > { %679 = vmatpush1.bf16.msra.mxu0 %v993_v37  ;;  %v1015_v52 = vld [vmem:[%s1224_s9 + $0x94] ss:$8 sps:$4 sm:$0xff]   ;;  %v1017_v53 = vld [vmem:[%s1224_s9 + $0x90] ss:$8 sps:$4 sm:$0xff]   ;;  %v1018_v54 = vld [vmem:[%s1224_s9 + $0xa4] ss:$8 sps:$4 sm:$0xff]  }
  0x2f   : > { %680 = vmatprep.subr.bf16.mxu0 %v994_v38  ;;  %v1020_v55 = vld [vmem:[%s1224_s9 + $0xa0] ss:$8 sps:$4 sm:$0xff]   ;;  %v1021_v56 = vld [vmem:[%s1224_s9 + $0xb4] ss:$8 sps:$4 sm:$0xff]   ;;  %v1023_v57 = vld [vmem:[%s1224_s9 + $0xb0] ss:$8 sps:$4 sm:$0xff]  }
  0x30   : > { %v1024_v58 = vld [vmem:[%s1224_s9 + $0xc4] ss:$8 sps:$4 sm:$0xff]   ;;  %v1026_v59 = vld [vmem:[%s1224_s9 + $0xc0] ss:$8 sps:$4 sm:$0xff]   ;;  %v1027_v60 = vld [vmem:[%s1224_s9 + $0xd4] ss:$8 sps:$4 sm:$0xff]  }
  0x31   : > { %v1029_v61 = vld [vmem:[%s1224_s9 + $0xd0] ss:$8 sps:$4 sm:$0xff]   ;;  %v1030_v62 = vld [vmem:[%s1224_s9 + $0xe4] ss:$8 sps:$4 sm:$0xff]   ;;  %v1032_v63 = vld [vmem:[%s1224_s9 + $0xe0] ss:$8 sps:$4 sm:$0xff]  }
  0x32   : > { %681 = vmatpush1.bf16.msra.mxu0 %v996_v39  ;;  %v1033_v0 = vld [vmem:[%s1224_s9 + $0xf4] ss:$8 sps:$4 sm:$0xff]   ;;  %v1035_v1 = vld [vmem:[%s1224_s9 + $0xf0] ss:$8 sps:$4 sm:$0xff]   ;;  %s1297_s10 = smov (!%p449_p9, %s905_s10), 3  ;;  %v730_v5 = vsub.s32 0, %v729_v4 }
  0x33   : > { %682 = vmatprep.subr.bf16.mxu0 %v997_v40  ;;  %s451_s13 = scalar_lea.vmem %s1287_s2, %s1297_s10  ;;  %s456_s21 = scalar_lea.vmem %s1288_s3, %s1297_s10  ;;  %v734_v7 = vsub.s32 1, %v729_v4 }
  0x34   : > { %v726_v6 = vld [vmem:[%s451_s13] sm:$0x3]  ;;  %s908_s17 = sshll.u32 %s1297_s10, 2 }
  0x35   : > { %v740_v8 = vld [vmem:[%s456_s21] sm:$0x3]  ;;  %v731_v9 = vrot.slane %v726_v6, %v730_v5  ;;  %v735_v10 = vrot.slane %v726_v6, %v734_v7  ;;  %s466_s25 = scalar_lea.vmem %s1289_s4, %s908_s17 }
  0x36   : > { %683 = vmatpush1.bf16.msra.mxu0 %v999_v41  ;;  %v745_v11 = vrot.slane %v740_v8, %v730_v5  ;;  %v749_v13 = vrot.slane %v740_v8, %v734_v7 }
  0x37   : > { %684 = vmatprep.subr.bf16.mxu0 %v1000_v42 }
  0x3a   : > { %685 = vmatpush1.bf16.msra.mxu0 %v1002_v43 }
  0x3b   : > { %686 = vmatprep.subr.bf16.mxu0 %v1003_v44 }
  0x3e   : > { %687 = vmatpush1.bf16.msra.mxu0 %v1005_v45 }
  0x3f   : > { %688 = vmatprep.subr.bf16.mxu0 %v1006_v46 }
  0x42   : > { %689 = vmatpush1.bf16.msra.mxu0 %v1008_v47 }
  0x43   : > { %690 = vmatprep.subr.bf16.mxu0 %v1009_v48 }
  0x46   : > { %691 = vmatpush1.bf16.msra.mxu0 %v1011_v49 }
  0x47   : > { %692 = vmatprep.subr.bf16.mxu0 %v1012_v50 }
  0x4a   : > { %693 = vmatpush1.bf16.msra.mxu0 %v1014_v51 }
  0x4b   : > { %694 = vmatprep.subr.bf16.mxu0 %v1015_v52 }
  0x4e   : > { %695 = vmatpush1.bf16.msra.mxu0 %v1017_v53 }
  0x4f   : > { %696 = vmatprep.subr.bf16.mxu0 %v1018_v54 }
  0x52   : > { %697 = vmatpush1.bf16.msra.mxu0 %v1020_v55 }
  0x53   : > { %698 = vmatprep.subr.bf16.mxu0 %v1021_v56 }
  0x56   : > { %699 = vmatpush1.bf16.msra.mxu0 %v1023_v57 }
  0x57   : > { %700 = vmatprep.subr.bf16.mxu0 %v1024_v58 }
  0x5a   : > { %701 = vmatpush1.bf16.msra.mxu0 %v1026_v59 }
  0x5b   : > { %702 = vmatprep.subr.bf16.mxu0 %v1027_v60 }
  0x5e   : > { %703 = vmatpush1.bf16.msra.mxu0 %v1029_v61 }
  0x5f   : > { %704 = vmatprep.subr.bf16.mxu0 %v1030_v62 }
  0x62   : > { %705 = vmatpush1.bf16.msra.mxu0 %v1032_v63 }
  0x63   : > { %706 = vmatprep.subr.bf16.mxu0 %v1033_v0 }
  0x66   : > { %707 = vmatpush1.bf16.msra.mxu0 %v1035_v1 }
  0x69   : > { %709 = vmatmul.mubr.bf16.vlgmr.msra.gmra.mrb[0].mxu0 %v909_v2 }
 0x13c   : > { %v710_v12 = vpop.f32.mrb[0].mxu0 }
 0x13d   : > { %v738_v14 = vmul.f32 %v731_v9, %v710_v12  ;;  %v712_v15 = vpop.f32.mrb[1].mxu0 }
 0x13e   : > { %v739_v16 = vmul.f32 %v735_v10, %v712_v15  ;;  %v714_v17 = vpop.f32.mrb[2].mxu0 }
 0x13f   : > { %v752_v18 = vadd.f32 %v745_v11, %v738_v14  ;;  %v715_v19 = vpop.f32.mrb[3].mxu0 }
 0x140   : > { %v753_v20 = vadd.f32 %v749_v13, %v739_v16 }
 0x142   : > { %v947_v21 = vpack.c.bf16 %v753_v20, %v752_v18 }
 0x144   : > { %762 = vst [vmem:[%s466_s25] sm:$0xff] %v947_v21 }
 0x145 PF: > { %s14_s19 = sadd.s32 1, %s1076_s19   ;;  %s1290_s15 = smov %s1064_s16 }
 0x146   : > { %p11_p10 = scmp.ge.s32.totalorder %s14_s19, 4   ;;  %s1291_s16 = smov %s1138_s23 }
 0x147   : > { %s1292_s17 = smov %s1072_s18  ;;  %s1293_s18 = smov %s1295_s20 }
 0x148   :  { %13 = sbr.rel (!%p11_p10) target bundleno = 3 (0x3), region = 126 }

// kernel: resnet18_forward.40
= control target key start
LH: loop header
LB: loop body
LE: loop exit
PB: predicated region body
PF: predicated region fallthrough
CT: control target
= control target key end

     0   :  { %s1691_s18 = smov 0   ;;  %s1693_s19 = smov 0   ;;  %s2017_s0 = inlined_call_operand.vmem [shape: bf16[8,4608], index: 0, kind: input, shape index: {}]   ;;  %s2018_s1 = inlined_call_operand.vmem [shape: bf16[4608,512], index: 1, kind: input, shape index: {}]   ;;  %s2019_s2 = inlined_call_operand.vmem [shape: f32[1,512], index: 2, kind: input, shape index: {}]   ;;  %s2020_s3 = inlined_call_operand.vmem [shape: f32[1,512], index: 3, kind: input, shape index: {}]   ;;  %s2021_s4 = inlined_call_operand.vmem [shape: bf16[8,512], index: 4, kind: input, shape index: {}]   ;;  %s2022_s5 = inlined_call_operand.vmem [shape: bf16[8,512], index: 5, kind: output, shape index: {}]  }
   0x1   :  { %s1695_s20 = smov 0   ;;  %s1697_s21 = smov 0  }
   0x2   :  { %s1699_s22 = smov 0   ;;  %s1701_s23 = smov 0  }
   0x3   :  { %s1703_s24 = smov 0  }
   0x4 LB: > { %s27_s25 = sadd.s32 1, %s1650_s22  ;;  %s30_s26 = sadd.s32 1, %s1654_s23  ;;  %s1658_s24 = sphi %s1703_s24, %s15_s24   ;;  %s1654_s23 = sphi %s1701_s23, %s2028_s23   ;;  %s1650_s22 = sphi %s1699_s22, %s2027_s22   ;;  %s1646_s21 = sphi %s1697_s21, %s2026_s21   ;;  %s1642_s20 = sphi %s1695_s20, %s2025_s20   ;;  %s1638_s19 = sphi %s1693_s19, %s2024_s19   ;;  %s1634_s18 = sphi %s1691_s18, %s2023_s18  }
   0x5   : > { %p28_p0 = scmp.ge.s32.totalorder %s27_s25, 9  ;;  %p78_p1 = scmp.ne.s32.totalorder %s1638_s19, %s1634_s18 }
   0x6   : > { %p79_p2 = scmp.eq.s32.totalorder %s1658_s24, 0  ;;  %s71_s30 = sadd.s32 1, %s1638_s19 }
   0x7   : > { %s2030_s25 = smov (%p28_p0, %s27_s25), 0  ;;  %s2032_s26 = smov (!%p28_p0, %s30_s26), %s1654_s23 }
   0x8   : > { %p80_p3 = por %p79_p2, %p78_p1  ;;  %p32_p4 = scmp.ge.s32.totalorder %s2032_s26, 2 }
   0x9   : > { %s66_s27 = ssub.s32 %s1650_s22, %s2030_s25  ;;  %p1356_p6 = scmp.ge.s32.totalorder %s1658_s24, 18 }
   0xa   : > { %s2034_s26 = smov (%p32_p4, %s2032_s26), 0 }
   0xb   : > { %s67_s28 = ssub.s32 %s1654_s23, %s2034_s26  ;;  %212 = sbr.rel (%p1356_p6) target bundleno = 57 (0x39), region = 16 }
   0xc   : > { %s68_s29 = sor.u32 %s67_s28, %s66_s27 }
   0xd   : > { %p69_p5 = scmp.eq.s32.totalorder %s68_s29, 0 }
   0xf   : > { %s1742_s6 = scalar_select %p69_p5, %s1638_s19, %s71_s30  }
  0x12   : > { %228 = sbr.rel (!%p80_p3) target bundleno = 57 (0x39), region = 24  ;;  %s230_s7 = sand.u32 (%p80_p3), 1, %s1638_s19  }
  0x13   : > { %s1359_s8 = sshll.u32 (%p80_p3), %s1654_s23, 1  ;;  %s1357_s9 = sshll.u32 (%p80_p3), %s230_s7, 9 }
  0x14   : > { %s1445_s10 = sshll.u32 (%p80_p3), %s1650_s22, 8  ;;  %s1756_s16 = scalar_lea.vmem (%p80_p3), [#allocation3], %s1357_s9 }
  0x15   : > { %s236_s11 = sadd.s32 (%p80_p3), %s1445_s10, %s1359_s8 }
  0x16   : > { %s1361_s12 = sshll.u32 (%p80_p3), %s236_s11, 2 }
  0x17   : > { %s1751_s15 = scalar_lea.vmem (%p80_p3), %s2018_s1, %s1361_s12 }
  0x18   : > { %v392_v0 = vld [vmem:[%s1751_s15] sm:$0xff] (%p80_p3)  ;;  %v394_v1 = vld [vmem:[%s1751_s15 + $0x10] sm:$0xff] (%p80_p3) }
  0x19   : > { %v396_v2 = vld [vmem:[%s1751_s15 + $0x20] sm:$0xff]  ;;  %393 = vst [vmem:[%s1756_s16] sm:$0xff] %v392_v0  ;;  %395 = vst [vmem:[%s1756_s16 + $0x8] sm:$0xff] %v394_v1  ;;  %v398_v3 = vld [vmem:[%s1751_s15 + $0x30] sm:$0xff] }
  0x1a   : > { %397 = vst [vmem:[%s1756_s16 + $0x10] sm:$0xff] %v396_v2  ;;  %v400_v4 = vld [vmem:[%s1751_s15 + $0x40] sm:$0xff]  ;;  %v402_v5 = vld [vmem:[%s1751_s15 + $0x50] sm:$0xff]  ;;  %399 = vst [vmem:[%s1756_s16 + $0x18] sm:$0xff] %v398_v3 }
  0x1b   : > { %401 = vst [vmem:[%s1756_s16 + $0x20] sm:$0xff] %v400_v4  ;;  %403 = vst [vmem:[%s1756_s16 + $0x28] sm:$0xff] %v402_v5  ;;  %v404_v6 = vld [vmem:[%s1751_s15 + $0x60] sm:$0xff]  ;;  %v406_v7 = vld [vmem:[%s1751_s15 + $0x70] sm:$0xff] }
  0x1c   : > { %v408_v8 = vld [vmem:[%s1751_s15 + $0x80] sm:$0xff]  ;;  %405 = vst [vmem:[%s1756_s16 + $0x30] sm:$0xff] %v404_v6  ;;  %407 = vst [vmem:[%s1756_s16 + $0x38] sm:$0xff] %v406_v7  ;;  %v410_v9 = vld [vmem:[%s1751_s15 + $0x90] sm:$0xff] }
  0x1d   : > { %409 = vst [vmem:[%s1756_s16 + $0x40] sm:$0xff] %v408_v8  ;;  %v412_v10 = vld [vmem:[%s1751_s15 + $0xa0] sm:$0xff]  ;;  %v414_v11 = vld [vmem:[%s1751_s15 + $0xb0] sm:$0xff]  ;;  %411 = vst [vmem:[%s1756_s16 + $0x48] sm:$0xff] %v410_v9 }
  0x1e   : > { %413 = vst [vmem:[%s1756_s16 + $0x50] sm:$0xff] %v412_v10  ;;  %415 = vst [vmem:[%s1756_s16 + $0x58] sm:$0xff] %v414_v11  ;;  %v416_v12 = vld [vmem:[%s1751_s15 + $0xc0] sm:$0xff]  ;;  %v418_v13 = vld [vmem:[%s1751_s15 + $0xd0] sm:$0xff] }
  0x1f   : > { %v420_v14 = vld [vmem:[%s1751_s15 + $0xe0] sm:$0xff]  ;;  %417 = vst [vmem:[%s1756_s16 + $0x60] sm:$0xff] %v416_v12  ;;  %419 = vst [vmem:[%s1756_s16 + $0x68] sm:$0xff] %v418_v13  ;;  %v422_v15 = vld [vmem:[%s1751_s15 + $0xf0] sm:$0xff] }
  0x20   : > { %421 = vst [vmem:[%s1756_s16 + $0x70] sm:$0xff] %v420_v14  ;;  %v424_v16 = vld [vmem:[%s1751_s15 + $0x100] sm:$0xff]  ;;  %v426_v17 = vld [vmem:[%s1751_s15 + $0x110] sm:$0xff]  ;;  %423 = vst [vmem:[%s1756_s16 + $0x78] sm:$0xff] %v422_v15 }
  0x21   : > { %425 = vst [vmem:[%s1756_s16 + $0x80] sm:$0xff] %v424_v16  ;;  %427 = vst [vmem:[%s1756_s16 + $0x88] sm:$0xff] %v426_v17  ;;  %v428_v18 = vld [vmem:[%s1751_s15 + $0x120] sm:$0xff]  ;;  %v430_v19 = vld [vmem:[%s1751_s15 + $0x130] sm:$0xff] }
  0x22   : > { %v432_v20 = vld [vmem:[%s1751_s15 + $0x140] sm:$0xff]  ;;  %429 = vst [vmem:[%s1756_s16 + $0x90] sm:$0xff] %v428_v18  ;;  %431 = vst [vmem:[%s1756_s16 + $0x98] sm:$0xff] %v430_v19  ;;  %v434_v21 = vld [vmem:[%s1751_s15 + $0x150] sm:$0xff] }
  0x23   : > { %433 = vst [vmem:[%s1756_s16 + $0xa0] sm:$0xff] %v432_v20  ;;  %v436_v22 = vld [vmem:[%s1751_s15 + $0x160] sm:$0xff]  ;;  %v438_v23 = vld [vmem:[%s1751_s15 + $0x170] sm:$0xff]  ;;  %435 = vst [vmem:[%s1756_s16 + $0xa8] sm:$0xff] %v434_v21 }
  0x24   : > { %437 = vst [vmem:[%s1756_s16 + $0xb0] sm:$0xff] %v436_v22  ;;  %439 = vst [vmem:[%s1756_s16 + $0xb8] sm:$0xff] %v438_v23  ;;  %v440_v24 = vld [vmem:[%s1751_s15 + $0x180] sm:$0xff]  ;;  %v442_v25 = vld [vmem:[%s1751_s15 + $0x190] sm:$0xff] }
  0x25   : > { %v444_v26 = vld [vmem:[%s1751_s15 + $0x1a0] sm:$0xff]  ;;  %441 = vst [vmem:[%s1756_s16 + $0xc0] sm:$0xff] %v440_v24  ;;  %443 = vst [vmem:[%s1756_s16 + $0xc8] sm:$0xff] %v442_v25  ;;  %v446_v27 = vld [vmem:[%s1751_s15 + $0x1b0] sm:$0xff] }
  0x26   : > { %445 = vst [vmem:[%s1756_s16 + $0xd0] sm:$0xff] %v444_v26  ;;  %v448_v28 = vld [vmem:[%s1751_s15 + $0x1c0] sm:$0xff]  ;;  %v450_v29 = vld [vmem:[%s1751_s15 + $0x1d0] sm:$0xff]  ;;  %447 = vst [vmem:[%s1756_s16 + $0xd8] sm:$0xff] %v446_v27 }
  0x27   : > { %449 = vst [vmem:[%s1756_s16 + $0xe0] sm:$0xff] %v448_v28  ;;  %451 = vst [vmem:[%s1756_s16 + $0xe8] sm:$0xff] %v450_v29  ;;  %v452_v30 = vld [vmem:[%s1751_s15 + $0x1e0] sm:$0xff]  ;;  %v454_v31 = vld [vmem:[%s1751_s15 + $0x1f0] sm:$0xff] }
  0x28   : > { %v456_v32 = vld [vmem:[%s1751_s15 + $0x200] sm:$0xff]  ;;  %453 = vst [vmem:[%s1756_s16 + $0xf0] sm:$0xff] %v452_v30  ;;  %455 = vst [vmem:[%s1756_s16 + $0xf8] sm:$0xff] %v454_v31  ;;  %v458_v33 = vld [vmem:[%s1751_s15 + $0x210] sm:$0xff] }
  0x29   : > { %457 = vst [vmem:[%s1756_s16 + $0x100] sm:$0xff] %v456_v32  ;;  %v460_v34 = vld [vmem:[%s1751_s15 + $0x220] sm:$0xff]  ;;  %v462_v35 = vld [vmem:[%s1751_s15 + $0x230] sm:$0xff]  ;;  %459 = vst [vmem:[%s1756_s16 + $0x108] sm:$0xff] %v458_v33 }
  0x2a   : > { %461 = vst [vmem:[%s1756_s16 + $0x110] sm:$0xff] %v460_v34  ;;  %463 = vst [vmem:[%s1756_s16 + $0x118] sm:$0xff] %v462_v35  ;;  %v464_v36 = vld [vmem:[%s1751_s15 + $0x240] sm:$0xff]  ;;  %v466_v37 = vld [vmem:[%s1751_s15 + $0x250] sm:$0xff] }
  0x2b   : > { %v468_v38 = vld [vmem:[%s1751_s15 + $0x260] sm:$0xff]  ;;  %465 = vst [vmem:[%s1756_s16 + $0x120] sm:$0xff] %v464_v36  ;;  %467 = vst [vmem:[%s1756_s16 + $0x128] sm:$0xff] %v466_v37  ;;  %v470_v39 = vld [vmem:[%s1751_s15 + $0x270] sm:$0xff] }
  0x2c   : > { %469 = vst [vmem:[%s1756_s16 + $0x130] sm:$0xff] %v468_v38  ;;  %v472_v40 = vld [vmem:[%s1751_s15 + $0x280] sm:$0xff]  ;;  %v474_v41 = vld [vmem:[%s1751_s15 + $0x290] sm:$0xff]  ;;  %471 = vst [vmem:[%s1756_s16 + $0x138] sm:$0xff] %v470_v39 }
  0x2d   : > { %473 = vst [vmem:[%s1756_s16 + $0x140] sm:$0xff] %v472_v40  ;;  %475 = vst [vmem:[%s1756_s16 + $0x148] sm:$0xff] %v474_v41  ;;  %v476_v42 = vld [vmem:[%s1751_s15 + $0x2a0] sm:$0xff]  ;;  %v478_v43 = vld [vmem:[%s1751_s15 + $0x2b0] sm:$0xff] }
  0x2e   : > { %v480_v44 = vld [vmem:[%s1751_s15 + $0x2c0] sm:$0xff]  ;;  %477 = vst [vmem:[%s1756_s16 + $0x150] sm:$0xff] %v476_v42  ;;  %479 = vst [vmem:[%s1756_s16 + $0x158] sm:$0xff] %v478_v43  ;;  %v482_v45 = vld [vmem:[%s1751_s15 + $0x2d0] sm:$0xff] }
  0x2f   : > { %481 = vst [vmem:[%s1756_s16 + $0x160] sm:$0xff] %v480_v44  ;;  %v484_v46 = vld [vmem:[%s1751_s15 + $0x2e0] sm:$0xff]  ;;  %v486_v47 = vld [vmem:[%s1751_s15 + $0x2f0] sm:$0xff]  ;;  %483 = vst [vmem:[%s1756_s16 + $0x168] sm:$0xff] %v482_v45 }
  0x30   : > { %485 = vst [vmem:[%s1756_s16 + $0x170] sm:$0xff] %v484_v46  ;;  %487 = vst [vmem:[%s1756_s16 + $0x178] sm:$0xff] %v486_v47  ;;  %v488_v48 = vld [vmem:[%s1751_s15 + $0x300] sm:$0xff]  ;;  %v490_v49 = vld [vmem:[%s1751_s15 + $0x310] sm:$0xff] }
  0x31   : > { %v492_v50 = vld [vmem:[%s1751_s15 + $0x320] sm:$0xff]  ;;  %489 = vst [vmem:[%s1756_s16 + $0x180] sm:$0xff] %v488_v48  ;;  %491 = vst [vmem:[%s1756_s16 + $0x188] sm:$0xff] %v490_v49  ;;  %v494_v51 = vld [vmem:[%s1751_s15 + $0x330] sm:$0xff] }
  0x32   : > { %493 = vst [vmem:[%s1756_s16 + $0x190] sm:$0xff] %v492_v50  ;;  %v496_v52 = vld [vmem:[%s1751_s15 + $0x340] sm:$0xff]  ;;  %v498_v53 = vld [vmem:[%s1751_s15 + $0x350] sm:$0xff]  ;;  %495 = vst [vmem:[%s1756_s16 + $0x198] sm:$0xff] %v494_v51 }
  0x33   : > { %497 = vst [vmem:[%s1756_s16 + $0x1a0] sm:$0xff] %v496_v52  ;;  %499 = vst [vmem:[%s1756_s16 + $0x1a8] sm:$0xff] %v498_v53  ;;  %v500_v54 = vld [vmem:[%s1751_s15 + $0x360] sm:$0xff]  ;;  %v502_v55 = vld [vmem:[%s1751_s15 + $0x370] sm:$0xff] }
  0x34   : > { %v504_v56 = vld [vmem:[%s1751_s15 + $0x380] sm:$0xff]  ;;  %501 = vst [vmem:[%s1756_s16 + $0x1b0] sm:$0xff] %v500_v54  ;;  %503 = vst [vmem:[%s1756_s16 + $0x1b8] sm:$0xff] %v502_v55  ;;  %v506_v57 = vld [vmem:[%s1751_s15 + $0x390] sm:$0xff] }
  0x35   : > { %505 = vst [vmem:[%s1756_s16 + $0x1c0] sm:$0xff] %v504_v56  ;;  %v508_v58 = vld [vmem:[%s1751_s15 + $0x3a0] sm:$0xff]  ;;  %v510_v59 = vld [vmem:[%s1751_s15 + $0x3b0] sm:$0xff]  ;;  %507 = vst [vmem:[%s1756_s16 + $0x1c8] sm:$0xff] %v506_v57 }
  0x36   : > { %509 = vst [vmem:[%s1756_s16 + $0x1d0] sm:$0xff] %v508_v58  ;;  %511 = vst [vmem:[%s1756_s16 + $0x1d8] sm:$0xff] %v510_v59  ;;  %v512_v60 = vld [vmem:[%s1751_s15 + $0x3c0] sm:$0xff]  ;;  %v514_v61 = vld [vmem:[%s1751_s15 + $0x3d0] sm:$0xff] }
  0x37   : > { %v516_v62 = vld [vmem:[%s1751_s15 + $0x3e0] sm:$0xff]  ;;  %513 = vst [vmem:[%s1756_s16 + $0x1e0] sm:$0xff] %v512_v60  ;;  %515 = vst [vmem:[%s1756_s16 + $0x1e8] sm:$0xff] %v514_v61  ;;  %v518_v63 = vld [vmem:[%s1751_s15 + $0x3f0] sm:$0xff] }
  0x38   : > { %517 = vst [vmem:[%s1756_s16 + $0x1f0] sm:$0xff] %v516_v62  ;;  %519 = vst [vmem:[%s1756_s16 + $0x1f8] sm:$0xff] %v518_v63 }
  0x39 PF: > { %p1362_p7 = scmp.ge.s32.totalorder %s1658_s24, 1  ;;  %p553_p8 = scmp.lt.s32.totalorder %s1658_s24, 19 }
  0x3b   : > { %p554_p9 = pnand %p1362_p7, %p553_p8 }
  0x3c   : > { %s560_s17 = sand.u32 (!%p554_p9), 1, %s1634_s18   ;;  %s1364_s27 = sshll.u32 (!%p554_p9), %s1642_s20, 2 }
  0x3d   : > { %557 = sbr.rel (%p554_p9) target bundleno = 380 (0x17c), region = 74  ;;  %s1363_s28 = sshll.u32 (!%p554_p9), %s560_s17, 9 }
  0x3e   : > { %p620_p10 = scmp.lt.s32.totalorder (!%p554_p9), %s1364_s27, 35  ;;  %s1366_s29 = sshll.u32 (!%p554_p9), %s1646_s21, 1 }
  0x3f   : > { %p630_p11 = scmp.lt.s32.totalorder (!%p554_p9), %s1366_s29, 3  ;;  %s1914_s8 = scalar_lea.vmem (!%p554_p9), [#allocation3], %s1363_s28 }
  0x40   : > { %p1372_p12 = scmp.ne.s32.totalorder (!%p554_p9), %s1642_s20, 0 }
  0x44   : > { %s2036_s27 = smov (!%p620_p10, %s1364_s27), 35  ;;  %s2038_s29 = smov (!%p630_p11, %s1366_s29), 3 }
  0x45   : > { %s1365_s30 = sshll.u32 %s2036_s27, 2  ;;  %s632_s18 = scalar_lea.vmem %s2019_s2, %s2038_s29  ;;  %v1660_v0 = vmov (!%p1372_p12), 0.0  }
  0x46   : > { %s1891_s9 = scalar_lea.vmem %s2017_s0, %s1365_s30  ;;  %s637_s21 = scalar_lea.vmem %s2020_s3, %s2038_s29  ;;  %663 = vst [vmem:[#allocation2] sm:$0xff] (!%p1372_p12), %v1660_v0  ;;  %664 = vst [vmem:[#allocation2 + $0x8] sm:$0xff] (!%p1372_p12), %v1660_v0 }
  0x47   : > { %s1369_s14 = sshll.u32 %s2038_s29, 2  ;;  %662 = sbr.rel (%p1372_p12) target bundleno = 78 (0x4e), region = 82 }
  0x48   : > { %s1907_s17 = scalar_lea.vmem %s2021_s4, %s1369_s14  ;;  %s1912_s7 = scalar_lea.vmem %s2022_s5, %s1369_s14 }
  0x4e PF: > { %v1504_v1 = vld [vmem:[%s1914_s8 + $0x4] ss:$8 sps:$4 sm:$0xff]   ;;  %v1508_v3 = vld [vmem:[%s1914_s8] ss:$8 sps:$4 sm:$0xff]   ;;  %v1510_v5 = vld [vmem:[%s1914_s8 + $0x14] ss:$8 sps:$4 sm:$0xff]  }
  0x4f   : > { %v1506_v2 = vld [vmem:[%s1914_s8 + $0x104] ss:$8 sps:$4 sm:$0xff]   ;;  %1067 = vmatprep.subr.bf16.mxu0 %v1504_v1  ;;  %v1509_v4 = vld [vmem:[%s1914_s8 + $0x100] ss:$8 sps:$4 sm:$0xff]   ;;  %v1512_v6 = vld [vmem:[%s1914_s8 + $0x114] ss:$8 sps:$4 sm:$0xff]  }
  0x50   : > { %1108 = vmatprep.subr.bf16.mxu1 %v1506_v2  ;;  %1068 = vmatpush1.bf16.msra.mxu0 %v1508_v3  ;;  %v1514_v7 = vld [vmem:[%s1914_s8 + $0x10] ss:$8 sps:$4 sm:$0xff]   ;;  %v1516_v9 = vld [vmem:[%s1914_s8 + $0x24] ss:$8 sps:$4 sm:$0xff]   ;;  %v1520_v11 = vld [vmem:[%s1914_s8 + $0x20] ss:$8 sps:$4 sm:$0xff]  }
  0x51   : > { %1109 = vmatpush1.bf16.msra.mxu1 %v1509_v4  ;;  %1069 = vmatprep.subr.bf16.mxu0 %v1510_v5  ;;  %v1515_v8 = vld [vmem:[%s1914_s8 + $0x110] ss:$8 sps:$4 sm:$0xff]   ;;  %v1518_v10 = vld [vmem:[%s1914_s8 + $0x124] ss:$8 sps:$4 sm:$0xff]   ;;  %v1521_v12 = vld [vmem:[%s1914_s8 + $0x120] ss:$8 sps:$4 sm:$0xff]  }
  0x52   : > { %1110 = vmatprep.subr.bf16.mxu1 %v1512_v6  ;;  %v1522_v13 = vld [vmem:[%s1914_s8 + $0x34] ss:$8 sps:$4 sm:$0xff]   ;;  %v1526_v15 = vld [vmem:[%s1914_s8 + $0x30] ss:$8 sps:$4 sm:$0xff]   ;;  %v1528_v17 = vld [vmem:[%s1914_s8 + $0x44] ss:$8 sps:$4 sm:$0xff]  }
  0x53   : > { %v1524_v14 = vld [vmem:[%s1914_s8 + $0x134] ss:$8 sps:$4 sm:$0xff]   ;;  %v1527_v16 = vld [vmem:[%s1914_s8 + $0x130] ss:$8 sps:$4 sm:$0xff]   ;;  %v1530_v18 = vld [vmem:[%s1914_s8 + $0x144] ss:$8 sps:$4 sm:$0xff]  }
  0x54   : > { %1070 = vmatpush1.bf16.msra.mxu0 %v1514_v7  ;;  %v1532_v19 = vld [vmem:[%s1914_s8 + $0x40] ss:$8 sps:$4 sm:$0xff]   ;;  %v1534_v21 = vld [vmem:[%s1914_s8 + $0x54] ss:$8 sps:$4 sm:$0xff]   ;;  %v1538_v23 = vld [vmem:[%s1914_s8 + $0x50] ss:$8 sps:$4 sm:$0xff]  }
  0x55   : > { %1111 = vmatpush1.bf16.msra.mxu1 %v1515_v8  ;;  %1071 = vmatprep.subr.bf16.mxu0 %v1516_v9  ;;  %v1533_v20 = vld [vmem:[%s1914_s8 + $0x140] ss:$8 sps:$4 sm:$0xff]   ;;  %v1536_v22 = vld [vmem:[%s1914_s8 + $0x154] ss:$8 sps:$4 sm:$0xff]   ;;  %v1539_v24 = vld [vmem:[%s1914_s8 + $0x150] ss:$8 sps:$4 sm:$0xff]  }
  0x56   : > { %1112 = vmatprep.subr.bf16.mxu1 %v1518_v10  ;;  %v1540_v25 = vld [vmem:[%s1914_s8 + $0x64] ss:$8 sps:$4 sm:$0xff]   ;;  %v1544_v27 = vld [vmem:[%s1914_s8 + $0x60] ss:$8 sps:$4 sm:$0xff]   ;;  %v1546_v29 = vld [vmem:[%s1914_s8 + $0x74] ss:$8 sps:$4 sm:$0xff]  }
  0x57   : > { %v1542_v26 = vld [vmem:[%s1914_s8 + $0x164] ss:$8 sps:$4 sm:$0xff]   ;;  %v1545_v28 = vld [vmem:[%s1914_s8 + $0x160] ss:$8 sps:$4 sm:$0xff]   ;;  %v1548_v30 = vld [vmem:[%s1914_s8 + $0x174] ss:$8 sps:$4 sm:$0xff]  }
  0x58   : > { %1072 = vmatpush1.bf16.msra.mxu0 %v1520_v11  ;;  %v1550_v31 = vld [vmem:[%s1914_s8 + $0x70] ss:$8 sps:$4 sm:$0xff]   ;;  %v1552_v33 = vld [vmem:[%s1914_s8 + $0x84] ss:$8 sps:$4 sm:$0xff]   ;;  %v1556_v35 = vld [vmem:[%s1914_s8 + $0x80] ss:$8 sps:$4 sm:$0xff]  }
  0x59   : > { %1113 = vmatpush1.bf16.msra.mxu1 %v1521_v12  ;;  %1073 = vmatprep.subr.bf16.mxu0 %v1522_v13  ;;  %v1551_v32 = vld [vmem:[%s1914_s8 + $0x170] ss:$8 sps:$4 sm:$0xff]   ;;  %v1554_v34 = vld [vmem:[%s1914_s8 + $0x184] ss:$8 sps:$4 sm:$0xff]   ;;  %v1557_v36 = vld [vmem:[%s1914_s8 + $0x180] ss:$8 sps:$4 sm:$0xff]  }
  0x5a   : > { %1114 = vmatprep.subr.bf16.mxu1 %v1524_v14  ;;  %v1558_v37 = vld [vmem:[%s1914_s8 + $0x94] ss:$8 sps:$4 sm:$0xff]   ;;  %v1562_v39 = vld [vmem:[%s1914_s8 + $0x90] ss:$8 sps:$4 sm:$0xff]   ;;  %v1564_v41 = vld [vmem:[%s1914_s8 + $0xa4] ss:$8 sps:$4 sm:$0xff]  }
  0x5b   : > { %v1560_v38 = vld [vmem:[%s1914_s8 + $0x194] ss:$8 sps:$4 sm:$0xff]   ;;  %v1563_v40 = vld [vmem:[%s1914_s8 + $0x190] ss:$8 sps:$4 sm:$0xff]   ;;  %v1566_v42 = vld [vmem:[%s1914_s8 + $0x1a4] ss:$8 sps:$4 sm:$0xff]  }
  0x5c   : > { %1074 = vmatpush1.bf16.msra.mxu0 %v1526_v15  ;;  %v1568_v43 = vld [vmem:[%s1914_s8 + $0xa0] ss:$8 sps:$4 sm:$0xff]   ;;  %v1570_v45 = vld [vmem:[%s1914_s8 + $0xb4] ss:$8 sps:$4 sm:$0xff]   ;;  %v1574_v50 = vld [vmem:[%s1914_s8 + $0xb0] ss:$8 sps:$4 sm:$0xff]  }
  0x5d   : > { %1115 = vmatpush1.bf16.msra.mxu1 %v1527_v16  ;;  %1075 = vmatprep.subr.bf16.mxu0 %v1528_v17  ;;  %v1569_v44 = vld [vmem:[%s1914_s8 + $0x1a0] ss:$8 sps:$4 sm:$0xff]   ;;  %v1572_v46 = vld [vmem:[%s1914_s8 + $0x1b4] ss:$8 sps:$4 sm:$0xff]   ;;  %v1575_v51 = vld [vmem:[%s1914_s8 + $0x1b0] ss:$8 sps:$4 sm:$0xff]  }
  0x5e   : > { %1116 = vmatprep.subr.bf16.mxu1 %v1530_v18  ;;  %v667_v47 = vld [vmem:[%s1891_s9] sm:$0xff]  ;;  %v668_v49 = vld [vmem:[%s1891_s9 + $0x8] sm:$0xff]  ;;  %v1576_v53 = vld [vmem:[%s1914_s8 + $0xc4] ss:$8 sps:$4 sm:$0xff]   ;;  %p1441_p13 = scmp.ne.s32.totalorder %s1642_s20, 8 }
  0x5f   : > { %v1374_v48 = vcombine.high %v667_v47, %v667_v47  ;;  %v1376_v52 = vcombine.high %v668_v49, %v668_v49  ;;  %v1578_v54 = vld [vmem:[%s1914_s8 + $0x1c4] ss:$8 sps:$4 sm:$0xff]   ;;  %v1580_v55 = vld [vmem:[%s1914_s8 + $0xc0] ss:$8 sps:$4 sm:$0xff]   ;;  %v1582_v57 = vld [vmem:[%s1914_s8 + $0xd4] ss:$8 sps:$4 sm:$0xff]   ;;  %v1373_v5 = vcombine.low %v667_v47, %v667_v47  ;;  %v1375_v6 = vcombine.low %v668_v49, %v668_v49 }
  0x60   : > { %1076 = vmatpush1.bf16.msra.mxu0 %v1532_v19  ;;  %v1581_v56 = vld [vmem:[%s1914_s8 + $0x1c0] ss:$8 sps:$4 sm:$0xff]   ;;  %v1584_v58 = vld [vmem:[%s1914_s8 + $0x1d4] ss:$8 sps:$4 sm:$0xff]   ;;  %v1586_v59 = vld [vmem:[%s1914_s8 + $0xd0] ss:$8 sps:$4 sm:$0xff]  }
  0x61   : > { %1117 = vmatpush1.bf16.msra.mxu1 %v1533_v20  ;;  %1077 = vmatprep.subr.bf16.mxu0 %v1534_v21  ;;  %v1587_v60 = vld [vmem:[%s1914_s8 + $0x1d0] ss:$8 sps:$4 sm:$0xff]   ;;  %v1588_v61 = vld [vmem:[%s1914_s8 + $0xe4] ss:$8 sps:$4 sm:$0xff]   ;;  %v1592_v63 = vld [vmem:[%s1914_s8 + $0xe0] ss:$8 sps:$4 sm:$0xff]   ;;  %v1161_v21 = vlaneseq (!%p1441_p13) }
  0x62   : > { %1118 = vmatprep.subr.bf16.mxu1 %v1536_v22  ;;  %1099 = vmatprep.mubr.bf16.mxu0 %v1374_v48  ;;  %v1590_v62 = vld [vmem:[%s1914_s8 + $0x1e4] ss:$8 sps:$4 sm:$0xff]   ;;  %v1593_v0 = vld [vmem:[%s1914_s8 + $0x1e0] ss:$8 sps:$4 sm:$0xff]   ;;  %v1594_v1 = vld [vmem:[%s1914_s8 + $0xf4] ss:$8 sps:$4 sm:$0xff]  }
  0x63   : > { %1140 = vmatprep.mubr.bf16.mxu1 %v1376_v52  ;;  %v1596_v2 = vld [vmem:[%s1914_s8 + $0x1f4] ss:$8 sps:$4 sm:$0xff]   ;;  %v1598_v3 = vld [vmem:[%s1914_s8 + $0xf0] ss:$8 sps:$4 sm:$0xff]   ;;  %v1162_v22 = vshrl.u32 (!%p1441_p13), %v1161_v21, 7 }
  0x64   : > { %1078 = vmatpush1.bf16.msra.mxu0 %v1538_v23  ;;  %v1599_v4 = vld [vmem:[%s1914_s8 + $0x1f0] ss:$8 sps:$4 sm:$0xff]  }
  0x65   : > { %1119 = vmatpush1.bf16.msra.mxu1 %v1539_v24  ;;  %1079 = vmatprep.subr.bf16.mxu0 %v1540_v25  ;;  %v665_v8 = vld [vmem:[#allocation2] sm:$0xff]  ;;  %v666_v12 = vld [vmem:[#allocation2 + $0x8] sm:$0xff]  ;;  %v1163_v25 = vsub.s32 (!%p1441_p13), 0, %v1162_v22 }
  0x66   : > { %1120 = vmatprep.subr.bf16.mxu1 %v1542_v26  ;;  %v1159_v23 = vld [vmem:[%s632_s18] sm:$0x3] (!%p1441_p13)  ;;  %v1167_v26 = vsub.s32 (!%p1441_p13), 1, %v1162_v22 }
  0x67   : > { %v1173_v24 = vld [vmem:[%s637_s21] sm:$0x3] (!%p1441_p13) }
  0x68   : > { %1080 = vmatpush1.bf16.msra.mxu0 %v1544_v27 }
  0x69   : > { %1121 = vmatpush1.bf16.msra.mxu1 %v1545_v28  ;;  %1081 = vmatprep.subr.bf16.mxu0 %v1546_v29  ;;  %v1187_v29 = vld [vmem:[%s1907_s17] sm:$0xff] (!%p1441_p13) }
  0x6a   : > { %1122 = vmatprep.subr.bf16.mxu1 %v1548_v30  ;;  %v1164_v30 = vrot.slane (!%p1441_p13), %v1159_v23, %v1163_v25 }
  0x6c   : > { %1082 = vmatpush1.bf16.msra.mxu0 %v1550_v31  ;;  %v1168_v31 = vrot.slane (!%p1441_p13), %v1159_v23, %v1167_v26 }
  0x6d   : > { %1123 = vmatpush1.bf16.msra.mxu1 %v1551_v32  ;;  %1083 = vmatprep.subr.bf16.mxu0 %v1552_v33  ;;  %v1178_v32 = vrot.slane (!%p1441_p13), %v1173_v24, %v1163_v25  ;;  %v1182_v33 = vrot.slane (!%p1441_p13), %v1173_v24, %v1167_v26 }
  0x6e   : > { %1124 = vmatprep.subr.bf16.mxu1 %v1554_v34 }
  0x70   : > { %1084 = vmatpush1.bf16.msra.mxu0 %v1556_v35 }
  0x71   : > { %1125 = vmatpush1.bf16.msra.mxu1 %v1557_v36  ;;  %1085 = vmatprep.subr.bf16.mxu0 %v1558_v37  ;;  %v1188_v36 = vunpack.c.l.bf16 (!%p1441_p13), %v1187_v29  ;;  %v1189_v37 = vunpack.c.h.bf16 (!%p1441_p13), %v1187_v29 }
  0x72   : > { %1126 = vmatprep.subr.bf16.mxu1 %v1560_v38 }
  0x74   : > { %1086 = vmatpush1.bf16.msra.mxu0 %v1562_v39 }
  0x75   : > { %1127 = vmatpush1.bf16.msra.mxu1 %v1563_v40  ;;  %1087 = vmatprep.subr.bf16.mxu0 %v1564_v41 }
  0x76   : > { %1128 = vmatprep.subr.bf16.mxu1 %v1566_v42 }
  0x78   : > { %1088 = vmatpush1.bf16.msra.mxu0 %v1568_v43 }
  0x79   : > { %1129 = vmatpush1.bf16.msra.mxu1 %v1569_v44  ;;  %1089 = vmatprep.subr.bf16.mxu0 %v1570_v45 }
  0x7a   : > { %1130 = vmatprep.subr.bf16.mxu1 %v1572_v46 }
  0x7c   : > { %1090 = vmatpush1.bf16.msra.mxu0 %v1574_v50 }
  0x7d   : > { %1131 = vmatpush1.bf16.msra.mxu1 %v1575_v51  ;;  %1091 = vmatprep.subr.bf16.mxu0 %v1576_v53 }
  0x7e   : > { %1132 = vmatprep.subr.bf16.mxu1 %v1578_v54 }
  0x80   : > { %1092 = vmatpush1.bf16.msra.mxu0 %v1580_v55 }
  0x81   : > { %1133 = vmatpush1.bf16.msra.mxu1 %v1581_v56  ;;  %1093 = vmatprep.subr.bf16.mxu0 %v1582_v57 }
  0x82   : > { %1134 = vmatprep.subr.bf16.mxu1 %v1584_v58 }
  0x84   : > { %1094 = vmatpush1.bf16.msra.mxu0 %v1586_v59 }
  0x85   : > { %1135 = vmatpush1.bf16.msra.mxu1 %v1587_v60  ;;  %1095 = vmatprep.subr.bf16.mxu0 %v1588_v61 }
  0x86   : > { %1136 = vmatprep.subr.bf16.mxu1 %v1590_v62 }
  0x88   : > { %1096 = vmatpush1.bf16.msra.mxu0 %v1592_v63 }
  0x89   : > { %1137 = vmatpush1.bf16.msra.mxu1 %v1593_v0  ;;  %1097 = vmatprep.subr.bf16.mxu0 %v1594_v1 }
  0x8a   : > { %1138 = vmatprep.subr.bf16.mxu1 %v1596_v2 }
  0x8c   : > { %1098 = vmatpush1.bf16.msra.mxu0 %v1598_v3 }
  0x8d   : > { %1139 = vmatpush1.bf16.msra.mxu1 %v1599_v4 }
  0x8f   : > { %1100 = vmatmul.mubr.bf16.vlgmr.msra.gmra.mrb[0].mxu0 %v1373_v5 }
  0x90   : > { %1141 = vmatmul.mubr.bf16.vlgmr.msra.gmra.mrb[0].mxu1 %v1375_v6 }
 0x162   : > { %v1101_v7 = vpop.f32.mrb[0].mxu0 }
 0x163   : > { %v1142_v9 = vpop.f32.mrb[0].mxu1  ;;  %v1103_v11 = vpop.f32.mrb[1].mxu0  ;;  %1156 = sbr.rel (%p1441_p13) target bundleno = 380 (0x17c), region = 86 }
 0x164   : > { %v1143_v10 = vadd.f32 %v1142_v9, %v1101_v7  ;;  %v1144_v13 = vpop.f32.mrb[1].mxu1  ;;  %v1105_v15 = vpop.f32.mrb[2].mxu0 }
 0x165   : > { %v1145_v14 = vadd.f32 %v1144_v13, %v1103_v11  ;;  %v1146_v16 = vpop.f32.mrb[2].mxu1  ;;  %v1106_v18 = vpop.f32.mrb[3].mxu0 }
 0x166   : > { %v1149_v17 = vadd.f32 %v1143_v10, %v665_v8  ;;  %v1147_v19 = vpop.f32.mrb[3].mxu1 }
 0x167   : > { %v1150_v20 = vadd.f32 %v1145_v14, %v666_v12 }
 0x168   : > { %1151 = vst [vmem:[#allocation2] sm:$0xff] %v1149_v17 }
 0x169   : > { %1152 = vst [vmem:[#allocation2 + $0x8] sm:$0xff] %v1150_v20 }
 0x16f   : > { %v1157_v27 = vld [vmem:[#allocation2] sm:$0xff] }
 0x170   : > { %v1158_v28 = vld [vmem:[#allocation2 + $0x8] sm:$0xff]  ;;  %v1171_v34 = vmul.f32 %v1164_v30, %v1157_v27 }
 0x171   : > { %v1172_v35 = vmul.f32 %v1168_v31, %v1158_v28 }
 0x172   : > { %v1185_v38 = vadd.f32 %v1178_v32, %v1171_v34 }
 0x173   : > { %v1186_v39 = vadd.f32 %v1182_v33, %v1172_v35 }
 0x174   : > { %v1190_v40 = vadd.f32 %v1188_v36, %v1185_v38 }
 0x175   : > { %v1191_v41 = vadd.f32 %v1189_v37, %v1186_v39 }
 0x176   : > { %v1192_v42 = vmax.f32 %v1190_v40, 0.0 }
 0x177   : > { %v1193_v43 = vmax.f32 %v1191_v41, 0.0 }
 0x179   : > { %v1446_v44 = vpack.c.bf16 %v1193_v43, %v1192_v42 }
 0x17b   : > { %1202 = vst [vmem:[%s1912_s7] sm:$0xff] %v1446_v44 }
 0x17c PF: > { %s15_s24 = sadd.s32 1, %s1658_s24   ;;  %s2023_s18 = smov %s1638_s19 }
 0x17d   : > { %p12_p0 = scmp.ge.s32.totalorder %s15_s24, 20   ;;  %s2024_s19 = smov %s1742_s6 }
 0x17e   : > { %s2025_s20 = smov %s1650_s22  ;;  %s2026_s21 = smov %s1654_s23 }
 0x17f   : > { %s2027_s22 = smov %s2030_s25  ;;  %s2028_s23 = smov %s2034_s26 }
 0x180   :  { %14 = sbr.rel (!%p12_p0) target bundleno = 4 (0x4), region = 133 }

// kernel: resnet18_forward.41
= control target key start
LH: loop header
LB: loop body
LE: loop exit
PB: predicated region body
PF: predicated region fallthrough
CT: control target
= control target key end

     0   :  { %s1598_s15 = smov 0   ;;  %s1600_s16 = smov 0   ;;  %s1918_s0 = inlined_call_operand.vmem [shape: bf16[8,4608], index: 0, kind: input, shape index: {}]   ;;  %s1919_s1 = inlined_call_operand.vmem [shape: bf16[4608,512], index: 1, kind: input, shape index: {}]   ;;  %s1920_s2 = inlined_call_operand.vmem [shape: f32[1,512], index: 2, kind: input, shape index: {}]   ;;  %s1921_s3 = inlined_call_operand.vmem [shape: f32[1,512], index: 3, kind: input, shape index: {}]   ;;  %s1922_s4 = inlined_call_operand.vmem [shape: bf16[8,512], index: 4, kind: output, shape index: {}]  }
   0x1   :  { %s1602_s17 = smov 0   ;;  %s1604_s18 = smov 0  }
   0x2   :  { %s1606_s19 = smov 0   ;;  %s1608_s20 = smov 0  }
   0x3   :  { %s1610_s21 = smov 0  }
   0x4 LB: > { %s26_s22 = sadd.s32 1, %s1562_s19  ;;  %s29_s23 = sadd.s32 1, %s1566_s20  ;;  %s1570_s21 = sphi %s1610_s21, %s14_s21   ;;  %s1566_s20 = sphi %s1608_s20, %s1928_s20   ;;  %s1562_s19 = sphi %s1606_s19, %s1927_s19   ;;  %s1558_s18 = sphi %s1604_s18, %s1926_s18   ;;  %s1554_s17 = sphi %s1602_s17, %s1925_s17   ;;  %s1550_s16 = sphi %s1600_s16, %s1924_s16   ;;  %s1546_s15 = sphi %s1598_s15, %s1923_s15  }
   0x5   : > { %p27_p0 = scmp.ge.s32.totalorder %s26_s22, 9  ;;  %p77_p1 = scmp.ne.s32.totalorder %s1550_s16, %s1546_s15 }
   0x6   : > { %p78_p2 = scmp.eq.s32.totalorder %s1570_s21, 0  ;;  %s70_s27 = sadd.s32 1, %s1550_s16 }
   0x7   : > { %s1930_s22 = smov (%p27_p0, %s26_s22), 0  ;;  %s1932_s23 = smov (!%p27_p0, %s29_s23), %s1566_s20 }
   0x8   : > { %p79_p3 = por %p78_p2, %p77_p1  ;;  %p31_p4 = scmp.ge.s32.totalorder %s1932_s23, 2 }
   0x9   : > { %s65_s24 = ssub.s32 %s1562_s19, %s1930_s22  ;;  %p1270_p6 = scmp.ge.s32.totalorder %s1570_s21, 18 }
   0xa   : > { %s1934_s23 = smov (%p31_p4, %s1932_s23), 0 }
   0xb   : > { %s66_s25 = ssub.s32 %s1566_s20, %s1934_s23  ;;  %183 = sbr.rel (%p1270_p6) target bundleno = 57 (0x39), region = 16 }
   0xc   : > { %s67_s26 = sor.u32 %s66_s25, %s65_s24 }
   0xd   : > { %p68_p5 = scmp.eq.s32.totalorder %s67_s26, 0 }
   0xf   : > { %s1649_s28 = scalar_select %p68_p5, %s1550_s16, %s70_s27  }
  0x12   : > { %199 = sbr.rel (!%p79_p3) target bundleno = 57 (0x39), region = 24  ;;  %s201_s29 = sand.u32 (%p79_p3), 1, %s1550_s16  }
  0x13   : > { %s1273_s30 = sshll.u32 (%p79_p3), %s1566_s20, 1  ;;  %s1271_s5 = sshll.u32 (%p79_p3), %s201_s29, 9 }
  0x14   : > { %s1357_s6 = sshll.u32 (%p79_p3), %s1562_s19, 8  ;;  %s1663_s12 = scalar_lea.vmem (%p79_p3), [#allocation3], %s1271_s5 }
  0x15   : > { %s207_s7 = sadd.s32 (%p79_p3), %s1357_s6, %s1273_s30 }
  0x16   : > { %s1275_s8 = sshll.u32 (%p79_p3), %s207_s7, 2 }
  0x17   : > { %s1658_s11 = scalar_lea.vmem (%p79_p3), %s1919_s1, %s1275_s8 }
  0x18   : > { %v363_v0 = vld [vmem:[%s1658_s11] sm:$0xff] (%p79_p3)  ;;  %v365_v1 = vld [vmem:[%s1658_s11 + $0x10] sm:$0xff] (%p79_p3) }
  0x19   : > { %v367_v2 = vld [vmem:[%s1658_s11 + $0x20] sm:$0xff]  ;;  %364 = vst [vmem:[%s1663_s12] sm:$0xff] %v363_v0  ;;  %366 = vst [vmem:[%s1663_s12 + $0x8] sm:$0xff] %v365_v1  ;;  %v369_v3 = vld [vmem:[%s1658_s11 + $0x30] sm:$0xff] }
  0x1a   : > { %368 = vst [vmem:[%s1663_s12 + $0x10] sm:$0xff] %v367_v2  ;;  %v371_v4 = vld [vmem:[%s1658_s11 + $0x40] sm:$0xff]  ;;  %v373_v5 = vld [vmem:[%s1658_s11 + $0x50] sm:$0xff]  ;;  %370 = vst [vmem:[%s1663_s12 + $0x18] sm:$0xff] %v369_v3 }
  0x1b   : > { %372 = vst [vmem:[%s1663_s12 + $0x20] sm:$0xff] %v371_v4  ;;  %374 = vst [vmem:[%s1663_s12 + $0x28] sm:$0xff] %v373_v5  ;;  %v375_v6 = vld [vmem:[%s1658_s11 + $0x60] sm:$0xff]  ;;  %v377_v7 = vld [vmem:[%s1658_s11 + $0x70] sm:$0xff] }
  0x1c   : > { %v379_v8 = vld [vmem:[%s1658_s11 + $0x80] sm:$0xff]  ;;  %376 = vst [vmem:[%s1663_s12 + $0x30] sm:$0xff] %v375_v6  ;;  %378 = vst [vmem:[%s1663_s12 + $0x38] sm:$0xff] %v377_v7  ;;  %v381_v9 = vld [vmem:[%s1658_s11 + $0x90] sm:$0xff] }
  0x1d   : > { %380 = vst [vmem:[%s1663_s12 + $0x40] sm:$0xff] %v379_v8  ;;  %v383_v10 = vld [vmem:[%s1658_s11 + $0xa0] sm:$0xff]  ;;  %v385_v11 = vld [vmem:[%s1658_s11 + $0xb0] sm:$0xff]  ;;  %382 = vst [vmem:[%s1663_s12 + $0x48] sm:$0xff] %v381_v9 }
  0x1e   : > { %384 = vst [vmem:[%s1663_s12 + $0x50] sm:$0xff] %v383_v10  ;;  %386 = vst [vmem:[%s1663_s12 + $0x58] sm:$0xff] %v385_v11  ;;  %v387_v12 = vld [vmem:[%s1658_s11 + $0xc0] sm:$0xff]  ;;  %v389_v13 = vld [vmem:[%s1658_s11 + $0xd0] sm:$0xff] }
  0x1f   : > { %v391_v14 = vld [vmem:[%s1658_s11 + $0xe0] sm:$0xff]  ;;  %388 = vst [vmem:[%s1663_s12 + $0x60] sm:$0xff] %v387_v12  ;;  %390 = vst [vmem:[%s1663_s12 + $0x68] sm:$0xff] %v389_v13  ;;  %v393_v15 = vld [vmem:[%s1658_s11 + $0xf0] sm:$0xff] }
  0x20   : > { %392 = vst [vmem:[%s1663_s12 + $0x70] sm:$0xff] %v391_v14  ;;  %v395_v16 = vld [vmem:[%s1658_s11 + $0x100] sm:$0xff]  ;;  %v397_v17 = vld [vmem:[%s1658_s11 + $0x110] sm:$0xff]  ;;  %394 = vst [vmem:[%s1663_s12 + $0x78] sm:$0xff] %v393_v15 }
  0x21   : > { %396 = vst [vmem:[%s1663_s12 + $0x80] sm:$0xff] %v395_v16  ;;  %398 = vst [vmem:[%s1663_s12 + $0x88] sm:$0xff] %v397_v17  ;;  %v399_v18 = vld [vmem:[%s1658_s11 + $0x120] sm:$0xff]  ;;  %v401_v19 = vld [vmem:[%s1658_s11 + $0x130] sm:$0xff] }
  0x22   : > { %v403_v20 = vld [vmem:[%s1658_s11 + $0x140] sm:$0xff]  ;;  %400 = vst [vmem:[%s1663_s12 + $0x90] sm:$0xff] %v399_v18  ;;  %402 = vst [vmem:[%s1663_s12 + $0x98] sm:$0xff] %v401_v19  ;;  %v405_v21 = vld [vmem:[%s1658_s11 + $0x150] sm:$0xff] }
  0x23   : > { %404 = vst [vmem:[%s1663_s12 + $0xa0] sm:$0xff] %v403_v20  ;;  %v407_v22 = vld [vmem:[%s1658_s11 + $0x160] sm:$0xff]  ;;  %v409_v23 = vld [vmem:[%s1658_s11 + $0x170] sm:$0xff]  ;;  %406 = vst [vmem:[%s1663_s12 + $0xa8] sm:$0xff] %v405_v21 }
  0x24   : > { %408 = vst [vmem:[%s1663_s12 + $0xb0] sm:$0xff] %v407_v22  ;;  %410 = vst [vmem:[%s1663_s12 + $0xb8] sm:$0xff] %v409_v23  ;;  %v411_v24 = vld [vmem:[%s1658_s11 + $0x180] sm:$0xff]  ;;  %v413_v25 = vld [vmem:[%s1658_s11 + $0x190] sm:$0xff] }
  0x25   : > { %v415_v26 = vld [vmem:[%s1658_s11 + $0x1a0] sm:$0xff]  ;;  %412 = vst [vmem:[%s1663_s12 + $0xc0] sm:$0xff] %v411_v24  ;;  %414 = vst [vmem:[%s1663_s12 + $0xc8] sm:$0xff] %v413_v25  ;;  %v417_v27 = vld [vmem:[%s1658_s11 + $0x1b0] sm:$0xff] }
  0x26   : > { %416 = vst [vmem:[%s1663_s12 + $0xd0] sm:$0xff] %v415_v26  ;;  %v419_v28 = vld [vmem:[%s1658_s11 + $0x1c0] sm:$0xff]  ;;  %v421_v29 = vld [vmem:[%s1658_s11 + $0x1d0] sm:$0xff]  ;;  %418 = vst [vmem:[%s1663_s12 + $0xd8] sm:$0xff] %v417_v27 }
  0x27   : > { %420 = vst [vmem:[%s1663_s12 + $0xe0] sm:$0xff] %v419_v28  ;;  %422 = vst [vmem:[%s1663_s12 + $0xe8] sm:$0xff] %v421_v29  ;;  %v423_v30 = vld [vmem:[%s1658_s11 + $0x1e0] sm:$0xff]  ;;  %v425_v31 = vld [vmem:[%s1658_s11 + $0x1f0] sm:$0xff] }
  0x28   : > { %v427_v32 = vld [vmem:[%s1658_s11 + $0x200] sm:$0xff]  ;;  %424 = vst [vmem:[%s1663_s12 + $0xf0] sm:$0xff] %v423_v30  ;;  %426 = vst [vmem:[%s1663_s12 + $0xf8] sm:$0xff] %v425_v31  ;;  %v429_v33 = vld [vmem:[%s1658_s11 + $0x210] sm:$0xff] }
  0x29   : > { %428 = vst [vmem:[%s1663_s12 + $0x100] sm:$0xff] %v427_v32  ;;  %v431_v34 = vld [vmem:[%s1658_s11 + $0x220] sm:$0xff]  ;;  %v433_v35 = vld [vmem:[%s1658_s11 + $0x230] sm:$0xff]  ;;  %430 = vst [vmem:[%s1663_s12 + $0x108] sm:$0xff] %v429_v33 }
  0x2a   : > { %432 = vst [vmem:[%s1663_s12 + $0x110] sm:$0xff] %v431_v34  ;;  %434 = vst [vmem:[%s1663_s12 + $0x118] sm:$0xff] %v433_v35  ;;  %v435_v36 = vld [vmem:[%s1658_s11 + $0x240] sm:$0xff]  ;;  %v437_v37 = vld [vmem:[%s1658_s11 + $0x250] sm:$0xff] }
  0x2b   : > { %v439_v38 = vld [vmem:[%s1658_s11 + $0x260] sm:$0xff]  ;;  %436 = vst [vmem:[%s1663_s12 + $0x120] sm:$0xff] %v435_v36  ;;  %438 = vst [vmem:[%s1663_s12 + $0x128] sm:$0xff] %v437_v37  ;;  %v441_v39 = vld [vmem:[%s1658_s11 + $0x270] sm:$0xff] }
  0x2c   : > { %440 = vst [vmem:[%s1663_s12 + $0x130] sm:$0xff] %v439_v38  ;;  %v443_v40 = vld [vmem:[%s1658_s11 + $0x280] sm:$0xff]  ;;  %v445_v41 = vld [vmem:[%s1658_s11 + $0x290] sm:$0xff]  ;;  %442 = vst [vmem:[%s1663_s12 + $0x138] sm:$0xff] %v441_v39 }
  0x2d   : > { %444 = vst [vmem:[%s1663_s12 + $0x140] sm:$0xff] %v443_v40  ;;  %446 = vst [vmem:[%s1663_s12 + $0x148] sm:$0xff] %v445_v41  ;;  %v447_v42 = vld [vmem:[%s1658_s11 + $0x2a0] sm:$0xff]  ;;  %v449_v43 = vld [vmem:[%s1658_s11 + $0x2b0] sm:$0xff] }
  0x2e   : > { %v451_v44 = vld [vmem:[%s1658_s11 + $0x2c0] sm:$0xff]  ;;  %448 = vst [vmem:[%s1663_s12 + $0x150] sm:$0xff] %v447_v42  ;;  %450 = vst [vmem:[%s1663_s12 + $0x158] sm:$0xff] %v449_v43  ;;  %v453_v45 = vld [vmem:[%s1658_s11 + $0x2d0] sm:$0xff] }
  0x2f   : > { %452 = vst [vmem:[%s1663_s12 + $0x160] sm:$0xff] %v451_v44  ;;  %v455_v46 = vld [vmem:[%s1658_s11 + $0x2e0] sm:$0xff]  ;;  %v457_v47 = vld [vmem:[%s1658_s11 + $0x2f0] sm:$0xff]  ;;  %454 = vst [vmem:[%s1663_s12 + $0x168] sm:$0xff] %v453_v45 }
  0x30   : > { %456 = vst [vmem:[%s1663_s12 + $0x170] sm:$0xff] %v455_v46  ;;  %458 = vst [vmem:[%s1663_s12 + $0x178] sm:$0xff] %v457_v47  ;;  %v459_v48 = vld [vmem:[%s1658_s11 + $0x300] sm:$0xff]  ;;  %v461_v49 = vld [vmem:[%s1658_s11 + $0x310] sm:$0xff] }
  0x31   : > { %v463_v50 = vld [vmem:[%s1658_s11 + $0x320] sm:$0xff]  ;;  %460 = vst [vmem:[%s1663_s12 + $0x180] sm:$0xff] %v459_v48  ;;  %462 = vst [vmem:[%s1663_s12 + $0x188] sm:$0xff] %v461_v49  ;;  %v465_v51 = vld [vmem:[%s1658_s11 + $0x330] sm:$0xff] }
  0x32   : > { %464 = vst [vmem:[%s1663_s12 + $0x190] sm:$0xff] %v463_v50  ;;  %v467_v52 = vld [vmem:[%s1658_s11 + $0x340] sm:$0xff]  ;;  %v469_v53 = vld [vmem:[%s1658_s11 + $0x350] sm:$0xff]  ;;  %466 = vst [vmem:[%s1663_s12 + $0x198] sm:$0xff] %v465_v51 }
  0x33   : > { %468 = vst [vmem:[%s1663_s12 + $0x1a0] sm:$0xff] %v467_v52  ;;  %470 = vst [vmem:[%s1663_s12 + $0x1a8] sm:$0xff] %v469_v53  ;;  %v471_v54 = vld [vmem:[%s1658_s11 + $0x360] sm:$0xff]  ;;  %v473_v55 = vld [vmem:[%s1658_s11 + $0x370] sm:$0xff] }
  0x34   : > { %v475_v56 = vld [vmem:[%s1658_s11 + $0x380] sm:$0xff]  ;;  %472 = vst [vmem:[%s1663_s12 + $0x1b0] sm:$0xff] %v471_v54  ;;  %474 = vst [vmem:[%s1663_s12 + $0x1b8] sm:$0xff] %v473_v55  ;;  %v477_v57 = vld [vmem:[%s1658_s11 + $0x390] sm:$0xff] }
  0x35   : > { %476 = vst [vmem:[%s1663_s12 + $0x1c0] sm:$0xff] %v475_v56  ;;  %v479_v58 = vld [vmem:[%s1658_s11 + $0x3a0] sm:$0xff]  ;;  %v481_v59 = vld [vmem:[%s1658_s11 + $0x3b0] sm:$0xff]  ;;  %478 = vst [vmem:[%s1663_s12 + $0x1c8] sm:$0xff] %v477_v57 }
  0x36   : > { %480 = vst [vmem:[%s1663_s12 + $0x1d0] sm:$0xff] %v479_v58  ;;  %482 = vst [vmem:[%s1663_s12 + $0x1d8] sm:$0xff] %v481_v59  ;;  %v483_v60 = vld [vmem:[%s1658_s11 + $0x3c0] sm:$0xff]  ;;  %v485_v61 = vld [vmem:[%s1658_s11 + $0x3d0] sm:$0xff] }
  0x37   : > { %v487_v62 = vld [vmem:[%s1658_s11 + $0x3e0] sm:$0xff]  ;;  %484 = vst [vmem:[%s1663_s12 + $0x1e0] sm:$0xff] %v483_v60  ;;  %486 = vst [vmem:[%s1663_s12 + $0x1e8] sm:$0xff] %v485_v61  ;;  %v489_v63 = vld [vmem:[%s1658_s11 + $0x3f0] sm:$0xff] }
  0x38   : > { %488 = vst [vmem:[%s1663_s12 + $0x1f0] sm:$0xff] %v487_v62  ;;  %490 = vst [vmem:[%s1663_s12 + $0x1f8] sm:$0xff] %v489_v63 }
  0x39 PF: > { %p1276_p7 = scmp.ge.s32.totalorder %s1570_s21, 1  ;;  %p511_p8 = scmp.lt.s32.totalorder %s1570_s21, 19 }
  0x3b   : > { %p512_p9 = pnand %p1276_p7, %p511_p8 }
  0x3c   : > { %s518_s13 = sand.u32 (!%p512_p9), 1, %s1546_s15   ;;  %s1278_s14 = sshll.u32 (!%p512_p9), %s1554_s17, 2 }
  0x3d   : > { %515 = sbr.rel (%p512_p9) target bundleno = 378 (0x17a), region = 70  ;;  %s1277_s24 = sshll.u32 (!%p512_p9), %s518_s13, 9 }
  0x3e   : > { %p567_p10 = scmp.lt.s32.totalorder (!%p512_p9), %s1278_s14, 35  ;;  %s1280_s25 = sshll.u32 (!%p512_p9), %s1558_s18, 1 }
  0x3f   : > { %p577_p11 = scmp.lt.s32.totalorder (!%p512_p9), %s1280_s25, 3  ;;  %s1816_s13 = scalar_lea.vmem (!%p512_p9), [#allocation3], %s1277_s24 }
  0x40   : > { %p1284_p12 = scmp.ne.s32.totalorder (!%p512_p9), %s1554_s17, 0 }
  0x44   : > { %s1936_s14 = smov (!%p567_p10, %s1278_s14), 35  ;;  %s1938_s25 = smov (!%p577_p11, %s1280_s25), 3 }
  0x45   : > { %s1279_s26 = sshll.u32 %s1936_s14, 2  ;;  %s579_s15 = scalar_lea.vmem %s1920_s2, %s1938_s25  ;;  %v1572_v0 = vmov (!%p1284_p12), 0.0  }
  0x46   : > { %s1798_s30 = scalar_lea.vmem %s1918_s0, %s1279_s26  ;;  %s584_s18 = scalar_lea.vmem %s1921_s3, %s1938_s25  ;;  %600 = vst [vmem:[#allocation2] sm:$0xff] (!%p1284_p12), %v1572_v0  ;;  %601 = vst [vmem:[#allocation2 + $0x8] sm:$0xff] (!%p1284_p12), %v1572_v0 }
  0x47   : > { %s1283_s9 = sshll.u32 %s1938_s25, 2  ;;  %599 = sbr.rel (%p1284_p12) target bundleno = 78 (0x4e), region = 78 }
  0x48   : > { %s1814_s12 = scalar_lea.vmem %s1922_s4, %s1283_s9 }
  0x4e PF: > { %v1416_v1 = vld [vmem:[%s1816_s13 + $0x4] ss:$8 sps:$4 sm:$0xff]   ;;  %v1420_v3 = vld [vmem:[%s1816_s13] ss:$8 sps:$4 sm:$0xff]   ;;  %v1422_v5 = vld [vmem:[%s1816_s13 + $0x14] ss:$8 sps:$4 sm:$0xff]  }
  0x4f   : > { %v1418_v2 = vld [vmem:[%s1816_s13 + $0x104] ss:$8 sps:$4 sm:$0xff]   ;;  %1004 = vmatprep.subr.bf16.mxu0 %v1416_v1  ;;  %v1421_v4 = vld [vmem:[%s1816_s13 + $0x100] ss:$8 sps:$4 sm:$0xff]   ;;  %v1424_v6 = vld [vmem:[%s1816_s13 + $0x114] ss:$8 sps:$4 sm:$0xff]  }
  0x50   : > { %1045 = vmatprep.subr.bf16.mxu1 %v1418_v2  ;;  %1005 = vmatpush1.bf16.msra.mxu0 %v1420_v3  ;;  %v1426_v7 = vld [vmem:[%s1816_s13 + $0x10] ss:$8 sps:$4 sm:$0xff]   ;;  %v1428_v9 = vld [vmem:[%s1816_s13 + $0x24] ss:$8 sps:$4 sm:$0xff]   ;;  %v1432_v11 = vld [vmem:[%s1816_s13 + $0x20] ss:$8 sps:$4 sm:$0xff]  }
  0x51   : > { %1046 = vmatpush1.bf16.msra.mxu1 %v1421_v4  ;;  %1006 = vmatprep.subr.bf16.mxu0 %v1422_v5  ;;  %v1427_v8 = vld [vmem:[%s1816_s13 + $0x110] ss:$8 sps:$4 sm:$0xff]   ;;  %v1430_v10 = vld [vmem:[%s1816_s13 + $0x124] ss:$8 sps:$4 sm:$0xff]   ;;  %v1433_v12 = vld [vmem:[%s1816_s13 + $0x120] ss:$8 sps:$4 sm:$0xff]  }
  0x52   : > { %1047 = vmatprep.subr.bf16.mxu1 %v1424_v6  ;;  %v1434_v13 = vld [vmem:[%s1816_s13 + $0x34] ss:$8 sps:$4 sm:$0xff]   ;;  %v1438_v15 = vld [vmem:[%s1816_s13 + $0x30] ss:$8 sps:$4 sm:$0xff]   ;;  %v1440_v17 = vld [vmem:[%s1816_s13 + $0x44] ss:$8 sps:$4 sm:$0xff]  }
  0x53   : > { %v1436_v14 = vld [vmem:[%s1816_s13 + $0x134] ss:$8 sps:$4 sm:$0xff]   ;;  %v1439_v16 = vld [vmem:[%s1816_s13 + $0x130] ss:$8 sps:$4 sm:$0xff]   ;;  %v1442_v18 = vld [vmem:[%s1816_s13 + $0x144] ss:$8 sps:$4 sm:$0xff]  }
  0x54   : > { %1007 = vmatpush1.bf16.msra.mxu0 %v1426_v7  ;;  %v1444_v19 = vld [vmem:[%s1816_s13 + $0x40] ss:$8 sps:$4 sm:$0xff]   ;;  %v1446_v21 = vld [vmem:[%s1816_s13 + $0x54] ss:$8 sps:$4 sm:$0xff]   ;;  %v1450_v23 = vld [vmem:[%s1816_s13 + $0x50] ss:$8 sps:$4 sm:$0xff]  }
  0x55   : > { %1048 = vmatpush1.bf16.msra.mxu1 %v1427_v8  ;;  %1008 = vmatprep.subr.bf16.mxu0 %v1428_v9  ;;  %v1445_v20 = vld [vmem:[%s1816_s13 + $0x140] ss:$8 sps:$4 sm:$0xff]   ;;  %v1448_v22 = vld [vmem:[%s1816_s13 + $0x154] ss:$8 sps:$4 sm:$0xff]   ;;  %v1451_v24 = vld [vmem:[%s1816_s13 + $0x150] ss:$8 sps:$4 sm:$0xff]  }
  0x56   : > { %1049 = vmatprep.subr.bf16.mxu1 %v1430_v10  ;;  %v1452_v25 = vld [vmem:[%s1816_s13 + $0x64] ss:$8 sps:$4 sm:$0xff]   ;;  %v1456_v27 = vld [vmem:[%s1816_s13 + $0x60] ss:$8 sps:$4 sm:$0xff]   ;;  %v1458_v29 = vld [vmem:[%s1816_s13 + $0x74] ss:$8 sps:$4 sm:$0xff]  }
  0x57   : > { %v1454_v26 = vld [vmem:[%s1816_s13 + $0x164] ss:$8 sps:$4 sm:$0xff]   ;;  %v1457_v28 = vld [vmem:[%s1816_s13 + $0x160] ss:$8 sps:$4 sm:$0xff]   ;;  %v1460_v30 = vld [vmem:[%s1816_s13 + $0x174] ss:$8 sps:$4 sm:$0xff]  }
  0x58   : > { %1009 = vmatpush1.bf16.msra.mxu0 %v1432_v11  ;;  %v1462_v31 = vld [vmem:[%s1816_s13 + $0x70] ss:$8 sps:$4 sm:$0xff]   ;;  %v1464_v33 = vld [vmem:[%s1816_s13 + $0x84] ss:$8 sps:$4 sm:$0xff]   ;;  %v1468_v35 = vld [vmem:[%s1816_s13 + $0x80] ss:$8 sps:$4 sm:$0xff]  }
  0x59   : > { %1050 = vmatpush1.bf16.msra.mxu1 %v1433_v12  ;;  %1010 = vmatprep.subr.bf16.mxu0 %v1434_v13  ;;  %v1463_v32 = vld [vmem:[%s1816_s13 + $0x170] ss:$8 sps:$4 sm:$0xff]   ;;  %v1466_v34 = vld [vmem:[%s1816_s13 + $0x184] ss:$8 sps:$4 sm:$0xff]   ;;  %v1469_v36 = vld [vmem:[%s1816_s13 + $0x180] ss:$8 sps:$4 sm:$0xff]  }
  0x5a   : > { %1051 = vmatprep.subr.bf16.mxu1 %v1436_v14  ;;  %v1470_v37 = vld [vmem:[%s1816_s13 + $0x94] ss:$8 sps:$4 sm:$0xff]   ;;  %v1474_v39 = vld [vmem:[%s1816_s13 + $0x90] ss:$8 sps:$4 sm:$0xff]   ;;  %v1476_v41 = vld [vmem:[%s1816_s13 + $0xa4] ss:$8 sps:$4 sm:$0xff]  }
  0x5b   : > { %v1472_v38 = vld [vmem:[%s1816_s13 + $0x194] ss:$8 sps:$4 sm:$0xff]   ;;  %v1475_v40 = vld [vmem:[%s1816_s13 + $0x190] ss:$8 sps:$4 sm:$0xff]   ;;  %v1478_v42 = vld [vmem:[%s1816_s13 + $0x1a4] ss:$8 sps:$4 sm:$0xff]  }
  0x5c   : > { %1011 = vmatpush1.bf16.msra.mxu0 %v1438_v15  ;;  %v1480_v43 = vld [vmem:[%s1816_s13 + $0xa0] ss:$8 sps:$4 sm:$0xff]   ;;  %v1482_v45 = vld [vmem:[%s1816_s13 + $0xb4] ss:$8 sps:$4 sm:$0xff]   ;;  %v1486_v50 = vld [vmem:[%s1816_s13 + $0xb0] ss:$8 sps:$4 sm:$0xff]  }
  0x5d   : > { %1052 = vmatpush1.bf16.msra.mxu1 %v1439_v16  ;;  %1012 = vmatprep.subr.bf16.mxu0 %v1440_v17  ;;  %v1481_v44 = vld [vmem:[%s1816_s13 + $0x1a0] ss:$8 sps:$4 sm:$0xff]   ;;  %v1484_v46 = vld [vmem:[%s1816_s13 + $0x1b4] ss:$8 sps:$4 sm:$0xff]   ;;  %v1487_v51 = vld [vmem:[%s1816_s13 + $0x1b0] ss:$8 sps:$4 sm:$0xff]  }
  0x5e   : > { %1053 = vmatprep.subr.bf16.mxu1 %v1442_v18  ;;  %v604_v47 = vld [vmem:[%s1798_s30] sm:$0xff]  ;;  %v605_v49 = vld [vmem:[%s1798_s30 + $0x8] sm:$0xff]  ;;  %v1488_v53 = vld [vmem:[%s1816_s13 + $0xc4] ss:$8 sps:$4 sm:$0xff]   ;;  %p1353_p13 = scmp.ne.s32.totalorder %s1554_s17, 8 }
  0x5f   : > { %v1286_v48 = vcombine.high %v604_v47, %v604_v47  ;;  %v1288_v52 = vcombine.high %v605_v49, %v605_v49  ;;  %v1490_v54 = vld [vmem:[%s1816_s13 + $0x1c4] ss:$8 sps:$4 sm:$0xff]   ;;  %v1492_v55 = vld [vmem:[%s1816_s13 + $0xc0] ss:$8 sps:$4 sm:$0xff]   ;;  %v1494_v57 = vld [vmem:[%s1816_s13 + $0xd4] ss:$8 sps:$4 sm:$0xff]   ;;  %v1285_v5 = vcombine.low %v604_v47, %v604_v47  ;;  %v1287_v6 = vcombine.low %v605_v49, %v605_v49 }
  0x60   : > { %1013 = vmatpush1.bf16.msra.mxu0 %v1444_v19  ;;  %v1493_v56 = vld [vmem:[%s1816_s13 + $0x1c0] ss:$8 sps:$4 sm:$0xff]   ;;  %v1496_v58 = vld [vmem:[%s1816_s13 + $0x1d4] ss:$8 sps:$4 sm:$0xff]   ;;  %v1498_v59 = vld [vmem:[%s1816_s13 + $0xd0] ss:$8 sps:$4 sm:$0xff]  }
  0x61   : > { %1054 = vmatpush1.bf16.msra.mxu1 %v1445_v20  ;;  %1014 = vmatprep.subr.bf16.mxu0 %v1446_v21  ;;  %v1499_v60 = vld [vmem:[%s1816_s13 + $0x1d0] ss:$8 sps:$4 sm:$0xff]   ;;  %v1500_v61 = vld [vmem:[%s1816_s13 + $0xe4] ss:$8 sps:$4 sm:$0xff]   ;;  %v1504_v63 = vld [vmem:[%s1816_s13 + $0xe0] ss:$8 sps:$4 sm:$0xff]   ;;  %v1098_v21 = vlaneseq (!%p1353_p13) }
  0x62   : > { %1055 = vmatprep.subr.bf16.mxu1 %v1448_v22  ;;  %1036 = vmatprep.mubr.bf16.mxu0 %v1286_v48  ;;  %v1502_v62 = vld [vmem:[%s1816_s13 + $0x1e4] ss:$8 sps:$4 sm:$0xff]   ;;  %v1505_v0 = vld [vmem:[%s1816_s13 + $0x1e0] ss:$8 sps:$4 sm:$0xff]   ;;  %v1506_v1 = vld [vmem:[%s1816_s13 + $0xf4] ss:$8 sps:$4 sm:$0xff]  }
  0x63   : > { %1077 = vmatprep.mubr.bf16.mxu1 %v1288_v52  ;;  %v1508_v2 = vld [vmem:[%s1816_s13 + $0x1f4] ss:$8 sps:$4 sm:$0xff]   ;;  %v1510_v3 = vld [vmem:[%s1816_s13 + $0xf0] ss:$8 sps:$4 sm:$0xff]   ;;  %v1099_v22 = vshrl.u32 (!%p1353_p13), %v1098_v21, 7 }
  0x64   : > { %1015 = vmatpush1.bf16.msra.mxu0 %v1450_v23  ;;  %v1511_v4 = vld [vmem:[%s1816_s13 + $0x1f0] ss:$8 sps:$4 sm:$0xff]  }
  0x65   : > { %1056 = vmatpush1.bf16.msra.mxu1 %v1451_v24  ;;  %1016 = vmatprep.subr.bf16.mxu0 %v1452_v25  ;;  %v602_v8 = vld [vmem:[#allocation2] sm:$0xff]  ;;  %v603_v12 = vld [vmem:[#allocation2 + $0x8] sm:$0xff]  ;;  %v1100_v25 = vsub.s32 (!%p1353_p13), 0, %v1099_v22 }
  0x66   : > { %1057 = vmatprep.subr.bf16.mxu1 %v1454_v26  ;;  %v1096_v23 = vld [vmem:[%s579_s15] sm:$0x3] (!%p1353_p13)  ;;  %v1104_v26 = vsub.s32 (!%p1353_p13), 1, %v1099_v22 }
  0x67   : > { %v1110_v24 = vld [vmem:[%s584_s18] sm:$0x3] (!%p1353_p13) }
  0x68   : > { %1017 = vmatpush1.bf16.msra.mxu0 %v1456_v27 }
  0x69   : > { %1058 = vmatpush1.bf16.msra.mxu1 %v1457_v28  ;;  %1018 = vmatprep.subr.bf16.mxu0 %v1458_v29  ;;  %v1101_v29 = vrot.slane (!%p1353_p13), %v1096_v23, %v1100_v25 }
  0x6a   : > { %1059 = vmatprep.subr.bf16.mxu1 %v1460_v30  ;;  %v1105_v30 = vrot.slane (!%p1353_p13), %v1096_v23, %v1104_v26 }
  0x6c   : > { %1019 = vmatpush1.bf16.msra.mxu0 %v1462_v31  ;;  %v1115_v31 = vrot.slane (!%p1353_p13), %v1110_v24, %v1100_v25 }
  0x6d   : > { %1060 = vmatpush1.bf16.msra.mxu1 %v1463_v32  ;;  %1020 = vmatprep.subr.bf16.mxu0 %v1464_v33  ;;  %v1119_v32 = vrot.slane (!%p1353_p13), %v1110_v24, %v1104_v26 }
  0x6e   : > { %1061 = vmatprep.subr.bf16.mxu1 %v1466_v34 }
  0x70   : > { %1021 = vmatpush1.bf16.msra.mxu0 %v1468_v35 }
  0x71   : > { %1062 = vmatpush1.bf16.msra.mxu1 %v1469_v36  ;;  %1022 = vmatprep.subr.bf16.mxu0 %v1470_v37 }
  0x72   : > { %1063 = vmatprep.subr.bf16.mxu1 %v1472_v38 }
  0x74   : > { %1023 = vmatpush1.bf16.msra.mxu0 %v1474_v39 }
  0x75   : > { %1064 = vmatpush1.bf16.msra.mxu1 %v1475_v40  ;;  %1024 = vmatprep.subr.bf16.mxu0 %v1476_v41 }
  0x76   : > { %1065 = vmatprep.subr.bf16.mxu1 %v1478_v42 }
  0x78   : > { %1025 = vmatpush1.bf16.msra.mxu0 %v1480_v43 }
  0x79   : > { %1066 = vmatpush1.bf16.msra.mxu1 %v1481_v44  ;;  %1026 = vmatprep.subr.bf16.mxu0 %v1482_v45 }
  0x7a   : > { %1067 = vmatprep.subr.bf16.mxu1 %v1484_v46 }
  0x7c   : > { %1027 = vmatpush1.bf16.msra.mxu0 %v1486_v50 }
  0x7d   : > { %1068 = vmatpush1.bf16.msra.mxu1 %v1487_v51  ;;  %1028 = vmatprep.subr.bf16.mxu0 %v1488_v53 }
  0x7e   : > { %1069 = vmatprep.subr.bf16.mxu1 %v1490_v54 }
  0x80   : > { %1029 = vmatpush1.bf16.msra.mxu0 %v1492_v55 }
  0x81   : > { %1070 = vmatpush1.bf16.msra.mxu1 %v1493_v56  ;;  %1030 = vmatprep.subr.bf16.mxu0 %v1494_v57 }
  0x82   : > { %1071 = vmatprep.subr.bf16.mxu1 %v1496_v58 }
  0x84   : > { %1031 = vmatpush1.bf16.msra.mxu0 %v1498_v59 }
  0x85   : > { %1072 = vmatpush1.bf16.msra.mxu1 %v1499_v60  ;;  %1032 = vmatprep.subr.bf16.mxu0 %v1500_v61 }
  0x86   : > { %1073 = vmatprep.subr.bf16.mxu1 %v1502_v62 }
  0x88   : > { %1033 = vmatpush1.bf16.msra.mxu0 %v1504_v63 }
  0x89   : > { %1074 = vmatpush1.bf16.msra.mxu1 %v1505_v0  ;;  %1034 = vmatprep.subr.bf16.mxu0 %v1506_v1 }
  0x8a   : > { %1075 = vmatprep.subr.bf16.mxu1 %v1508_v2 }
  0x8c   : > { %1035 = vmatpush1.bf16.msra.mxu0 %v1510_v3 }
  0x8d   : > { %1076 = vmatpush1.bf16.msra.mxu1 %v1511_v4 }
  0x8f   : > { %1037 = vmatmul.mubr.bf16.vlgmr.msra.gmra.mrb[0].mxu0 %v1285_v5 }
  0x90   : > { %1078 = vmatmul.mubr.bf16.vlgmr.msra.gmra.mrb[0].mxu1 %v1287_v6 }
 0x162   : > { %v1038_v7 = vpop.f32.mrb[0].mxu0 }
 0x163   : > { %v1079_v9 = vpop.f32.mrb[0].mxu1  ;;  %v1040_v11 = vpop.f32.mrb[1].mxu0  ;;  %1093 = sbr.rel (%p1353_p13) target bundleno = 378 (0x17a), region = 82 }
 0x164   : > { %v1080_v10 = vadd.f32 %v1079_v9, %v1038_v7  ;;  %v1081_v13 = vpop.f32.mrb[1].mxu1  ;;  %v1042_v15 = vpop.f32.mrb[2].mxu0 }
 0x165   : > { %v1082_v14 = vadd.f32 %v1081_v13, %v1040_v11  ;;  %v1083_v16 = vpop.f32.mrb[2].mxu1  ;;  %v1043_v18 = vpop.f32.mrb[3].mxu0 }
 0x166   : > { %v1086_v17 = vadd.f32 %v1080_v10, %v602_v8  ;;  %v1084_v19 = vpop.f32.mrb[3].mxu1 }
 0x167   : > { %v1087_v20 = vadd.f32 %v1082_v14, %v603_v12 }
 0x168   : > { %1088 = vst [vmem:[#allocation2] sm:$0xff] %v1086_v17 }
 0x169   : > { %1089 = vst [vmem:[#allocation2 + $0x8] sm:$0xff] %v1087_v20 }
 0x16f   : > { %v1094_v27 = vld [vmem:[#allocation2] sm:$0xff] }
 0x170   : > { %v1095_v28 = vld [vmem:[#allocation2 + $0x8] sm:$0xff]  ;;  %v1108_v33 = vmul.f32 %v1101_v29, %v1094_v27 }
 0x171   : > { %v1109_v34 = vmul.f32 %v1105_v30, %v1095_v28 }
 0x172   : > { %v1122_v35 = vadd.f32 %v1115_v31, %v1108_v33 }
 0x173   : > { %v1123_v36 = vadd.f32 %v1119_v32, %v1109_v34 }
 0x174   : > { %v1124_v37 = vmax.f32 %v1122_v35, 0.0 }
 0x175   : > { %v1125_v38 = vmax.f32 %v1123_v36, 0.0 }
 0x177   : > { %v1358_v39 = vpack.c.bf16 %v1125_v38, %v1124_v37 }
 0x179   : > { %1134 = vst [vmem:[%s1814_s12] sm:$0xff] %v1358_v39 }
 0x17a PF: > { %s14_s21 = sadd.s32 1, %s1570_s21   ;;  %s1923_s15 = smov %s1550_s16 }
 0x17b   : > { %p11_p0 = scmp.ge.s32.totalorder %s14_s21, 20   ;;  %s1924_s16 = smov %s1649_s28 }
 0x17c   : > { %s1925_s17 = smov %s1562_s19  ;;  %s1926_s18 = smov %s1566_s20 }
 0x17d   : > { %s1927_s19 = smov %s1930_s22  ;;  %s1928_s20 = smov %s1934_s23 }
 0x17e   :  { %13 = sbr.rel (!%p11_p0) target bundleno = 4 (0x4), region = 126 }

// kernel: resnet18_forward.43
= control target key start
LH: loop header
LB: loop body
LE: loop exit
PB: predicated region body
PF: predicated region fallthrough
CT: control target
= control target key end

     0   :  { %v94_v51 = vlaneseq  ;;  %s696_s0 = inlined_call_operand.vmem [shape: bf16[2,1,512], index: 0, kind: input, shape index: {}]   ;;  %s697_s1 = inlined_call_operand.vmem [shape: f32[512,2], index: 1, kind: input, shape index: {}]   ;;  %s698_s2 = inlined_call_operand.vmem [shape: f32[1,2], index: 2, kind: input, shape index: {}]   ;;  %s699_s3 = inlined_call_operand.hbm [shape: f32[2,2], index: 3, kind: output, shape index: {}]  }
   0x1   :  { %v37_v0 = vld [vmem:[%s697_s1 + $0x80] sm:$0xff]  ;;  %v38_v1 = vld [vmem:[%s697_s1 + $0x88] sm:$0xff]  ;;  %v39_v11 = vld [vmem:[%s697_s1 + $0x90] sm:$0xff] }
   0x2   :  { %v21_v2 = vld [vmem:[%s697_s1] sm:$0xff]  ;;  %v366_v3 = vpack.c.bf16 %v38_v1, %v37_v0  ;;  %v22_v4 = vld [vmem:[%s697_s1 + $0x8] sm:$0xff]  ;;  %v40_v13 = vld [vmem:[%s697_s1 + $0x98] sm:$0xff]  ;;  %v608_v0 = vshrl.u32 %v94_v51, 7 }
   0x3   :  { %v69_v5 = vld [vmem:[%s697_s1 + $0x180] sm:$0xff]  ;;  %v70_v6 = vld [vmem:[%s697_s1 + $0x188] sm:$0xff]  ;;  %v368_v7 = vpack.c.bf16 %v22_v4, %v21_v2  ;;  %v23_v14 = vld [vmem:[%s697_s1 + $0x10] sm:$0xff]  ;;  %v370_v16 = vpack.c.bf16 %v40_v13, %v39_v11 }
   0x4   :  { %v398_v8 = vpack.c.bf16 %v70_v6, %v69_v5  ;;  %v53_v9 = vld [vmem:[%s697_s1 + $0x100] sm:$0xff]  ;;  %v54_v10 = vld [vmem:[%s697_s1 + $0x108] sm:$0xff]  ;;  %367 = vmatprep.subr.bf16.mxu0 %v366_v3  ;;  %v24_v15 = vld [vmem:[%s697_s1 + $0x18] sm:$0xff] }
   0x5   :  { %v400_v12 = vpack.c.bf16 %v54_v10, %v53_v9  ;;  %369 = vmatpush3.bf16.msra.mxu0 %v368_v7  ;;  %v372_v17 = vpack.c.bf16 %v24_v15, %v23_v14  ;;  %v71_v18 = vld [vmem:[%s697_s1 + $0x190] sm:$0xff]  ;;  %v72_v19 = vld [vmem:[%s697_s1 + $0x198] sm:$0xff]  ;;  %v41_v23 = vld [vmem:[%s697_s1 + $0xa0] sm:$0xff] }
   0x6   :  { %399 = vmatprep.subr.bf16.mxu1 %v398_v8  ;;  %v55_v20 = vld [vmem:[%s697_s1 + $0x110] sm:$0xff]  ;;  %v402_v21 = vpack.c.bf16 %v72_v19, %v71_v18  ;;  %v56_v22 = vld [vmem:[%s697_s1 + $0x118] sm:$0xff]  ;;  %v42_v24 = vld [vmem:[%s697_s1 + $0xa8] sm:$0xff]  ;;  %371 = vmatprep.subr.bf16.mxu0 %v370_v16  ;;  %v100_v16 = vsub.s32 2, %v608_v0 }
   0x7   :  { %401 = vmatpush3.bf16.msra.mxu1 %v400_v12  ;;  %v404_v25 = vpack.c.bf16 %v56_v22, %v55_v20  ;;  %v374_v26 = vpack.c.bf16 %v42_v24, %v41_v23  ;;  %v25_v27 = vld [vmem:[%s697_s1 + $0x20] sm:$0xff]  ;;  %v26_v28 = vld [vmem:[%s697_s1 + $0x28] sm:$0xff]  ;;  %v43_v35 = vld [vmem:[%s697_s1 + $0xb0] sm:$0xff] }
   0x8   :  { %v73_v29 = vld [vmem:[%s697_s1 + $0x1a0] sm:$0xff]  ;;  %403 = vmatprep.subr.bf16.mxu1 %v402_v21  ;;  %v74_v30 = vld [vmem:[%s697_s1 + $0x1a8] sm:$0xff]  ;;  %v376_v33 = vpack.c.bf16 %v26_v28, %v25_v27  ;;  %v44_v36 = vld [vmem:[%s697_s1 + $0xb8] sm:$0xff]  ;;  %v108_v21 = vsub.s32 6, %v608_v0 }
   0x9   :  { %v57_v31 = vld [vmem:[%s697_s1 + $0x120] sm:$0xff]  ;;  %v58_v32 = vld [vmem:[%s697_s1 + $0x128] sm:$0xff]  ;;  %373 = vmatpush3.bf16.msra.mxu0 %v372_v17  ;;  %v406_v34 = vpack.c.bf16 %v74_v30, %v73_v29  ;;  %v27_v37 = vld [vmem:[%s697_s1 + $0x30] sm:$0xff]  ;;  %v378_v39 = vpack.c.bf16 %v44_v36, %v43_v35 }
   0xa   :  { %375 = vmatprep.subr.bf16.mxu0 %v374_v26  ;;  %v408_v38 = vpack.c.bf16 %v58_v32, %v57_v31  ;;  %v28_v40 = vld [vmem:[%s697_s1 + $0x38] sm:$0xff]  ;;  %v75_v41 = vld [vmem:[%s697_s1 + $0x1b0] sm:$0xff]  ;;  %v45_v46 = vld [vmem:[%s697_s1 + $0xc0] sm:$0xff] }
   0xb   :  { %405 = vmatpush3.bf16.msra.mxu1 %v404_v25  ;;  %v76_v42 = vld [vmem:[%s697_s1 + $0x1b8] sm:$0xff]  ;;  %v59_v44 = vld [vmem:[%s697_s1 + $0x130] sm:$0xff]  ;;  %v46_v47 = vld [vmem:[%s697_s1 + $0xc8] sm:$0xff]  ;;  %v380_v48 = vpack.c.bf16 %v28_v40, %v27_v37 }
   0xc   :  { %407 = vmatprep.subr.bf16.mxu1 %v406_v34  ;;  %v410_v43 = vpack.c.bf16 %v76_v42, %v75_v41  ;;  %v60_v45 = vld [vmem:[%s697_s1 + $0x138] sm:$0xff]  ;;  %v77_v49 = vld [vmem:[%s697_s1 + $0x1c0] sm:$0xff]  ;;  %v78_v50 = vld [vmem:[%s697_s1 + $0x1c8] sm:$0xff]  ;;  %v382_v53 = vpack.c.bf16 %v46_v47, %v45_v46 }
   0xd   :  { %377 = vmatpush3.bf16.msra.mxu0 %v376_v33  ;;  %v412_v52 = vpack.c.bf16 %v60_v45, %v59_v44  ;;  %v29_v54 = vld [vmem:[%s697_s1 + $0x40] sm:$0xff]  ;;  %v30_v55 = vld [vmem:[%s697_s1 + $0x48] sm:$0xff]  ;;  %v414_v57 = vpack.c.bf16 %v78_v50, %v77_v49  ;;  %v47_v59 = vld [vmem:[%s697_s1 + $0xd0] sm:$0xff] }
   0xe   :  { %379 = vmatprep.subr.bf16.mxu0 %v378_v39  ;;  %v61_v56 = vld [vmem:[%s697_s1 + $0x140] sm:$0xff]  ;;  %v62_v58 = vld [vmem:[%s697_s1 + $0x148] sm:$0xff]  ;;  %v48_v60 = vld [vmem:[%s697_s1 + $0xd8] sm:$0xff]  ;;  %v384_v63 = vpack.c.bf16 %v30_v55, %v29_v54 }
   0xf   :  { %409 = vmatpush3.bf16.msra.mxu1 %v408_v38  ;;  %v79_v61 = vld [vmem:[%s697_s1 + $0x1d0] sm:$0xff]  ;;  %v80_v62 = vld [vmem:[%s697_s1 + $0x1d8] sm:$0xff]  ;;  %v416_v1 = vpack.c.bf16 %v62_v58, %v61_v56  ;;  %v386_v2 = vpack.c.bf16 %v48_v60, %v47_v59  ;;  %v49_v8 = vld [vmem:[%s697_s1 + $0xe0] sm:$0xff] }
  0x10   :  { %411 = vmatprep.subr.bf16.mxu1 %v410_v43  ;;  %v31_v3 = vld [vmem:[%s697_s1 + $0x50] sm:$0xff]  ;;  %v32_v4 = vld [vmem:[%s697_s1 + $0x58] sm:$0xff]  ;;  %v418_v6 = vpack.c.bf16 %v80_v62, %v79_v61  ;;  %v50_v9 = vld [vmem:[%s697_s1 + $0xe8] sm:$0xff] }
  0x11   :  { %381 = vmatpush3.bf16.msra.mxu0 %v380_v48  ;;  %v63_v5 = vld [vmem:[%s697_s1 + $0x150] sm:$0xff]  ;;  %v64_v7 = vld [vmem:[%s697_s1 + $0x158] sm:$0xff]  ;;  %v81_v10 = vld [vmem:[%s697_s1 + $0x1e0] sm:$0xff]  ;;  %v388_v12 = vpack.c.bf16 %v32_v4, %v31_v3  ;;  %v390_v18 = vpack.c.bf16 %v50_v9, %v49_v8 }
  0x12   :  { %383 = vmatprep.subr.bf16.mxu0 %v382_v53  ;;  %v82_v11 = vld [vmem:[%s697_s1 + $0x1e8] sm:$0xff]  ;;  %v33_v13 = vld [vmem:[%s697_s1 + $0x60] sm:$0xff]  ;;  %v420_v17 = vpack.c.bf16 %v64_v7, %v63_v5 }
  0x13   :  { %413 = vmatpush3.bf16.msra.mxu1 %v412_v52  ;;  %v34_v14 = vld [vmem:[%s697_s1 + $0x68] sm:$0xff]  ;;  %v65_v15 = vld [vmem:[%s697_s1 + $0x160] sm:$0xff] }
  0x14   :  { %415 = vmatprep.subr.bf16.mxu1 %v414_v57  ;;  %v66_v19 = vld [vmem:[%s697_s1 + $0x168] sm:$0xff]  ;;  %v293_v20 = vld [vmem:[%s696_s0] sm:$0xff]  }
  0x15   :  { %385 = vmatpush3.bf16.msra.mxu0 %v384_v63 }
  0x16   :  { %387 = vmatprep.subr.bf16.mxu0 %v386_v2 }
  0x17   :  { %417 = vmatpush3.bf16.msra.mxu1 %v416_v1 }
  0x18   :  { %8 = vsyncpa [#allocation3], 0  ;;  %419 = vmatprep.subr.bf16.mxu1 %v418_v6  ;;  %v422_v22 = vpack.c.bf16 %v82_v11, %v81_v10  ;;  %v51_v23 = vld [vmem:[%s697_s1 + $0xf0] sm:$0xff]  ;;  %v52_v24 = vld [vmem:[%s697_s1 + $0xf8] sm:$0xff]  ;;  %v294_v25 = vunpack.c.l.bf16 %v293_v20  ;;  %v295_v26 = vunpack.c.h.bf16 %v293_v20  ;;  %vm126_vm0 = vcmask 1041409   ;;  %s455_s7 = smov [#allocation2]  }
  0x19   :  { %v83_v27 = vld [vmem:[%s697_s1 + $0x1f0] sm:$0xff]  ;;  %v84_v28 = vld [vmem:[%s697_s1 + $0x1f8] sm:$0xff]  ;;  %v96_v29 = vsub.s32 0, %v608_v0  ;;  %389 = vmatpush3.bf16.msra.mxu0 %v388_v12  ;;  %v392_v30 = vpack.c.bf16 %v34_v14, %v33_v13  ;;  %v424_v31 = vpack.c.bf16 %v66_v19, %v65_v15  ;;  %v394_v34 = vpack.c.bf16 %v52_v24, %v51_v23  ;;  %v291_v54 = vld [vmem:[%s698_s2] ss:$0 sm:$0xff]  ;;  %s283_s8 = sshll.u32 %s455_s7, 4  ;;  %s284_s8 = int_to_ptr.vmem [resolvable:$true] %s283_s8 }
  0x1a   :  { %v101_v32 = vrot.slane %v294_v25, %v100_v16  ;;  %v117_v33 = vrot.slane %v295_v26, %v100_v16  ;;  %391 = vmatprep.subr.bf16.mxu0 %v390_v18  ;;  %v35_v35 = vld [vmem:[%s697_s1 + $0x70] sm:$0xff]  ;;  %v36_v36 = vld [vmem:[%s697_s1 + $0x78] sm:$0xff]  ;;  %v109_v37 = vrot.slane %v294_v25, %v108_v21  ;;  %v125_v38 = vrot.slane %v295_v26, %v108_v21  ;;  %s431_s9 = scalar_lea.vmem %s284_s8, 32  ;;  %p436_p1 = scmp.lt.s32.totalorder %s284_s8, %s284_s8 }
  0x1b   :  { %421 = vmatpush3.bf16.msra.mxu1 %v420_v17  ;;  %v104_v39 = vsub.s32 4, %v608_v0  ;;  %v426_v40 = vpack.c.bf16 %v84_v28, %v83_v27  ;;  %v67_v41 = vld [vmem:[%s697_s1 + $0x170] sm:$0xff]  ;;  %v68_v42 = vld [vmem:[%s697_s1 + $0x178] sm:$0xff]  ;;  %v396_v45 = vpack.c.bf16 %v36_v36, %v35_v35  ;;  %v97_v46 = vrot.slane %v294_v25, %v96_v29  ;;  %p432_p0 = scmp.ne.s32.totalorder %s284_s8, %s431_s9  ;;  %p437_p2 = scmp.lt.s32.totalorder %s431_s9, %s431_s9 }
  0x1c   :  { %423 = vmatprep.subr.bf16.mxu1 %v422_v22  ;;  %v128_v43 = vsel %vm126_vm0, %v117_v33, %v101_v32  ;;  %v130_v44 = vsel %vm126_vm0, %v125_v38, %v109_v37  ;;  %v113_v47 = vrot.slane %v295_v26, %v96_v29  ;;  %v428_v48 = vpack.c.bf16 %v68_v42, %v67_v41 }
  0x1d   :  { %199 = vmatprep.mubr.f32.mxu0 %v128_v43  ;;  %393 = vmatpush3.bf16.msra.mxu0 %v392_v30  ;;  %v105_v49 = vrot.slane %v294_v25, %v104_v39  ;;  %v121_v50 = vrot.slane %v295_v26, %v104_v39  ;;  %vm275_vm1 = vcmask 9216   ;;  %p438_p3 = por %p437_p2, %p436_p1 }
  0x1e   :  { %269 = vmatprep.mubr.f32.mxu1 %v130_v44  ;;  %395 = vmatprep.subr.bf16.mxu0 %v394_v34  ;;  %v127_v51 = vsel %vm126_vm0, %v113_v47, %v97_v46 }
  0x1f   :  { %425 = vmatpush3.bf16.msra.mxu1 %v424_v31  ;;  %v129_v52 = vsel %vm126_vm0, %v121_v50, %v105_v49  ;;  %p439_p4 = pnand %p438_p3, %p432_p0 }
  0x20   :  { %427 = vmatprep.subr.bf16.mxu1 %v426_v40 }
  0x21   :  { %397 = vmatpush3.bf16.msra.mxu0 %v396_v45 }
  0x23   :  { %429 = vmatpush3.bf16.msra.mxu1 %v428_v48 }
  0x24   :  { %200 = vmatmul.mubr.f32.vlgmr.msra.gmra.mrb[0].mxu0 %v127_v51 }
  0x26   :  { %270 = vmatmul.mubr.f32.vlgmr.msra.gmra.mrb[0].mxu1 %v129_v52 }
  0xf7   :  { %v328_v53 = vpop.f32.mrb[0].mxu0 }
  0xf8   :  { %v329_v55 = vpop.f32.mrb[1].mxu0 }
  0xf9   :  { %v363_v56 = vpop.f32.mrb[0].mxu1  ;;  %v330_v57 = vadd.f32 %v329_v55, %v328_v53 }
  0xfa   :  { %v364_v58 = vpop.f32.mrb[1].mxu1 }
  0xfb   :  { %v365_v59 = vadd.f32 %v364_v58, %v363_v56  ;;  %v202_v60 = vadd.f32 %v330_v57, %v291_v54 }
  0xfd   :  { %v272_v61 = vadd.f32 %v365_v59, %v202_v60 }
  0xff   :  { %276 = vst.msk [vmem:[#allocation2] sm:$0x3] %vm275_vm1, %v272_v61 }
 0x100   :  { %442 = shalt.err (!%p439_p4)
}
 0x101   :  { %s443_s11 = scalar_lea.hbm %s699_s3, 32 }
 0x102   :  { %p444_p5 = scmp.ne.s32.totalorder %s699_s3, %s443_s11  ;;  %p447_p6 = scmp.lt.u32.totalorder %s443_s11, %s699_s3 }
 0x104   :  { %p449_p7 = pnand %p447_p6, %p444_p5 }
 0x106   :  { %452 = shalt.err (!%p449_p7)
}
 0x107   :  { %286 = dma.vmem_to_hbm [thread:$0]  %s284_s8, 32, %s699_s3, [#allocation3]  }
 0x108   :  { %453 = dma.done.wait [#allocation3], 32  }
 0x109   :  { %454 = vsyncadd [#allocation3], 4294967264 }
 0x10a   :  { %290 = vsyncpa [#allocation3], 1 }

</bundles_post_ra>
